<compile_context>
chip_gen: v5e
topology: v5e:2x2
jax: 0.10.0
libtpu: 0.0.40
codegen_flags: <defaults>
</compile_context>

<pallas_src>
import functools

import jax
import jax.numpy as jnp
from jax.experimental import pallas as pl
from jax.experimental.pallas import tpu as pltpu


def _round_up(x, m):
    return ((x + m - 1) // m) * m


def _vmem_limit_bytes():
    # v7x: 64 MiB physical VMEM per core -> keep the scoped limit at 32 MiB.
    # v5e/v6e: 128 MiB -> allow 64 MiB for deeper buffering headroom.
    try:
        cap = int(getattr(pltpu.get_tpu_info(), "vmem_capacity_bytes", 0))
    except Exception:
        cap = 0
    if cap <= 0:
        cap = 64 * 1024 * 1024  # unknown -> conservative (yields 32 MiB)
    return int(min(64 * 1024 * 1024, cap // 2))


def _pick_tm(m, cap):
    """16-aligned row tile; full extent if it fits, else prefer a divisor of M."""
    m16 = _round_up(max(m, 16), 16)
    if m16 <= cap:
        return m16
    t = cap
    while t >= max(16, cap // 2):
        if m % t == 0:
            return t
        t -= 16
    return cap


# ----------------------------------------------------------------------------
# Fused Conv2d(k=4, stride=2, pad=1) + folded-BN bias + LeakyReLU(0.2) kernel.
# Works on the space-to-depth / flattened-rows form built by the wrapper.
# ----------------------------------------------------------------------------
def _conv4x4s2_kernel(xf_ref, w_ref, b_ref, o_ref, *, taps, ext):
    # xf_ref: (Rtot, C4) bf16  -- resident s2d activation rows (whole array)
    # w_ref : (4, C4, tn) bf16 -- resident tap weights (BN scale folded in)
    # b_ref : (1, tn) f32      -- folded bias
    # o_ref : (tm, tn) bf16    -- output row/channel tile
    i = pl.program_id(1)                      # row-tile index (inner grid axis)
    tm = o_ref.shape[0]
    base = pl.multiple_of(i * tm, tm)         # 16-aligned dynamic start
    big = xf_ref[pl.ds(base, ext), :]         # one aligned slab covering all taps

    acc = jnp.zeros(o_ref.shape, jnp.float32)
    for t, d in enumerate(taps):              # taps / d are static Python ints
        slab = big[d:d + tm, :]               # static row shift (0, 1, Ws, Ws+1)
        acc = acc + jnp.dot(slab, w_ref[t], preferred_element_type=jnp.float32)

    y = acc + b_ref[...]
    y = jnp.where(y > 0, y, 0.2 * y)          # LeakyReLU(0.2)
    o_ref[...] = y.astype(o_ref.dtype)


def conv4x4_s2_pallas(x_nhwc, w, scale, bias):
    """Conv2d(cin, cout, 4, 2, 1) [+ folded BN scale/bias] + LeakyReLU(0.2).

    x_nhwc: (N, H, W, Cin) bf16;  w: (Cout, Cin, 4, 4) f32 (PyTorch OIHW).
    Returns (N, H//2, W//2, Cout) bf16, NHWC.
    """
    n, h, w_sp, cin = x_nhwc.shape
    cout = w.shape[0]
    ho, wo = h // 2, w_sp // 2
    hs, ws = ho + 1, wo + 1
    c4 = 4 * cin
    r_img = hs * ws
    m = n * r_img

    # -- space-to-depth (stride-2 -> stride-1) + row flatten: one XLA transpose.
    xp = jnp.pad(x_nhwc, ((0, 0), (1, 1), (1, 1), (0, 0)))
    xs = xp.reshape(n, hs, 2, ws, 2, cin).transpose(0, 1, 3, 2, 4, 5)
    xf = xs.reshape(m, c4).astype(jnp.bfloat16)

    # -- tap weights: (tap=2a+b, (p,q,cin), cout), BN scale folded into columns.
    w_r = w.transpose(2, 3, 1, 0).reshape(2, 2, 2, 2, cin, cout)   # (a,p,b,q,ci,co)
    w4 = w_r.transpose(0, 2, 1, 3, 4, 5).reshape(4, c4, cout)      # (2a+b,(p,q,ci),co)
    w4 = (w4 * scale[None, None, :]).astype(jnp.bfloat16)

    # -- lane-dense output channels: pad Cout up to a multiple of 128.
    np_ = _round_up(cout, 128)
    b_row = bias.astype(jnp.float32).reshape(1, cout)
    if np_ != cout:
        w4 = jnp.pad(w4, ((0, 0), (0, 0), (0, np_ - cout)))
        b_row = jnp.pad(b_row, ((0, 0), (0, np_ - cout)))

    # -- tile selection (shape-aware tm; tn 256 when it divides Np, else 128).
    tn = 256 if (np_ % 256 == 0) else 128
    keff = 4 * c4                                   # total contraction per row
    if keff * tn <= 64 * 1024:
        cap = 4096                                  # tiny per-row work (layer 1)
    elif keff * tn <= 512 * 1024:
        cap = 2048
    else:
        cap = 1024
    tm = _pick_tm(m, cap)
    mp = _round_up(m, tm)
    if mp // tm == 1 and np_ // tn == 1 and tn > 128:
        tn = 128                                    # keep >=2 tiles for v7x megacore

    # -- pad the activation rows so the tap window of the last tile stays in-bounds.
    ext = _round_up(tm + ws + 1, 8)                 # rows each grid step touches
    rtot = mp - tm + ext
    xf = jnp.pad(xf, ((0, rtot - m), (0, 0)))

    taps = (0, 1, ws, ws + 1)
    grid = (np_ // tn, mp // tm)                    # j (Cout tiles) outer, i inner
    out = pl.pallas_call(
        functools.partial(_conv4x4s2_kernel, taps=taps, ext=ext),
        out_shape=jax.ShapeDtypeStruct((mp, np_), jnp.bfloat16),
        grid=grid,
        in_specs=[
            pl.BlockSpec((rtot, c4), lambda j, i: (0, 0)),       # resident activations
            pl.BlockSpec((4, c4, tn), lambda j, i: (0, 0, j)),   # resident tap weights
            pl.BlockSpec((1, tn), lambda j, i: (0, j)),          # bias
        ],
        out_specs=pl.BlockSpec((tm, tn), lambda j, i: (i, j)),
        compiler_params=pltpu.CompilerParams(
            dimension_semantics=("parallel", "parallel"),
            vmem_limit_bytes=_vmem_limit_bytes(),
        ),
    )(xf, w4, b_row)

    # Strip garbage rows / garbage width column / padded channels in one slice
    # (this extraction pass is required by the flattened-conv form anyway).
    y = out[:m].reshape(n, hs, ws, np_)[:, :ho, :wo, :cout]
    return y


def final_head(y_nhwc, w, bias):
    # Conv2d(8*dim, 1, 4) on a 4x4 map (single output position) + Sigmoid.
    # Cout=1 / M=batch -> tiny; plain XLA matmul per the perf review.
    n, h, w_sp, c = y_nhwc.shape
    cout = w.shape[0]
    patches = y_nhwc.reshape(n, h * w_sp * c).astype(jnp.float32)   # (kh, kw, cin) order
    w_mat = w.transpose(2, 3, 1, 0).reshape(h * w_sp * c, cout).astype(jnp.float32)
    logits = patches @ w_mat + bias[None, :].astype(jnp.float32)
    return jax.nn.sigmoid(logits)                                    # (N, 1)


# ----------------------------------------------------------------------------
# Parameters (Conv weights + eval-mode BatchNorm folded into scale/bias).
# ----------------------------------------------------------------------------
def init_params(key, dim=64):
    # (cin, cout, has_bn) for the five conv layers of the discriminator.
    specs = [
        (3, dim, False),
        (dim, 2 * dim, True),
        (2 * dim, 4 * dim, True),
        (4 * dim, 8 * dim, True),
        (8 * dim, 1, False),
    ]
    eps = 1e-5
    params = []
    for (cin, cout, has_bn) in specs:
        key, kw_, kb, kg, kbt = jax.random.split(key, 5)
        fan_in = cin * 16
        w = jax.random.normal(kw_, (cout, cin, 4, 4), jnp.float32) / jnp.sqrt(fan_in)
        b = 0.01 * jax.random.normal(kb, (cout,), jnp.float32)
        if has_bn:
            gamma = 1.0 + 0.1 * jax.random.normal(kg, (cout,), jnp.float32)
            beta = 0.1 * jax.random.normal(kbt, (cout,), jnp.float32)
            running_mean = jnp.zeros((cout,), jnp.float32)
            running_var = jnp.ones((cout,), jnp.float32)
            s = gamma / jnp.sqrt(running_var + eps)
            scale = s
            bias = (b - running_mean) * s + beta
        else:
            scale = jnp.ones((cout,), jnp.float32)
            bias = b
        params.append((w, scale, bias))
    return params


def discriminator_forward(x, params):
    # x: (N, 3, H, W) float32 (PyTorch layout).  One NHWC transpose up front;
    # all intermediate activations stay NHWC / bf16 (f32 accumulation in-kernel).
    y = x.transpose(0, 2, 3, 1).astype(jnp.bfloat16)
    for (w, scale, bias) in params[:4]:
        y = conv4x4_s2_pallas(y, w, scale, bias)
    w, _scale, bias = params[4]
    y = final_head(y, w, bias)
    return y.reshape(-1)                                             # y.view(-1)


def _reference_forward(x, params):
    # Pure-XLA reference in the same precision regime (bf16 activations/weights,
    # f32 accumulation) -- used only to sanity-check the Pallas path.
    y = x.transpose(0, 2, 3, 1).astype(jnp.bfloat16)
    for (w, scale, bias) in params[:4]:
        w_hwio = (w * scale[:, None, None, None]).transpose(2, 3, 1, 0)
        z = jax.lax.conv_general_dilated(
            y, w_hwio.astype(jnp.bfloat16),
            window_strides=(2, 2), padding=((1, 1), (1, 1)),
            dimension_numbers=("NHWC", "HWIO", "NHWC"),
            preferred_element_type=jnp.float32)
        z = z + bias.reshape(1, 1, 1, -1).astype(jnp.float32)
        y = jnp.where(z > 0, z, 0.2 * z).astype(jnp.bfloat16)
    w, _scale, bias = params[4]
    return final_head(y, w, bias).reshape(-1)


if __name__ == "__main__":
    key = jax.random.PRNGKey(0)
    kx, kp = jax.random.split(key)
    dim = 8                                      # small 'dim' for the test
    # 64x64 input is implied by the module (final Conv2d(8*dim, 1, 4) needs 4x4).
    x = jax.random.normal(kx, (2, 3, 64, 64), jnp.float32)
    params = init_params(kp, dim=dim)

    fwd = jax.jit(discriminator_forward)
    y = jax.block_until_ready(fwd(x, params))
    assert y.shape == (2,), y.shape
    assert bool(jnp.all(jnp.isfinite(y)))
    assert bool(jnp.all((y >= 0) & (y <= 1)))

    y_ref = jax.block_until_ready(jax.jit(_reference_forward)(x, params))
    assert bool(jnp.max(jnp.abs(y - y_ref)) < 0.05), (y, y_ref)
    print("KERNEL_OK")
</pallas_src>

<mosaic_0001>
module attributes {stable_mosaic.version = 11 : i64} {
  func.func @_conv4x4s2_kernel(%arg0: i32, %arg1: i32, %arg2: memref<2232x12xbf16, #tpu.memory_space<vmem>>, %arg3: memref<4x12x128xbf16, #tpu.memory_space<vmem>>, %arg4: memref<1x128xf32, #tpu.memory_space<vmem>>, %arg5: memref<2192x128xbf16, #tpu.memory_space<vmem>>) attributes {dimension_semantics = [#tpu.dimension_semantics<parallel>, #tpu.dimension_semantics<parallel>], iteration_bounds = array<i64: 1, 1>, scalar_prefetch = 0 : i64, scratch_operands = 0 : i64, tpu.core_type = #tpu.core_type<tc>, window_params = [{pipeline_mode = #tpu.pipeline_mode<synchronous>, transform_indices = @transform_0, window_bounds = array<i64: 2232, 12>}, {transform_indices = @transform_1, window_bounds = array<i64: 4, 12, 128>}, {transform_indices = @transform_2, window_bounds = array<i64: 1, 128>}, {transform_indices = @transform_3, window_bounds = array<i64: 2192, 128>}]} {
    %c2192_i32 = arith.constant 2192 : i32
    %0 = arith.muli %arg1, %c2192_i32 : i32
    %1 = tpu.assume_multiple %0, 2192 : i32
    %2 = arith.index_cast %1 : i32 to index
    %c0 = arith.constant 0 : index
    %3 = vector.load %arg2[%2, %c0] : memref<2232x12xbf16, #tpu.memory_space<vmem>>, vector<2232x12xbf16>
    %cst = arith.constant 0.000000e+00 : f32
    %4 = vector.broadcast %cst : f32 to vector<2192x128xf32>
    %5 = vector.extract_strided_slice %3 {offsets = [0, 0], sizes = [2192, 12], strides = [1, 1]} : vector<2232x12xbf16> to vector<2192x12xbf16>
    %c0_0 = arith.constant 0 : index
    %c0_1 = arith.constant 0 : index
    %c0_2 = arith.constant 0 : index
    %6 = vector.load %arg3[%c0_0, %c0_1, %c0_2] : memref<4x12x128xbf16, #tpu.memory_space<vmem>>, vector<1x12x128xbf16>
    %7 = vector.shape_cast %6 : vector<1x12x128xbf16> to vector<12x128xbf16>
    %cst_3 = arith.constant dense<0.000000e+00> : vector<2192x128xf32>
    %8 = tpu.matmul %5, %7, %cst_3 {dimension_numbers = #tpu.dot_dimension_numbers<[1], [0], [0], [1], [0, 0, 1, 1], [], []>} : vector<2192x12xbf16>, vector<12x128xbf16>, vector<2192x128xf32> -> vector<2192x128xf32>
    %9 = arith.addf %4, %8 : vector<2192x128xf32>
    %10 = vector.extract_strided_slice %3 {offsets = [1, 0], sizes = [2192, 12], strides = [1, 1]} : vector<2232x12xbf16> to vector<2192x12xbf16>
    %c1 = arith.constant 1 : index
    %c0_4 = arith.constant 0 : index
    %c0_5 = arith.constant 0 : index
    %11 = vector.load %arg3[%c1, %c0_4, %c0_5] : memref<4x12x128xbf16, #tpu.memory_space<vmem>>, vector<1x12x128xbf16>
    %12 = vector.shape_cast %11 : vector<1x12x128xbf16> to vector<12x128xbf16>
    %cst_6 = arith.constant dense<0.000000e+00> : vector<2192x128xf32>
    %13 = tpu.matmul %10, %12, %cst_6 {dimension_numbers = #tpu.dot_dimension_numbers<[1], [0], [0], [1], [0, 0, 1, 1], [], []>} : vector<2192x12xbf16>, vector<12x128xbf16>, vector<2192x128xf32> -> vector<2192x128xf32>
    %14 = arith.addf %9, %13 : vector<2192x128xf32>
    %15 = vector.extract_strided_slice %3 {offsets = [33, 0], sizes = [2192, 12], strides = [1, 1]} : vector<2232x12xbf16> to vector<2192x12xbf16>
    %c2 = arith.constant 2 : index
    %c0_7 = arith.constant 0 : index
    %c0_8 = arith.constant 0 : index
    %16 = vector.load %arg3[%c2, %c0_7, %c0_8] : memref<4x12x128xbf16, #tpu.memory_space<vmem>>, vector<1x12x128xbf16>
    %17 = vector.shape_cast %16 : vector<1x12x128xbf16> to vector<12x128xbf16>
    %cst_9 = arith.constant dense<0.000000e+00> : vector<2192x128xf32>
    %18 = tpu.matmul %15, %17, %cst_9 {dimension_numbers = #tpu.dot_dimension_numbers<[1], [0], [0], [1], [0, 0, 1, 1], [], []>} : vector<2192x12xbf16>, vector<12x128xbf16>, vector<2192x128xf32> -> vector<2192x128xf32>
    %19 = arith.addf %14, %18 : vector<2192x128xf32>
    %20 = vector.extract_strided_slice %3 {offsets = [34, 0], sizes = [2192, 12], strides = [1, 1]} : vector<2232x12xbf16> to vector<2192x12xbf16>
    %c3 = arith.constant 3 : index
    %c0_10 = arith.constant 0 : index
    %c0_11 = arith.constant 0 : index
    %21 = vector.load %arg3[%c3, %c0_10, %c0_11] : memref<4x12x128xbf16, #tpu.memory_space<vmem>>, vector<1x12x128xbf16>
    %22 = vector.shape_cast %21 : vector<1x12x128xbf16> to vector<12x128xbf16>
    %cst_12 = arith.constant dense<0.000000e+00> : vector<2192x128xf32>
    %23 = tpu.matmul %20, %22, %cst_12 {dimension_numbers = #tpu.dot_dimension_numbers<[1], [0], [0], [1], [0, 0, 1, 1], [], []>} : vector<2192x12xbf16>, vector<12x128xbf16>, vector<2192x128xf32> -> vector<2192x128xf32>
    %24 = arith.addf %19, %23 : vector<2192x128xf32>
    %c0_13 = arith.constant 0 : index
    %c0_14 = arith.constant 0 : index
    %25 = vector.load %arg4[%c0_13, %c0_14] : memref<1x128xf32, #tpu.memory_space<vmem>>, vector<1x128xf32>
    %26 = vector.broadcast %25 : vector<1x128xf32> to vector<2192x128xf32>
    %27 = arith.addf %24, %26 : vector<2192x128xf32>
    %cst_15 = arith.constant 0.000000e+00 : f32
    %28 = vector.broadcast %cst_15 : f32 to vector<2192x128xf32>
    %29 = arith.cmpf ogt, %27, %28 : vector<2192x128xf32>
    %cst_16 = arith.constant 2.000000e-01 : f32
    %30 = vector.broadcast %cst_16 : f32 to vector<2192x128xf32>
    %31 = arith.mulf %30, %27 : vector<2192x128xf32>
    %32 = arith.select %29, %27, %31 : vector<2192x128xi1>, vector<2192x128xf32>
    %33 = arith.truncf %32 : vector<2192x128xf32> to vector<2192x128xbf16>
    %c0_17 = arith.constant 0 : index
    %c0_18 = arith.constant 0 : index
    %34 = vector.load %arg5[%c0_17, %c0_18] : memref<2192x128xbf16, #tpu.memory_space<vmem>>, vector<2192x128xbf16>
    tpu.vector_store %arg5[%c0_17, %c0_18], %33 {strides = array<i32>} : memref<2192x128xbf16, #tpu.memory_space<vmem>>, vector<2192x128xbf16>,
    return
  }
  func.func @transform_0(%arg0: i32, %arg1: i32) -> (i32, i32) {
    %c0_i32 = arith.constant 0 : i32
    %c0_i32_0 = arith.constant 0 : i32
    %c0_i32_1 = arith.constant 0 : i32
    return %c0_i32, %c0_i32_0 : i32, i32
  }
  func.func @transform_1(%arg0: i32, %arg1: i32) -> (i32, i32, i32) {
    %c0_i32 = arith.constant 0 : i32
    %c0_i32_0 = arith.constant 0 : i32
    %c0_i32_1 = arith.constant 0 : i32
    return %c0_i32, %c0_i32_0, %arg0 : i32, i32, i32
  }
  func.func @transform_2(%arg0: i32, %arg1: i32) -> (i32, i32) {
    %c0_i32 = arith.constant 0 : i32
    %c0_i32_0 = arith.constant 0 : i32
    return %c0_i32, %arg0 : i32, i32
  }
  func.func @transform_3(%arg0: i32, %arg1: i32) -> (i32, i32) {
    %c0_i32 = arith.constant 0 : i32
    return %arg1, %arg0 : i32, i32
  }
}

module attributes {stable_mosaic.version = 11 : i64} {
  func.func @_conv4x4s2_kernel(%arg0: i32, %arg1: i32, %arg2: memref<616x32xbf16, #tpu.memory_space<vmem>>, %arg3: memref<4x32x128xbf16, #tpu.memory_space<vmem>>, %arg4: memref<1x128xf32, #tpu.memory_space<vmem>>, %arg5: memref<592x128xbf16, #tpu.memory_space<vmem>>) attributes {dimension_semantics = [#tpu.dimension_semantics<parallel>, #tpu.dimension_semantics<parallel>], iteration_bounds = array<i64: 1, 1>, scalar_prefetch = 0 : i64, scratch_operands = 0 : i64, tpu.core_type = #tpu.core_type<tc>, window_params = [{pipeline_mode = #tpu.pipeline_mode<synchronous>, transform_indices = @transform_0, window_bounds = array<i64: 616, 32>}, {transform_indices = @transform_1, window_bounds = array<i64: 4, 32, 128>}, {transform_indices = @transform_2, window_bounds = array<i64: 1, 128>}, {transform_indices = @transform_3, window_bounds = array<i64: 592, 128>}]} {
    %c592_i32 = arith.constant 592 : i32
    %0 = arith.muli %arg1, %c592_i32 : i32
    %1 = tpu.assume_multiple %0, 592 : i32
    %2 = arith.index_cast %1 : i32 to index
    %c0 = arith.constant 0 : index
    %3 = vector.load %arg2[%2, %c0] : memref<616x32xbf16, #tpu.memory_space<vmem>>, vector<616x32xbf16>
    %cst = arith.constant 0.000000e+00 : f32
    %4 = vector.broadcast %cst : f32 to vector<592x128xf32>
    %5 = vector.extract_strided_slice %3 {offsets = [0, 0], sizes = [592, 32], strides = [1, 1]} : vector<616x32xbf16> to vector<592x32xbf16>
    %c0_0 = arith.constant 0 : index
    %c0_1 = arith.constant 0 : index
    %c0_2 = arith.constant 0 : index
    %6 = vector.load %arg3[%c0_0, %c0_1, %c0_2] : memref<4x32x128xbf16, #tpu.memory_space<vmem>>, vector<1x32x128xbf16>
    %7 = vector.shape_cast %6 : vector<1x32x128xbf16> to vector<32x128xbf16>
    %cst_3 = arith.constant dense<0.000000e+00> : vector<592x128xf32>
    %8 = tpu.matmul %5, %7, %cst_3 {dimension_numbers = #tpu.dot_dimension_numbers<[1], [0], [0], [1], [0, 0, 1, 1], [], []>} : vector<592x32xbf16>, vector<32x128xbf16>, vector<592x128xf32> -> vector<592x128xf32>
    %9 = arith.addf %4, %8 : vector<592x128xf32>
    %10 = vector.extract_strided_slice %3 {offsets = [1, 0], sizes = [592, 32], strides = [1, 1]} : vector<616x32xbf16> to vector<592x32xbf16>
    %c1 = arith.constant 1 : index
    %c0_4 = arith.constant 0 : index
    %c0_5 = arith.constant 0 : index
    %11 = vector.load %arg3[%c1, %c0_4, %c0_5] : memref<4x32x128xbf16, #tpu.memory_space<vmem>>, vector<1x32x128xbf16>
    %12 = vector.shape_cast %11 : vector<1x32x128xbf16> to vector<32x128xbf16>
    %cst_6 = arith.constant dense<0.000000e+00> : vector<592x128xf32>
    %13 = tpu.matmul %10, %12, %cst_6 {dimension_numbers = #tpu.dot_dimension_numbers<[1], [0], [0], [1], [0, 0, 1, 1], [], []>} : vector<592x32xbf16>, vector<32x128xbf16>, vector<592x128xf32> -> vector<592x128xf32>
    %14 = arith.addf %9, %13 : vector<592x128xf32>
    %15 = vector.extract_strided_slice %3 {offsets = [17, 0], sizes = [592, 32], strides = [1, 1]} : vector<616x32xbf16> to vector<592x32xbf16>
    %c2 = arith.constant 2 : index
    %c0_7 = arith.constant 0 : index
    %c0_8 = arith.constant 0 : index
    %16 = vector.load %arg3[%c2, %c0_7, %c0_8] : memref<4x32x128xbf16, #tpu.memory_space<vmem>>, vector<1x32x128xbf16>
    %17 = vector.shape_cast %16 : vector<1x32x128xbf16> to vector<32x128xbf16>
    %cst_9 = arith.constant dense<0.000000e+00> : vector<592x128xf32>
    %18 = tpu.matmul %15, %17, %cst_9 {dimension_numbers = #tpu.dot_dimension_numbers<[1], [0], [0], [1], [0, 0, 1, 1], [], []>} : vector<592x32xbf16>, vector<32x128xbf16>, vector<592x128xf32> -> vector<592x128xf32>
    %19 = arith.addf %14, %18 : vector<592x128xf32>
    %20 = vector.extract_strided_slice %3 {offsets = [18, 0], sizes = [592, 32], strides = [1, 1]} : vector<616x32xbf16> to vector<592x32xbf16>
    %c3 = arith.constant 3 : index
    %c0_10 = arith.constant 0 : index
    %c0_11 = arith.constant 0 : index
    %21 = vector.load %arg3[%c3, %c0_10, %c0_11] : memref<4x32x128xbf16, #tpu.memory_space<vmem>>, vector<1x32x128xbf16>
    %22 = vector.shape_cast %21 : vector<1x32x128xbf16> to vector<32x128xbf16>
    %cst_12 = arith.constant dense<0.000000e+00> : vector<592x128xf32>
    %23 = tpu.matmul %20, %22, %cst_12 {dimension_numbers = #tpu.dot_dimension_numbers<[1], [0], [0], [1], [0, 0, 1, 1], [], []>} : vector<592x32xbf16>, vector<32x128xbf16>, vector<592x128xf32> -> vector<592x128xf32>
    %24 = arith.addf %19, %23 : vector<592x128xf32>
    %c0_13 = arith.constant 0 : index
    %c0_14 = arith.constant 0 : index
    %25 = vector.load %arg4[%c0_13, %c0_14] : memref<1x128xf32, #tpu.memory_space<vmem>>, vector<1x128xf32>
    %26 = vector.broadcast %25 : vector<1x128xf32> to vector<592x128xf32>
    %27 = arith.addf %24, %26 : vector<592x128xf32>
    %cst_15 = arith.constant 0.000000e+00 : f32
    %28 = vector.broadcast %cst_15 : f32 to vector<592x128xf32>
    %29 = arith.cmpf ogt, %27, %28 : vector<592x128xf32>
    %cst_16 = arith.constant 2.000000e-01 : f32
    %30 = vector.broadcast %cst_16 : f32 to vector<592x128xf32>
    %31 = arith.mulf %30, %27 : vector<592x128xf32>
    %32 = arith.select %29, %27, %31 : vector<592x128xi1>, vector<592x128xf32>
    %33 = arith.truncf %32 : vector<592x128xf32> to vector<592x128xbf16>
    %c0_17 = arith.constant 0 : index
    %c0_18 = arith.constant 0 : index
    %34 = vector.load %arg5[%c0_17, %c0_18] : memref<592x128xbf16, #tpu.memory_space<vmem>>, vector<592x128xbf16>
    tpu.vector_store %arg5[%c0_17, %c0_18], %33 {strides = array<i32>} : memref<592x128xbf16, #tpu.memory_space<vmem>>, vector<592x128xbf16>,
    return
  }
  func.func @transform_0(%arg0: i32, %arg1: i32) -> (i32, i32) {
    %c0_i32 = arith.constant 0 : i32
    %c0_i32_0 = arith.constant 0 : i32
    %c0_i32_1 = arith.constant 0 : i32
    return %c0_i32, %c0_i32_0 : i32, i32
  }
  func.func @transform_1(%arg0: i32, %arg1: i32) -> (i32, i32, i32) {
    %c0_i32 = arith.constant 0 : i32
    %c0_i32_0 = arith.constant 0 : i32
    %c0_i32_1 = arith.constant 0 : i32
    return %c0_i32, %c0_i32_0, %arg0 : i32, i32, i32
  }
  func.func @transform_2(%arg0: i32, %arg1: i32) -> (i32, i32) {
    %c0_i32 = arith.constant 0 : i32
    %c0_i32_0 = arith.constant 0 : i32
    return %c0_i32, %arg0 : i32, i32
  }
  func.func @transform_3(%arg0: i32, %arg1: i32) -> (i32, i32) {
    %c0_i32 = arith.constant 0 : i32
    return %arg1, %arg0 : i32, i32
  }
}

module attributes {stable_mosaic.version = 11 : i64} {
  func.func @_conv4x4s2_kernel(%arg0: i32, %arg1: i32, %arg2: memref<192x64xbf16, #tpu.memory_space<vmem>>, %arg3: memref<4x64x128xbf16, #tpu.memory_space<vmem>>, %arg4: memref<1x128xf32, #tpu.memory_space<vmem>>, %arg5: memref<176x128xbf16, #tpu.memory_space<vmem>>) attributes {dimension_semantics = [#tpu.dimension_semantics<parallel>, #tpu.dimension_semantics<parallel>], iteration_bounds = array<i64: 1, 1>, scalar_prefetch = 0 : i64, scratch_operands = 0 : i64, tpu.core_type = #tpu.core_type<tc>, window_params = [{pipeline_mode = #tpu.pipeline_mode<synchronous>, transform_indices = @transform_0, window_bounds = array<i64: 192, 64>}, {transform_indices = @transform_1, window_bounds = array<i64: 4, 64, 128>}, {transform_indices = @transform_2, window_bounds = array<i64: 1, 128>}, {transform_indices = @transform_3, window_bounds = array<i64: 176, 128>}]} {
    %c176_i32 = arith.constant 176 : i32
    %0 = arith.muli %arg1, %c176_i32 : i32
    %1 = tpu.assume_multiple %0, 176 : i32
    %2 = arith.index_cast %1 : i32 to index
    %c0 = arith.constant 0 : index
    %3 = vector.load %arg2[%2, %c0] : memref<192x64xbf16, #tpu.memory_space<vmem>>, vector<192x64xbf16>
    %cst = arith.constant 0.000000e+00 : f32
    %4 = vector.broadcast %cst : f32 to vector<176x128xf32>
    %5 = vector.extract_strided_slice %3 {offsets = [0, 0], sizes = [176, 64], strides = [1, 1]} : vector<192x64xbf16> to vector<176x64xbf16>
    %c0_0 = arith.constant 0 : index
    %c0_1 = arith.constant 0 : index
    %c0_2 = arith.constant 0 : index
    %6 = vector.load %arg3[%c0_0, %c0_1, %c0_2] : memref<4x64x128xbf16, #tpu.memory_space<vmem>>, vector<1x64x128xbf16>
    %7 = vector.shape_cast %6 : vector<1x64x128xbf16> to vector<64x128xbf16>
    %cst_3 = arith.constant dense<0.000000e+00> : vector<176x128xf32>
    %8 = tpu.matmul %5, %7, %cst_3 {dimension_numbers = #tpu.dot_dimension_numbers<[1], [0], [0], [1], [0, 0, 1, 1], [], []>} : vector<176x64xbf16>, vector<64x128xbf16>, vector<176x128xf32> -> vector<176x128xf32>
    %9 = arith.addf %4, %8 : vector<176x128xf32>
    %10 = vector.extract_strided_slice %3 {offsets = [1, 0], sizes = [176, 64], strides = [1, 1]} : vector<192x64xbf16> to vector<176x64xbf16>
    %c1 = arith.constant 1 : index
    %c0_4 = arith.constant 0 : index
    %c0_5 = arith.constant 0 : index
    %11 = vector.load %arg3[%c1, %c0_4, %c0_5] : memref<4x64x128xbf16, #tpu.memory_space<vmem>>, vector<1x64x128xbf16>
    %12 = vector.shape_cast %11 : vector<1x64x128xbf16> to vector<64x128xbf16>
    %cst_6 = arith.constant dense<0.000000e+00> : vector<176x128xf32>
    %13 = tpu.matmul %10, %12, %cst_6 {dimension_numbers = #tpu.dot_dimension_numbers<[1], [0], [0], [1], [0, 0, 1, 1], [], []>} : vector<176x64xbf16>, vector<64x128xbf16>, vector<176x128xf32> -> vector<176x128xf32>
    %14 = arith.addf %9, %13 : vector<176x128xf32>
    %15 = vector.extract_strided_slice %3 {offsets = [9, 0], sizes = [176, 64], strides = [1, 1]} : vector<192x64xbf16> to vector<176x64xbf16>
    %c2 = arith.constant 2 : index
    %c0_7 = arith.constant 0 : index
    %c0_8 = arith.constant 0 : index
    %16 = vector.load %arg3[%c2, %c0_7, %c0_8] : memref<4x64x128xbf16, #tpu.memory_space<vmem>>, vector<1x64x128xbf16>
    %17 = vector.shape_cast %16 : vector<1x64x128xbf16> to vector<64x128xbf16>
    %cst_9 = arith.constant dense<0.000000e+00> : vector<176x128xf32>
    %18 = tpu.matmul %15, %17, %cst_9 {dimension_numbers = #tpu.dot_dimension_numbers<[1], [0], [0], [1], [0, 0, 1, 1], [], []>} : vector<176x64xbf16>, vector<64x128xbf16>, vector<176x128xf32> -> vector<176x128xf32>
    %19 = arith.addf %14, %18 : vector<176x128xf32>
    %20 = vector.extract_strided_slice %3 {offsets = [10, 0], sizes = [176, 64], strides = [1, 1]} : vector<192x64xbf16> to vector<176x64xbf16>
    %c3 = arith.constant 3 : index
    %c0_10 = arith.constant 0 : index
    %c0_11 = arith.constant 0 : index
    %21 = vector.load %arg3[%c3, %c0_10, %c0_11] : memref<4x64x128xbf16, #tpu.memory_space<vmem>>, vector<1x64x128xbf16>
    %22 = vector.shape_cast %21 : vector<1x64x128xbf16> to vector<64x128xbf16>
    %cst_12 = arith.constant dense<0.000000e+00> : vector<176x128xf32>
    %23 = tpu.matmul %20, %22, %cst_12 {dimension_numbers = #tpu.dot_dimension_numbers<[1], [0], [0], [1], [0, 0, 1, 1], [], []>} : vector<176x64xbf16>, vector<64x128xbf16>, vector<176x128xf32> -> vector<176x128xf32>
    %24 = arith.addf %19, %23 : vector<176x128xf32>
    %c0_13 = arith.constant 0 : index
    %c0_14 = arith.constant 0 : index
    %25 = vector.load %arg4[%c0_13, %c0_14] : memref<1x128xf32, #tpu.memory_space<vmem>>, vector<1x128xf32>
    %26 = vector.broadcast %25 : vector<1x128xf32> to vector<176x128xf32>
    %27 = arith.addf %24, %26 : vector<176x128xf32>
    %cst_15 = arith.constant 0.000000e+00 : f32
    %28 = vector.broadcast %cst_15 : f32 to vector<176x128xf32>
    %29 = arith.cmpf ogt, %27, %28 : vector<176x128xf32>
    %cst_16 = arith.constant 2.000000e-01 : f32
    %30 = vector.broadcast %cst_16 : f32 to vector<176x128xf32>
    %31 = arith.mulf %30, %27 : vector<176x128xf32>
    %32 = arith.select %29, %27, %31 : vector<176x128xi1>, vector<176x128xf32>
    %33 = arith.truncf %32 : vector<176x128xf32> to vector<176x128xbf16>
    %c0_17 = arith.constant 0 : index
    %c0_18 = arith.constant 0 : index
    %34 = vector.load %arg5[%c0_17, %c0_18] : memref<176x128xbf16, #tpu.memory_space<vmem>>, vector<176x128xbf16>
    tpu.vector_store %arg5[%c0_17, %c0_18], %33 {strides = array<i32>} : memref<176x128xbf16, #tpu.memory_space<vmem>>, vector<176x128xbf16>,
    return
  }
  func.func @transform_0(%arg0: i32, %arg1: i32) -> (i32, i32) {
    %c0_i32 = arith.constant 0 : i32
    %c0_i32_0 = arith.constant 0 : i32
    %c0_i32_1 = arith.constant 0 : i32
    return %c0_i32, %c0_i32_0 : i32, i32
  }
  func.func @transform_1(%arg0: i32, %arg1: i32) -> (i32, i32, i32) {
    %c0_i32 = arith.constant 0 : i32
    %c0_i32_0 = arith.constant 0 : i32
    %c0_i32_1 = arith.constant 0 : i32
    return %c0_i32, %c0_i32_0, %arg0 : i32, i32, i32
  }
  func.func @transform_2(%arg0: i32, %arg1: i32) -> (i32, i32) {
    %c0_i32 = arith.constant 0 : i32
    %c0_i32_0 = arith.constant 0 : i32
    return %c0_i32, %arg0 : i32, i32
  }
  func.func @transform_3(%arg0: i32, %arg1: i32) -> (i32, i32) {
    %c0_i32 = arith.constant 0 : i32
    return %arg1, %arg0 : i32, i32
  }
}

module attributes {stable_mosaic.version = 11 : i64} {
  func.func @_conv4x4s2_kernel(%arg0: i32, %arg1: i32, %arg2: memref<72x128xbf16, #tpu.memory_space<vmem>>, %arg3: memref<4x128x128xbf16, #tpu.memory_space<vmem>>, %arg4: memref<1x128xf32, #tpu.memory_space<vmem>>, %arg5: memref<64x128xbf16, #tpu.memory_space<vmem>>) attributes {dimension_semantics = [#tpu.dimension_semantics<parallel>, #tpu.dimension_semantics<parallel>], iteration_bounds = array<i64: 1, 1>, scalar_prefetch = 0 : i64, scratch_operands = 0 : i64, tpu.core_type = #tpu.core_type<tc>, window_params = [{pipeline_mode = #tpu.pipeline_mode<synchronous>, transform_indices = @transform_0, window_bounds = array<i64: 72, 128>}, {transform_indices = @transform_1, window_bounds = array<i64: 4, 128, 128>}, {transform_indices = @transform_2, window_bounds = array<i64: 1, 128>}, {transform_indices = @transform_3, window_bounds = array<i64: 64, 128>}]} {
    %c64_i32 = arith.constant 64 : i32
    %0 = arith.muli %arg1, %c64_i32 : i32
    %1 = tpu.assume_multiple %0, 64 : i32
    %2 = arith.index_cast %1 : i32 to index
    %c0 = arith.constant 0 : index
    %3 = vector.load %arg2[%2, %c0] : memref<72x128xbf16, #tpu.memory_space<vmem>>, vector<72x128xbf16>
    %cst = arith.constant 0.000000e+00 : f32
    %4 = vector.broadcast %cst : f32 to vector<64x128xf32>
    %5 = vector.extract_strided_slice %3 {offsets = [0, 0], sizes = [64, 128], strides = [1, 1]} : vector<72x128xbf16> to vector<64x128xbf16>
    %c0_0 = arith.constant 0 : index
    %c0_1 = arith.constant 0 : index
    %c0_2 = arith.constant 0 : index
    %6 = vector.load %arg3[%c0_0, %c0_1, %c0_2] : memref<4x128x128xbf16, #tpu.memory_space<vmem>>, vector<1x128x128xbf16>
    %7 = vector.shape_cast %6 : vector<1x128x128xbf16> to vector<128x128xbf16>
    %cst_3 = arith.constant dense<0.000000e+00> : vector<64x128xf32>
    %8 = tpu.matmul %5, %7, %cst_3 {dimension_numbers = #tpu.dot_dimension_numbers<[1], [0], [0], [1], [0, 0, 1, 1], [], []>} : vector<64x128xbf16>, vector<128x128xbf16>, vector<64x128xf32> -> vector<64x128xf32>
    %9 = arith.addf %4, %8 : vector<64x128xf32>
    %10 = vector.extract_strided_slice %3 {offsets = [1, 0], sizes = [64, 128], strides = [1, 1]} : vector<72x128xbf16> to vector<64x128xbf16>
    %c1 = arith.constant 1 : index
    %c0_4 = arith.constant 0 : index
    %c0_5 = arith.constant 0 : index
    %11 = vector.load %arg3[%c1, %c0_4, %c0_5] : memref<4x128x128xbf16, #tpu.memory_space<vmem>>, vector<1x128x128xbf16>
    %12 = vector.shape_cast %11 : vector<1x128x128xbf16> to vector<128x128xbf16>
    %cst_6 = arith.constant dense<0.000000e+00> : vector<64x128xf32>
    %13 = tpu.matmul %10, %12, %cst_6 {dimension_numbers = #tpu.dot_dimension_numbers<[1], [0], [0], [1], [0, 0, 1, 1], [], []>} : vector<64x128xbf16>, vector<128x128xbf16>, vector<64x128xf32> -> vector<64x128xf32>
    %14 = arith.addf %9, %13 : vector<64x128xf32>
    %15 = vector.extract_strided_slice %3 {offsets = [5, 0], sizes = [64, 128], strides = [1, 1]} : vector<72x128xbf16> to vector<64x128xbf16>
    %c2 = arith.constant 2 : index
    %c0_7 = arith.constant 0 : index
    %c0_8 = arith.constant 0 : index
    %16 = vector.load %arg3[%c2, %c0_7, %c0_8] : memref<4x128x128xbf16, #tpu.memory_space<vmem>>, vector<1x128x128xbf16>
    %17 = vector.shape_cast %16 : vector<1x128x128xbf16> to vector<128x128xbf16>
    %cst_9 = arith.constant dense<0.000000e+00> : vector<64x128xf32>
    %18 = tpu.matmul %15, %17, %cst_9 {dimension_numbers = #tpu.dot_dimension_numbers<[1], [0], [0], [1], [0, 0, 1, 1], [], []>} : vector<64x128xbf16>, vector<128x128xbf16>, vector<64x128xf32> -> vector<64x128xf32>
    %19 = arith.addf %14, %18 : vector<64x128xf32>
    %20 = vector.extract_strided_slice %3 {offsets = [6, 0], sizes = [64, 128], strides = [1, 1]} : vector<72x128xbf16> to vector<64x128xbf16>
    %c3 = arith.constant 3 : index
    %c0_10 = arith.constant 0 : index
    %c0_11 = arith.constant 0 : index
    %21 = vector.load %arg3[%c3, %c0_10, %c0_11] : memref<4x128x128xbf16, #tpu.memory_space<vmem>>, vector<1x128x128xbf16>
    %22 = vector.shape_cast %21 : vector<1x128x128xbf16> to vector<128x128xbf16>
    %cst_12 = arith.constant dense<0.000000e+00> : vector<64x128xf32>
    %23 = tpu.matmul %20, %22, %cst_12 {dimension_numbers = #tpu.dot_dimension_numbers<[1], [0], [0], [1], [0, 0, 1, 1], [], []>} : vector<64x128xbf16>, vector<128x128xbf16>, vector<64x128xf32> -> vector<64x128xf32>
    %24 = arith.addf %19, %23 : vector<64x128xf32>
    %c0_13 = arith.constant 0 : index
    %c0_14 = arith.constant 0 : index
    %25 = vector.load %arg4[%c0_13, %c0_14] : memref<1x128xf32, #tpu.memory_space<vmem>>, vector<1x128xf32>
    %26 = vector.broadcast %25 : vector<1x128xf32> to vector<64x128xf32>
    %27 = arith.addf %24, %26 : vector<64x128xf32>
    %cst_15 = arith.constant 0.000000e+00 : f32
    %28 = vector.broadcast %cst_15 : f32 to vector<64x128xf32>
    %29 = arith.cmpf ogt, %27, %28 : vector<64x128xf32>
    %cst_16 = arith.constant 2.000000e-01 : f32
    %30 = vector.broadcast %cst_16 : f32 to vector<64x128xf32>
    %31 = arith.mulf %30, %27 : vector<64x128xf32>
    %32 = arith.select %29, %27, %31 : vector<64x128xi1>, vector<64x128xf32>
    %33 = arith.truncf %32 : vector<64x128xf32> to vector<64x128xbf16>
    %c0_17 = arith.constant 0 : index
    %c0_18 = arith.constant 0 : index
    %34 = vector.load %arg5[%c0_17, %c0_18] : memref<64x128xbf16, #tpu.memory_space<vmem>>, vector<64x128xbf16>
    tpu.vector_store %arg5[%c0_17, %c0_18], %33 {strides = array<i32>} : memref<64x128xbf16, #tpu.memory_space<vmem>>, vector<64x128xbf16>,
    return
  }
  func.func @transform_0(%arg0: i32, %arg1: i32) -> (i32, i32) {
    %c0_i32 = arith.constant 0 : i32
    %c0_i32_0 = arith.constant 0 : i32
    %c0_i32_1 = arith.constant 0 : i32
    return %c0_i32, %c0_i32_0 : i32, i32
  }
  func.func @transform_1(%arg0: i32, %arg1: i32) -> (i32, i32, i32) {
    %c0_i32 = arith.constant 0 : i32
    %c0_i32_0 = arith.constant 0 : i32
    %c0_i32_1 = arith.constant 0 : i32
    return %c0_i32, %c0_i32_0, %arg0 : i32, i32, i32
  }
  func.func @transform_2(%arg0: i32, %arg1: i32) -> (i32, i32) {
    %c0_i32 = arith.constant 0 : i32
    %c0_i32_0 = arith.constant 0 : i32
    return %c0_i32, %arg0 : i32, i32
  }
  func.func @transform_3(%arg0: i32, %arg1: i32) -> (i32, i32) {
    %c0_i32 = arith.constant 0 : i32
    return %arg1, %arg0 : i32, i32
  }
}

</mosaic_0001>

<bundles_post_ra>
// kernel: discriminator_forward.4
= control target key start
LH: loop header
LB: loop body
LE: loop exit
PB: predicated region body
PF: predicated region fallthrough
CT: control target
= control target key end

     0   :  { %vm2510_vm0 = vcmask 1045504   ;;  %vm2098_vm1 = vcmask 97280   ;;  %vm5207_vm2 = vcmask 1046528   ;;  %vm992_vm3 = vsmask.f32 7424  ;;  %s13934_s1 = inlined_call_operand.vmem [shape: bf16[4,12,128], index: 1, kind: input, shape index: {}]   ;;  %s13935_s0 = inlined_call_operand.vmem [shape: bf16[2232,12], index: 0, kind: input, shape index: {}]   ;;  %s13936_s2 = inlined_call_operand.vmem [shape: f32[1,128], index: 2, kind: input, shape index: {}]   ;;  %s13937_s3 = inlined_call_operand.vmem [shape: bf16[2192,128], index: 3, kind: output, shape index: {}]  }
   0x1   :  { %v9217_v0 = vld [vmem:[%s13934_s1] sm:$0xf]  ;;  %v9784_v1 = vld [vmem:[%s13934_s1] sm:$0x30]  ;;  %v9507_v2 = vld [vmem:[%s13934_s1 + $0x18] sm:$0xf] }
   0x2   :  { %v9218_v3 = vor.u32 %v9784_v1, %v9217_v0  ;;  %v9787_v4 = vld [vmem:[%s13934_s1 + $0x18] sm:$0x30]  ;;  %v9076_v5 = vld [vmem:[%s13934_s1 + $0x8] sm:$0xf]  ;;  %v9785_v6 = vld [vmem:[%s13934_s1 + $0x8] sm:$0x30] }
   0x3   :  { %v9508_v7 = vor.u32 %v9787_v4, %v9507_v2  ;;  %v9077_v8 = vor.u32 %v9785_v6, %v9076_v5  ;;  %v9646_v9 = vld [vmem:[%s13935_s0] sm:$0xff]  ;;  %v9364_v10 = vld [vmem:[%s13934_s1 + $0x10] sm:$0xf]  ;;  %v9786_v11 = vld [vmem:[%s13934_s1 + $0x10] sm:$0x30] }
   0x4   :  { %v3488_v12 = vsel %vm2510_vm0, %v9218_v3, 0  ;;  %v9365_v13 = vor.u32 %v9786_v11, %v9364_v10  ;;  %v9648_v14 = vld [vmem:[%s13935_s0 + $0x10] sm:$0xff]  ;;  %v10678_v15 = vld [vmem:[%s13935_s0 + $0x18] sm:$0xff]  ;;  %v9647_v16 = vld [vmem:[%s13935_s0 + $0x8] sm:$0xff]  ;;  %v996_v19 = vshll.u32 %v9646_v9, 16  ;;  %v994_v20 = vshrl.u32 %v9646_v9, 16 }
   0x5   :  { %3497 = vmatpush.bf16.msra.mxu1 %v3488_v12  ;;  %v5900_v17 = vsel %vm2510_vm0, %v9508_v7, 0  ;;  %v2512_v18 = vsel %vm2510_vm0, %v9077_v8, 0  ;;  %v5208_v22 = vrot.slane %v9648_v14, 1  ;;  %v5209_v23 = vrot.slane %v10678_v15, 1  ;;  %v9650_v37 = vld [vmem:[%s13935_s0 + $0x20] sm:$0xff]  ;;  %v9651_v48 = vld [vmem:[%s13935_s0 + $0x28] sm:$0xff] }
   0x6   :  { %5909 = vmatpush.bf16.msra.mxu3 %v5900_v17  ;;  %2521 = vmatpush.bf16.msra.mxu0 %v2512_v18  ;;  %v4234_v21 = vsel %vm2510_vm0, %v9365_v13, 0  ;;  %v1001_v24 = vshll.u32 %v9647_v16, 16  ;;  %v998_v25 = vrot.slane %v996_v19, 1  ;;  %v1009_v26 = vshll.u32 %v9648_v14, 16  ;;  %v9652_v56 = vld [vmem:[%s13935_s0 + $0x30] sm:$0xff]  ;;  %v9653_v0 = vld [vmem:[%s13935_s0 + $0x38] sm:$0xff] }
   0x7   :  { %4243 = vmatpush.bf16.msra.mxu2 %v4234_v21  ;;  %v1013_v27 = vshrl.u32 %v9648_v14, 16  ;;  %v1017_v28 = vshll.u32 %v10678_v15, 16  ;;  %v5210_v29 = vsel %vm5207_vm2, %v5208_v22, %v5209_v23  ;;  %v1005_v38 = vshrl.u32 %v9647_v16, 16  ;;  %v9654_v8 = vld [vmem:[%s13935_s0 + $0x40] sm:$0xff] }
   0x8   :  { %9219 = vmatmul.msk.bf16.vlgmr.msra.gmra.mxu1 %vm2098_vm1, %v9646_v9  ;;  %v1003_v30 = vrot.slane %v1001_v24, 1  ;;  %v999_v31 = vor.u32 %v998_v25, %v994_v20  ;;  %v1011_v32 = vrot.slane %v1009_v26, 1  ;;  %v5211_v39 = vrot.slane %v9650_v37, 1  ;;  %v10755_v24 = vld [vmem:[%s13935_s0 + $0x50] sm:$0xff] }
   0x9   :  { %9509 = vmatmul.msk.bf16.vlgmr.msra.gmra.mxu3 %vm2098_vm1, %v5210_v29  ;;  %v1019_v33 = vrot.slane %v1017_v28, 1  ;;  %v1021_v40 = vshrl.u32 %v10678_v15, 16  ;;  %v1025_v41 = vshll.u32 %v9650_v37, 16  ;;  %v5213_v49 = vrot.slane %v9651_v48, 1 }
   0xa   :  { %v1004_v34 = vsel %vm992_vm3, %v999_v31, %v1003_v30  ;;  %v1015_v35 = vor.u32 %v1013_v27, %v1011_v32  ;;  %v1007_v42 = vor.u32 %v1005_v38, %v1003_v30  ;;  %v5212_v43 = vsel %vm5207_vm2, %v5209_v23, %v5211_v39 }
   0xb   :  { %9078 = vmatmul.msk.bf16.vlgmr.msra.gmra.mxu0 %vm2098_vm1, %v1004_v34  ;;  %v1023_v44 = vor.u32 %v1021_v40, %v1019_v33  ;;  %v1027_v45 = vrot.slane %v1025_v41, 1  ;;  %v1029_v50 = vshrl.u32 %v9650_v37, 16  ;;  %v1033_v51 = vshll.u32 %v9651_v48, 16 }
   0xc   :  { %v1020_v36 = vsel %vm992_vm3, %v1015_v35, %v1019_v33  ;;  %v1012_v46 = vsel %vm992_vm3, %v1007_v42, %v1011_v32  ;;  %v5214_v52 = vsel %vm5207_vm2, %v5211_v39, %v5213_v49  ;;  %v5215_v57 = vrot.slane %v9652_v56, 1  ;;  %v10768_v32 = vld [vmem:[%s13935_s0 + $0x58] sm:$0xff] }
   0xd   :  { %9366 = vmatmul.msk.bf16.vlgmr.msra.gmra.mxu2 %vm2098_vm1, %v1020_v36  ;;  %v1028_v47 = vsel %vm992_vm3, %v1023_v44, %v1027_v45  ;;  %v1031_v53 = vor.u32 %v1029_v50, %v1027_v45  ;;  %v1035_v54 = vrot.slane %v1033_v51, 1  ;;  %v1037_v58 = vshrl.u32 %v9651_v48, 16  ;;  %v10785_v45 = vld [vmem:[%s13935_s0 + $0x60] sm:$0xff] }
   0xe   :  { %v1041_v59 = vshll.u32 %v9652_v56, 16  ;;  %v5216_v60 = vsel %vm5207_vm2, %v5213_v49, %v5215_v57  ;;  %v5217_v1 = vrot.slane %v9653_v0, 1  ;;  %v1045_v2 = vshrl.u32 %v9652_v56, 16 }
   0xf   :  { %v1036_v55 = vsel %vm992_vm3, %v1031_v53, %v1035_v54  ;;  %v1039_v61 = vor.u32 %v1037_v58, %v1035_v54  ;;  %v1049_v3 = vshll.u32 %v9653_v0, 16  ;;  %v5219_v9 = vrot.slane %v9654_v8, 1 }
  0x10   :  { %v1043_v62 = vrot.slane %v1041_v59, 1  ;;  %v5218_v4 = vsel %vm5207_vm2, %v5215_v57, %v5217_v1  ;;  %v1053_v10 = vshrl.u32 %v9653_v0, 16  ;;  %v1057_v11 = vshll.u32 %v9654_v8, 16 }
  0x11   :  { %v1051_v6 = vrot.slane %v1049_v3, 1  ;;  %v5220_v12 = vsel %vm5207_vm2, %v5217_v1, %v5219_v9  ;;  %v1061_v18 = vshrl.u32 %v9654_v8, 16  ;;  %v5223_v25 = vrot.slane %v10755_v24, 1 }
  0x12   :  { %v1044_v63 = vsel %vm992_vm3, %v1039_v61, %v1043_v62  ;;  %v1047_v5 = vor.u32 %v1045_v2, %v1043_v62  ;;  %v1073_v27 = vshll.u32 %v10755_v24, 16  ;;  %v5225_v33 = vrot.slane %v10768_v32, 1 }
  0x13   :  { %v1055_v13 = vor.u32 %v1053_v10, %v1051_v6  ;;  %v1077_v34 = vshrl.u32 %v10755_v24, 16  ;;  %v1081_v35 = vshll.u32 %v10768_v32, 16  ;;  %v5227_v49 = vrot.slane %v10785_v45, 1 }
  0x14   :  { %v1052_v7 = vsel %vm992_vm3, %v1047_v5, %v1051_v6  ;;  %v1075_v30 = vrot.slane %v1073_v27, 1  ;;  %v1085_v50 = vshrl.u32 %v10768_v32, 16  ;;  %v1089_v51 = vshll.u32 %v10785_v45, 16 }
  0x15   :  { %v1083_v39 = vrot.slane %v1081_v35, 1 }
  0x16   :  { %v1079_v38 = vor.u32 %v1077_v34, %v1075_v30  ;;  %v1091_v58 = vrot.slane %v1089_v51, 1 }
  0x17   :  { %v1087_v57 = vor.u32 %v1085_v50, %v1083_v39 }
  0x18   :  { %9220 = vmatmul.msk.bf16.gmra.mxu1 %vm2098_vm1, %v9647_v16  ;;  %v9655_v16 = vld [vmem:[%s13935_s0 + $0x48] sm:$0xff]  ;;  %v10777_v41 = vsel %vm992_vm3, %v1079_v38, %v1083_v39 }
  0x19   :  { %9510 = vmatmul.msk.bf16.gmra.mxu3 %vm2098_vm1, %v5212_v43  ;;  %v5221_v17 = vrot.slane %v9655_v16, 1  ;;  %v1065_v19 = vshll.u32 %v9655_v16, 16  ;;  %v1069_v26 = vshrl.u32 %v9655_v16, 16 }
  0x1b   :  { %9079 = vmatmul.msk.bf16.gmra.mxu0 %vm2098_vm1, %v1012_v46  ;;  %v5222_v20 = vsel %vm5207_vm2, %v5219_v9, %v5221_v17  ;;  %v1067_v22 = vrot.slane %v1065_v19, 1  ;;  %v5224_v28 = vsel %vm5207_vm2, %v5221_v17, %v5223_v25 }
  0x1d   :  { %9367 = vmatmul.msk.bf16.gmra.mxu2 %vm2098_vm1, %v1028_v47  ;;  %v1071_v29 = vor.u32 %v1069_v26, %v1067_v22 }
  0x1f   :  { %v1076_v31 = vsel %vm992_vm3, %v1071_v29, %v1075_v30 }
  0x28   :  { %9221 = vmatmul.msk.bf16.gmra.mxu1 %vm2098_vm1, %v9648_v14  ;;  %v1059_v14 = vrot.slane %v1057_v11, 1 }
  0x29   :  { %9511 = vmatmul.msk.bf16.gmra.mxu3 %vm2098_vm1, %v5214_v52 }
  0x2a   :  { %v1063_v21 = vor.u32 %v1061_v18, %v1059_v14 }
  0x2b   :  { %9080 = vmatmul.msk.bf16.gmra.mxu0 %vm2098_vm1, %v1020_v36 }
  0x2c   :  { %v1068_v23 = vsel %vm992_vm3, %v1063_v21, %v1067_v22 }
  0x2d   :  { %9368 = vmatmul.msk.bf16.gmra.mxu2 %vm2098_vm1, %v1036_v55 }
  0x38   :  { %9222 = vmatmul.msk.bf16.gmra.mxu1 %vm2098_vm1, %v10678_v15  ;;  %v1060_v15 = vsel %vm992_vm3, %v1055_v13, %v1059_v14 }
  0x39   :  { %9512 = vmatmul.msk.bf16.gmra.mxu3 %vm2098_vm1, %v5216_v60 }
  0x3b   :  { %9081 = vmatmul.msk.bf16.gmra.mxu0 %vm2098_vm1, %v1028_v47 }
  0x3d   :  { %9369 = vmatmul.msk.bf16.gmra.mxu2 %vm2098_vm1, %v1044_v63 }
  0x48   :  { %9223 = vmatmul.msk.bf16.gmra.mxu1 %vm2098_vm1, %v9650_v37  ;;  %v5226_v37 = vsel %vm5207_vm2, %v5223_v25, %v5225_v33 }
  0x49   :  { %9513 = vmatmul.msk.bf16.gmra.mxu3 %vm2098_vm1, %v5218_v4 }
  0x4b   :  { %9082 = vmatmul.msk.bf16.gmra.mxu0 %vm2098_vm1, %v1036_v55  ;;  %v10793_v55 = vld [vmem:[%s13936_s2] ss:$0 sm:$0xff] }
  0x4d   :  { %9370 = vmatmul.msk.bf16.gmra.mxu2 %vm2098_vm1, %v1052_v7 }
  0x58   :  { %9224 = vmatmul.msk.bf16.gmra.mxu1 %vm2098_vm1, %v9651_v48 }
  0x59   :  { %9514 = vmatmul.msk.bf16.gmra.mxu3 %vm2098_vm1, %v5220_v12 }
  0x5b   :  { %9083 = vmatmul.msk.bf16.gmra.mxu0 %vm2098_vm1, %v1044_v63 }
  0x5d   :  { %9371 = vmatmul.msk.bf16.gmra.mxu2 %vm2098_vm1, %v1060_v15 }
  0x68   :  { %9225 = vmatmul.msk.bf16.gmra.mxu1 %vm2098_vm1, %v9652_v56  ;;  %v5228_v56 = vsel %vm5207_vm2, %v5225_v33, %v5227_v49 }
  0x69   :  { %9515 = vmatmul.msk.bf16.gmra.mxu3 %vm2098_vm1, %v5222_v20 }
  0x6b   :  { %9084 = vmatmul.msk.bf16.gmra.mxu0 %vm2098_vm1, %v1052_v7  ;;  %v10809_v7 = vld [vmem:[%s13935_s0 + $0x68] sm:$0xff] }
  0x6c   :  { %v5229_v14 = vrot.slane %v10809_v7, 1  ;;  %v1097_v17 = vshll.u32 %v10809_v7, 16 }
  0x6d   :  { %9372 = vmatmul.msk.bf16.gmra.mxu2 %vm2098_vm1, %v1068_v23 }
  0x6e   :  { %v5230_v21 = vsel %vm5207_vm2, %v5227_v49, %v5229_v14 }
  0x78   :  { %9226 = vmatmul.msk.bf16.gmra.mxu1 %vm2098_vm1, %v9653_v0  ;;  %v10800_v0 = vsel %vm992_vm3, %v1087_v57, %v1091_v58 }
  0x79   :  { %9516 = vmatmul.msk.bf16.gmra.mxu3 %vm2098_vm1, %v5224_v28 }
  0x7b   :  { %9085 = vmatmul.msk.bf16.gmra.mxu0 %vm2098_vm1, %v1060_v15 }
  0x7d   :  { %9373 = vmatmul.msk.bf16.gmra.mxu2 %vm2098_vm1, %v1076_v31 }
  0x85   :  { %v3499_v36 = vpop.f32.mrf.mxu1 }
  0x88   :  { %9227 = vmatmul.msk.bf16.gmra.mxu1 %vm2098_vm1, %v9654_v8  ;;  %v2523_v40 = vpop.f32.mrf.mxu0 }
  0x89   :  { %9517 = vmatmul.msk.bf16.gmra.mxu3 %vm2098_vm1, %v5226_v37  ;;  %v3500_v44 = vadd.f32 %v3499_v36, %v2523_v40  ;;  %v10833_v37 = vld [vmem:[%s13935_s0 + $0x70] sm:$0xff] }
  0x8b   :  { %9086 = vmatmul.msk.bf16.gmra.mxu0 %vm2098_vm1, %v1068_v23  ;;  %v1099_v23 = vrot.slane %v1097_v17, 1 }
  0x8c   :  { %v5911_v42 = vpop.f32.mrf.mxu3 }
  0x8d   :  { %v3501_v43 = vpop.f32.mrf.mxu1  ;;  %9374 = vmatmul.msk.bf16.gmra.mxu2 %vm2098_vm1, %v10777_v41 }
  0x90   :  { %v4245_v46 = vpop.f32.mrf.mxu2  ;;  %v2525_v47 = vpop.f32.mrf.mxu0 }
  0x91   :  { %v4930_v48 = vadd.f32 %v4245_v46, %v3500_v44  ;;  %v3502_v59 = vadd.f32 %v3501_v43, %v2525_v47  ;;  %v5231_v44 = vrot.slane %v10833_v37, 1  ;;  %v1101_v47 = vshrl.u32 %v10809_v7, 16 }
  0x93   :  { %v6596_v54 = vadd.f32 %v5911_v42, %v4930_v48  ;;  %v1105_v48 = vshll.u32 %v10833_v37, 16 }
  0x94   :  { %v5913_v52 = vpop.f32.mrf.mxu3 }
  0x95   :  { %v3504_v53 = vpop.f32.mrf.mxu1  ;;  %v6874_v62 = vadd.f32 %v10793_v55, %v6596_v54  ;;  %v1107_v54 = vrot.slane %v1105_v48, 1 }
  0x97   :  { %v7422_v4 = vmul.f32 0.2, %v6874_v62  ;;  %vm7148_vm4 = vcmp.gt.f32.partialorder %v6874_v62, 0.0 }
  0x98   :  { %9228 = vmatmul.msk.bf16.gmra.mxu1 %vm2098_vm1, %v9655_v16  ;;  %v4247_v60 = vpop.f32.mrf.mxu2  ;;  %v2528_v61 = vpop.f32.mrf.mxu0  ;;  %v1093_v16 = vshrl.u32 %v10785_v45, 16 }
  0x99   :  { %9518 = vmatmul.msk.bf16.gmra.mxu3 %vm2098_vm1, %v5228_v56  ;;  %v4931_v63 = vadd.f32 %v4247_v60, %v3502_v59  ;;  %v3505_v6 = vadd.f32 %v3504_v53, %v2528_v61  ;;  %v7696_v11 = vsel %vm7148_vm4, %v6874_v62, %v7422_v4  ;;  %v1103_v53 = vor.u32 %v1101_v47, %v1099_v23  ;;  %v10857_v4 = vld [vmem:[%s13935_s0 + $0x78] sm:$0xff] }
  0x9a   :  { %v1095_v22 = vor.u32 %v1093_v16, %v1091_v58 }
  0x9b   :  { %v6597_v1 = vadd.f32 %v5913_v52, %v4931_v63  ;;  %9087 = vmatmul.msk.bf16.gmra.mxu0 %vm2098_vm1, %v1076_v31  ;;  %v5232_v52 = vsel %vm5207_vm2, %v5229_v14, %v5231_v44  ;;  %v10847_v61 = vsel %vm992_vm3, %v1103_v53, %v1107_v54  ;;  %v1113_v14 = vshll.u32 %v10857_v4, 16 }
  0x9c   :  { %v5916_v2 = vpop.f32.mrf.mxu3  ;;  %v10823_v30 = vsel %vm992_vm3, %v1095_v22, %v1099_v23 }
  0x9d   :  { %v3506_v3 = vpop.f32.mrf.mxu1  ;;  %v6875_v5 = vadd.f32 %v10793_v55, %v6597_v1  ;;  %9375 = vmatmul.msk.bf16.gmra.mxu2 %vm2098_vm1, %v10800_v0 }
  0x9f   :  { %vm7149_vm5 = vcmp.gt.f32.partialorder %v6875_v5, 0.0  ;;  %v7423_v8 = vmul.f32 0.2, %v6875_v5 }
  0xa0   :  { %v4250_v9 = vpop.f32.mrf.mxu2  ;;  %v2530_v10 = vpop.f32.mrf.mxu0 }
  0xa1   :  { %v7697_v12 = vsel %vm7149_vm5, %v6875_v5, %v7423_v8  ;;  %v4932_v13 = vadd.f32 %v4250_v9, %v3505_v6  ;;  %v3507_v25 = vadd.f32 %v3506_v3, %v2530_v10 }
  0xa2   :  { %v9795_v15 = vpack.c.bf16 %v7697_v12, %v7696_v11  ;;  %v5233_v11 = vrot.slane %v10857_v4, 1 }
  0xa3   :  { %v6598_v20 = vadd.f32 %v5916_v2, %v4932_v13  ;;  %v1109_v13 = vshrl.u32 %v10833_v37, 16 }
  0xa4   :  { %v5918_v18 = vpop.f32.mrf.mxu3  ;;  %9796 = vst [vmem:[%s13937_s3] sm:$0xff] %v9795_v15  }
  0xa5   :  { %v3509_v19 = vpop.f32.mrf.mxu1  ;;  %v6876_v28 = vadd.f32 %v10793_v55, %v6598_v20  ;;  %v1115_v20 = vrot.slane %v1113_v14, 1 }
  0xa7   :  { %v7424_v35 = vmul.f32 0.2, %v6876_v28  ;;  %vm7150_vm6 = vcmp.gt.f32.partialorder %v6876_v28, 0.0 }
  0xa8   :  { %9229 = vmatmul.msk.bf16.gmra.mxu1 %vm2098_vm1, %v10755_v24  ;;  %v4252_v26 = vpop.f32.mrf.mxu2  ;;  %v2533_v27 = vpop.f32.mrf.mxu0 }
  0xa9   :  { %9519 = vmatmul.msk.bf16.gmra.mxu3 %vm2098_vm1, %v5230_v21  ;;  %v4933_v29 = vadd.f32 %v4252_v26, %v3507_v25  ;;  %v3510_v24 = vadd.f32 %v3509_v19, %v2533_v27  ;;  %v1111_v19 = vor.u32 %v1109_v13, %v1107_v54 }
  0xab   :  { %v6599_v31 = vadd.f32 %v5918_v18, %v4933_v29  ;;  %9088 = vmatmul.msk.bf16.gmra.mxu0 %vm2098_vm1, %v10777_v41  ;;  %v7698_v41 = vsel %vm7150_vm6, %v6876_v28, %v7424_v35  ;;  %v5234_v18 = vsel %vm5207_vm2, %v5231_v44, %v5233_v11  ;;  %v10871_v27 = vsel %vm992_vm3, %v1111_v19, %v1115_v20  ;;  %v10881_v35 = vld [vmem:[%s13935_s0 + $0x80] sm:$0xff] }
  0xac   :  { %v5921_v33 = vpop.f32.mrf.mxu3  ;;  %v1121_v44 = vshll.u32 %v10881_v35, 16 }
  0xad   :  { %v3511_v34 = vpop.f32.mrf.mxu1  ;;  %v6877_v36 = vadd.f32 %v10793_v55, %v6599_v31  ;;  %9376 = vmatmul.msk.bf16.gmra.mxu2 %vm2098_vm1, %v10823_v30 }
  0xaf   :  { %vm7151_vm7 = vcmp.gt.f32.partialorder %v6877_v36, 0.0  ;;  %v7425_v38 = vmul.f32 0.2, %v6877_v36 }
  0xb0   :  { %v4255_v39 = vpop.f32.mrf.mxu2  ;;  %v2535_v40 = vpop.f32.mrf.mxu0 }
  0xb1   :  { %v7699_v42 = vsel %vm7151_vm7, %v6877_v36, %v7425_v38  ;;  %v4934_v43 = vadd.f32 %v4255_v39, %v3510_v24  ;;  %v3512_v56 = vadd.f32 %v3511_v34, %v2535_v40 }
  0xb2   :  { %v9800_v46 = vpack.c.bf16 %v7699_v42, %v7698_v41  ;;  %v5235_v41 = vrot.slane %v10881_v35, 1 }
  0xb3   :  { %v6600_v51 = vadd.f32 %v5921_v33, %v4934_v43  ;;  %v1117_v43 = vshrl.u32 %v10857_v4, 16 }
  0xb4   :  { %v5923_v49 = vpop.f32.mrf.mxu3  ;;  %10478 = vst [vmem:[%s13937_s3 + $0x8] sm:$0xff] %v9800_v46  }
  0xb5   :  { %v3514_v50 = vpop.f32.mrf.mxu1  ;;  %v6878_v59 = vadd.f32 %v10793_v55, %v6600_v51  ;;  %v1123_v51 = vrot.slane %v1121_v44, 1 }
  0xb7   :  { %v7426_v2 = vmul.f32 0.2, %v6878_v59  ;;  %vm7152_vm8 = vcmp.gt.f32.partialorder %v6878_v59, 0.0 }
  0xb8   :  { %9230 = vmatmul.msk.bf16.gmra.mxu1 %vm2098_vm1, %v10768_v32  ;;  %v4257_v57 = vpop.f32.mrf.mxu2  ;;  %v2538_v58 = vpop.f32.mrf.mxu0 }
  0xb9   :  { %9520 = vmatmul.msk.bf16.gmra.mxu3 %vm2098_vm1, %v5232_v52  ;;  %v4935_v60 = vadd.f32 %v4257_v57, %v3512_v56  ;;  %v3515_v32 = vadd.f32 %v3514_v50, %v2538_v58  ;;  %v1119_v50 = vor.u32 %v1117_v43, %v1115_v20 }
  0xbb   :  { %v6601_v62 = vadd.f32 %v5923_v49, %v4935_v60  ;;  %9089 = vmatmul.msk.bf16.gmra.mxu0 %vm2098_vm1, %v10800_v0  ;;  %v7700_v0 = vsel %vm7152_vm8, %v6878_v59, %v7426_v2  ;;  %v5236_v49 = vsel %vm5207_vm2, %v5233_v11, %v5235_v41  ;;  %v10895_v58 = vsel %vm992_vm3, %v1119_v50, %v1123_v51  ;;  %v10905_v2 = vld [vmem:[%s13935_s0 + $0x88] sm:$0xff] }
  0xbc   :  { %v5926_v63 = vpop.f32.mrf.mxu3  ;;  %v1129_v11 = vshll.u32 %v10905_v2, 16 }
  0xbd   :  { %v3516_v1 = vpop.f32.mrf.mxu1  ;;  %v6879_v3 = vadd.f32 %v10793_v55, %v6601_v62  ;;  %9377 = vmatmul.msk.bf16.gmra.mxu2 %vm2098_vm1, %v10847_v61 }
  0xbf   :  { %vm7153_vm9 = vcmp.gt.f32.partialorder %v6879_v3, 0.0  ;;  %v7427_v5 = vmul.f32 0.2, %v6879_v3 }
  0xc0   :  { %v4260_v6 = vpop.f32.mrf.mxu2  ;;  %v2540_v8 = vpop.f32.mrf.mxu0 }
  0xc1   :  { %v7701_v9 = vsel %vm7153_vm9, %v6879_v3, %v7427_v5  ;;  %v4936_v10 = vadd.f32 %v4260_v6, %v3515_v32  ;;  %v3517_v21 = vadd.f32 %v3516_v1, %v2540_v8 }
  0xc2   :  { %v9805_v12 = vpack.c.bf16 %v7701_v9, %v7700_v0  ;;  %v5237_v0 = vrot.slane %v10905_v2, 1 }
  0xc3   :  { %v6602_v17 = vadd.f32 %v5926_v63, %v4936_v10  ;;  %v1125_v10 = vshrl.u32 %v10881_v35, 16 }
  0xc4   :  { %v5928_v15 = vpop.f32.mrf.mxu3  ;;  %10479 = vst [vmem:[%s13937_s3 + $0x10] sm:$0xff] %v9805_v12  }
  0xc5   :  { %v3519_v16 = vpop.f32.mrf.mxu1  ;;  %v6880_v25 = vadd.f32 %v10793_v55, %v6602_v17  ;;  %v1131_v17 = vrot.slane %v1129_v11, 1 }
  0xc7   :  { %v7428_v33 = vmul.f32 0.2, %v6880_v25  ;;  %vm7154_vm10 = vcmp.gt.f32.partialorder %v6880_v25, 0.0 }
  0xc8   :  { %9231 = vmatmul.msk.bf16.gmra.mxu1 %vm2098_vm1, %v10785_v45  ;;  %v4262_v22 = vpop.f32.mrf.mxu2  ;;  %v2543_v23 = vpop.f32.mrf.mxu0 }
  0xc9   :  { %9521 = vmatmul.msk.bf16.gmra.mxu3 %vm2098_vm1, %v5234_v18  ;;  %v4937_v26 = vadd.f32 %v4262_v22, %v3517_v21  ;;  %v3520_v45 = vadd.f32 %v3519_v16, %v2543_v23  ;;  %v1127_v16 = vor.u32 %v1125_v10, %v1123_v51 }
  0xcb   :  { %v6603_v28 = vadd.f32 %v5928_v15, %v4937_v26  ;;  %9090 = vmatmul.msk.bf16.gmra.mxu0 %vm2098_vm1, %v10823_v30  ;;  %v7702_v30 = vsel %vm7154_vm10, %v6880_v25, %v7428_v33  ;;  %v5238_v15 = vsel %vm5207_vm2, %v5235_v41, %v5237_v0  ;;  %v10919_v23 = vsel %vm992_vm3, %v1127_v16, %v1131_v17  ;;  %v10929_v33 = vld [vmem:[%s13935_s0 + $0x90] sm:$0xff] }
  0xcc   :  { %v5931_v29 = vpop.f32.mrf.mxu3  ;;  %v1137_v41 = vshll.u32 %v10929_v33, 16 }
  0xcd   :  { %v3521_v31 = vpop.f32.mrf.mxu1  ;;  %v6881_v34 = vadd.f32 %v10793_v55, %v6603_v28  ;;  %9378 = vmatmul.msk.bf16.gmra.mxu2 %vm2098_vm1, %v10871_v27 }
  0xcf   :  { %vm7155_vm11 = vcmp.gt.f32.partialorder %v6881_v34, 0.0  ;;  %v7429_v36 = vmul.f32 0.2, %v6881_v34 }
  0xd0   :  { %v4265_v24 = vpop.f32.mrf.mxu2  ;;  %v2545_v38 = vpop.f32.mrf.mxu0 }
  0xd1   :  { %v7703_v39 = vsel %vm7155_vm11, %v6881_v34, %v7429_v36  ;;  %v4938_v40 = vadd.f32 %v4265_v24, %v3520_v45  ;;  %v3522_v52 = vadd.f32 %v3521_v31, %v2545_v38 }
  0xd2   :  { %v9810_v42 = vpack.c.bf16 %v7703_v39, %v7702_v30  ;;  %v5239_v30 = vrot.slane %v10929_v33, 1 }
  0xd3   :  { %v6604_v48 = vadd.f32 %v5931_v29, %v4938_v40  ;;  %v1133_v40 = vshrl.u32 %v10905_v2, 16 }
  0xd4   :  { %v5933_v46 = vpop.f32.mrf.mxu3  ;;  %10480 = vst [vmem:[%s13937_s3 + $0x18] sm:$0xff] %v9810_v42  }
  0xd5   :  { %v3524_v47 = vpop.f32.mrf.mxu1  ;;  %v6882_v56 = vadd.f32 %v10793_v55, %v6604_v48  ;;  %v1139_v48 = vrot.slane %v1137_v41, 1 }
  0xd7   :  { %v7430_v63 = vmul.f32 0.2, %v6882_v56  ;;  %vm7156_vm12 = vcmp.gt.f32.partialorder %v6882_v56, 0.0 }
  0xd8   :  { %9232 = vmatmul.msk.bf16.gmra.mxu1 %vm2098_vm1, %v10809_v7  ;;  %v4267_v53 = vpop.f32.mrf.mxu2  ;;  %v2548_v54 = vpop.f32.mrf.mxu0 }
  0xd9   :  { %9522 = vmatmul.msk.bf16.gmra.mxu3 %vm2098_vm1, %v5236_v49  ;;  %v4939_v57 = vadd.f32 %v4267_v53, %v3522_v52  ;;  %v3525_v7 = vadd.f32 %v3524_v47, %v2548_v54  ;;  %v1135_v47 = vor.u32 %v1133_v40, %v1131_v17 }
  0xdb   :  { %v6605_v59 = vadd.f32 %v5933_v46, %v4939_v57  ;;  %9091 = vmatmul.msk.bf16.gmra.mxu0 %vm2098_vm1, %v10847_v61  ;;  %v7704_v61 = vsel %vm7156_vm12, %v6882_v56, %v7430_v63  ;;  %v5240_v46 = vsel %vm5207_vm2, %v5237_v0, %v5239_v30  ;;  %v10943_v54 = vsel %vm992_vm3, %v1135_v47, %v1139_v48  ;;  %v10953_v63 = vld [vmem:[%s13935_s0 + $0x98] sm:$0xff] }
  0xdc   :  { %v5936_v60 = vpop.f32.mrf.mxu3  ;;  %v1145_v0 = vshll.u32 %v10953_v63, 16 }
  0xdd   :  { %v3526_v62 = vpop.f32.mrf.mxu1  ;;  %v6883_v1 = vadd.f32 %v10793_v55, %v6605_v59  ;;  %9379 = vmatmul.msk.bf16.gmra.mxu2 %vm2098_vm1, %v10895_v58 }
  0xdf   :  { %vm7157_vm13 = vcmp.gt.f32.partialorder %v6883_v1, 0.0  ;;  %v7431_v3 = vmul.f32 0.2, %v6883_v1 }
  0xe0   :  { %v4270_v32 = vpop.f32.mrf.mxu2  ;;  %v2550_v5 = vpop.f32.mrf.mxu0 }
  0xe1   :  { %v7705_v6 = vsel %vm7157_vm13, %v6883_v1, %v7431_v3  ;;  %v4940_v8 = vadd.f32 %v4270_v32, %v3525_v7  ;;  %v3527_v18 = vadd.f32 %v3526_v62, %v2550_v5 }
  0xe2   :  { %v9815_v9 = vpack.c.bf16 %v7705_v6, %v7704_v61  ;;  %v5241_v61 = vrot.slane %v10953_v63, 1 }
  0xe3   :  { %v6606_v14 = vadd.f32 %v5936_v60, %v4940_v8  ;;  %v1141_v8 = vshrl.u32 %v10929_v33, 16 }
  0xe4   :  { %v5938_v12 = vpop.f32.mrf.mxu3  ;;  %10481 = vst [vmem:[%s13937_s3 + $0x20] sm:$0xff] %v9815_v9  }
  0xe5   :  { %v3529_v13 = vpop.f32.mrf.mxu1  ;;  %v6884_v21 = vadd.f32 %v10793_v55, %v6606_v14  ;;  %v1147_v14 = vrot.slane %v1145_v0, 1 }
  0xe7   :  { %v7432_v29 = vmul.f32 0.2, %v6884_v21  ;;  %vm7158_vm14 = vcmp.gt.f32.partialorder %v6884_v21, 0.0 }
  0xe8   :  { %9233 = vmatmul.msk.bf16.gmra.mxu1 %vm2098_vm1, %v10833_v37  ;;  %v4272_v19 = vpop.f32.mrf.mxu2  ;;  %v2553_v20 = vpop.f32.mrf.mxu0 }
  0xe9   :  { %9523 = vmatmul.msk.bf16.gmra.mxu3 %vm2098_vm1, %v5238_v15  ;;  %v4941_v22 = vadd.f32 %v4272_v19, %v3527_v18  ;;  %v3530_v37 = vadd.f32 %v3529_v13, %v2553_v20  ;;  %v1143_v13 = vor.u32 %v1141_v8, %v1139_v48 }
  0xeb   :  { %v6607_v25 = vadd.f32 %v5938_v12, %v4941_v22  ;;  %9092 = vmatmul.msk.bf16.gmra.mxu0 %vm2098_vm1, %v10871_v27  ;;  %v7706_v27 = vsel %vm7158_vm14, %v6884_v21, %v7432_v29  ;;  %v5242_v12 = vsel %vm5207_vm2, %v5239_v30, %v5241_v61  ;;  %v10967_v20 = vsel %vm992_vm3, %v1143_v13, %v1147_v14  ;;  %v10977_v29 = vld [vmem:[%s13935_s0 + $0xa0] sm:$0xff] }
  0xec   :  { %v5941_v26 = vpop.f32.mrf.mxu3  ;;  %v1153_v30 = vshll.u32 %v10977_v29, 16 }
  0xed   :  { %v3531_v28 = vpop.f32.mrf.mxu1  ;;  %v6885_v31 = vadd.f32 %v10793_v55, %v6607_v25  ;;  %9380 = vmatmul.msk.bf16.gmra.mxu2 %vm2098_vm1, %v10919_v23 }
  0xef   :  { %vm7159_vm15 = vcmp.gt.f32.partialorder %v6885_v31, 0.0  ;;  %v7433_v34 = vmul.f32 0.2, %v6885_v31 }
  0xf0   :  { %v4275_v45 = vpop.f32.mrf.mxu2  ;;  %v2555_v36 = vpop.f32.mrf.mxu0 }
  0xf1   :  { %v7707_v24 = vsel %vm7159_vm15, %v6885_v31, %v7433_v34  ;;  %v4942_v38 = vadd.f32 %v4275_v45, %v3530_v37  ;;  %v3532_v49 = vadd.f32 %v3531_v28, %v2555_v36 }
  0xf2   :  { %v9820_v39 = vpack.c.bf16 %v7707_v24, %v7706_v27  ;;  %v5243_v27 = vrot.slane %v10977_v29, 1 }
  0xf3   :  { %v6608_v44 = vadd.f32 %v5941_v26, %v4942_v38  ;;  %v1149_v38 = vshrl.u32 %v10953_v63, 16 }
  0xf4   :  { %v5943_v42 = vpop.f32.mrf.mxu3  ;;  %10482 = vst [vmem:[%s13937_s3 + $0x28] sm:$0xff] %v9820_v39  }
  0xf5   :  { %v3534_v43 = vpop.f32.mrf.mxu1  ;;  %v6886_v52 = vadd.f32 %v10793_v55, %v6608_v44  ;;  %v1155_v44 = vrot.slane %v1153_v30, 1 }
  0xf7   :  { %v7434_v60 = vmul.f32 0.2, %v6886_v52  ;;  %vm7160_vm0 = vcmp.gt.f32.partialorder %v6886_v52, 0.0 }
  0xf8   :  { %9234 = vmatmul.msk.bf16.gmra.mxu1 %vm2098_vm1, %v10857_v4  ;;  %v4277_v50 = vpop.f32.mrf.mxu2  ;;  %v2558_v51 = vpop.f32.mrf.mxu0 }
  0xf9   :  { %9524 = vmatmul.msk.bf16.gmra.mxu3 %vm2098_vm1, %v5240_v46  ;;  %v4943_v53 = vadd.f32 %v4277_v50, %v3532_v49  ;;  %v3535_v4 = vadd.f32 %v3534_v43, %v2558_v51  ;;  %v1151_v43 = vor.u32 %v1149_v38, %v1147_v14 }
  0xfb   :  { %v6609_v56 = vadd.f32 %v5943_v42, %v4943_v53  ;;  %9093 = vmatmul.msk.bf16.gmra.mxu0 %vm2098_vm1, %v10895_v58  ;;  %v7708_v58 = vsel %vm7160_vm0, %v6886_v52, %v7434_v60  ;;  %v5244_v42 = vsel %vm5207_vm2, %v5241_v61, %v5243_v27  ;;  %v10991_v51 = vsel %vm992_vm3, %v1151_v43, %v1155_v44  ;;  %v11001_v60 = vld [vmem:[%s13935_s0 + $0xa8] sm:$0xff] }
  0xfc   :  { %v5946_v57 = vpop.f32.mrf.mxu3  ;;  %v1161_v61 = vshll.u32 %v11001_v60, 16 }
  0xfd   :  { %v3536_v59 = vpop.f32.mrf.mxu1  ;;  %v6887_v62 = vadd.f32 %v10793_v55, %v6609_v56  ;;  %9381 = vmatmul.msk.bf16.gmra.mxu2 %vm2098_vm1, %v10943_v54 }
  0xff   :  { %vm7161_vm4 = vcmp.gt.f32.partialorder %v6887_v62, 0.0  ;;  %v7435_v1 = vmul.f32 0.2, %v6887_v62 }
 0x100   :  { %v4280_v7 = vpop.f32.mrf.mxu2  ;;  %v2560_v3 = vpop.f32.mrf.mxu0 }
 0x101   :  { %v7709_v32 = vsel %vm7161_vm4, %v6887_v62, %v7435_v1  ;;  %v4944_v5 = vadd.f32 %v4280_v7, %v3535_v4  ;;  %v3537_v15 = vadd.f32 %v3536_v59, %v2560_v3 }
 0x102   :  { %v9825_v6 = vpack.c.bf16 %v7709_v32, %v7708_v58  ;;  %v5245_v58 = vrot.slane %v11001_v60, 1 }
 0x103   :  { %v6610_v11 = vadd.f32 %v5946_v57, %v4944_v5  ;;  %v1157_v5 = vshrl.u32 %v10977_v29, 16 }
 0x104   :  { %v5948_v9 = vpop.f32.mrf.mxu3  ;;  %10483 = vst [vmem:[%s13937_s3 + $0x30] sm:$0xff] %v9825_v6  }
 0x105   :  { %v3539_v10 = vpop.f32.mrf.mxu1  ;;  %v6888_v18 = vadd.f32 %v10793_v55, %v6610_v11  ;;  %v1163_v11 = vrot.slane %v1161_v61, 1 }
 0x107   :  { %v7436_v26 = vmul.f32 0.2, %v6888_v18  ;;  %vm7162_vm5 = vcmp.gt.f32.partialorder %v6888_v18, 0.0 }
 0x108   :  { %9235 = vmatmul.msk.bf16.gmra.mxu1 %vm2098_vm1, %v10881_v35  ;;  %v4282_v16 = vpop.f32.mrf.mxu2  ;;  %v2563_v17 = vpop.f32.mrf.mxu0 }
 0x109   :  { %9525 = vmatmul.msk.bf16.gmra.mxu3 %vm2098_vm1, %v5242_v12  ;;  %v4945_v19 = vadd.f32 %v4282_v16, %v3537_v15  ;;  %v3540_v35 = vadd.f32 %v3539_v10, %v2563_v17  ;;  %v1159_v10 = vor.u32 %v1157_v5, %v1155_v44 }
 0x10b   :  { %v6611_v21 = vadd.f32 %v5948_v9, %v4945_v19  ;;  %9094 = vmatmul.msk.bf16.gmra.mxu0 %vm2098_vm1, %v10919_v23  ;;  %v7710_v23 = vsel %vm7162_vm5, %v6888_v18, %v7436_v26  ;;  %v5246_v9 = vsel %vm5207_vm2, %v5243_v27, %v5245_v58  ;;  %v11015_v17 = vsel %vm992_vm3, %v1159_v10, %v1163_v11  ;;  %v11025_v26 = vld [vmem:[%s13935_s0 + $0xb0] sm:$0xff] }
 0x10c   :  { %v5951_v22 = vpop.f32.mrf.mxu3  ;;  %v1169_v27 = vshll.u32 %v11025_v26, 16 }
 0x10d   :  { %v3541_v25 = vpop.f32.mrf.mxu1  ;;  %v6889_v28 = vadd.f32 %v10793_v55, %v6611_v21  ;;  %9382 = vmatmul.msk.bf16.gmra.mxu2 %vm2098_vm1, %v10967_v20 }
 0x10f   :  { %vm7163_vm6 = vcmp.gt.f32.partialorder %v6889_v28, 0.0  ;;  %v7437_v31 = vmul.f32 0.2, %v6889_v28 }
 0x110   :  { %v4285_v37 = vpop.f32.mrf.mxu2  ;;  %v2565_v34 = vpop.f32.mrf.mxu0 }
 0x111   :  { %v7711_v45 = vsel %vm7163_vm6, %v6889_v28, %v7437_v31  ;;  %v4946_v36 = vadd.f32 %v4285_v37, %v3540_v35  ;;  %v3542_v46 = vadd.f32 %v3541_v25, %v2565_v34 }
 0x112   :  { %v9830_v24 = vpack.c.bf16 %v7711_v45, %v7710_v23  ;;  %v5247_v23 = vrot.slane %v11025_v26, 1 }
 0x113   :  { %v6612_v41 = vadd.f32 %v5951_v22, %v4946_v36  ;;  %v1165_v36 = vshrl.u32 %v11001_v60, 16 }
 0x114   :  { %v5953_v39 = vpop.f32.mrf.mxu3  ;;  %10484 = vst [vmem:[%s13937_s3 + $0x38] sm:$0xff] %v9830_v24  }
 0x115   :  { %v3544_v40 = vpop.f32.mrf.mxu1  ;;  %v6890_v49 = vadd.f32 %v10793_v55, %v6612_v41  ;;  %v1171_v41 = vrot.slane %v1169_v27, 1 }
 0x117   :  { %v7438_v57 = vmul.f32 0.2, %v6890_v49  ;;  %vm7164_vm7 = vcmp.gt.f32.partialorder %v6890_v49, 0.0 }
 0x118   :  { %9236 = vmatmul.msk.bf16.gmra.mxu1 %vm2098_vm1, %v10905_v2  ;;  %v4287_v47 = vpop.f32.mrf.mxu2  ;;  %v2568_v48 = vpop.f32.mrf.mxu0 }
 0x119   :  { %9526 = vmatmul.msk.bf16.gmra.mxu3 %vm2098_vm1, %v5244_v42  ;;  %v4947_v50 = vadd.f32 %v4287_v47, %v3542_v46  ;;  %v3545_v2 = vadd.f32 %v3544_v40, %v2568_v48  ;;  %v1167_v40 = vor.u32 %v1165_v36, %v1163_v11 }
 0x11b   :  { %v6613_v52 = vadd.f32 %v5953_v39, %v4947_v50  ;;  %9095 = vmatmul.msk.bf16.gmra.mxu0 %vm2098_vm1, %v10943_v54  ;;  %v7712_v54 = vsel %vm7164_vm7, %v6890_v49, %v7438_v57  ;;  %v5248_v39 = vsel %vm5207_vm2, %v5245_v58, %v5247_v23  ;;  %v11039_v48 = vsel %vm992_vm3, %v1167_v40, %v1171_v41  ;;  %v11049_v57 = vld [vmem:[%s13935_s0 + $0xb8] sm:$0xff] }
 0x11c   :  { %v5956_v53 = vpop.f32.mrf.mxu3  ;;  %v1177_v58 = vshll.u32 %v11049_v57, 16 }
 0x11d   :  { %v3546_v56 = vpop.f32.mrf.mxu1  ;;  %v6891_v59 = vadd.f32 %v10793_v55, %v6613_v52  ;;  %9383 = vmatmul.msk.bf16.gmra.mxu2 %vm2098_vm1, %v10991_v51 }
 0x11f   :  { %vm7165_vm8 = vcmp.gt.f32.partialorder %v6891_v59, 0.0  ;;  %v7439_v62 = vmul.f32 0.2, %v6891_v59 }
 0x120   :  { %v4290_v4 = vpop.f32.mrf.mxu2  ;;  %v2570_v1 = vpop.f32.mrf.mxu0 }
 0x121   :  { %v7713_v7 = vsel %vm7165_vm8, %v6891_v59, %v7439_v62  ;;  %v4948_v3 = vadd.f32 %v4290_v4, %v3545_v2  ;;  %v3547_v12 = vadd.f32 %v3546_v56, %v2570_v1 }
 0x122   :  { %v9835_v32 = vpack.c.bf16 %v7713_v7, %v7712_v54  ;;  %v5249_v54 = vrot.slane %v11049_v57, 1 }
 0x123   :  { %v6614_v0 = vadd.f32 %v5956_v53, %v4948_v3  ;;  %v1173_v3 = vshrl.u32 %v11025_v26, 16 }
 0x124   :  { %v5958_v6 = vpop.f32.mrf.mxu3  ;;  %10485 = vst [vmem:[%s13937_s3 + $0x40] sm:$0xff] %v9835_v32  }
 0x125   :  { %v3549_v8 = vpop.f32.mrf.mxu1  ;;  %v6892_v15 = vadd.f32 %v10793_v55, %v6614_v0  ;;  %v1179_v0 = vrot.slane %v1177_v58, 1 }
 0x127   :  { %v7440_v22 = vmul.f32 0.2, %v6892_v15  ;;  %vm7166_vm9 = vcmp.gt.f32.partialorder %v6892_v15, 0.0 }
 0x128   :  { %9237 = vmatmul.msk.bf16.gmra.mxu1 %vm2098_vm1, %v10929_v33  ;;  %v4292_v13 = vpop.f32.mrf.mxu2  ;;  %v2573_v14 = vpop.f32.mrf.mxu0 }
 0x129   :  { %9527 = vmatmul.msk.bf16.gmra.mxu3 %vm2098_vm1, %v5246_v9  ;;  %v4949_v16 = vadd.f32 %v4292_v13, %v3547_v12  ;;  %v3550_v33 = vadd.f32 %v3549_v8, %v2573_v14  ;;  %v1175_v8 = vor.u32 %v1173_v3, %v1171_v41 }
 0x12b   :  { %v6615_v18 = vadd.f32 %v5958_v6, %v4949_v16  ;;  %9096 = vmatmul.msk.bf16.gmra.mxu0 %vm2098_vm1, %v10967_v20  ;;  %v7714_v20 = vsel %vm7166_vm9, %v6892_v15, %v7440_v22  ;;  %v5250_v6 = vsel %vm5207_vm2, %v5247_v23, %v5249_v54  ;;  %v11063_v14 = vsel %vm992_vm3, %v1175_v8, %v1179_v0  ;;  %v11073_v22 = vld [vmem:[%s13935_s0 + $0xc0] sm:$0xff] }
 0x12c   :  { %v5961_v19 = vpop.f32.mrf.mxu3  ;;  %v1185_v23 = vshll.u32 %v11073_v22, 16 }
 0x12d   :  { %v3551_v21 = vpop.f32.mrf.mxu1  ;;  %v6893_v25 = vadd.f32 %v10793_v55, %v6615_v18  ;;  %9384 = vmatmul.msk.bf16.gmra.mxu2 %vm2098_vm1, %v11015_v17 }
 0x12f   :  { %vm7167_vm10 = vcmp.gt.f32.partialorder %v6893_v25, 0.0  ;;  %v7441_v28 = vmul.f32 0.2, %v6893_v25 }
 0x130   :  { %v4295_v35 = vpop.f32.mrf.mxu2  ;;  %v2575_v31 = vpop.f32.mrf.mxu0 }
 0x131   :  { %v7715_v37 = vsel %vm7167_vm10, %v6893_v25, %v7441_v28  ;;  %v4950_v34 = vadd.f32 %v4295_v35, %v3550_v33  ;;  %v3552_v42 = vadd.f32 %v3551_v21, %v2575_v31 }
 0x132   :  { %v9840_v45 = vpack.c.bf16 %v7715_v37, %v7714_v20  ;;  %v5251_v20 = vrot.slane %v11073_v22, 1 }
 0x133   :  { %v6616_v30 = vadd.f32 %v5961_v19, %v4950_v34  ;;  %v1181_v34 = vshrl.u32 %v11049_v57, 16 }
 0x134   :  { %v5963_v24 = vpop.f32.mrf.mxu3  ;;  %10486 = vst [vmem:[%s13937_s3 + $0x48] sm:$0xff] %v9840_v45  }
 0x135   :  { %v3554_v38 = vpop.f32.mrf.mxu1  ;;  %v6894_v46 = vadd.f32 %v10793_v55, %v6616_v30  ;;  %v1187_v30 = vrot.slane %v1185_v23, 1 }
 0x137   :  { %v7442_v53 = vmul.f32 0.2, %v6894_v46  ;;  %vm7168_vm11 = vcmp.gt.f32.partialorder %v6894_v46, 0.0 }
 0x138   :  { %9238 = vmatmul.msk.bf16.gmra.mxu1 %vm2098_vm1, %v10953_v63  ;;  %v4297_v43 = vpop.f32.mrf.mxu2  ;;  %v2578_v44 = vpop.f32.mrf.mxu0 }
 0x139   :  { %9528 = vmatmul.msk.bf16.gmra.mxu3 %vm2098_vm1, %v5248_v39  ;;  %v4951_v47 = vadd.f32 %v4297_v43, %v3552_v42  ;;  %v3555_v63 = vadd.f32 %v3554_v38, %v2578_v44  ;;  %v1183_v38 = vor.u32 %v1181_v34, %v1179_v0 }
 0x13b   :  { %v6617_v49 = vadd.f32 %v5963_v24, %v4951_v47  ;;  %9097 = vmatmul.msk.bf16.gmra.mxu0 %vm2098_vm1, %v10991_v51  ;;  %v7716_v51 = vsel %vm7168_vm11, %v6894_v46, %v7442_v53  ;;  %v5252_v24 = vsel %vm5207_vm2, %v5249_v54, %v5251_v20  ;;  %v11087_v44 = vsel %vm992_vm3, %v1183_v38, %v1187_v30  ;;  %v11097_v53 = vld [vmem:[%s13935_s0 + $0xc8] sm:$0xff] }
 0x13c   :  { %v5966_v50 = vpop.f32.mrf.mxu3  ;;  %v1193_v54 = vshll.u32 %v11097_v53, 16 }
 0x13d   :  { %v3556_v52 = vpop.f32.mrf.mxu1  ;;  %v6895_v56 = vadd.f32 %v10793_v55, %v6617_v49  ;;  %9385 = vmatmul.msk.bf16.gmra.mxu2 %vm2098_vm1, %v11039_v48 }
 0x13f   :  { %vm7169_vm12 = vcmp.gt.f32.partialorder %v6895_v56, 0.0  ;;  %v7443_v59 = vmul.f32 0.2, %v6895_v56 }
 0x140   :  { %v4300_v2 = vpop.f32.mrf.mxu2  ;;  %v2580_v62 = vpop.f32.mrf.mxu0 }
 0x141   :  { %v7717_v4 = vsel %vm7169_vm12, %v6895_v56, %v7443_v59  ;;  %v4952_v1 = vadd.f32 %v4300_v2, %v3555_v63  ;;  %v3557_v9 = vadd.f32 %v3556_v52, %v2580_v62 }
 0x142   :  { %v9845_v7 = vpack.c.bf16 %v7717_v4, %v7716_v51  ;;  %v5253_v51 = vrot.slane %v11097_v53, 1 }
 0x143   :  { %v6618_v61 = vadd.f32 %v5966_v50, %v4952_v1  ;;  %v1189_v1 = vshrl.u32 %v11073_v22, 16 }
 0x144   :  { %v5968_v32 = vpop.f32.mrf.mxu3  ;;  %10487 = vst [vmem:[%s13937_s3 + $0x50] sm:$0xff] %v9845_v7  }
 0x145   :  { %v3559_v5 = vpop.f32.mrf.mxu1  ;;  %v6896_v12 = vadd.f32 %v10793_v55, %v6618_v61  ;;  %v1195_v61 = vrot.slane %v1193_v54, 1 }
 0x147   :  { %v7444_v19 = vmul.f32 0.2, %v6896_v12  ;;  %vm7170_vm13 = vcmp.gt.f32.partialorder %v6896_v12, 0.0 }
 0x148   :  { %9239 = vmatmul.msk.bf16.gmra.mxu1 %vm2098_vm1, %v10977_v29  ;;  %v4302_v10 = vpop.f32.mrf.mxu2  ;;  %v2583_v11 = vpop.f32.mrf.mxu0 }
 0x149   :  { %9529 = vmatmul.msk.bf16.gmra.mxu3 %vm2098_vm1, %v5250_v6  ;;  %v4953_v13 = vadd.f32 %v4302_v10, %v3557_v9  ;;  %v3560_v29 = vadd.f32 %v3559_v5, %v2583_v11  ;;  %v1191_v5 = vor.u32 %v1189_v1, %v1187_v30  ;;  %v11136_v30 = vld [vmem:[%s13936_s2] ss:$0 sm:$0xff] }
 0x14b   :  { %v6619_v15 = vadd.f32 %v5968_v32, %v4953_v13  ;;  %9098 = vmatmul.msk.bf16.gmra.mxu0 %vm2098_vm1, %v11015_v17  ;;  %v7718_v17 = vsel %vm7170_vm13, %v6896_v12, %v7444_v19  ;;  %v5254_v32 = vsel %vm5207_vm2, %v5251_v20, %v5253_v51  ;;  %v11111_v11 = vsel %vm992_vm3, %v1191_v5, %v1195_v61  ;;  %v11121_v19 = vld [vmem:[%s13935_s0 + $0xd0] sm:$0xff] }
 0x14c   :  { %v5971_v16 = vpop.f32.mrf.mxu3 }
 0x14d   :  { %v3561_v18 = vpop.f32.mrf.mxu1  ;;  %v6897_v21 = vadd.f32 %v10793_v55, %v6619_v15  ;;  %9386 = vmatmul.msk.bf16.gmra.mxu2 %vm2098_vm1, %v11063_v14 }
 0x14f   :  { %vm7171_vm14 = vcmp.gt.f32.partialorder %v6897_v21, 0.0  ;;  %v7445_v25 = vmul.f32 0.2, %v6897_v21 }
 0x150   :  { %v4305_v33 = vpop.f32.mrf.mxu2  ;;  %v2585_v28 = vpop.f32.mrf.mxu0 }
 0x151   :  { %v7719_v35 = vsel %vm7171_vm14, %v6897_v21, %v7445_v25  ;;  %v4954_v31 = vadd.f32 %v4305_v33, %v3560_v29  ;;  %v3562_v39 = vadd.f32 %v3561_v18, %v2585_v28 }
 0x152   :  { %v9850_v37 = vpack.c.bf16 %v7719_v35, %v7718_v17  ;;  %v5255_v17 = vrot.slane %v11121_v19, 1  ;;  %v1197_v35 = vshrl.u32 %v11097_v53, 16 }
 0x153   :  { %v6620_v27 = vadd.f32 %v5971_v16, %v4954_v31  ;;  %v1201_v31 = vshll.u32 %v11121_v19, 16 }
 0x154   :  { %v5973_v45 = vpop.f32.mrf.mxu3  ;;  %10488 = vst [vmem:[%s13937_s3 + $0x58] sm:$0xff] %v9850_v37   ;;  %v5256_v23 = vsel %vm5207_vm2, %v5253_v51, %v5255_v17 }
 0x155   :  { %v3564_v36 = vpop.f32.mrf.mxu1  ;;  %v6898_v42 = vadd.f32 %v10793_v55, %v6620_v27 }
 0x157   :  { %v7446_v50 = vmul.f32 0.2, %v6898_v42  ;;  %vm7172_vm15 = vcmp.gt.f32.partialorder %v6898_v42, 0.0 }
 0x158   :  { %9240 = vmatmul.msk.bf16.gmra.mxu1 %vm2098_vm1, %v11001_v60  ;;  %v4307_v40 = vpop.f32.mrf.mxu2  ;;  %v2588_v41 = vpop.f32.mrf.mxu0 }
 0x159   :  { %9530 = vmatmul.msk.bf16.gmra.mxu3 %vm2098_vm1, %v5252_v24  ;;  %v4955_v43 = vadd.f32 %v4307_v40, %v3562_v39  ;;  %v3565_v60 = vadd.f32 %v3564_v36, %v2588_v41  ;;  %v1203_v36 = vrot.slane %v1201_v31, 1 }
 0x15b   :  { %v6621_v46 = vadd.f32 %v5973_v45, %v4955_v43  ;;  %9099 = vmatmul.msk.bf16.gmra.mxu0 %vm2098_vm1, %v11039_v48  ;;  %v7720_v48 = vsel %vm7172_vm15, %v6898_v42, %v7446_v50  ;;  %v1199_v45 = vor.u32 %v1197_v35, %v1195_v61  ;;  %v11150_v50 = vld [vmem:[%s13935_s0 + $0xd8] sm:$0xff] }
 0x15c   :  { %v5976_v47 = vpop.f32.mrf.mxu3  ;;  %v1209_v51 = vshll.u32 %v11150_v50, 16 }
 0x15d   :  { %v3566_v49 = vpop.f32.mrf.mxu1  ;;  %v6899_v52 = vadd.f32 %v10793_v55, %v6621_v46  ;;  %9387 = vmatmul.msk.bf16.gmra.mxu2 %vm2098_vm1, %v11087_v44  ;;  %v11140_v41 = vsel %vm992_vm3, %v1199_v45, %v1203_v36 }
 0x15f   :  { %vm7173_vm0 = vcmp.gt.f32.partialorder %v6899_v52, 0.0  ;;  %v7447_v56 = vmul.f32 0.2, %v6899_v52 }
 0x160   :  { %v4310_v63 = vpop.f32.mrf.mxu2  ;;  %v2590_v59 = vpop.f32.mrf.mxu0 }
 0x161   :  { %v7721_v2 = vsel %vm7173_vm0, %v6899_v52, %v7447_v56  ;;  %v4956_v62 = vadd.f32 %v4310_v63, %v3565_v60  ;;  %v3567_v6 = vadd.f32 %v3566_v49, %v2590_v59 }
 0x162   :  { %v9855_v4 = vpack.c.bf16 %v7721_v2, %v7720_v48  ;;  %v5257_v48 = vrot.slane %v11150_v50, 1 }
 0x163   :  { %v6622_v58 = vadd.f32 %v5976_v47, %v4956_v62  ;;  %v1205_v62 = vshrl.u32 %v11121_v19, 16 }
 0x164   :  { %v5978_v7 = vpop.f32.mrf.mxu3  ;;  %10489 = vst [vmem:[%s13937_s3 + $0x60] sm:$0xff] %v9855_v4  }
 0x165   :  { %v3569_v3 = vpop.f32.mrf.mxu1  ;;  %v6900_v9 = vadd.f32 %v10793_v55, %v6622_v58  ;;  %v1211_v58 = vrot.slane %v1209_v51, 1 }
 0x167   :  { %v7448_v16 = vmul.f32 0.2, %v6900_v9  ;;  %vm7174_vm4 = vcmp.gt.f32.partialorder %v6900_v9, 0.0 }
 0x168   :  { %9241 = vmatmul.msk.bf16.gmra.mxu1 %vm2098_vm1, %v11025_v26  ;;  %v4312_v8 = vpop.f32.mrf.mxu2  ;;  %v2593_v0 = vpop.f32.mrf.mxu0 }
 0x169   :  { %9531 = vmatmul.msk.bf16.gmra.mxu3 %vm2098_vm1, %v5254_v32  ;;  %v4957_v10 = vadd.f32 %v4312_v8, %v3567_v6  ;;  %v3570_v26 = vadd.f32 %v3569_v3, %v2593_v0  ;;  %v1207_v3 = vor.u32 %v1205_v62, %v1203_v36 }
 0x16b   :  { %v6623_v12 = vadd.f32 %v5978_v7, %v4957_v10  ;;  %9100 = vmatmul.msk.bf16.gmra.mxu0 %vm2098_vm1, %v11063_v14  ;;  %v7722_v14 = vsel %vm7174_vm4, %v6900_v9, %v7448_v16  ;;  %v5258_v7 = vsel %vm5207_vm2, %v5255_v17, %v5257_v48  ;;  %v11164_v0 = vsel %vm992_vm3, %v1207_v3, %v1211_v58  ;;  %v11174_v16 = vld [vmem:[%s13935_s0 + $0xe0] sm:$0xff] }
 0x16c   :  { %v5981_v13 = vpop.f32.mrf.mxu3  ;;  %v1217_v17 = vshll.u32 %v11174_v16, 16 }
 0x16d   :  { %v3571_v15 = vpop.f32.mrf.mxu1  ;;  %v6901_v18 = vadd.f32 %v10793_v55, %v6623_v12  ;;  %9388 = vmatmul.msk.bf16.gmra.mxu2 %vm2098_vm1, %v11111_v11 }
 0x16f   :  { %vm7175_vm5 = vcmp.gt.f32.partialorder %v6901_v18, 0.0  ;;  %v7449_v21 = vmul.f32 0.2, %v6901_v18 }
 0x170   :  { %v4315_v29 = vpop.f32.mrf.mxu2  ;;  %v2595_v25 = vpop.f32.mrf.mxu0 }
 0x171   :  { %v7723_v33 = vsel %vm7175_vm5, %v6901_v18, %v7449_v21  ;;  %v4958_v28 = vadd.f32 %v4315_v29, %v3570_v26  ;;  %v3572_v27 = vadd.f32 %v3571_v15, %v2595_v25 }
 0x172   :  { %v9860_v55 = vpack.c.bf16 %v7723_v33, %v7722_v14  ;;  %v5259_v14 = vrot.slane %v11174_v16, 1 }
 0x173   :  { %v6624_v34 = vadd.f32 %v5981_v13, %v4958_v28  ;;  %v1213_v28 = vshrl.u32 %v11150_v50, 16 }
 0x174   :  { %v5983_v20 = vpop.f32.mrf.mxu3  ;;  %10490 = vst [vmem:[%s13937_s3 + $0x68] sm:$0xff] %v9860_v55  }
 0x175   :  { %v3574_v37 = vpop.f32.mrf.mxu1  ;;  %v6902_v39 = vadd.f32 %v11136_v30, %v6624_v34  ;;  %v1219_v34 = vrot.slane %v1217_v17, 1 }
 0x177   :  { %v7450_v46 = vmul.f32 0.2, %v6902_v39  ;;  %vm7176_vm6 = vcmp.gt.f32.partialorder %v6902_v39, 0.0 }
 0x178   :  { %9242 = vmatmul.msk.bf16.gmra.mxu1 %vm2098_vm1, %v11049_v57  ;;  %v4317_v24 = vpop.f32.mrf.mxu2  ;;  %v2598_v38 = vpop.f32.mrf.mxu0 }
 0x179   :  { %9532 = vmatmul.msk.bf16.gmra.mxu3 %vm2098_vm1, %v5256_v23  ;;  %v4959_v40 = vadd.f32 %v4317_v24, %v3572_v27  ;;  %v3575_v49 = vadd.f32 %v3574_v37, %v2598_v38  ;;  %v1215_v37 = vor.u32 %v1213_v28, %v1211_v58 }
 0x17b   :  { %v6625_v42 = vadd.f32 %v5983_v20, %v4959_v40  ;;  %9101 = vmatmul.msk.bf16.gmra.mxu0 %vm2098_vm1, %v11087_v44  ;;  %v7724_v44 = vsel %vm7176_vm6, %v6902_v39, %v7450_v46  ;;  %v5260_v20 = vsel %vm5207_vm2, %v5257_v48, %v5259_v14  ;;  %v11188_v38 = vsel %vm992_vm3, %v1215_v37, %v1219_v34  ;;  %v11198_v46 = vld [vmem:[%s13935_s0 + $0xe8] sm:$0xff] }
 0x17c   :  { %v5986_v57 = vpop.f32.mrf.mxu3  ;;  %v1225_v48 = vshll.u32 %v11198_v46, 16 }
 0x17d   :  { %v3576_v43 = vpop.f32.mrf.mxu1  ;;  %v6903_v47 = vadd.f32 %v11136_v30, %v6625_v42  ;;  %9389 = vmatmul.msk.bf16.gmra.mxu2 %vm2098_vm1, %v11140_v41 }
 0x17f   :  { %vm7177_vm7 = vcmp.gt.f32.partialorder %v6903_v47, 0.0  ;;  %v7451_v52 = vmul.f32 0.2, %v6903_v47 }
 0x180   :  { %v4320_v60 = vpop.f32.mrf.mxu2  ;;  %v2600_v56 = vpop.f32.mrf.mxu0 }
 0x181   :  { %v7725_v63 = vsel %vm7177_vm7, %v6903_v47, %v7451_v52  ;;  %v4960_v59 = vadd.f32 %v4320_v60, %v3575_v49  ;;  %v3577_v32 = vadd.f32 %v3576_v43, %v2600_v56 }
 0x182   :  { %v9865_v2 = vpack.c.bf16 %v7725_v63, %v7724_v44  ;;  %v5261_v44 = vrot.slane %v11198_v46, 1 }
 0x183   :  { %v6626_v54 = vadd.f32 %v5986_v57, %v4960_v59  ;;  %v1221_v59 = vshrl.u32 %v11174_v16, 16 }
 0x184   :  { %v5988_v4 = vpop.f32.mrf.mxu3  ;;  %10491 = vst [vmem:[%s13937_s3 + $0x70] sm:$0xff] %v9865_v2  }
 0x185   :  { %v3579_v1 = vpop.f32.mrf.mxu1  ;;  %v6904_v6 = vadd.f32 %v11136_v30, %v6626_v54  ;;  %v1227_v54 = vrot.slane %v1225_v48, 1 }
 0x187   :  { %v7452_v13 = vmul.f32 0.2, %v6904_v6  ;;  %vm7178_vm8 = vcmp.gt.f32.partialorder %v6904_v6, 0.0 }
 0x188   :  { %9243 = vmatmul.msk.bf16.gmra.mxu1 %vm2098_vm1, %v11073_v22  ;;  %v4322_v5 = vpop.f32.mrf.mxu2  ;;  %v2603_v61 = vpop.f32.mrf.mxu0 }
 0x189   :  { %9533 = vmatmul.msk.bf16.gmra.mxu3 %vm2098_vm1, %v5258_v7  ;;  %v4961_v8 = vadd.f32 %v4322_v5, %v3577_v32  ;;  %v3580_v22 = vadd.f32 %v3579_v1, %v2603_v61  ;;  %v1223_v1 = vor.u32 %v1221_v59, %v1219_v34 }
 0x18b   :  { %v6627_v9 = vadd.f32 %v5988_v4, %v4961_v8  ;;  %9102 = vmatmul.msk.bf16.gmra.mxu0 %vm2098_vm1, %v11111_v11  ;;  %v7726_v11 = vsel %vm7178_vm8, %v6904_v6, %v7452_v13  ;;  %v5262_v4 = vsel %vm5207_vm2, %v5259_v14, %v5261_v44  ;;  %v11212_v61 = vsel %vm992_vm3, %v1223_v1, %v1227_v54  ;;  %v11222_v13 = vld [vmem:[%s13935_s0 + $0xf0] sm:$0xff] }
 0x18c   :  { %v5991_v10 = vpop.f32.mrf.mxu3  ;;  %v1233_v14 = vshll.u32 %v11222_v13, 16 }
 0x18d   :  { %v3581_v12 = vpop.f32.mrf.mxu1  ;;  %v6905_v15 = vadd.f32 %v11136_v30, %v6627_v9  ;;  %9390 = vmatmul.msk.bf16.gmra.mxu2 %vm2098_vm1, %v11164_v0 }
 0x18f   :  { %vm7179_vm9 = vcmp.gt.f32.partialorder %v6905_v15, 0.0  ;;  %v7453_v18 = vmul.f32 0.2, %v6905_v15 }
 0x190   :  { %v4325_v26 = vpop.f32.mrf.mxu2  ;;  %v2605_v21 = vpop.f32.mrf.mxu0 }
 0x191   :  { %v7727_v29 = vsel %vm7179_vm9, %v6905_v15, %v7453_v18  ;;  %v4962_v25 = vadd.f32 %v4325_v26, %v3580_v22  ;;  %v3582_v23 = vadd.f32 %v3581_v12, %v2605_v21 }
 0x192   :  { %v9870_v33 = vpack.c.bf16 %v7727_v29, %v7726_v11  ;;  %v5263_v11 = vrot.slane %v11222_v13, 1 }
 0x193   :  { %v6628_v31 = vadd.f32 %v5991_v10, %v4962_v25  ;;  %v1229_v25 = vshrl.u32 %v11198_v46, 16 }
 0x194   :  { %v5993_v55 = vpop.f32.mrf.mxu3  ;;  %10492 = vst [vmem:[%s13937_s3 + $0x78] sm:$0xff] %v9870_v33  }
 0x195   :  { %v3584_v35 = vpop.f32.mrf.mxu1  ;;  %v6906_v27 = vadd.f32 %v11136_v30, %v6628_v31  ;;  %v1235_v31 = vrot.slane %v1233_v14, 1 }
 0x197   :  { %v7454_v57 = vmul.f32 0.2, %v6906_v27  ;;  %vm7180_vm10 = vcmp.gt.f32.partialorder %v6906_v27, 0.0 }
 0x198   :  { %9244 = vmatmul.msk.bf16.gmra.mxu1 %vm2098_vm1, %v11097_v53  ;;  %v4327_v45 = vpop.f32.mrf.mxu2  ;;  %v2608_v36 = vpop.f32.mrf.mxu0 }
 0x199   :  { %9534 = vmatmul.msk.bf16.gmra.mxu3 %vm2098_vm1, %v5260_v20  ;;  %v4963_v24 = vadd.f32 %v4327_v45, %v3582_v23  ;;  %v3585_v53 = vadd.f32 %v3584_v35, %v2608_v36  ;;  %v1231_v35 = vor.u32 %v1229_v25, %v1227_v54 }
 0x19b   :  { %v6629_v39 = vadd.f32 %v5993_v55, %v4963_v24  ;;  %9103 = vmatmul.msk.bf16.gmra.mxu0 %vm2098_vm1, %v11140_v41  ;;  %v7728_v41 = vsel %vm7180_vm10, %v6906_v27, %v7454_v57  ;;  %v5264_v55 = vsel %vm5207_vm2, %v5261_v44, %v5263_v11  ;;  %v11236_v36 = vsel %vm992_vm3, %v1231_v35, %v1235_v31  ;;  %v11246_v57 = vld [vmem:[%s13935_s0 + $0xf8] sm:$0xff] }
 0x19c   :  { %v5996_v40 = vpop.f32.mrf.mxu3  ;;  %v1241_v44 = vshll.u32 %v11246_v57, 16 }
 0x19d   :  { %v3586_v42 = vpop.f32.mrf.mxu1  ;;  %v6907_v43 = vadd.f32 %v11136_v30, %v6629_v39  ;;  %9391 = vmatmul.msk.bf16.gmra.mxu2 %vm2098_vm1, %v11188_v38 }
 0x19f   :  { %vm7181_vm11 = vcmp.gt.f32.partialorder %v6907_v43, 0.0  ;;  %v7455_v47 = vmul.f32 0.2, %v6907_v43 }
 0x1a0   :  { %v4330_v49 = vpop.f32.mrf.mxu2  ;;  %v2610_v52 = vpop.f32.mrf.mxu0 }
 0x1a1   :  { %v7729_v60 = vsel %vm7181_vm11, %v6907_v43, %v7455_v47  ;;  %v4964_v56 = vadd.f32 %v4330_v49, %v3585_v53  ;;  %v3587_v7 = vadd.f32 %v3586_v42, %v2610_v52 }
 0x1a2   :  { %v9875_v63 = vpack.c.bf16 %v7729_v60, %v7728_v41  ;;  %v5265_v41 = vrot.slane %v11246_v57, 1 }
 0x1a3   :  { %v6630_v51 = vadd.f32 %v5996_v40, %v4964_v56  ;;  %v1237_v56 = vshrl.u32 %v11222_v13, 16 }
 0x1a4   :  { %v5998_v2 = vpop.f32.mrf.mxu3  ;;  %10493 = vst [vmem:[%s13937_s3 + $0x80] sm:$0xff] %v9875_v63  }
 0x1a5   :  { %v3589_v62 = vpop.f32.mrf.mxu1  ;;  %v6908_v32 = vadd.f32 %v11136_v30, %v6630_v51  ;;  %v1243_v51 = vrot.slane %v1241_v44, 1 }
 0x1a7   :  { %v7456_v10 = vmul.f32 0.2, %v6908_v32  ;;  %vm7182_vm12 = vcmp.gt.f32.partialorder %v6908_v32, 0.0 }
 0x1a8   :  { %9245 = vmatmul.msk.bf16.gmra.mxu1 %vm2098_vm1, %v11121_v19  ;;  %v4332_v3 = vpop.f32.mrf.mxu2  ;;  %v2613_v58 = vpop.f32.mrf.mxu0 }
 0x1a9   :  { %9535 = vmatmul.msk.bf16.gmra.mxu3 %vm2098_vm1, %v5262_v4  ;;  %v4965_v5 = vadd.f32 %v4332_v3, %v3587_v7  ;;  %v3590_v19 = vadd.f32 %v3589_v62, %v2613_v58  ;;  %v1239_v62 = vor.u32 %v1237_v56, %v1235_v31 }
 0x1ab   :  { %v6631_v6 = vadd.f32 %v5998_v2, %v4965_v5  ;;  %9104 = vmatmul.msk.bf16.gmra.mxu0 %vm2098_vm1, %v11164_v0  ;;  %v7730_v0 = vsel %vm7182_vm12, %v6908_v32, %v7456_v10  ;;  %v5266_v2 = vsel %vm5207_vm2, %v5263_v11, %v5265_v41  ;;  %v11260_v58 = vsel %vm992_vm3, %v1239_v62, %v1243_v51  ;;  %v11270_v10 = vld [vmem:[%s13935_s0 + $0x100] sm:$0xff] }
 0x1ac   :  { %v6001_v8 = vpop.f32.mrf.mxu3  ;;  %v1249_v11 = vshll.u32 %v11270_v10, 16 }
 0x1ad   :  { %v3591_v9 = vpop.f32.mrf.mxu1  ;;  %v6909_v12 = vadd.f32 %v11136_v30, %v6631_v6  ;;  %9392 = vmatmul.msk.bf16.gmra.mxu2 %vm2098_vm1, %v11212_v61 }
 0x1af   :  { %vm7183_vm13 = vcmp.gt.f32.partialorder %v6909_v12, 0.0  ;;  %v7457_v15 = vmul.f32 0.2, %v6909_v12 }
 0x1b0   :  { %v4335_v22 = vpop.f32.mrf.mxu2  ;;  %v2615_v18 = vpop.f32.mrf.mxu0 }
 0x1b1   :  { %v7731_v26 = vsel %vm7183_vm13, %v6909_v12, %v7457_v15  ;;  %v4966_v21 = vadd.f32 %v4335_v22, %v3590_v19  ;;  %v3592_v20 = vadd.f32 %v3591_v9, %v2615_v18 }
 0x1b2   :  { %v9880_v29 = vpack.c.bf16 %v7731_v26, %v7730_v0  ;;  %v5267_v0 = vrot.slane %v11270_v10, 1 }
 0x1b3   :  { %v6632_v17 = vadd.f32 %v6001_v8, %v4966_v21  ;;  %v1245_v21 = vshrl.u32 %v11246_v57, 16 }
 0x1b4   :  { %v6003_v33 = vpop.f32.mrf.mxu3  ;;  %10494 = vst [vmem:[%s13937_s3 + $0x88] sm:$0xff] %v9880_v29  }
 0x1b5   :  { %v3594_v28 = vpop.f32.mrf.mxu1  ;;  %v6910_v23 = vadd.f32 %v11136_v30, %v6632_v17  ;;  %v1251_v17 = vrot.slane %v1249_v11, 1 }
 0x1b7   :  { %v7458_v40 = vmul.f32 0.2, %v6910_v23  ;;  %vm7184_vm14 = vcmp.gt.f32.partialorder %v6910_v23, 0.0 }
 0x1b8   :  { %9246 = vmatmul.msk.bf16.gmra.mxu1 %vm2098_vm1, %v11150_v50  ;;  %v4337_v37 = vpop.f32.mrf.mxu2  ;;  %v2618_v34 = vpop.f32.mrf.mxu0 }
 0x1b9   :  { %9536 = vmatmul.msk.bf16.gmra.mxu3 %vm2098_vm1, %v5264_v55  ;;  %v4967_v45 = vadd.f32 %v4337_v37, %v3592_v20  ;;  %v3595_v50 = vadd.f32 %v3594_v28, %v2618_v34  ;;  %v1247_v28 = vor.u32 %v1245_v21, %v1243_v51 }
 0x1bb   :  { %v6633_v27 = vadd.f32 %v6003_v33, %v4967_v45  ;;  %9105 = vmatmul.msk.bf16.gmra.mxu0 %vm2098_vm1, %v11188_v38  ;;  %v7732_v38 = vsel %vm7184_vm14, %v6910_v23, %v7458_v40  ;;  %v5268_v33 = vsel %vm5207_vm2, %v5265_v41, %v5267_v0  ;;  %v11284_v34 = vsel %vm992_vm3, %v1247_v28, %v1251_v17  ;;  %v11294_v40 = vld [vmem:[%s13935_s0 + $0x108] sm:$0xff] }
 0x1bc   :  { %v6006_v24 = vpop.f32.mrf.mxu3  ;;  %v1257_v41 = vshll.u32 %v11294_v40, 16 }
 0x1bd   :  { %v3596_v39 = vpop.f32.mrf.mxu1  ;;  %v6911_v42 = vadd.f32 %v11136_v30, %v6633_v27  ;;  %9393 = vmatmul.msk.bf16.gmra.mxu2 %vm2098_vm1, %v11236_v36 }
 0x1bf   :  { %vm7185_vm15 = vcmp.gt.f32.partialorder %v6911_v42, 0.0  ;;  %v7459_v43 = vmul.f32 0.2, %v6911_v42 }
 0x1c0   :  { %v4340_v53 = vpop.f32.mrf.mxu2  ;;  %v2620_v47 = vpop.f32.mrf.mxu0 }
 0x1c1   :  { %v7733_v49 = vsel %vm7185_vm15, %v6911_v42, %v7459_v43  ;;  %v4968_v52 = vadd.f32 %v4340_v53, %v3595_v50  ;;  %v3597_v4 = vadd.f32 %v3596_v39, %v2620_v47 }
 0x1c2   :  { %v9885_v60 = vpack.c.bf16 %v7733_v49, %v7732_v38  ;;  %v5269_v38 = vrot.slane %v11294_v40, 1 }
 0x1c3   :  { %v6634_v48 = vadd.f32 %v6006_v24, %v4968_v52  ;;  %v1253_v52 = vshrl.u32 %v11270_v10, 16 }
 0x1c4   :  { %v6008_v63 = vpop.f32.mrf.mxu3  ;;  %10495 = vst [vmem:[%s13937_s3 + $0x90] sm:$0xff] %v9885_v60  }
 0x1c5   :  { %v3599_v59 = vpop.f32.mrf.mxu1  ;;  %v6912_v7 = vadd.f32 %v11136_v30, %v6634_v48  ;;  %v1259_v48 = vrot.slane %v1257_v41, 1 }
 0x1c7   :  { %v7460_v8 = vmul.f32 0.2, %v6912_v7  ;;  %vm7186_vm0 = vcmp.gt.f32.partialorder %v6912_v7, 0.0 }
 0x1c8   :  { %9247 = vmatmul.msk.bf16.gmra.mxu1 %vm2098_vm1, %v11174_v16  ;;  %v4342_v1 = vpop.f32.mrf.mxu2  ;;  %v2623_v54 = vpop.f32.mrf.mxu0 }
 0x1c9   :  { %9537 = vmatmul.msk.bf16.gmra.mxu3 %vm2098_vm1, %v5266_v2  ;;  %v4969_v3 = vadd.f32 %v4342_v1, %v3597_v4  ;;  %v3600_v16 = vadd.f32 %v3599_v59, %v2623_v54  ;;  %v1255_v59 = vor.u32 %v1253_v52, %v1251_v17 }
 0x1cb   :  { %v6635_v32 = vadd.f32 %v6008_v63, %v4969_v3  ;;  %9106 = vmatmul.msk.bf16.gmra.mxu0 %vm2098_vm1, %v11212_v61  ;;  %v7734_v61 = vsel %vm7186_vm0, %v6912_v7, %v7460_v8  ;;  %v5270_v63 = vsel %vm5207_vm2, %v5267_v0, %v5269_v38  ;;  %v11308_v54 = vsel %vm992_vm3, %v1255_v59, %v1259_v48  ;;  %v11318_v8 = vld [vmem:[%s13935_s0 + $0x110] sm:$0xff] }
 0x1cc   :  { %v6011_v5 = vpop.f32.mrf.mxu3  ;;  %v1265_v0 = vshll.u32 %v11318_v8, 16 }
 0x1cd   :  { %v3601_v6 = vpop.f32.mrf.mxu1  ;;  %v6913_v9 = vadd.f32 %v11136_v30, %v6635_v32  ;;  %9394 = vmatmul.msk.bf16.gmra.mxu2 %vm2098_vm1, %v11260_v58 }
 0x1cf   :  { %vm7187_vm4 = vcmp.gt.f32.partialorder %v6913_v9, 0.0  ;;  %v7461_v12 = vmul.f32 0.2, %v6913_v9 }
 0x1d0   :  { %v4345_v19 = vpop.f32.mrf.mxu2  ;;  %v2625_v15 = vpop.f32.mrf.mxu0 }
 0x1d1   :  { %v7735_v22 = vsel %vm7187_vm4, %v6913_v9, %v7461_v12  ;;  %v4970_v18 = vadd.f32 %v4345_v19, %v3600_v16  ;;  %v3602_v55 = vadd.f32 %v3601_v6, %v2625_v15 }
 0x1d2   :  { %v9890_v26 = vpack.c.bf16 %v7735_v22, %v7734_v61  ;;  %v5271_v61 = vrot.slane %v11318_v8, 1 }
 0x1d3   :  { %v6636_v14 = vadd.f32 %v6011_v5, %v4970_v18  ;;  %v1261_v18 = vshrl.u32 %v11294_v40, 16 }
 0x1d4   :  { %v6013_v29 = vpop.f32.mrf.mxu3  ;;  %10496 = vst [vmem:[%s13937_s3 + $0x98] sm:$0xff] %v9890_v26  }
 0x1d5   :  { %v3604_v25 = vpop.f32.mrf.mxu1  ;;  %v6914_v20 = vadd.f32 %v11136_v30, %v6636_v14  ;;  %v1267_v14 = vrot.slane %v1265_v0, 1 }
 0x1d7   :  { %v7462_v24 = vmul.f32 0.2, %v6914_v20  ;;  %vm7188_vm5 = vcmp.gt.f32.partialorder %v6914_v20, 0.0 }
 0x1d8   :  { %9248 = vmatmul.msk.bf16.gmra.mxu1 %vm2098_vm1, %v11198_v46  ;;  %v4347_v35 = vpop.f32.mrf.mxu2  ;;  %v2628_v31 = vpop.f32.mrf.mxu0 }
 0x1d9   :  { %9538 = vmatmul.msk.bf16.gmra.mxu3 %vm2098_vm1, %v5268_v33  ;;  %v4971_v37 = vadd.f32 %v4347_v35, %v3602_v55  ;;  %v3605_v46 = vadd.f32 %v3604_v25, %v2628_v31  ;;  %v1263_v25 = vor.u32 %v1261_v18, %v1259_v48 }
 0x1db   :  { %v6637_v23 = vadd.f32 %v6013_v29, %v4971_v37  ;;  %9107 = vmatmul.msk.bf16.gmra.mxu0 %vm2098_vm1, %v11236_v36  ;;  %v7736_v36 = vsel %vm7188_vm5, %v6914_v20, %v7462_v24  ;;  %v5272_v29 = vsel %vm5207_vm2, %v5269_v38, %v5271_v61  ;;  %v11332_v31 = vsel %vm992_vm3, %v1263_v25, %v1267_v14  ;;  %v11342_v24 = vld [vmem:[%s13935_s0 + $0x118] sm:$0xff] }
 0x1dc   :  { %v6016_v45 = vpop.f32.mrf.mxu3  ;;  %v1273_v38 = vshll.u32 %v11342_v24, 16 }
 0x1dd   :  { %v3606_v27 = vpop.f32.mrf.mxu1  ;;  %v6915_v39 = vadd.f32 %v11136_v30, %v6637_v23  ;;  %9395 = vmatmul.msk.bf16.gmra.mxu2 %vm2098_vm1, %v11284_v34 }
 0x1df   :  { %vm7189_vm6 = vcmp.gt.f32.partialorder %v6915_v39, 0.0  ;;  %v7463_v42 = vmul.f32 0.2, %v6915_v39 }
 0x1e0   :  { %v4350_v50 = vpop.f32.mrf.mxu2  ;;  %v2630_v43 = vpop.f32.mrf.mxu0 }
 0x1e1   :  { %v7737_v53 = vsel %vm7189_vm6, %v6915_v39, %v7463_v42  ;;  %v4972_v47 = vadd.f32 %v4350_v50, %v3605_v46  ;;  %v3607_v2 = vadd.f32 %v3606_v27, %v2630_v43 }
 0x1e2   :  { %v9895_v49 = vpack.c.bf16 %v7737_v53, %v7736_v36  ;;  %v5273_v36 = vrot.slane %v11342_v24, 1 }
 0x1e3   :  { %v6638_v44 = vadd.f32 %v6016_v45, %v4972_v47  ;;  %v1269_v47 = vshrl.u32 %v11318_v8, 16 }
 0x1e4   :  { %v6018_v60 = vpop.f32.mrf.mxu3  ;;  %10497 = vst [vmem:[%s13937_s3 + $0xa0] sm:$0xff] %v9895_v49  }
 0x1e5   :  { %v3609_v56 = vpop.f32.mrf.mxu1  ;;  %v6916_v4 = vadd.f32 %v11136_v30, %v6638_v44  ;;  %v1275_v44 = vrot.slane %v1273_v38, 1 }
 0x1e7   :  { %v7464_v5 = vmul.f32 0.2, %v6916_v4  ;;  %vm7190_vm7 = vcmp.gt.f32.partialorder %v6916_v4, 0.0 }
 0x1e8   :  { %9249 = vmatmul.msk.bf16.gmra.mxu1 %vm2098_vm1, %v11222_v13  ;;  %v4352_v62 = vpop.f32.mrf.mxu2  ;;  %v2633_v51 = vpop.f32.mrf.mxu0 }
 0x1e9   :  { %9539 = vmatmul.msk.bf16.gmra.mxu3 %vm2098_vm1, %v5270_v63  ;;  %v4973_v1 = vadd.f32 %v4352_v62, %v3607_v2  ;;  %v3610_v13 = vadd.f32 %v3609_v56, %v2633_v51  ;;  %v1271_v56 = vor.u32 %v1269_v47, %v1267_v14 }
 0x1eb   :  { %v6639_v7 = vadd.f32 %v6018_v60, %v4973_v1  ;;  %9108 = vmatmul.msk.bf16.gmra.mxu0 %vm2098_vm1, %v11260_v58  ;;  %v7738_v58 = vsel %vm7190_vm7, %v6916_v4, %v7464_v5  ;;  %v5274_v60 = vsel %vm5207_vm2, %v5271_v61, %v5273_v36  ;;  %v11356_v51 = vsel %vm992_vm3, %v1271_v56, %v1275_v44  ;;  %v11366_v5 = vld [vmem:[%s13935_s0 + $0x120] sm:$0xff] }
 0x1ec   :  { %v6021_v3 = vpop.f32.mrf.mxu3  ;;  %v1281_v61 = vshll.u32 %v11366_v5, 16 }
 0x1ed   :  { %v3611_v32 = vpop.f32.mrf.mxu1  ;;  %v6917_v6 = vadd.f32 %v11136_v30, %v6639_v7  ;;  %9396 = vmatmul.msk.bf16.gmra.mxu2 %vm2098_vm1, %v11308_v54 }
 0x1ef   :  { %vm7191_vm8 = vcmp.gt.f32.partialorder %v6917_v6, 0.0  ;;  %v7465_v9 = vmul.f32 0.2, %v6917_v6 }
 0x1f0   :  { %v4355_v16 = vpop.f32.mrf.mxu2  ;;  %v2635_v12 = vpop.f32.mrf.mxu0 }
 0x1f1   :  { %v7739_v19 = vsel %vm7191_vm8, %v6917_v6, %v7465_v9  ;;  %v4974_v15 = vadd.f32 %v4355_v16, %v3610_v13  ;;  %v3612_v33 = vadd.f32 %v3611_v32, %v2635_v12 }
 0x1f2   :  { %v9900_v22 = vpack.c.bf16 %v7739_v19, %v7738_v58  ;;  %v5275_v58 = vrot.slane %v11366_v5, 1 }
 0x1f3   :  { %v6640_v11 = vadd.f32 %v6021_v3, %v4974_v15  ;;  %v1277_v15 = vshrl.u32 %v11342_v24, 16 }
 0x1f4   :  { %v6023_v26 = vpop.f32.mrf.mxu3  ;;  %10498 = vst [vmem:[%s13937_s3 + $0xa8] sm:$0xff] %v9900_v22  }
 0x1f5   :  { %v3614_v21 = vpop.f32.mrf.mxu1  ;;  %v6918_v55 = vadd.f32 %v11136_v30, %v6640_v11  ;;  %v1283_v11 = vrot.slane %v1281_v61, 1 }
 0x1f7   :  { %v7466_v45 = vmul.f32 0.2, %v6918_v55  ;;  %vm7192_vm9 = vcmp.gt.f32.partialorder %v6918_v55, 0.0 }
 0x1f8   :  { %9250 = vmatmul.msk.bf16.gmra.mxu1 %vm2098_vm1, %v11246_v57  ;;  %v4357_v28 = vpop.f32.mrf.mxu2  ;;  %v2638_v17 = vpop.f32.mrf.mxu0 }
 0x1f9   :  { %9540 = vmatmul.msk.bf16.gmra.mxu3 %vm2098_vm1, %v5272_v29  ;;  %v4975_v35 = vadd.f32 %v4357_v28, %v3612_v33  ;;  %v3615_v57 = vadd.f32 %v3614_v21, %v2638_v17  ;;  %v1279_v21 = vor.u32 %v1277_v15, %v1275_v44 }
 0x1fb   :  { %v6641_v20 = vadd.f32 %v6023_v26, %v4975_v35  ;;  %9109 = vmatmul.msk.bf16.gmra.mxu0 %vm2098_vm1, %v11284_v34  ;;  %v7740_v34 = vsel %vm7192_vm9, %v6918_v55, %v7466_v45  ;;  %v5276_v26 = vsel %vm5207_vm2, %v5273_v36, %v5275_v58  ;;  %v11380_v17 = vsel %vm992_vm3, %v1279_v21, %v1283_v11  ;;  %v11390_v45 = vld [vmem:[%s13935_s0 + $0x128] sm:$0xff] }
 0x1fc   :  { %v6026_v37 = vpop.f32.mrf.mxu3  ;;  %v1289_v36 = vshll.u32 %v11390_v45, 16 }
 0x1fd   :  { %v3616_v23 = vpop.f32.mrf.mxu1  ;;  %v6919_v27 = vadd.f32 %v11136_v30, %v6641_v20  ;;  %9397 = vmatmul.msk.bf16.gmra.mxu2 %vm2098_vm1, %v11332_v31 }
 0x1ff   :  { %vm7193_vm10 = vcmp.gt.f32.partialorder %v6919_v27, 0.0  ;;  %v7467_v39 = vmul.f32 0.2, %v6919_v27 }
 0x200   :  { %v4360_v46 = vpop.f32.mrf.mxu2  ;;  %v2640_v42 = vpop.f32.mrf.mxu0 }
 0x201   :  { %v7741_v50 = vsel %vm7193_vm10, %v6919_v27, %v7467_v39  ;;  %v4976_v43 = vadd.f32 %v4360_v46, %v3615_v57  ;;  %v3617_v63 = vadd.f32 %v3616_v23, %v2640_v42 }
 0x202   :  { %v9905_v53 = vpack.c.bf16 %v7741_v50, %v7740_v34  ;;  %v5277_v34 = vrot.slane %v11390_v45, 1 }
 0x203   :  { %v6642_v41 = vadd.f32 %v6026_v37, %v4976_v43  ;;  %v1285_v43 = vshrl.u32 %v11366_v5, 16 }
 0x204   :  { %v6028_v49 = vpop.f32.mrf.mxu3  ;;  %10499 = vst [vmem:[%s13937_s3 + $0xb0] sm:$0xff] %v9905_v53  }
 0x205   :  { %v3619_v52 = vpop.f32.mrf.mxu1  ;;  %v6920_v2 = vadd.f32 %v11136_v30, %v6642_v41  ;;  %v1291_v41 = vrot.slane %v1289_v36, 1 }
 0x207   :  { %v7468_v3 = vmul.f32 0.2, %v6920_v2  ;;  %vm7194_vm11 = vcmp.gt.f32.partialorder %v6920_v2, 0.0 }
 0x208   :  { %9251 = vmatmul.msk.bf16.gmra.mxu1 %vm2098_vm1, %v11270_v10  ;;  %v4362_v59 = vpop.f32.mrf.mxu2  ;;  %v2643_v48 = vpop.f32.mrf.mxu0 }
 0x209   :  { %9541 = vmatmul.msk.bf16.gmra.mxu3 %vm2098_vm1, %v5274_v60  ;;  %v4977_v62 = vadd.f32 %v4362_v59, %v3617_v63  ;;  %v3620_v10 = vadd.f32 %v3619_v52, %v2643_v48  ;;  %v1287_v52 = vor.u32 %v1285_v43, %v1283_v11 }
 0x20b   :  { %v6643_v4 = vadd.f32 %v6028_v49, %v4977_v62  ;;  %9110 = vmatmul.msk.bf16.gmra.mxu0 %vm2098_vm1, %v11308_v54  ;;  %v7742_v54 = vsel %vm7194_vm11, %v6920_v2, %v7468_v3  ;;  %v5278_v49 = vsel %vm5207_vm2, %v5275_v58, %v5277_v34  ;;  %v11404_v48 = vsel %vm992_vm3, %v1287_v52, %v1291_v41  ;;  %v11414_v3 = vld [vmem:[%s13935_s0 + $0x130] sm:$0xff] }
 0x20c   :  { %v6031_v1 = vpop.f32.mrf.mxu3  ;;  %v1297_v58 = vshll.u32 %v11414_v3, 16 }
 0x20d   :  { %v3621_v7 = vpop.f32.mrf.mxu1  ;;  %v6921_v32 = vadd.f32 %v11136_v30, %v6643_v4  ;;  %9398 = vmatmul.msk.bf16.gmra.mxu2 %vm2098_vm1, %v11356_v51 }
 0x20f   :  { %vm7195_vm12 = vcmp.gt.f32.partialorder %v6921_v32, 0.0  ;;  %v7469_v6 = vmul.f32 0.2, %v6921_v32 }
 0x210   :  { %v4365_v13 = vpop.f32.mrf.mxu2  ;;  %v2645_v9 = vpop.f32.mrf.mxu0 }
 0x211   :  { %v7743_v16 = vsel %vm7195_vm12, %v6921_v32, %v7469_v6  ;;  %v4978_v12 = vadd.f32 %v4365_v13, %v3620_v10  ;;  %v3622_v29 = vadd.f32 %v3621_v7, %v2645_v9 }
 0x212   :  { %v9910_v19 = vpack.c.bf16 %v7743_v16, %v7742_v54  ;;  %v5279_v54 = vrot.slane %v11414_v3, 1 }
 0x213   :  { %v6644_v0 = vadd.f32 %v6031_v1, %v4978_v12  ;;  %v1293_v12 = vshrl.u32 %v11390_v45, 16 }
 0x214   :  { %v6033_v22 = vpop.f32.mrf.mxu3  ;;  %10500 = vst [vmem:[%s13937_s3 + $0xb8] sm:$0xff] %v9910_v19  }
 0x215   :  { %v3624_v18 = vpop.f32.mrf.mxu1  ;;  %v6922_v33 = vadd.f32 %v11136_v30, %v6644_v0  ;;  %v1299_v0 = vrot.slane %v1297_v58, 1 }
 0x217   :  { %v7470_v37 = vmul.f32 0.2, %v6922_v33  ;;  %vm7196_vm13 = vcmp.gt.f32.partialorder %v6922_v33, 0.0 }
 0x218   :  { %9252 = vmatmul.msk.bf16.gmra.mxu1 %vm2098_vm1, %v11294_v40  ;;  %v4367_v25 = vpop.f32.mrf.mxu2  ;;  %v2648_v14 = vpop.f32.mrf.mxu0 }
 0x219   :  { %9542 = vmatmul.msk.bf16.gmra.mxu3 %vm2098_vm1, %v5276_v26  ;;  %v4979_v28 = vadd.f32 %v4367_v25, %v3622_v29  ;;  %v3625_v40 = vadd.f32 %v3624_v18, %v2648_v14  ;;  %v1295_v18 = vor.u32 %v1293_v12, %v1291_v41 }
 0x21b   :  { %v6645_v55 = vadd.f32 %v6033_v22, %v4979_v28  ;;  %9111 = vmatmul.msk.bf16.gmra.mxu0 %vm2098_vm1, %v11332_v31  ;;  %v7744_v31 = vsel %vm7196_vm13, %v6922_v33, %v7470_v37  ;;  %v5280_v22 = vsel %vm5207_vm2, %v5277_v34, %v5279_v54  ;;  %v11428_v14 = vsel %vm992_vm3, %v1295_v18, %v1299_v0  ;;  %v11438_v37 = vld [vmem:[%s13935_s0 + $0x138] sm:$0xff] }
 0x21c   :  { %v6036_v35 = vpop.f32.mrf.mxu3  ;;  %v1305_v34 = vshll.u32 %v11438_v37, 16 }
 0x21d   :  { %v3626_v20 = vpop.f32.mrf.mxu1  ;;  %v6923_v23 = vadd.f32 %v11136_v30, %v6645_v55  ;;  %9399 = vmatmul.msk.bf16.gmra.mxu2 %vm2098_vm1, %v11380_v17 }
 0x21f   :  { %vm7197_vm14 = vcmp.gt.f32.partialorder %v6923_v23, 0.0  ;;  %v7471_v27 = vmul.f32 0.2, %v6923_v23 }
 0x220   :  { %v4370_v57 = vpop.f32.mrf.mxu2  ;;  %v2650_v39 = vpop.f32.mrf.mxu0 }
 0x221   :  { %v7745_v46 = vsel %vm7197_vm14, %v6923_v23, %v7471_v27  ;;  %v4980_v42 = vadd.f32 %v4370_v57, %v3625_v40  ;;  %v3627_v60 = vadd.f32 %v3626_v20, %v2650_v39 }
 0x222   :  { %v9915_v50 = vpack.c.bf16 %v7745_v46, %v7744_v31  ;;  %v5281_v31 = vrot.slane %v11438_v37, 1 }
 0x223   :  { %v6646_v38 = vadd.f32 %v6036_v35, %v4980_v42  ;;  %v1301_v42 = vshrl.u32 %v11414_v3, 16 }
 0x224   :  { %v6038_v53 = vpop.f32.mrf.mxu3  ;;  %10501 = vst [vmem:[%s13937_s3 + $0xc0] sm:$0xff] %v9915_v50  }
 0x225   :  { %v3629_v47 = vpop.f32.mrf.mxu1  ;;  %v6924_v63 = vadd.f32 %v11136_v30, %v6646_v38  ;;  %v1307_v38 = vrot.slane %v1305_v34, 1 }
 0x227   :  { %v7472_v1 = vmul.f32 0.2, %v6924_v63  ;;  %vm7198_vm15 = vcmp.gt.f32.partialorder %v6924_v63, 0.0 }
 0x228   :  { %9253 = vmatmul.msk.bf16.gmra.mxu1 %vm2098_vm1, %v11318_v8  ;;  %v4372_v56 = vpop.f32.mrf.mxu2  ;;  %v2653_v44 = vpop.f32.mrf.mxu0 }
 0x229   :  { %9543 = vmatmul.msk.bf16.gmra.mxu3 %vm2098_vm1, %v5278_v49  ;;  %v4981_v59 = vadd.f32 %v4372_v56, %v3627_v60  ;;  %v3630_v8 = vadd.f32 %v3629_v47, %v2653_v44  ;;  %v1303_v47 = vor.u32 %v1301_v42, %v1299_v0 }
 0x22b   :  { %v6647_v2 = vadd.f32 %v6038_v53, %v4981_v59  ;;  %9112 = vmatmul.msk.bf16.gmra.mxu0 %vm2098_vm1, %v11356_v51  ;;  %v7746_v51 = vsel %vm7198_vm15, %v6924_v63, %v7472_v1  ;;  %v5282_v53 = vsel %vm5207_vm2, %v5279_v54, %v5281_v31  ;;  %v11452_v44 = vsel %vm992_vm3, %v1303_v47, %v1307_v38  ;;  %v11462_v1 = vld [vmem:[%s13935_s0 + $0x140] sm:$0xff] }
 0x22c   :  { %v6041_v62 = vpop.f32.mrf.mxu3  ;;  %v1313_v54 = vshll.u32 %v11462_v1, 16 }
 0x22d   :  { %v3631_v4 = vpop.f32.mrf.mxu1  ;;  %v6925_v7 = vadd.f32 %v11136_v30, %v6647_v2  ;;  %9400 = vmatmul.msk.bf16.gmra.mxu2 %vm2098_vm1, %v11404_v48 }
 0x22f   :  { %vm7199_vm0 = vcmp.gt.f32.partialorder %v6925_v7, 0.0  ;;  %v7473_v32 = vmul.f32 0.2, %v6925_v7 }
 0x230   :  { %v4375_v10 = vpop.f32.mrf.mxu2  ;;  %v2655_v6 = vpop.f32.mrf.mxu0 }
 0x231   :  { %v7747_v13 = vsel %vm7199_vm0, %v6925_v7, %v7473_v32  ;;  %v4982_v9 = vadd.f32 %v4375_v10, %v3630_v8  ;;  %v3632_v26 = vadd.f32 %v3631_v4, %v2655_v6 }
 0x232   :  { %v9920_v16 = vpack.c.bf16 %v7747_v13, %v7746_v51  ;;  %v5283_v51 = vrot.slane %v11462_v1, 1 }
 0x233   :  { %v6648_v61 = vadd.f32 %v6041_v62, %v4982_v9  ;;  %v1309_v9 = vshrl.u32 %v11438_v37, 16 }
 0x234   :  { %v6043_v19 = vpop.f32.mrf.mxu3  ;;  %10502 = vst [vmem:[%s13937_s3 + $0xc8] sm:$0xff] %v9920_v16  }
 0x235   :  { %v3634_v15 = vpop.f32.mrf.mxu1  ;;  %v6926_v29 = vadd.f32 %v11136_v30, %v6648_v61  ;;  %v1315_v61 = vrot.slane %v1313_v54, 1 }
 0x237   :  { %v7474_v35 = vmul.f32 0.2, %v6926_v29  ;;  %vm7200_vm4 = vcmp.gt.f32.partialorder %v6926_v29, 0.0 }
 0x238   :  { %9254 = vmatmul.msk.bf16.gmra.mxu1 %vm2098_vm1, %v11342_v24  ;;  %v4377_v21 = vpop.f32.mrf.mxu2  ;;  %v2658_v11 = vpop.f32.mrf.mxu0 }
 0x239   :  { %9544 = vmatmul.msk.bf16.gmra.mxu3 %vm2098_vm1, %v5280_v22  ;;  %v4983_v25 = vadd.f32 %v4377_v21, %v3632_v26  ;;  %v3635_v24 = vadd.f32 %v3634_v15, %v2658_v11  ;;  %v1311_v15 = vor.u32 %v1309_v9, %v1307_v38 }
 0x23b   :  { %v6649_v33 = vadd.f32 %v6043_v19, %v4983_v25  ;;  %9113 = vmatmul.msk.bf16.gmra.mxu0 %vm2098_vm1, %v11380_v17  ;;  %v7748_v17 = vsel %vm7200_vm4, %v6926_v29, %v7474_v35  ;;  %v5284_v19 = vsel %vm5207_vm2, %v5281_v31, %v5283_v51  ;;  %v11476_v11 = vsel %vm992_vm3, %v1311_v15, %v1315_v61 }
 0x23c   :  { %v6046_v28 = vpop.f32.mrf.mxu3 }
 0x23d   :  { %v3636_v55 = vpop.f32.mrf.mxu1  ;;  %v6927_v20 = vadd.f32 %v11136_v30, %v6649_v33  ;;  %9401 = vmatmul.msk.bf16.gmra.mxu2 %vm2098_vm1, %v11428_v14 }
 0x23f   :  { %vm7201_vm5 = vcmp.gt.f32.partialorder %v6927_v20, 0.0  ;;  %v7475_v23 = vmul.f32 0.2, %v6927_v20 }
 0x240   :  { %v4380_v40 = vpop.f32.mrf.mxu2  ;;  %v2660_v27 = vpop.f32.mrf.mxu0 }
 0x241   :  { %v7749_v57 = vsel %vm7201_vm5, %v6927_v20, %v7475_v23  ;;  %v4984_v39 = vadd.f32 %v4380_v40, %v3635_v24  ;;  %v3637_v49 = vadd.f32 %v3636_v55, %v2660_v27 }
 0x242   :  { %v9925_v46 = vpack.c.bf16 %v7749_v57, %v7748_v17 }
 0x243   :  { %v6650_v36 = vadd.f32 %v6046_v28, %v4984_v39  ;;  %v1317_v39 = vshrl.u32 %v11462_v1, 16 }
 0x244   :  { %v6048_v50 = vpop.f32.mrf.mxu3  ;;  %10503 = vst [vmem:[%s13937_s3 + $0xd0] sm:$0xff] %v9925_v46  }
 0x245   :  { %v3639_v43 = vpop.f32.mrf.mxu1  ;;  %v6928_v60 = vadd.f32 %v11136_v30, %v6650_v36 }
 0x247   :  { %v7476_v62 = vmul.f32 0.2, %v6928_v60  ;;  %vm7202_vm6 = vcmp.gt.f32.partialorder %v6928_v60, 0.0 }
 0x248   :  { %9255 = vmatmul.msk.bf16.gmra.mxu1 %vm2098_vm1, %v11366_v5  ;;  %v4382_v52 = vpop.f32.mrf.mxu2  ;;  %v2663_v41 = vpop.f32.mrf.mxu0 }
 0x249   :  { %9545 = vmatmul.msk.bf16.gmra.mxu3 %vm2098_vm1, %v5282_v53  ;;  %v4985_v56 = vadd.f32 %v4382_v52, %v3637_v49  ;;  %v3640_v5 = vadd.f32 %v3639_v43, %v2663_v41  ;;  %v1319_v43 = vor.u32 %v1317_v39, %v1315_v61 }
 0x24b   :  { %v6651_v63 = vadd.f32 %v6048_v50, %v4985_v56  ;;  %9114 = vmatmul.msk.bf16.gmra.mxu0 %vm2098_vm1, %v11404_v48  ;;  %v7750_v48 = vsel %vm7202_vm6, %v6928_v60, %v7476_v62  ;;  %v11515_v62 = vld [vmem:[%s13935_s0 + $0x150] sm:$0xff] }
 0x24c   :  { %v6051_v59 = vpop.f32.mrf.mxu3 }
 0x24d   :  { %v3641_v2 = vpop.f32.mrf.mxu1  ;;  %v6929_v4 = vadd.f32 %v11136_v30, %v6651_v63  ;;  %9402 = vmatmul.msk.bf16.gmra.mxu2 %vm2098_vm1, %v11452_v44 }
 0x24f   :  { %vm7203_vm7 = vcmp.gt.f32.partialorder %v6929_v4, 0.0  ;;  %v7477_v7 = vmul.f32 0.2, %v6929_v4 }
 0x250   :  { %v4385_v8 = vpop.f32.mrf.mxu2  ;;  %v2665_v32 = vpop.f32.mrf.mxu0 }
 0x251   :  { %v7751_v10 = vsel %vm7203_vm7, %v6929_v4, %v7477_v7  ;;  %v4986_v6 = vadd.f32 %v4385_v8, %v3640_v5  ;;  %v3642_v22 = vadd.f32 %v3641_v2, %v2665_v32 }
 0x252   :  { %v9930_v13 = vpack.c.bf16 %v7751_v10, %v7750_v48  ;;  %v5287_v48 = vrot.slane %v11515_v62, 1 }
 0x253   :  { %v6652_v58 = vadd.f32 %v6051_v59, %v4986_v6 }
 0x254   :  { %v6053_v16 = vpop.f32.mrf.mxu3  ;;  %10504 = vst [vmem:[%s13937_s3 + $0xd8] sm:$0xff] %v9930_v13  }
 0x255   :  { %v3644_v12 = vpop.f32.mrf.mxu1  ;;  %v6930_v26 = vadd.f32 %v11136_v30, %v6652_v58  ;;  %v11491_v30 = vld [vmem:[%s13935_s0 + $0x148] sm:$0xff] }
 0x256   :  { %v5285_v17 = vrot.slane %v11491_v30, 1  ;;  %v1321_v31 = vshll.u32 %v11491_v30, 16  ;;  %v1325_v6 = vshrl.u32 %v11491_v30, 16 }
 0x257   :  { %v7478_v28 = vmul.f32 0.2, %v6930_v26  ;;  %vm7204_vm8 = vcmp.gt.f32.partialorder %v6930_v26, 0.0 }
 0x258   :  { %9256 = vmatmul.msk.bf16.gmra.mxu1 %vm2098_vm1, %v11390_v45  ;;  %v4387_v18 = vpop.f32.mrf.mxu2  ;;  %v2668_v0 = vpop.f32.mrf.mxu0  ;;  %v11483_v45 = vld [vmem:[%s13936_s2] ss:$0 sm:$0xff]  ;;  %v5286_v50 = vsel %vm5207_vm2, %v5283_v51, %v5285_v17  ;;  %v1323_v36 = vrot.slane %v1321_v31, 1  ;;  %v1329_v51 = vshll.u32 %v11515_v62, 16 }
 0x259   :  { %9546 = vmatmul.msk.bf16.gmra.mxu3 %vm2098_vm1, %v5284_v19  ;;  %v4987_v21 = vadd.f32 %v4387_v18, %v3642_v22  ;;  %v3645_v35 = vadd.f32 %v3644_v12, %v2668_v0  ;;  %v7752_v23 = vsel %vm7204_vm8, %v6930_v26, %v7478_v28  ;;  %v11539_v28 = vld [vmem:[%s13935_s0 + $0x158] sm:$0xff] }
 0x25a   :  { %v11505_v41 = vsel %vm992_vm3, %v1319_v43, %v1323_v36  ;;  %v1327_v12 = vor.u32 %v1325_v6, %v1323_v36  ;;  %v1331_v58 = vrot.slane %v1329_v51, 1 }
 0x25b   :  { %v6653_v29 = vadd.f32 %v6053_v16, %v4987_v21  ;;  %9115 = vmatmul.msk.bf16.gmra.mxu0 %vm2098_vm1, %v11428_v14  ;;  %v5288_v16 = vsel %vm5207_vm2, %v5285_v17, %v5287_v48  ;;  %v1337_v17 = vshll.u32 %v11539_v28, 16 }
 0x25c   :  { %v6056_v25 = vpop.f32.mrf.mxu3  ;;  %v11529_v0 = vsel %vm992_vm3, %v1327_v12, %v1331_v58 }
 0x25d   :  { %v3646_v33 = vpop.f32.mrf.mxu1  ;;  %v6931_v55 = vadd.f32 %v11483_v45, %v6653_v29  ;;  %9403 = vmatmul.msk.bf16.gmra.mxu2 %vm2098_vm1, %v11476_v11 }
 0x25f   :  { %vm7205_vm9 = vcmp.gt.f32.partialorder %v6931_v55, 0.0  ;;  %v7479_v14 = vmul.f32 0.2, %v6931_v55 }
 0x260   :  { %v4390_v20 = vpop.f32.mrf.mxu2  ;;  %v2670_v24 = vpop.f32.mrf.mxu0 }
 0x261   :  { %v7753_v40 = vsel %vm7205_vm9, %v6931_v55, %v7479_v14  ;;  %v4988_v27 = vadd.f32 %v4390_v20, %v3645_v35  ;;  %v3647_v53 = vadd.f32 %v3646_v33, %v2670_v24 }
 0x262   :  { %v9935_v57 = vpack.c.bf16 %v7753_v40, %v7752_v23  ;;  %v5289_v23 = vrot.slane %v11539_v28, 1 }
 0x263   :  { %v6654_v34 = vadd.f32 %v6056_v25, %v4988_v27  ;;  %v1333_v27 = vshrl.u32 %v11515_v62, 16 }
 0x264   :  { %v6058_v46 = vpop.f32.mrf.mxu3  ;;  %10505 = vst [vmem:[%s13937_s3 + $0xe0] sm:$0xff] %v9935_v57  }
 0x265   :  { %v3649_v42 = vpop.f32.mrf.mxu1  ;;  %v6932_v49 = vadd.f32 %v11483_v45, %v6654_v34  ;;  %v1339_v34 = vrot.slane %v1337_v17, 1 }
 0x267   :  { %v7480_v59 = vmul.f32 0.2, %v6932_v49  ;;  %vm7206_vm10 = vcmp.gt.f32.partialorder %v6932_v49, 0.0 }
 0x268   :  { %9257 = vmatmul.msk.bf16.gmra.mxu1 %vm2098_vm1, %v11414_v3  ;;  %v4392_v47 = vpop.f32.mrf.mxu2  ;;  %v2673_v38 = vpop.f32.mrf.mxu0 }
 0x269   :  { %9547 = vmatmul.msk.bf16.gmra.mxu3 %vm2098_vm1, %v5286_v50  ;;  %v4989_v52 = vadd.f32 %v4392_v47, %v3647_v53  ;;  %v3650_v3 = vadd.f32 %v3649_v42, %v2673_v38  ;;  %v1335_v42 = vor.u32 %v1333_v27, %v1331_v58 }
 0x26b   :  { %v6655_v60 = vadd.f32 %v6058_v46, %v4989_v52  ;;  %9116 = vmatmul.msk.bf16.gmra.mxu0 %vm2098_vm1, %v11452_v44  ;;  %v7754_v44 = vsel %vm7206_vm10, %v6932_v49, %v7480_v59  ;;  %v5290_v46 = vsel %vm5207_vm2, %v5287_v48, %v5289_v23  ;;  %v11553_v38 = vsel %vm992_vm3, %v1335_v42, %v1339_v34  ;;  %v11563_v59 = vld [vmem:[%s13935_s0 + $0x160] sm:$0xff] }
 0x26c   :  { %v6061_v56 = vpop.f32.mrf.mxu3  ;;  %v1345_v48 = vshll.u32 %v11563_v59, 16 }
 0x26d   :  { %v3651_v63 = vpop.f32.mrf.mxu1  ;;  %v6933_v2 = vadd.f32 %v11483_v45, %v6655_v60  ;;  %9404 = vmatmul.msk.bf16.gmra.mxu2 %vm2098_vm1, %v11505_v41 }
 0x26f   :  { %vm7207_vm11 = vcmp.gt.f32.partialorder %v6933_v2, 0.0  ;;  %v7481_v4 = vmul.f32 0.2, %v6933_v2 }
 0x270   :  { %v4395_v5 = vpop.f32.mrf.mxu2  ;;  %v2675_v7 = vpop.f32.mrf.mxu0 }
 0x271   :  { %v7755_v8 = vsel %vm7207_vm11, %v6933_v2, %v7481_v4  ;;  %v4990_v32 = vadd.f32 %v4395_v5, %v3650_v3  ;;  %v3652_v19 = vadd.f32 %v3651_v63, %v2675_v7 }
 0x272   :  { %v9940_v10 = vpack.c.bf16 %v7755_v8, %v7754_v44  ;;  %v5291_v44 = vrot.slane %v11563_v59, 1 }
 0x273   :  { %v6656_v54 = vadd.f32 %v6061_v56, %v4990_v32  ;;  %v1341_v32 = vshrl.u32 %v11539_v28, 16 }
 0x274   :  { %v6063_v13 = vpop.f32.mrf.mxu3  ;;  %10506 = vst [vmem:[%s13937_s3 + $0xe8] sm:$0xff] %v9940_v10  }
 0x275   :  { %v3654_v9 = vpop.f32.mrf.mxu1  ;;  %v6934_v22 = vadd.f32 %v11483_v45, %v6656_v54  ;;  %v1347_v54 = vrot.slane %v1345_v48, 1 }
 0x277   :  { %v7482_v25 = vmul.f32 0.2, %v6934_v22  ;;  %vm7208_vm12 = vcmp.gt.f32.partialorder %v6934_v22, 0.0 }
 0x278   :  { %9258 = vmatmul.msk.bf16.gmra.mxu1 %vm2098_vm1, %v11438_v37  ;;  %v4397_v15 = vpop.f32.mrf.mxu2  ;;  %v2678_v61 = vpop.f32.mrf.mxu0 }
 0x279   :  { %9548 = vmatmul.msk.bf16.gmra.mxu3 %vm2098_vm1, %v5288_v16  ;;  %v4991_v18 = vadd.f32 %v4397_v15, %v3652_v19  ;;  %v3655_v37 = vadd.f32 %v3654_v9, %v2678_v61  ;;  %v1343_v9 = vor.u32 %v1341_v32, %v1339_v34 }
 0x27b   :  { %v6657_v26 = vadd.f32 %v6063_v13, %v4991_v18  ;;  %9117 = vmatmul.msk.bf16.gmra.mxu0 %vm2098_vm1, %v11476_v11  ;;  %v7756_v11 = vsel %vm7208_vm12, %v6934_v22, %v7482_v25  ;;  %v5292_v13 = vsel %vm5207_vm2, %v5289_v23, %v5291_v44  ;;  %v11577_v61 = vsel %vm992_vm3, %v1343_v9, %v1347_v54  ;;  %v11587_v25 = vld [vmem:[%s13935_s0 + $0x168] sm:$0xff] }
 0x27c   :  { %v6066_v21 = vpop.f32.mrf.mxu3  ;;  %v1353_v23 = vshll.u32 %v11587_v25, 16 }
 0x27d   :  { %v3656_v29 = vpop.f32.mrf.mxu1  ;;  %v6935_v33 = vadd.f32 %v11483_v45, %v6657_v26  ;;  %9405 = vmatmul.msk.bf16.gmra.mxu2 %vm2098_vm1, %v11529_v0 }
 0x27f   :  { %vm7209_vm13 = vcmp.gt.f32.partialorder %v6935_v33, 0.0  ;;  %v7483_v55 = vmul.f32 0.2, %v6935_v33 }
 0x280   :  { %v4400_v35 = vpop.f32.mrf.mxu2  ;;  %v2680_v14 = vpop.f32.mrf.mxu0 }
 0x281   :  { %v7757_v20 = vsel %vm7209_vm13, %v6935_v33, %v7483_v55  ;;  %v4992_v24 = vadd.f32 %v4400_v35, %v3655_v37  ;;  %v3657_v50 = vadd.f32 %v3656_v29, %v2680_v14 }
 0x282   :  { %v9945_v40 = vpack.c.bf16 %v7757_v20, %v7756_v11  ;;  %v5293_v11 = vrot.slane %v11587_v25, 1 }
 0x283   :  { %v6658_v31 = vadd.f32 %v6066_v21, %v4992_v24  ;;  %v1349_v24 = vshrl.u32 %v11563_v59, 16 }
 0x284   :  { %v6068_v57 = vpop.f32.mrf.mxu3  ;;  %10507 = vst [vmem:[%s13937_s3 + $0xf0] sm:$0xff] %v9945_v40  }
 0x285   :  { %v3659_v39 = vpop.f32.mrf.mxu1  ;;  %v6936_v53 = vadd.f32 %v11483_v45, %v6658_v31  ;;  %v1355_v31 = vrot.slane %v1353_v23, 1 }
 0x287   :  { %v7484_v56 = vmul.f32 0.2, %v6936_v53  ;;  %vm7210_vm14 = vcmp.gt.f32.partialorder %v6936_v53, 0.0 }
 0x288   :  { %9259 = vmatmul.msk.bf16.gmra.mxu1 %vm2098_vm1, %v11462_v1  ;;  %v4402_v43 = vpop.f32.mrf.mxu2  ;;  %v2683_v36 = vpop.f32.mrf.mxu0 }
 0x289   :  { %9549 = vmatmul.msk.bf16.gmra.mxu3 %vm2098_vm1, %v5290_v46  ;;  %v4993_v47 = vadd.f32 %v4402_v43, %v3657_v50  ;;  %v3660_v1 = vadd.f32 %v3659_v39, %v2683_v36  ;;  %v1351_v39 = vor.u32 %v1349_v24, %v1347_v54 }
 0x28b   :  { %v6659_v49 = vadd.f32 %v6068_v57, %v4993_v47  ;;  %9118 = vmatmul.msk.bf16.gmra.mxu0 %vm2098_vm1, %v11505_v41  ;;  %v7758_v41 = vsel %vm7210_vm14, %v6936_v53, %v7484_v56  ;;  %v5294_v57 = vsel %vm5207_vm2, %v5291_v44, %v5293_v11  ;;  %v11601_v36 = vsel %vm992_vm3, %v1351_v39, %v1355_v31  ;;  %v11611_v56 = vld [vmem:[%s13935_s0 + $0x170] sm:$0xff] }
 0x28c   :  { %v6071_v52 = vpop.f32.mrf.mxu3  ;;  %v1361_v44 = vshll.u32 %v11611_v56, 16 }
 0x28d   :  { %v3661_v60 = vpop.f32.mrf.mxu1  ;;  %v6937_v63 = vadd.f32 %v11483_v45, %v6659_v49  ;;  %9406 = vmatmul.msk.bf16.gmra.mxu2 %vm2098_vm1, %v11553_v38 }
 0x28f   :  { %vm7211_vm15 = vcmp.gt.f32.partialorder %v6937_v63, 0.0  ;;  %v7485_v2 = vmul.f32 0.2, %v6937_v63 }
 0x290   :  { %v4405_v3 = vpop.f32.mrf.mxu2  ;;  %v2685_v4 = vpop.f32.mrf.mxu0 }
 0x291   :  { %v7759_v5 = vsel %vm7211_vm15, %v6937_v63, %v7485_v2  ;;  %v4994_v7 = vadd.f32 %v4405_v3, %v3660_v1  ;;  %v3662_v16 = vadd.f32 %v3661_v60, %v2685_v4 }
 0x292   :  { %v9950_v8 = vpack.c.bf16 %v7759_v5, %v7758_v41  ;;  %v5295_v41 = vrot.slane %v11611_v56, 1 }
 0x293   :  { %v6660_v51 = vadd.f32 %v6071_v52, %v4994_v7  ;;  %v1357_v7 = vshrl.u32 %v11587_v25, 16 }
 0x294   :  { %v6073_v10 = vpop.f32.mrf.mxu3  ;;  %10508 = vst [vmem:[%s13937_s3 + $0xf8] sm:$0xff] %v9950_v8  }
 0x295   :  { %v3664_v6 = vpop.f32.mrf.mxu1  ;;  %v6938_v19 = vadd.f32 %v11483_v45, %v6660_v51  ;;  %v1363_v51 = vrot.slane %v1361_v44, 1 }
 0x297   :  { %v7486_v21 = vmul.f32 0.2, %v6938_v19  ;;  %vm7212_vm0 = vcmp.gt.f32.partialorder %v6938_v19, 0.0 }
 0x298   :  { %9260 = vmatmul.msk.bf16.gmra.mxu1 %vm2098_vm1, %v11491_v30  ;;  %v4407_v12 = vpop.f32.mrf.mxu2  ;;  %v2688_v58 = vpop.f32.mrf.mxu0 }
 0x299   :  { %9550 = vmatmul.msk.bf16.gmra.mxu3 %vm2098_vm1, %v5292_v13  ;;  %v4995_v15 = vadd.f32 %v4407_v12, %v3662_v16  ;;  %v3665_v30 = vadd.f32 %v3664_v6, %v2688_v58  ;;  %v1359_v6 = vor.u32 %v1357_v7, %v1355_v31 }
 0x29b   :  { %v6661_v22 = vadd.f32 %v6073_v10, %v4995_v15  ;;  %9119 = vmatmul.msk.bf16.gmra.mxu0 %vm2098_vm1, %v11529_v0  ;;  %v7760_v0 = vsel %vm7212_vm0, %v6938_v19, %v7486_v21  ;;  %v5296_v10 = vsel %vm5207_vm2, %v5293_v11, %v5295_v41  ;;  %v11625_v58 = vsel %vm992_vm3, %v1359_v6, %v1363_v51  ;;  %v11635_v21 = vld [vmem:[%s13935_s0 + $0x178] sm:$0xff] }
 0x29c   :  { %v6076_v18 = vpop.f32.mrf.mxu3  ;;  %v1369_v11 = vshll.u32 %v11635_v21, 16 }
 0x29d   :  { %v3666_v26 = vpop.f32.mrf.mxu1  ;;  %v6939_v29 = vadd.f32 %v11483_v45, %v6661_v22  ;;  %9407 = vmatmul.msk.bf16.gmra.mxu2 %vm2098_vm1, %v11577_v61 }
 0x29f   :  { %vm7213_vm4 = vcmp.gt.f32.partialorder %v6939_v29, 0.0  ;;  %v7487_v33 = vmul.f32 0.2, %v6939_v29 }
 0x2a0   :  { %v4410_v37 = vpop.f32.mrf.mxu2  ;;  %v2690_v55 = vpop.f32.mrf.mxu0 }
 0x2a1   :  { %v7761_v35 = vsel %vm7213_vm4, %v6939_v29, %v7487_v33  ;;  %v4996_v14 = vadd.f32 %v4410_v37, %v3665_v30  ;;  %v3667_v46 = vadd.f32 %v3666_v26, %v2690_v55 }
 0x2a2   :  { %v9955_v20 = vpack.c.bf16 %v7761_v35, %v7760_v0  ;;  %v5297_v0 = vrot.slane %v11635_v21, 1 }
 0x2a3   :  { %v6662_v17 = vadd.f32 %v6076_v18, %v4996_v14  ;;  %v1365_v14 = vshrl.u32 %v11611_v56, 16 }
 0x2a4   :  { %v6078_v40 = vpop.f32.mrf.mxu3  ;;  %10509 = vst [vmem:[%s13937_s3 + $0x100] sm:$0xff] %v9955_v20  }
 0x2a5   :  { %v3669_v27 = vpop.f32.mrf.mxu1  ;;  %v6940_v50 = vadd.f32 %v11483_v45, %v6662_v17  ;;  %v1371_v17 = vrot.slane %v1369_v11, 1 }
 0x2a7   :  { %v7488_v52 = vmul.f32 0.2, %v6940_v50  ;;  %vm7214_vm5 = vcmp.gt.f32.partialorder %v6940_v50, 0.0 }
 0x2a8   :  { %9261 = vmatmul.msk.bf16.gmra.mxu1 %vm2098_vm1, %v11515_v62  ;;  %v4412_v42 = vpop.f32.mrf.mxu2  ;;  %v2693_v34 = vpop.f32.mrf.mxu0 }
 0x2a9   :  { %9551 = vmatmul.msk.bf16.gmra.mxu3 %vm2098_vm1, %v5294_v57  ;;  %v4997_v43 = vadd.f32 %v4412_v42, %v3667_v46  ;;  %v3670_v62 = vadd.f32 %v3669_v27, %v2693_v34  ;;  %v1367_v27 = vor.u32 %v1365_v14, %v1363_v51 }
 0x2ab   :  { %v6663_v53 = vadd.f32 %v6078_v40, %v4997_v43  ;;  %9120 = vmatmul.msk.bf16.gmra.mxu0 %vm2098_vm1, %v11553_v38  ;;  %v7762_v38 = vsel %vm7214_vm5, %v6940_v50, %v7488_v52  ;;  %v5298_v40 = vsel %vm5207_vm2, %v5295_v41, %v5297_v0  ;;  %v11649_v34 = vsel %vm992_vm3, %v1367_v27, %v1371_v17  ;;  %v11659_v52 = vld [vmem:[%s13935_s0 + $0x180] sm:$0xff] }
 0x2ac   :  { %v6081_v47 = vpop.f32.mrf.mxu3  ;;  %v1377_v41 = vshll.u32 %v11659_v52, 16 }
 0x2ad   :  { %v3671_v49 = vpop.f32.mrf.mxu1  ;;  %v6941_v60 = vadd.f32 %v11483_v45, %v6663_v53  ;;  %9408 = vmatmul.msk.bf16.gmra.mxu2 %vm2098_vm1, %v11601_v36 }
 0x2af   :  { %vm7215_vm6 = vcmp.gt.f32.partialorder %v6941_v60, 0.0  ;;  %v7489_v63 = vmul.f32 0.2, %v6941_v60 }
 0x2b0   :  { %v4415_v1 = vpop.f32.mrf.mxu2  ;;  %v2695_v2 = vpop.f32.mrf.mxu0 }
 0x2b1   :  { %v7763_v3 = vsel %vm7215_vm6, %v6941_v60, %v7489_v63  ;;  %v4998_v4 = vadd.f32 %v4415_v1, %v3670_v62  ;;  %v3672_v13 = vadd.f32 %v3671_v49, %v2695_v2 }
 0x2b2   :  { %v9960_v5 = vpack.c.bf16 %v7763_v3, %v7762_v38  ;;  %v5299_v38 = vrot.slane %v11659_v52, 1 }
 0x2b3   :  { %v6664_v48 = vadd.f32 %v6081_v47, %v4998_v4  ;;  %v1373_v4 = vshrl.u32 %v11635_v21, 16 }
 0x2b4   :  { %v6083_v8 = vpop.f32.mrf.mxu3  ;;  %10510 = vst [vmem:[%s13937_s3 + $0x108] sm:$0xff] %v9960_v5  }
 0x2b5   :  { %v3674_v32 = vpop.f32.mrf.mxu1  ;;  %v6942_v16 = vadd.f32 %v11483_v45, %v6664_v48  ;;  %v1379_v48 = vrot.slane %v1377_v41, 1 }
 0x2b7   :  { %v7490_v18 = vmul.f32 0.2, %v6942_v16  ;;  %vm7216_vm7 = vcmp.gt.f32.partialorder %v6942_v16, 0.0 }
 0x2b8   :  { %9262 = vmatmul.msk.bf16.gmra.mxu1 %vm2098_vm1, %v11539_v28  ;;  %v4417_v9 = vpop.f32.mrf.mxu2  ;;  %v2698_v54 = vpop.f32.mrf.mxu0 }
 0x2b9   :  { %9552 = vmatmul.msk.bf16.gmra.mxu3 %vm2098_vm1, %v5296_v10  ;;  %v4999_v12 = vadd.f32 %v4417_v9, %v3672_v13  ;;  %v3675_v28 = vadd.f32 %v3674_v32, %v2698_v54  ;;  %v1375_v32 = vor.u32 %v1373_v4, %v1371_v17 }
 0x2bb   :  { %v6665_v19 = vadd.f32 %v6083_v8, %v4999_v12  ;;  %9121 = vmatmul.msk.bf16.gmra.mxu0 %vm2098_vm1, %v11577_v61  ;;  %v7764_v61 = vsel %vm7216_vm7, %v6942_v16, %v7490_v18  ;;  %v5300_v8 = vsel %vm5207_vm2, %v5297_v0, %v5299_v38  ;;  %v11673_v54 = vsel %vm992_vm3, %v1375_v32, %v1379_v48  ;;  %v11683_v18 = vld [vmem:[%s13935_s0 + $0x188] sm:$0xff] }
 0x2bc   :  { %v6086_v15 = vpop.f32.mrf.mxu3  ;;  %v1385_v0 = vshll.u32 %v11683_v18, 16 }
 0x2bd   :  { %v3676_v22 = vpop.f32.mrf.mxu1  ;;  %v6943_v26 = vadd.f32 %v11483_v45, %v6665_v19  ;;  %9409 = vmatmul.msk.bf16.gmra.mxu2 %vm2098_vm1, %v11625_v58 }
 0x2bf   :  { %vm7217_vm8 = vcmp.gt.f32.partialorder %v6943_v26, 0.0  ;;  %v7491_v29 = vmul.f32 0.2, %v6943_v26 }
 0x2c0   :  { %v4420_v30 = vpop.f32.mrf.mxu2  ;;  %v2700_v33 = vpop.f32.mrf.mxu0 }
 0x2c1   :  { %v7765_v37 = vsel %vm7217_vm8, %v6943_v26, %v7491_v29  ;;  %v5000_v55 = vadd.f32 %v4420_v30, %v3675_v28  ;;  %v3677_v57 = vadd.f32 %v3676_v22, %v2700_v33 }
 0x2c2   :  { %v9965_v35 = vpack.c.bf16 %v7765_v37, %v7764_v61  ;;  %v5301_v61 = vrot.slane %v11683_v18, 1 }
 0x2c3   :  { %v6666_v23 = vadd.f32 %v6086_v15, %v5000_v55  ;;  %v1381_v55 = vshrl.u32 %v11659_v52, 16 }
 0x2c4   :  { %v6088_v20 = vpop.f32.mrf.mxu3  ;;  %10511 = vst [vmem:[%s13937_s3 + $0x110] sm:$0xff] %v9965_v35  }
 0x2c5   :  { %v3679_v24 = vpop.f32.mrf.mxu1  ;;  %v6944_v46 = vadd.f32 %v11483_v45, %v6666_v23  ;;  %v1387_v23 = vrot.slane %v1385_v0, 1 }
 0x2c7   :  { %v7492_v47 = vmul.f32 0.2, %v6944_v46  ;;  %vm7218_vm9 = vcmp.gt.f32.partialorder %v6944_v46, 0.0 }
 0x2c8   :  { %9263 = vmatmul.msk.bf16.gmra.mxu1 %vm2098_vm1, %v11563_v59  ;;  %v4422_v39 = vpop.f32.mrf.mxu2  ;;  %v2703_v31 = vpop.f32.mrf.mxu0 }
 0x2c9   :  { %9553 = vmatmul.msk.bf16.gmra.mxu3 %vm2098_vm1, %v5298_v40  ;;  %v5001_v42 = vadd.f32 %v4422_v39, %v3677_v57  ;;  %v3680_v59 = vadd.f32 %v3679_v24, %v2703_v31  ;;  %v1383_v24 = vor.u32 %v1381_v55, %v1379_v48 }
 0x2cb   :  { %v6667_v50 = vadd.f32 %v6088_v20, %v5001_v42  ;;  %9122 = vmatmul.msk.bf16.gmra.mxu0 %vm2098_vm1, %v11601_v36  ;;  %v7766_v36 = vsel %vm7218_vm9, %v6944_v46, %v7492_v47  ;;  %v5302_v20 = vsel %vm5207_vm2, %v5299_v38, %v5301_v61  ;;  %v11697_v31 = vsel %vm992_vm3, %v1383_v24, %v1387_v23  ;;  %v11707_v47 = vld [vmem:[%s13935_s0 + $0x190] sm:$0xff] }
 0x2cc   :  { %v6091_v43 = vpop.f32.mrf.mxu3  ;;  %v1393_v38 = vshll.u32 %v11707_v47, 16 }
 0x2cd   :  { %v3681_v53 = vpop.f32.mrf.mxu1  ;;  %v6945_v49 = vadd.f32 %v11483_v45, %v6667_v50  ;;  %9410 = vmatmul.msk.bf16.gmra.mxu2 %vm2098_vm1, %v11649_v34 }
 0x2cf   :  { %vm7219_vm10 = vcmp.gt.f32.partialorder %v6945_v49, 0.0  ;;  %v7493_v60 = vmul.f32 0.2, %v6945_v49 }
 0x2d0   :  { %v4425_v62 = vpop.f32.mrf.mxu2  ;;  %v2705_v63 = vpop.f32.mrf.mxu0 }
 0x2d1   :  { %v7767_v1 = vsel %vm7219_vm10, %v6945_v49, %v7493_v60  ;;  %v5002_v2 = vadd.f32 %v4425_v62, %v3680_v59  ;;  %v3682_v10 = vadd.f32 %v3681_v53, %v2705_v63 }
 0x2d2   :  { %v9970_v3 = vpack.c.bf16 %v7767_v1, %v7766_v36  ;;  %v5303_v36 = vrot.slane %v11707_v47, 1 }
 0x2d3   :  { %v6668_v44 = vadd.f32 %v6091_v43, %v5002_v2  ;;  %v1389_v2 = vshrl.u32 %v11683_v18, 16 }
 0x2d4   :  { %v6093_v5 = vpop.f32.mrf.mxu3  ;;  %10512 = vst [vmem:[%s13937_s3 + $0x118] sm:$0xff] %v9970_v3  }
 0x2d5   :  { %v3684_v7 = vpop.f32.mrf.mxu1  ;;  %v6946_v13 = vadd.f32 %v11483_v45, %v6668_v44  ;;  %v1395_v44 = vrot.slane %v1393_v38, 1 }
 0x2d7   :  { %v7494_v15 = vmul.f32 0.2, %v6946_v13  ;;  %vm7220_vm11 = vcmp.gt.f32.partialorder %v6946_v13, 0.0 }
 0x2d8   :  { %9264 = vmatmul.msk.bf16.gmra.mxu1 %vm2098_vm1, %v11587_v25  ;;  %v4427_v6 = vpop.f32.mrf.mxu2  ;;  %v2708_v51 = vpop.f32.mrf.mxu0 }
 0x2d9   :  { %9554 = vmatmul.msk.bf16.gmra.mxu3 %vm2098_vm1, %v5300_v8  ;;  %v5003_v9 = vadd.f32 %v4427_v6, %v3682_v10  ;;  %v3685_v25 = vadd.f32 %v3684_v7, %v2708_v51  ;;  %v1391_v7 = vor.u32 %v1389_v2, %v1387_v23 }
 0x2db   :  { %v6669_v16 = vadd.f32 %v6093_v5, %v5003_v9  ;;  %9123 = vmatmul.msk.bf16.gmra.mxu0 %vm2098_vm1, %v11625_v58  ;;  %v7768_v58 = vsel %vm7220_vm11, %v6946_v13, %v7494_v15  ;;  %v5304_v5 = vsel %vm5207_vm2, %v5301_v61, %v5303_v36  ;;  %v11721_v51 = vsel %vm992_vm3, %v1391_v7, %v1395_v44  ;;  %v11731_v15 = vld [vmem:[%s13935_s0 + $0x198] sm:$0xff] }
 0x2dc   :  { %v6096_v12 = vpop.f32.mrf.mxu3  ;;  %v1401_v61 = vshll.u32 %v11731_v15, 16 }
 0x2dd   :  { %v3686_v19 = vpop.f32.mrf.mxu1  ;;  %v6947_v22 = vadd.f32 %v11483_v45, %v6669_v16  ;;  %9411 = vmatmul.msk.bf16.gmra.mxu2 %vm2098_vm1, %v11673_v54 }
 0x2df   :  { %vm7221_vm12 = vcmp.gt.f32.partialorder %v6947_v22, 0.0  ;;  %v7495_v26 = vmul.f32 0.2, %v6947_v22 }
 0x2e0   :  { %v4430_v28 = vpop.f32.mrf.mxu2  ;;  %v2710_v29 = vpop.f32.mrf.mxu0 }
 0x2e1   :  { %v7769_v30 = vsel %vm7221_vm12, %v6947_v22, %v7495_v26  ;;  %v5004_v33 = vadd.f32 %v4430_v28, %v3685_v25  ;;  %v3687_v40 = vadd.f32 %v3686_v19, %v2710_v29 }
 0x2e2   :  { %v9975_v37 = vpack.c.bf16 %v7769_v30, %v7768_v58  ;;  %v5305_v58 = vrot.slane %v11731_v15, 1 }
 0x2e3   :  { %v6670_v11 = vadd.f32 %v6096_v12, %v5004_v33  ;;  %v1397_v33 = vshrl.u32 %v11707_v47, 16 }
 0x2e4   :  { %v6098_v35 = vpop.f32.mrf.mxu3  ;;  %10513 = vst [vmem:[%s13937_s3 + $0x120] sm:$0xff] %v9975_v37  }
 0x2e5   :  { %v3689_v14 = vpop.f32.mrf.mxu1  ;;  %v6948_v57 = vadd.f32 %v11483_v45, %v6670_v11  ;;  %v1403_v11 = vrot.slane %v1401_v61, 1 }
 0x2e7   :  { %v7496_v43 = vmul.f32 0.2, %v6948_v57  ;;  %vm7222_vm13 = vcmp.gt.f32.partialorder %v6948_v57, 0.0 }
 0x2e8   :  { %9265 = vmatmul.msk.bf16.gmra.mxu1 %vm2098_vm1, %v11611_v56  ;;  %v4432_v27 = vpop.f32.mrf.mxu2  ;;  %v2713_v17 = vpop.f32.mrf.mxu0 }
 0x2e9   :  { %9555 = vmatmul.msk.bf16.gmra.mxu3 %vm2098_vm1, %v5302_v20  ;;  %v5005_v39 = vadd.f32 %v4432_v27, %v3687_v40  ;;  %v3690_v56 = vadd.f32 %v3689_v14, %v2713_v17  ;;  %v1399_v14 = vor.u32 %v1397_v33, %v1395_v44 }
 0x2eb   :  { %v6671_v46 = vadd.f32 %v6098_v35, %v5005_v39  ;;  %9124 = vmatmul.msk.bf16.gmra.mxu0 %vm2098_vm1, %v11649_v34  ;;  %v7770_v34 = vsel %vm7222_vm13, %v6948_v57, %v7496_v43  ;;  %v5306_v35 = vsel %vm5207_vm2, %v5303_v36, %v5305_v58  ;;  %v11745_v17 = vsel %vm992_vm3, %v1399_v14, %v1403_v11  ;;  %v11755_v43 = vld [vmem:[%s13935_s0 + $0x1a0] sm:$0xff] }
 0x2ec   :  { %v6101_v42 = vpop.f32.mrf.mxu3  ;;  %v1409_v36 = vshll.u32 %v11755_v43, 16 }
 0x2ed   :  { %v3691_v50 = vpop.f32.mrf.mxu1  ;;  %v6949_v53 = vadd.f32 %v11483_v45, %v6671_v46  ;;  %9412 = vmatmul.msk.bf16.gmra.mxu2 %vm2098_vm1, %v11697_v31 }
 0x2ef   :  { %vm7223_vm14 = vcmp.gt.f32.partialorder %v6949_v53, 0.0  ;;  %v7497_v49 = vmul.f32 0.2, %v6949_v53 }
 0x2f0   :  { %v4435_v59 = vpop.f32.mrf.mxu2  ;;  %v2715_v60 = vpop.f32.mrf.mxu0 }
 0x2f1   :  { %v7771_v62 = vsel %vm7223_vm14, %v6949_v53, %v7497_v49  ;;  %v5006_v63 = vadd.f32 %v4435_v59, %v3690_v56  ;;  %v3692_v8 = vadd.f32 %v3691_v50, %v2715_v60 }
 0x2f2   :  { %v9980_v1 = vpack.c.bf16 %v7771_v62, %v7770_v34  ;;  %v5307_v34 = vrot.slane %v11755_v43, 1 }
 0x2f3   :  { %v6672_v41 = vadd.f32 %v6101_v42, %v5006_v63  ;;  %v1405_v63 = vshrl.u32 %v11731_v15, 16 }
 0x2f4   :  { %v6103_v3 = vpop.f32.mrf.mxu3  ;;  %10514 = vst [vmem:[%s13937_s3 + $0x128] sm:$0xff] %v9980_v1  }
 0x2f5   :  { %v3694_v4 = vpop.f32.mrf.mxu1  ;;  %v6950_v10 = vadd.f32 %v11483_v45, %v6672_v41  ;;  %v1411_v41 = vrot.slane %v1409_v36, 1 }
 0x2f7   :  { %v7498_v12 = vmul.f32 0.2, %v6950_v10  ;;  %vm7224_vm15 = vcmp.gt.f32.partialorder %v6950_v10, 0.0 }
 0x2f8   :  { %9266 = vmatmul.msk.bf16.gmra.mxu1 %vm2098_vm1, %v11635_v21  ;;  %v4437_v32 = vpop.f32.mrf.mxu2  ;;  %v2718_v48 = vpop.f32.mrf.mxu0 }
 0x2f9   :  { %9556 = vmatmul.msk.bf16.gmra.mxu3 %vm2098_vm1, %v5304_v5  ;;  %v5007_v6 = vadd.f32 %v4437_v32, %v3692_v8  ;;  %v3695_v21 = vadd.f32 %v3694_v4, %v2718_v48  ;;  %v1407_v4 = vor.u32 %v1405_v63, %v1403_v11 }
 0x2fb   :  { %v6673_v13 = vadd.f32 %v6103_v3, %v5007_v6  ;;  %9125 = vmatmul.msk.bf16.gmra.mxu0 %vm2098_vm1, %v11673_v54  ;;  %v7772_v54 = vsel %vm7224_vm15, %v6950_v10, %v7498_v12  ;;  %v5308_v3 = vsel %vm5207_vm2, %v5305_v58, %v5307_v34  ;;  %v11769_v48 = vsel %vm992_vm3, %v1407_v4, %v1411_v41  ;;  %v11779_v12 = vld [vmem:[%s13935_s0 + $0x1a8] sm:$0xff] }
 0x2fc   :  { %v6106_v9 = vpop.f32.mrf.mxu3  ;;  %v1417_v58 = vshll.u32 %v11779_v12, 16 }
 0x2fd   :  { %v3696_v16 = vpop.f32.mrf.mxu1  ;;  %v6951_v19 = vadd.f32 %v11483_v45, %v6673_v13  ;;  %9413 = vmatmul.msk.bf16.gmra.mxu2 %vm2098_vm1, %v11721_v51 }
 0x2ff   :  { %vm7225_vm0 = vcmp.gt.f32.partialorder %v6951_v19, 0.0  ;;  %v7499_v22 = vmul.f32 0.2, %v6951_v19 }
 0x300   :  { %v4440_v25 = vpop.f32.mrf.mxu2  ;;  %v2720_v26 = vpop.f32.mrf.mxu0 }
 0x301   :  { %v7773_v28 = vsel %vm7225_vm0, %v6951_v19, %v7499_v22  ;;  %v5008_v29 = vadd.f32 %v4440_v25, %v3695_v21  ;;  %v3697_v20 = vadd.f32 %v3696_v16, %v2720_v26 }
 0x302   :  { %v9985_v30 = vpack.c.bf16 %v7773_v28, %v7772_v54  ;;  %v5309_v54 = vrot.slane %v11779_v12, 1 }
 0x303   :  { %v6674_v0 = vadd.f32 %v6106_v9, %v5008_v29  ;;  %v1413_v29 = vshrl.u32 %v11755_v43, 16 }
 0x304   :  { %v6108_v37 = vpop.f32.mrf.mxu3  ;;  %10515 = vst [vmem:[%s13937_s3 + $0x130] sm:$0xff] %v9985_v30  }
 0x305   :  { %v3699_v55 = vpop.f32.mrf.mxu1  ;;  %v6952_v40 = vadd.f32 %v11483_v45, %v6674_v0  ;;  %v1419_v0 = vrot.slane %v1417_v58, 1 }
 0x307   :  { %v7500_v42 = vmul.f32 0.2, %v6952_v40  ;;  %vm7226_vm4 = vcmp.gt.f32.partialorder %v6952_v40, 0.0 }
 0x308   :  { %9267 = vmatmul.msk.bf16.gmra.mxu1 %vm2098_vm1, %v11659_v52  ;;  %v4442_v24 = vpop.f32.mrf.mxu2  ;;  %v2723_v23 = vpop.f32.mrf.mxu0 }
 0x309   :  { %9557 = vmatmul.msk.bf16.gmra.mxu3 %vm2098_vm1, %v5306_v35  ;;  %v5009_v27 = vadd.f32 %v4442_v24, %v3697_v20  ;;  %v3700_v52 = vadd.f32 %v3699_v55, %v2723_v23  ;;  %v1415_v55 = vor.u32 %v1413_v29, %v1411_v41 }
 0x30b   :  { %v6675_v57 = vadd.f32 %v6108_v37, %v5009_v27  ;;  %9126 = vmatmul.msk.bf16.gmra.mxu0 %vm2098_vm1, %v11697_v31  ;;  %v7774_v31 = vsel %vm7226_vm4, %v6952_v40, %v7500_v42  ;;  %v5310_v37 = vsel %vm5207_vm2, %v5307_v34, %v5309_v54  ;;  %v11793_v23 = vsel %vm992_vm3, %v1415_v55, %v1419_v0  ;;  %v11803_v42 = vld [vmem:[%s13935_s0 + $0x1b0] sm:$0xff] }
 0x30c   :  { %v6111_v39 = vpop.f32.mrf.mxu3  ;;  %v1425_v34 = vshll.u32 %v11803_v42, 16 }
 0x30d   :  { %v3701_v46 = vpop.f32.mrf.mxu1  ;;  %v6953_v50 = vadd.f32 %v11483_v45, %v6675_v57  ;;  %9414 = vmatmul.msk.bf16.gmra.mxu2 %vm2098_vm1, %v11745_v17 }
 0x30f   :  { %vm7227_vm5 = vcmp.gt.f32.partialorder %v6953_v50, 0.0  ;;  %v7501_v53 = vmul.f32 0.2, %v6953_v50 }
 0x310   :  { %v4445_v56 = vpop.f32.mrf.mxu2  ;;  %v2725_v49 = vpop.f32.mrf.mxu0 }
 0x311   :  { %v7775_v59 = vsel %vm7227_vm5, %v6953_v50, %v7501_v53  ;;  %v5010_v60 = vadd.f32 %v4445_v56, %v3700_v52  ;;  %v3702_v5 = vadd.f32 %v3701_v46, %v2725_v49 }
 0x312   :  { %v9990_v62 = vpack.c.bf16 %v7775_v59, %v7774_v31  ;;  %v5311_v31 = vrot.slane %v11803_v42, 1 }
 0x313   :  { %v6676_v38 = vadd.f32 %v6111_v39, %v5010_v60  ;;  %v1421_v60 = vshrl.u32 %v11779_v12, 16 }
 0x314   :  { %v6113_v1 = vpop.f32.mrf.mxu3  ;;  %10516 = vst [vmem:[%s13937_s3 + $0x138] sm:$0xff] %v9990_v62  }
 0x315   :  { %v3704_v2 = vpop.f32.mrf.mxu1  ;;  %v6954_v8 = vadd.f32 %v11483_v45, %v6676_v38  ;;  %v1427_v38 = vrot.slane %v1425_v34, 1 }
 0x317   :  { %v7502_v9 = vmul.f32 0.2, %v6954_v8  ;;  %vm7228_vm6 = vcmp.gt.f32.partialorder %v6954_v8, 0.0 }
 0x318   :  { %9268 = vmatmul.msk.bf16.gmra.mxu1 %vm2098_vm1, %v11683_v18  ;;  %v4447_v7 = vpop.f32.mrf.mxu2  ;;  %v2728_v44 = vpop.f32.mrf.mxu0 }
 0x319   :  { %9558 = vmatmul.msk.bf16.gmra.mxu3 %vm2098_vm1, %v5308_v3  ;;  %v5011_v32 = vadd.f32 %v4447_v7, %v3702_v5  ;;  %v3705_v18 = vadd.f32 %v3704_v2, %v2728_v44  ;;  %v1423_v2 = vor.u32 %v1421_v60, %v1419_v0  ;;  %v11842_v0 = vld [vmem:[%s13936_s2] ss:$0 sm:$0xff] }
 0x31b   :  { %v6677_v10 = vadd.f32 %v6113_v1, %v5011_v32  ;;  %9127 = vmatmul.msk.bf16.gmra.mxu0 %vm2098_vm1, %v11721_v51  ;;  %v7776_v51 = vsel %vm7228_vm6, %v6954_v8, %v7502_v9  ;;  %v5312_v1 = vsel %vm5207_vm2, %v5309_v54, %v5311_v31  ;;  %v11817_v44 = vsel %vm992_vm3, %v1423_v2, %v1427_v38  ;;  %v11827_v9 = vld [vmem:[%s13935_s0 + $0x1b8] sm:$0xff] }
 0x31c   :  { %v6116_v6 = vpop.f32.mrf.mxu3 }
 0x31d   :  { %v3706_v13 = vpop.f32.mrf.mxu1  ;;  %v6955_v16 = vadd.f32 %v11483_v45, %v6677_v10  ;;  %9415 = vmatmul.msk.bf16.gmra.mxu2 %vm2098_vm1, %v11769_v48 }
 0x31f   :  { %vm7229_vm7 = vcmp.gt.f32.partialorder %v6955_v16, 0.0  ;;  %v7503_v19 = vmul.f32 0.2, %v6955_v16 }
 0x320   :  { %v4450_v21 = vpop.f32.mrf.mxu2  ;;  %v2730_v22 = vpop.f32.mrf.mxu0 }
 0x321   :  { %v7777_v25 = vsel %vm7229_vm7, %v6955_v16, %v7503_v19  ;;  %v5012_v26 = vadd.f32 %v4450_v21, %v3705_v18  ;;  %v3707_v35 = vadd.f32 %v3706_v13, %v2730_v22 }
 0x322   :  { %v9995_v28 = vpack.c.bf16 %v7777_v25, %v7776_v51  ;;  %v5313_v51 = vrot.slane %v11827_v9, 1  ;;  %v1429_v25 = vshrl.u32 %v11803_v42, 16 }
 0x323   :  { %v6678_v61 = vadd.f32 %v6116_v6, %v5012_v26  ;;  %v1433_v26 = vshll.u32 %v11827_v9, 16 }
 0x324   :  { %v6118_v30 = vpop.f32.mrf.mxu3  ;;  %10517 = vst [vmem:[%s13937_s3 + $0x140] sm:$0xff] %v9995_v28   ;;  %v5314_v58 = vsel %vm5207_vm2, %v5311_v31, %v5313_v51 }
 0x325   :  { %v3709_v33 = vpop.f32.mrf.mxu1  ;;  %v6956_v20 = vadd.f32 %v11483_v45, %v6678_v61 }
 0x327   :  { %v7504_v39 = vmul.f32 0.2, %v6956_v20  ;;  %vm7230_vm8 = vcmp.gt.f32.partialorder %v6956_v20, 0.0 }
 0x328   :  { %9269 = vmatmul.msk.bf16.gmra.mxu1 %vm2098_vm1, %v11707_v47  ;;  %v4452_v14 = vpop.f32.mrf.mxu2  ;;  %v2733_v11 = vpop.f32.mrf.mxu0 }
 0x329   :  { %9559 = vmatmul.msk.bf16.gmra.mxu3 %vm2098_vm1, %v5310_v37  ;;  %v5013_v24 = vadd.f32 %v4452_v14, %v3707_v35  ;;  %v3710_v47 = vadd.f32 %v3709_v33, %v2733_v11  ;;  %v1435_v33 = vrot.slane %v1433_v26, 1 }
 0x32b   :  { %v6679_v40 = vadd.f32 %v6118_v30, %v5013_v24  ;;  %9128 = vmatmul.msk.bf16.gmra.mxu0 %vm2098_vm1, %v11745_v17  ;;  %v7778_v17 = vsel %vm7230_vm8, %v6956_v20, %v7504_v39  ;;  %v1431_v30 = vor.u32 %v1429_v25, %v1427_v38  ;;  %v11856_v39 = vld [vmem:[%s13935_s0 + $0x1c0] sm:$0xff] }
 0x32c   :  { %v6121_v27 = vpop.f32.mrf.mxu3  ;;  %v1441_v31 = vshll.u32 %v11856_v39, 16 }
 0x32d   :  { %v3711_v57 = vpop.f32.mrf.mxu1  ;;  %v6957_v46 = vadd.f32 %v11483_v45, %v6679_v40  ;;  %9416 = vmatmul.msk.bf16.gmra.mxu2 %vm2098_vm1, %v11793_v23  ;;  %v11846_v11 = vsel %vm992_vm3, %v1431_v30, %v1435_v33 }
 0x32f   :  { %vm7231_vm9 = vcmp.gt.f32.partialorder %v6957_v46, 0.0  ;;  %v7505_v50 = vmul.f32 0.2, %v6957_v46 }
 0x330   :  { %v4455_v52 = vpop.f32.mrf.mxu2  ;;  %v2735_v53 = vpop.f32.mrf.mxu0 }
 0x331   :  { %v7779_v56 = vsel %vm7231_vm9, %v6957_v46, %v7505_v50  ;;  %v5014_v49 = vadd.f32 %v4455_v52, %v3710_v47  ;;  %v3712_v3 = vadd.f32 %v3711_v57, %v2735_v53 }
 0x332   :  { %v10000_v59 = vpack.c.bf16 %v7779_v56, %v7778_v17  ;;  %v5315_v17 = vrot.slane %v11856_v39, 1 }
 0x333   :  { %v6680_v36 = vadd.f32 %v6121_v27, %v5014_v49  ;;  %v1437_v49 = vshrl.u32 %v11827_v9, 16 }
 0x334   :  { %v6123_v62 = vpop.f32.mrf.mxu3  ;;  %10518 = vst [vmem:[%s13937_s3 + $0x148] sm:$0xff] %v10000_v59  }
 0x335   :  { %v3714_v63 = vpop.f32.mrf.mxu1  ;;  %v6958_v5 = vadd.f32 %v11483_v45, %v6680_v36  ;;  %v1443_v36 = vrot.slane %v1441_v31, 1 }
 0x337   :  { %v7506_v6 = vmul.f32 0.2, %v6958_v5  ;;  %vm7232_vm10 = vcmp.gt.f32.partialorder %v6958_v5, 0.0 }
 0x338   :  { %9270 = vmatmul.msk.bf16.gmra.mxu1 %vm2098_vm1, %v11731_v15  ;;  %v4457_v4 = vpop.f32.mrf.mxu2  ;;  %v2738_v41 = vpop.f32.mrf.mxu0 }
 0x339   :  { %9560 = vmatmul.msk.bf16.gmra.mxu3 %vm2098_vm1, %v5312_v1  ;;  %v5015_v7 = vadd.f32 %v4457_v4, %v3712_v3  ;;  %v3715_v15 = vadd.f32 %v3714_v63, %v2738_v41  ;;  %v1439_v63 = vor.u32 %v1437_v49, %v1435_v33 }
 0x33b   :  { %v6681_v8 = vadd.f32 %v6123_v62, %v5015_v7  ;;  %9129 = vmatmul.msk.bf16.gmra.mxu0 %vm2098_vm1, %v11769_v48  ;;  %v7780_v48 = vsel %vm7232_vm10, %v6958_v5, %v7506_v6  ;;  %v5316_v62 = vsel %vm5207_vm2, %v5313_v51, %v5315_v17  ;;  %v11870_v41 = vsel %vm992_vm3, %v1439_v63, %v1443_v36  ;;  %v11880_v6 = vld [vmem:[%s13935_s0 + $0x1c8] sm:$0xff] }
 0x33c   :  { %v6126_v32 = vpop.f32.mrf.mxu3  ;;  %v1449_v51 = vshll.u32 %v11880_v6, 16 }
 0x33d   :  { %v3716_v10 = vpop.f32.mrf.mxu1  ;;  %v6959_v13 = vadd.f32 %v11483_v45, %v6681_v8  ;;  %9417 = vmatmul.msk.bf16.gmra.mxu2 %vm2098_vm1, %v11817_v44 }
 0x33f   :  { %vm7233_vm11 = vcmp.gt.f32.partialorder %v6959_v13, 0.0  ;;  %v7507_v16 = vmul.f32 0.2, %v6959_v13 }
 0x340   :  { %v4460_v18 = vpop.f32.mrf.mxu2  ;;  %v2740_v19 = vpop.f32.mrf.mxu0 }
 0x341   :  { %v7781_v21 = vsel %vm7233_vm11, %v6959_v13, %v7507_v16  ;;  %v5016_v22 = vadd.f32 %v4460_v18, %v3715_v15  ;;  %v3717_v61 = vadd.f32 %v3716_v10, %v2740_v19 }
 0x342   :  { %v10005_v45 = vpack.c.bf16 %v7781_v21, %v7780_v48  ;;  %v5317_v48 = vrot.slane %v11880_v6, 1 }
 0x343   :  { %v6682_v29 = vadd.f32 %v6126_v32, %v5016_v22  ;;  %v1445_v22 = vshrl.u32 %v11856_v39, 16 }
 0x344   :  { %v6128_v54 = vpop.f32.mrf.mxu3  ;;  %10519 = vst [vmem:[%s13937_s3 + $0x150] sm:$0xff] %v10005_v45  }
 0x345   :  { %v3719_v28 = vpop.f32.mrf.mxu1  ;;  %v6960_v35 = vadd.f32 %v11842_v0, %v6682_v29  ;;  %v1451_v29 = vrot.slane %v1449_v51, 1 }
 0x347   :  { %v7508_v40 = vmul.f32 0.2, %v6960_v35  ;;  %vm7234_vm12 = vcmp.gt.f32.partialorder %v6960_v35, 0.0 }
 0x348   :  { %9271 = vmatmul.msk.bf16.gmra.mxu1 %vm2098_vm1, %v11755_v43  ;;  %v4462_v37 = vpop.f32.mrf.mxu2  ;;  %v2743_v55 = vpop.f32.mrf.mxu0 }
 0x349   :  { %9561 = vmatmul.msk.bf16.gmra.mxu3 %vm2098_vm1, %v5314_v58  ;;  %v5017_v14 = vadd.f32 %v4462_v37, %v3717_v61  ;;  %v3720_v57 = vadd.f32 %v3719_v28, %v2743_v55  ;;  %v1447_v28 = vor.u32 %v1445_v22, %v1443_v36 }
 0x34b   :  { %v6683_v20 = vadd.f32 %v6128_v54, %v5017_v14  ;;  %9130 = vmatmul.msk.bf16.gmra.mxu0 %vm2098_vm1, %v11793_v23  ;;  %v7782_v23 = vsel %vm7234_vm12, %v6960_v35, %v7508_v40  ;;  %v5318_v54 = vsel %vm5207_vm2, %v5315_v17, %v5317_v48  ;;  %v11894_v55 = vsel %vm992_vm3, %v1447_v28, %v1451_v29  ;;  %v11904_v40 = vld [vmem:[%s13935_s0 + $0x1d0] sm:$0xff] }
 0x34c   :  { %v6131_v43 = vpop.f32.mrf.mxu3  ;;  %v1457_v17 = vshll.u32 %v11904_v40, 16 }
 0x34d   :  { %v3721_v24 = vpop.f32.mrf.mxu1  ;;  %v6961_v27 = vadd.f32 %v11842_v0, %v6683_v20  ;;  %9418 = vmatmul.msk.bf16.gmra.mxu2 %vm2098_vm1, %v11846_v11 }
 0x34f   :  { %vm7235_vm13 = vcmp.gt.f32.partialorder %v6961_v27, 0.0  ;;  %v7509_v46 = vmul.f32 0.2, %v6961_v27 }
 0x350   :  { %v4465_v47 = vpop.f32.mrf.mxu2  ;;  %v2745_v50 = vpop.f32.mrf.mxu0 }
 0x351   :  { %v7783_v52 = vsel %vm7235_vm13, %v6961_v27, %v7509_v46  ;;  %v5018_v53 = vadd.f32 %v4465_v47, %v3720_v57  ;;  %v3722_v1 = vadd.f32 %v3721_v24, %v2745_v50 }
 0x352   :  { %v10010_v56 = vpack.c.bf16 %v7783_v52, %v7782_v23  ;;  %v5319_v23 = vrot.slane %v11904_v40, 1 }
 0x353   :  { %v6684_v34 = vadd.f32 %v6131_v43, %v5018_v53  ;;  %v1453_v53 = vshrl.u32 %v11880_v6, 16 }
 0x354   :  { %v6133_v59 = vpop.f32.mrf.mxu3  ;;  %10520 = vst [vmem:[%s13937_s3 + $0x158] sm:$0xff] %v10010_v56  }
 0x355   :  { %v3724_v60 = vpop.f32.mrf.mxu1  ;;  %v6962_v3 = vadd.f32 %v11842_v0, %v6684_v34  ;;  %v1459_v34 = vrot.slane %v1457_v17, 1 }
 0x357   :  { %v7510_v32 = vmul.f32 0.2, %v6962_v3  ;;  %vm7236_vm14 = vcmp.gt.f32.partialorder %v6962_v3, 0.0 }
 0x358   :  { %9272 = vmatmul.msk.bf16.gmra.mxu1 %vm2098_vm1, %v11779_v12  ;;  %v4467_v2 = vpop.f32.mrf.mxu2  ;;  %v2748_v38 = vpop.f32.mrf.mxu0 }
 0x359   :  { %9562 = vmatmul.msk.bf16.gmra.mxu3 %vm2098_vm1, %v5316_v62  ;;  %v5019_v4 = vadd.f32 %v4467_v2, %v3722_v1  ;;  %v3725_v12 = vadd.f32 %v3724_v60, %v2748_v38  ;;  %v1455_v60 = vor.u32 %v1453_v53, %v1451_v29 }
 0x35b   :  { %v6685_v5 = vadd.f32 %v6133_v59, %v5019_v4  ;;  %9131 = vmatmul.msk.bf16.gmra.mxu0 %vm2098_vm1, %v11817_v44  ;;  %v7784_v44 = vsel %vm7236_vm14, %v6962_v3, %v7510_v32  ;;  %v5320_v59 = vsel %vm5207_vm2, %v5317_v48, %v5319_v23  ;;  %v11918_v38 = vsel %vm992_vm3, %v1455_v60, %v1459_v34  ;;  %v11928_v32 = vld [vmem:[%s13935_s0 + $0x1d8] sm:$0xff] }
 0x35c   :  { %v6136_v7 = vpop.f32.mrf.mxu3  ;;  %v1465_v48 = vshll.u32 %v11928_v32, 16 }
 0x35d   :  { %v3726_v8 = vpop.f32.mrf.mxu1  ;;  %v6963_v10 = vadd.f32 %v11842_v0, %v6685_v5  ;;  %9419 = vmatmul.msk.bf16.gmra.mxu2 %vm2098_vm1, %v11870_v41 }
 0x35f   :  { %vm7237_vm15 = vcmp.gt.f32.partialorder %v6963_v10, 0.0  ;;  %v7511_v13 = vmul.f32 0.2, %v6963_v10 }
 0x360   :  { %v4470_v15 = vpop.f32.mrf.mxu2  ;;  %v2750_v16 = vpop.f32.mrf.mxu0 }
 0x361   :  { %v7785_v18 = vsel %vm7237_vm15, %v6963_v10, %v7511_v13  ;;  %v5020_v19 = vadd.f32 %v4470_v15, %v3725_v12  ;;  %v3727_v58 = vadd.f32 %v3726_v8, %v2750_v16 }
 0x362   :  { %v10015_v21 = vpack.c.bf16 %v7785_v18, %v7784_v44  ;;  %v5321_v44 = vrot.slane %v11928_v32, 1 }
 0x363   :  { %v6686_v26 = vadd.f32 %v6136_v7, %v5020_v19  ;;  %v1461_v19 = vshrl.u32 %v11904_v40, 16 }
 0x364   :  { %v6138_v45 = vpop.f32.mrf.mxu3  ;;  %10521 = vst [vmem:[%s13937_s3 + $0x160] sm:$0xff] %v10015_v21  }
 0x365   :  { %v3729_v25 = vpop.f32.mrf.mxu1  ;;  %v6964_v61 = vadd.f32 %v11842_v0, %v6686_v26  ;;  %v1467_v26 = vrot.slane %v1465_v48, 1 }
 0x367   :  { %v7512_v43 = vmul.f32 0.2, %v6964_v61  ;;  %vm7238_vm0 = vcmp.gt.f32.partialorder %v6964_v61, 0.0 }
 0x368   :  { %9273 = vmatmul.msk.bf16.gmra.mxu1 %vm2098_vm1, %v11803_v42  ;;  %v4472_v30 = vpop.f32.mrf.mxu2  ;;  %v2753_v33 = vpop.f32.mrf.mxu0 }
 0x369   :  { %9563 = vmatmul.msk.bf16.gmra.mxu3 %vm2098_vm1, %v5318_v54  ;;  %v5021_v37 = vadd.f32 %v4472_v30, %v3727_v58  ;;  %v3730_v42 = vadd.f32 %v3729_v25, %v2753_v33  ;;  %v1463_v25 = vor.u32 %v1461_v19, %v1459_v34 }
 0x36b   :  { %v6687_v35 = vadd.f32 %v6138_v45, %v5021_v37  ;;  %9132 = vmatmul.msk.bf16.gmra.mxu0 %vm2098_vm1, %v11846_v11  ;;  %v7786_v11 = vsel %vm7238_vm0, %v6964_v61, %v7512_v43  ;;  %v5322_v45 = vsel %vm5207_vm2, %v5319_v23, %v5321_v44  ;;  %v11942_v33 = vsel %vm992_vm3, %v1463_v25, %v1467_v26  ;;  %v11952_v43 = vld [vmem:[%s13935_s0 + $0x1e0] sm:$0xff] }
 0x36c   :  { %v6141_v14 = vpop.f32.mrf.mxu3  ;;  %v1473_v23 = vshll.u32 %v11952_v43, 16 }
 0x36d   :  { %v3731_v20 = vpop.f32.mrf.mxu1  ;;  %v6965_v24 = vadd.f32 %v11842_v0, %v6687_v35  ;;  %9420 = vmatmul.msk.bf16.gmra.mxu2 %vm2098_vm1, %v11894_v55 }
 0x36f   :  { %vm7239_vm4 = vcmp.gt.f32.partialorder %v6965_v24, 0.0  ;;  %v7513_v27 = vmul.f32 0.2, %v6965_v24 }
 0x370   :  { %v4475_v57 = vpop.f32.mrf.mxu2  ;;  %v2755_v46 = vpop.f32.mrf.mxu0 }
 0x371   :  { %v7787_v47 = vsel %vm7239_vm4, %v6965_v24, %v7513_v27  ;;  %v5022_v50 = vadd.f32 %v4475_v57, %v3730_v42  ;;  %v3732_v62 = vadd.f32 %v3731_v20, %v2755_v46 }
 0x372   :  { %v10020_v52 = vpack.c.bf16 %v7787_v47, %v7786_v11  ;;  %v5323_v11 = vrot.slane %v11952_v43, 1 }
 0x373   :  { %v6688_v31 = vadd.f32 %v6141_v14, %v5022_v50  ;;  %v1469_v50 = vshrl.u32 %v11928_v32, 16 }
 0x374   :  { %v6143_v56 = vpop.f32.mrf.mxu3  ;;  %10522 = vst [vmem:[%s13937_s3 + $0x168] sm:$0xff] %v10020_v52  }
 0x375   :  { %v3734_v49 = vpop.f32.mrf.mxu1  ;;  %v6966_v1 = vadd.f32 %v11842_v0, %v6688_v31  ;;  %v1475_v31 = vrot.slane %v1473_v23, 1 }
 0x377   :  { %v7514_v7 = vmul.f32 0.2, %v6966_v1  ;;  %vm7240_vm5 = vcmp.gt.f32.partialorder %v6966_v1, 0.0 }
 0x378   :  { %9274 = vmatmul.msk.bf16.gmra.mxu1 %vm2098_vm1, %v11827_v9  ;;  %v4477_v63 = vpop.f32.mrf.mxu2  ;;  %v2758_v36 = vpop.f32.mrf.mxu0 }
 0x379   :  { %9564 = vmatmul.msk.bf16.gmra.mxu3 %vm2098_vm1, %v5320_v59  ;;  %v5023_v2 = vadd.f32 %v4477_v63, %v3732_v62  ;;  %v3735_v9 = vadd.f32 %v3734_v49, %v2758_v36  ;;  %v1471_v49 = vor.u32 %v1469_v50, %v1467_v26 }
 0x37b   :  { %v6689_v3 = vadd.f32 %v6143_v56, %v5023_v2  ;;  %9133 = vmatmul.msk.bf16.gmra.mxu0 %vm2098_vm1, %v11870_v41  ;;  %v7788_v41 = vsel %vm7240_vm5, %v6966_v1, %v7514_v7  ;;  %v5324_v56 = vsel %vm5207_vm2, %v5321_v44, %v5323_v11  ;;  %v11966_v36 = vsel %vm992_vm3, %v1471_v49, %v1475_v31  ;;  %v11976_v7 = vld [vmem:[%s13935_s0 + $0x1e8] sm:$0xff] }
 0x37c   :  { %v6146_v4 = vpop.f32.mrf.mxu3  ;;  %v1481_v44 = vshll.u32 %v11976_v7, 16 }
 0x37d   :  { %v3736_v5 = vpop.f32.mrf.mxu1  ;;  %v6967_v8 = vadd.f32 %v11842_v0, %v6689_v3  ;;  %9421 = vmatmul.msk.bf16.gmra.mxu2 %vm2098_vm1, %v11918_v38 }
 0x37f   :  { %vm7241_vm6 = vcmp.gt.f32.partialorder %v6967_v8, 0.0  ;;  %v7515_v10 = vmul.f32 0.2, %v6967_v8 }
 0x380   :  { %v4480_v12 = vpop.f32.mrf.mxu2  ;;  %v2760_v13 = vpop.f32.mrf.mxu0 }
 0x381   :  { %v7789_v15 = vsel %vm7241_vm6, %v6967_v8, %v7515_v10  ;;  %v5024_v16 = vadd.f32 %v4480_v12, %v3735_v9  ;;  %v3737_v54 = vadd.f32 %v3736_v5, %v2760_v13 }
 0x382   :  { %v10025_v18 = vpack.c.bf16 %v7789_v15, %v7788_v41  ;;  %v5325_v41 = vrot.slane %v11976_v7, 1 }
 0x383   :  { %v6690_v51 = vadd.f32 %v6146_v4, %v5024_v16  ;;  %v1477_v16 = vshrl.u32 %v11952_v43, 16 }
 0x384   :  { %v6148_v21 = vpop.f32.mrf.mxu3  ;;  %10523 = vst [vmem:[%s13937_s3 + $0x170] sm:$0xff] %v10025_v18  }
 0x385   :  { %v3739_v22 = vpop.f32.mrf.mxu1  ;;  %v6968_v58 = vadd.f32 %v11842_v0, %v6690_v51  ;;  %v1483_v51 = vrot.slane %v1481_v44, 1 }
 0x387   :  { %v7516_v14 = vmul.f32 0.2, %v6968_v58  ;;  %vm7242_vm7 = vcmp.gt.f32.partialorder %v6968_v58, 0.0 }
 0x388   :  { %9275 = vmatmul.msk.bf16.gmra.mxu1 %vm2098_vm1, %v11856_v39  ;;  %v4482_v28 = vpop.f32.mrf.mxu2  ;;  %v2763_v29 = vpop.f32.mrf.mxu0 }
 0x389   :  { %9565 = vmatmul.msk.bf16.gmra.mxu3 %vm2098_vm1, %v5322_v45  ;;  %v5025_v30 = vadd.f32 %v4482_v28, %v3737_v54  ;;  %v3740_v39 = vadd.f32 %v3739_v22, %v2763_v29  ;;  %v1479_v22 = vor.u32 %v1477_v16, %v1475_v31 }
 0x38b   :  { %v6691_v61 = vadd.f32 %v6148_v21, %v5025_v30  ;;  %9134 = vmatmul.msk.bf16.gmra.mxu0 %vm2098_vm1, %v11894_v55  ;;  %v7790_v55 = vsel %vm7242_vm7, %v6968_v58, %v7516_v14  ;;  %v5326_v21 = vsel %vm5207_vm2, %v5323_v11, %v5325_v41  ;;  %v11990_v29 = vsel %vm992_vm3, %v1479_v22, %v1483_v51  ;;  %v12000_v14 = vld [vmem:[%s13935_s0 + $0x1f0] sm:$0xff] }
 0x38c   :  { %v6151_v37 = vpop.f32.mrf.mxu3  ;;  %v1489_v11 = vshll.u32 %v12000_v14, 16 }
 0x38d   :  { %v3741_v35 = vpop.f32.mrf.mxu1  ;;  %v6969_v20 = vadd.f32 %v11842_v0, %v6691_v61  ;;  %9422 = vmatmul.msk.bf16.gmra.mxu2 %vm2098_vm1, %v11942_v33 }
 0x38f   :  { %vm7243_vm8 = vcmp.gt.f32.partialorder %v6969_v20, 0.0  ;;  %v7517_v24 = vmul.f32 0.2, %v6969_v20 }
 0x390   :  { %v4485_v42 = vpop.f32.mrf.mxu2  ;;  %v2765_v27 = vpop.f32.mrf.mxu0 }
 0x391   :  { %v7791_v57 = vsel %vm7243_vm8, %v6969_v20, %v7517_v24  ;;  %v5026_v46 = vadd.f32 %v4485_v42, %v3740_v39  ;;  %v3742_v59 = vadd.f32 %v3741_v35, %v2765_v27 }
 0x392   :  { %v10030_v47 = vpack.c.bf16 %v7791_v57, %v7790_v55  ;;  %v5327_v55 = vrot.slane %v12000_v14, 1 }
 0x393   :  { %v6692_v17 = vadd.f32 %v6151_v37, %v5026_v46  ;;  %v1485_v46 = vshrl.u32 %v11976_v7, 16 }
 0x394   :  { %v6153_v52 = vpop.f32.mrf.mxu3  ;;  %10524 = vst [vmem:[%s13937_s3 + $0x178] sm:$0xff] %v10030_v47  }
 0x395   :  { %v3744_v53 = vpop.f32.mrf.mxu1  ;;  %v6970_v62 = vadd.f32 %v11842_v0, %v6692_v17  ;;  %v1491_v17 = vrot.slane %v1489_v11, 1 }
 0x397   :  { %v7518_v4 = vmul.f32 0.2, %v6970_v62  ;;  %vm7244_vm9 = vcmp.gt.f32.partialorder %v6970_v62, 0.0 }
 0x398   :  { %9276 = vmatmul.msk.bf16.gmra.mxu1 %vm2098_vm1, %v11880_v6  ;;  %v4487_v60 = vpop.f32.mrf.mxu2  ;;  %v2768_v34 = vpop.f32.mrf.mxu0 }
 0x399   :  { %9566 = vmatmul.msk.bf16.gmra.mxu3 %vm2098_vm1, %v5324_v56  ;;  %v5027_v63 = vadd.f32 %v4487_v60, %v3742_v59  ;;  %v3745_v6 = vadd.f32 %v3744_v53, %v2768_v34  ;;  %v1487_v53 = vor.u32 %v1485_v46, %v1483_v51 }
 0x39b   :  { %v6693_v1 = vadd.f32 %v6153_v52, %v5027_v63  ;;  %9135 = vmatmul.msk.bf16.gmra.mxu0 %vm2098_vm1, %v11918_v38  ;;  %v7792_v38 = vsel %vm7244_vm9, %v6970_v62, %v7518_v4  ;;  %v5328_v52 = vsel %vm5207_vm2, %v5325_v41, %v5327_v55  ;;  %v12014_v34 = vsel %vm992_vm3, %v1487_v53, %v1491_v17  ;;  %v12024_v4 = vld [vmem:[%s13935_s0 + $0x1f8] sm:$0xff] }
 0x39c   :  { %v6156_v2 = vpop.f32.mrf.mxu3  ;;  %v1497_v41 = vshll.u32 %v12024_v4, 16 }
 0x39d   :  { %v3746_v3 = vpop.f32.mrf.mxu1  ;;  %v6971_v5 = vadd.f32 %v11842_v0, %v6693_v1  ;;  %9423 = vmatmul.msk.bf16.gmra.mxu2 %vm2098_vm1, %v11966_v36 }
 0x39f   :  { %vm7245_vm10 = vcmp.gt.f32.partialorder %v6971_v5, 0.0  ;;  %v7519_v8 = vmul.f32 0.2, %v6971_v5 }
 0x3a0   :  { %v4490_v9 = vpop.f32.mrf.mxu2  ;;  %v2770_v10 = vpop.f32.mrf.mxu0 }
 0x3a1   :  { %v7793_v12 = vsel %vm7245_vm10, %v6971_v5, %v7519_v8  ;;  %v5028_v13 = vadd.f32 %v4490_v9, %v3745_v6  ;;  %v3747_v45 = vadd.f32 %v3746_v3, %v2770_v10 }
 0x3a2   :  { %v10035_v15 = vpack.c.bf16 %v7793_v12, %v7792_v38  ;;  %v5329_v38 = vrot.slane %v12024_v4, 1 }
 0x3a3   :  { %v6694_v48 = vadd.f32 %v6156_v2, %v5028_v13  ;;  %v1493_v13 = vshrl.u32 %v12000_v14, 16 }
 0x3a4   :  { %v6158_v18 = vpop.f32.mrf.mxu3  ;;  %10525 = vst [vmem:[%s13937_s3 + $0x180] sm:$0xff] %v10035_v15  }
 0x3a5   :  { %v3749_v19 = vpop.f32.mrf.mxu1  ;;  %v6972_v54 = vadd.f32 %v11842_v0, %v6694_v48  ;;  %v1499_v48 = vrot.slane %v1497_v41, 1 }
 0x3a7   :  { %v7520_v37 = vmul.f32 0.2, %v6972_v54  ;;  %vm7246_vm11 = vcmp.gt.f32.partialorder %v6972_v54, 0.0 }
 0x3a8   :  { %9277 = vmatmul.msk.bf16.gmra.mxu1 %vm2098_vm1, %v11904_v40  ;;  %v4492_v25 = vpop.f32.mrf.mxu2  ;;  %v2773_v26 = vpop.f32.mrf.mxu0 }
 0x3a9   :  { %9567 = vmatmul.msk.bf16.gmra.mxu3 %vm2098_vm1, %v5326_v21  ;;  %v5029_v28 = vadd.f32 %v4492_v25, %v3747_v45  ;;  %v3750_v40 = vadd.f32 %v3749_v19, %v2773_v26  ;;  %v1495_v19 = vor.u32 %v1493_v13, %v1491_v17 }
 0x3ab   :  { %v6695_v58 = vadd.f32 %v6158_v18, %v5029_v28  ;;  %9136 = vmatmul.msk.bf16.gmra.mxu0 %vm2098_vm1, %v11942_v33  ;;  %v7794_v33 = vsel %vm7246_vm11, %v6972_v54, %v7520_v37  ;;  %v5330_v18 = vsel %vm5207_vm2, %v5327_v55, %v5329_v38  ;;  %v12038_v26 = vsel %vm992_vm3, %v1495_v19, %v1499_v48  ;;  %v12048_v37 = vld [vmem:[%s13935_s0 + $0x200] sm:$0xff] }
 0x3ac   :  { %v6161_v30 = vpop.f32.mrf.mxu3  ;;  %v1505_v55 = vshll.u32 %v12048_v37, 16 }
 0x3ad   :  { %v3751_v61 = vpop.f32.mrf.mxu1  ;;  %v6973_v35 = vadd.f32 %v11842_v0, %v6695_v58  ;;  %9424 = vmatmul.msk.bf16.gmra.mxu2 %vm2098_vm1, %v11990_v29 }
 0x3af   :  { %vm7247_vm12 = vcmp.gt.f32.partialorder %v6973_v35, 0.0  ;;  %v7521_v20 = vmul.f32 0.2, %v6973_v35 }
 0x3b0   :  { %v4495_v39 = vpop.f32.mrf.mxu2  ;;  %v2775_v24 = vpop.f32.mrf.mxu0 }
 0x3b1   :  { %v7795_v42 = vsel %vm7247_vm12, %v6973_v35, %v7521_v20  ;;  %v5030_v27 = vadd.f32 %v4495_v39, %v3750_v40  ;;  %v3752_v56 = vadd.f32 %v3751_v61, %v2775_v24 }
 0x3b2   :  { %v10040_v57 = vpack.c.bf16 %v7795_v42, %v7794_v33  ;;  %v5331_v33 = vrot.slane %v12048_v37, 1 }
 0x3b3   :  { %v6696_v23 = vadd.f32 %v6161_v30, %v5030_v27  ;;  %v1501_v27 = vshrl.u32 %v12024_v4, 16 }
 0x3b4   :  { %v6163_v47 = vpop.f32.mrf.mxu3  ;;  %10526 = vst [vmem:[%s13937_s3 + $0x188] sm:$0xff] %v10040_v57  }
 0x3b5   :  { %v3754_v50 = vpop.f32.mrf.mxu1  ;;  %v6974_v59 = vadd.f32 %v11842_v0, %v6696_v23  ;;  %v1507_v23 = vrot.slane %v1505_v55, 1 }
 0x3b7   :  { %v7522_v2 = vmul.f32 0.2, %v6974_v59  ;;  %vm7248_vm13 = vcmp.gt.f32.partialorder %v6974_v59, 0.0 }
 0x3b8   :  { %9278 = vmatmul.msk.bf16.gmra.mxu1 %vm2098_vm1, %v11928_v32  ;;  %v4497_v49 = vpop.f32.mrf.mxu2  ;;  %v2778_v31 = vpop.f32.mrf.mxu0 }
 0x3b9   :  { %9568 = vmatmul.msk.bf16.gmra.mxu3 %vm2098_vm1, %v5328_v52  ;;  %v5031_v60 = vadd.f32 %v4497_v49, %v3752_v56  ;;  %v3755_v32 = vadd.f32 %v3754_v50, %v2778_v31  ;;  %v1503_v50 = vor.u32 %v1501_v27, %v1499_v48 }
 0x3bb   :  { %v6697_v62 = vadd.f32 %v6163_v47, %v5031_v60  ;;  %9137 = vmatmul.msk.bf16.gmra.mxu0 %vm2098_vm1, %v11966_v36  ;;  %v7796_v36 = vsel %vm7248_vm13, %v6974_v59, %v7522_v2  ;;  %v5332_v47 = vsel %vm5207_vm2, %v5329_v38, %v5331_v33  ;;  %v12062_v31 = vsel %vm992_vm3, %v1503_v50, %v1507_v23  ;;  %v12072_v2 = vld [vmem:[%s13935_s0 + $0x208] sm:$0xff] }
 0x3bc   :  { %v6166_v63 = vpop.f32.mrf.mxu3  ;;  %v1513_v38 = vshll.u32 %v12072_v2, 16 }
 0x3bd   :  { %v3756_v1 = vpop.f32.mrf.mxu1  ;;  %v6975_v3 = vadd.f32 %v11842_v0, %v6697_v62  ;;  %9425 = vmatmul.msk.bf16.gmra.mxu2 %vm2098_vm1, %v12014_v34 }
 0x3bf   :  { %vm7249_vm14 = vcmp.gt.f32.partialorder %v6975_v3, 0.0  ;;  %v7523_v5 = vmul.f32 0.2, %v6975_v3 }
 0x3c0   :  { %v4500_v6 = vpop.f32.mrf.mxu2  ;;  %v2780_v8 = vpop.f32.mrf.mxu0 }
 0x3c1   :  { %v7797_v9 = vsel %vm7249_vm14, %v6975_v3, %v7523_v5  ;;  %v5032_v10 = vadd.f32 %v4500_v6, %v3755_v32  ;;  %v3757_v21 = vadd.f32 %v3756_v1, %v2780_v8 }
 0x3c2   :  { %v10045_v12 = vpack.c.bf16 %v7797_v9, %v7796_v36  ;;  %v5333_v36 = vrot.slane %v12072_v2, 1 }
 0x3c3   :  { %v6698_v44 = vadd.f32 %v6166_v63, %v5032_v10  ;;  %v1509_v10 = vshrl.u32 %v12048_v37, 16 }
 0x3c4   :  { %v6168_v15 = vpop.f32.mrf.mxu3  ;;  %10527 = vst [vmem:[%s13937_s3 + $0x190] sm:$0xff] %v10045_v12  }
 0x3c5   :  { %v3759_v16 = vpop.f32.mrf.mxu1  ;;  %v6976_v45 = vadd.f32 %v11842_v0, %v6698_v44  ;;  %v1515_v44 = vrot.slane %v1513_v38, 1 }
 0x3c7   :  { %v7524_v30 = vmul.f32 0.2, %v6976_v45  ;;  %vm7250_vm15 = vcmp.gt.f32.partialorder %v6976_v45, 0.0 }
 0x3c8   :  { %9279 = vmatmul.msk.bf16.gmra.mxu1 %vm2098_vm1, %v11952_v43  ;;  %v4502_v22 = vpop.f32.mrf.mxu2  ;;  %v2783_v51 = vpop.f32.mrf.mxu0 }
 0x3c9   :  { %9569 = vmatmul.msk.bf16.gmra.mxu3 %vm2098_vm1, %v5330_v18  ;;  %v5033_v25 = vadd.f32 %v4502_v22, %v3757_v21  ;;  %v3760_v43 = vadd.f32 %v3759_v16, %v2783_v51  ;;  %v1511_v16 = vor.u32 %v1509_v10, %v1507_v23 }
 0x3cb   :  { %v6699_v54 = vadd.f32 %v6168_v15, %v5033_v25  ;;  %9138 = vmatmul.msk.bf16.gmra.mxu0 %vm2098_vm1, %v11990_v29  ;;  %v7798_v29 = vsel %vm7250_vm15, %v6976_v45, %v7524_v30  ;;  %v5334_v15 = vsel %vm5207_vm2, %v5331_v33, %v5333_v36  ;;  %v12086_v51 = vsel %vm992_vm3, %v1511_v16, %v1515_v44  ;;  %v12096_v30 = vld [vmem:[%s13935_s0 + $0x210] sm:$0xff] }
 0x3cc   :  { %v6171_v28 = vpop.f32.mrf.mxu3  ;;  %v1521_v33 = vshll.u32 %v12096_v30, 16 }
 0x3cd   :  { %v3761_v58 = vpop.f32.mrf.mxu1  ;;  %v6977_v61 = vadd.f32 %v11842_v0, %v6699_v54  ;;  %9426 = vmatmul.msk.bf16.gmra.mxu2 %vm2098_vm1, %v12038_v26 }
 0x3cf   :  { %vm7251_vm0 = vcmp.gt.f32.partialorder %v6977_v61, 0.0  ;;  %v7525_v35 = vmul.f32 0.2, %v6977_v61 }
 0x3d0   :  { %v4505_v40 = vpop.f32.mrf.mxu2  ;;  %v2785_v20 = vpop.f32.mrf.mxu0 }
 0x3d1   :  { %v7799_v39 = vsel %vm7251_vm0, %v6977_v61, %v7525_v35  ;;  %v5034_v24 = vadd.f32 %v4505_v40, %v3760_v43  ;;  %v3762_v52 = vadd.f32 %v3761_v58, %v2785_v20 }
 0x3d2   :  { %v10050_v42 = vpack.c.bf16 %v7799_v39, %v7798_v29  ;;  %v5335_v29 = vrot.slane %v12096_v30, 1 }
 0x3d3   :  { %v6700_v11 = vadd.f32 %v6171_v28, %v5034_v24  ;;  %v1517_v24 = vshrl.u32 %v12072_v2, 16 }
 0x3d4   :  { %v6173_v57 = vpop.f32.mrf.mxu3  ;;  %10528 = vst [vmem:[%s13937_s3 + $0x198] sm:$0xff] %v10050_v42  }
 0x3d5   :  { %v3764_v46 = vpop.f32.mrf.mxu1  ;;  %v6978_v56 = vadd.f32 %v11842_v0, %v6700_v11  ;;  %v1523_v11 = vrot.slane %v1521_v33, 1 }
 0x3d7   :  { %v7526_v63 = vmul.f32 0.2, %v6978_v56  ;;  %vm7252_vm4 = vcmp.gt.f32.partialorder %v6978_v56, 0.0 }
 0x3d8   :  { %9280 = vmatmul.msk.bf16.gmra.mxu1 %vm2098_vm1, %v11976_v7  ;;  %v4507_v53 = vpop.f32.mrf.mxu2  ;;  %v2788_v17 = vpop.f32.mrf.mxu0 }
 0x3d9   :  { %9570 = vmatmul.msk.bf16.gmra.mxu3 %vm2098_vm1, %v5332_v47  ;;  %v5035_v49 = vadd.f32 %v4507_v53, %v3762_v52  ;;  %v3765_v7 = vadd.f32 %v3764_v46, %v2788_v17  ;;  %v1519_v46 = vor.u32 %v1517_v24, %v1515_v44 }
 0x3db   :  { %v6701_v59 = vadd.f32 %v6173_v57, %v5035_v49  ;;  %9139 = vmatmul.msk.bf16.gmra.mxu0 %vm2098_vm1, %v12014_v34  ;;  %v7800_v34 = vsel %vm7252_vm4, %v6978_v56, %v7526_v63  ;;  %v5336_v57 = vsel %vm5207_vm2, %v5333_v36, %v5335_v29  ;;  %v12110_v17 = vsel %vm992_vm3, %v1519_v46, %v1523_v11  ;;  %v12120_v63 = vld [vmem:[%s13935_s0 + $0x218] sm:$0xff] }
 0x3dc   :  { %v6176_v60 = vpop.f32.mrf.mxu3  ;;  %v1529_v36 = vshll.u32 %v12120_v63, 16 }
 0x3dd   :  { %v3766_v62 = vpop.f32.mrf.mxu1  ;;  %v6979_v1 = vadd.f32 %v11842_v0, %v6701_v59  ;;  %9427 = vmatmul.msk.bf16.gmra.mxu2 %vm2098_vm1, %v12062_v31 }
 0x3df   :  { %vm7253_vm5 = vcmp.gt.f32.partialorder %v6979_v1, 0.0  ;;  %v7527_v3 = vmul.f32 0.2, %v6979_v1 }
 0x3e0   :  { %v4510_v32 = vpop.f32.mrf.mxu2  ;;  %v2790_v5 = vpop.f32.mrf.mxu0 }
 0x3e1   :  { %v7801_v6 = vsel %vm7253_vm5, %v6979_v1, %v7527_v3  ;;  %v5036_v8 = vadd.f32 %v4510_v32, %v3765_v7  ;;  %v3767_v18 = vadd.f32 %v3766_v62, %v2790_v5 }
 0x3e2   :  { %v10055_v9 = vpack.c.bf16 %v7801_v6, %v7800_v34  ;;  %v5337_v34 = vrot.slane %v12120_v63, 1 }
 0x3e3   :  { %v6702_v41 = vadd.f32 %v6176_v60, %v5036_v8  ;;  %v1525_v8 = vshrl.u32 %v12096_v30, 16 }
 0x3e4   :  { %v6178_v12 = vpop.f32.mrf.mxu3  ;;  %10529 = vst [vmem:[%s13937_s3 + $0x1a0] sm:$0xff] %v10055_v9  }
 0x3e5   :  { %v3769_v13 = vpop.f32.mrf.mxu1  ;;  %v6980_v21 = vadd.f32 %v11842_v0, %v6702_v41  ;;  %v1531_v41 = vrot.slane %v1529_v36, 1 }
 0x3e7   :  { %v7528_v28 = vmul.f32 0.2, %v6980_v21  ;;  %vm7254_vm6 = vcmp.gt.f32.partialorder %v6980_v21, 0.0 }
 0x3e8   :  { %9281 = vmatmul.msk.bf16.gmra.mxu1 %vm2098_vm1, %v12000_v14  ;;  %v4512_v19 = vpop.f32.mrf.mxu2  ;;  %v2793_v48 = vpop.f32.mrf.mxu0 }
 0x3e9   :  { %9571 = vmatmul.msk.bf16.gmra.mxu3 %vm2098_vm1, %v5334_v15  ;;  %v5037_v22 = vadd.f32 %v4512_v19, %v3767_v18  ;;  %v3770_v14 = vadd.f32 %v3769_v13, %v2793_v48  ;;  %v1527_v13 = vor.u32 %v1525_v8, %v1523_v11 }
 0x3eb   :  { %v6703_v45 = vadd.f32 %v6178_v12, %v5037_v22  ;;  %9140 = vmatmul.msk.bf16.gmra.mxu0 %vm2098_vm1, %v12038_v26  ;;  %v7802_v26 = vsel %vm7254_vm6, %v6980_v21, %v7528_v28  ;;  %v5338_v12 = vsel %vm5207_vm2, %v5335_v29, %v5337_v34  ;;  %v12134_v48 = vsel %vm992_vm3, %v1527_v13, %v1531_v41  ;;  %v12144_v28 = vld [vmem:[%s13935_s0 + $0x220] sm:$0xff] }
 0x3ec   :  { %v6181_v25 = vpop.f32.mrf.mxu3  ;;  %v1537_v29 = vshll.u32 %v12144_v28, 16 }
 0x3ed   :  { %v3771_v54 = vpop.f32.mrf.mxu1  ;;  %v6981_v58 = vadd.f32 %v11842_v0, %v6703_v45  ;;  %9428 = vmatmul.msk.bf16.gmra.mxu2 %vm2098_vm1, %v12086_v51 }
 0x3ef   :  { %vm7255_vm7 = vcmp.gt.f32.partialorder %v6981_v58, 0.0  ;;  %v7529_v61 = vmul.f32 0.2, %v6981_v58 }
 0x3f0   :  { %v4515_v43 = vpop.f32.mrf.mxu2  ;;  %v2795_v35 = vpop.f32.mrf.mxu0 }
 0x3f1   :  { %v7803_v40 = vsel %vm7255_vm7, %v6981_v58, %v7529_v61  ;;  %v5038_v20 = vadd.f32 %v4515_v43, %v3770_v14  ;;  %v3772_v47 = vadd.f32 %v3771_v54, %v2795_v35 }
 0x3f2   :  { %v10060_v39 = vpack.c.bf16 %v7803_v40, %v7802_v26  ;;  %v5339_v26 = vrot.slane %v12144_v28, 1 }
 0x3f3   :  { %v6704_v55 = vadd.f32 %v6181_v25, %v5038_v20  ;;  %v1533_v20 = vshrl.u32 %v12120_v63, 16 }
 0x3f4   :  { %v6183_v42 = vpop.f32.mrf.mxu3  ;;  %10530 = vst [vmem:[%s13937_s3 + $0x1a8] sm:$0xff] %v10060_v39  }
 0x3f5   :  { %v3774_v27 = vpop.f32.mrf.mxu1  ;;  %v6982_v52 = vadd.f32 %v11842_v0, %v6704_v55  ;;  %v1539_v55 = vrot.slane %v1537_v29, 1 }
 0x3f7   :  { %v7530_v60 = vmul.f32 0.2, %v6982_v52  ;;  %vm7256_vm8 = vcmp.gt.f32.partialorder %v6982_v52, 0.0 }
 0x3f8   :  { %9282 = vmatmul.msk.bf16.gmra.mxu1 %vm2098_vm1, %v12024_v4  ;;  %v4517_v50 = vpop.f32.mrf.mxu2  ;;  %v2798_v23 = vpop.f32.mrf.mxu0 }
 0x3f9   :  { %9572 = vmatmul.msk.bf16.gmra.mxu3 %vm2098_vm1, %v5336_v57  ;;  %v5039_v53 = vadd.f32 %v4517_v50, %v3772_v47  ;;  %v3775_v4 = vadd.f32 %v3774_v27, %v2798_v23  ;;  %v1535_v27 = vor.u32 %v1533_v20, %v1531_v41 }
 0x3fb   :  { %v6705_v56 = vadd.f32 %v6183_v42, %v5039_v53  ;;  %9141 = vmatmul.msk.bf16.gmra.mxu0 %vm2098_vm1, %v12062_v31  ;;  %v7804_v31 = vsel %vm7256_vm8, %v6982_v52, %v7530_v60  ;;  %v5340_v42 = vsel %vm5207_vm2, %v5337_v34, %v5339_v26  ;;  %v12158_v23 = vsel %vm992_vm3, %v1535_v27, %v1539_v55  ;;  %v12168_v60 = vld [vmem:[%s13935_s0 + $0x228] sm:$0xff] }
 0x3fc   :  { %v6186_v49 = vpop.f32.mrf.mxu3  ;;  %v1545_v34 = vshll.u32 %v12168_v60, 16 }
 0x3fd   :  { %v3776_v59 = vpop.f32.mrf.mxu1  ;;  %v6983_v62 = vadd.f32 %v11842_v0, %v6705_v56  ;;  %9429 = vmatmul.msk.bf16.gmra.mxu2 %vm2098_vm1, %v12110_v17 }
 0x3ff   :  { %vm7257_vm9 = vcmp.gt.f32.partialorder %v6983_v62, 0.0  ;;  %v7531_v1 = vmul.f32 0.2, %v6983_v62 }
 0x400   :  { %v4520_v7 = vpop.f32.mrf.mxu2  ;;  %v2800_v3 = vpop.f32.mrf.mxu0 }
 0x401   :  { %v7805_v32 = vsel %vm7257_vm9, %v6983_v62, %v7531_v1  ;;  %v5040_v5 = vadd.f32 %v4520_v7, %v3775_v4  ;;  %v3777_v15 = vadd.f32 %v3776_v59, %v2800_v3 }
 0x402   :  { %v10065_v6 = vpack.c.bf16 %v7805_v32, %v7804_v31  ;;  %v5341_v31 = vrot.slane %v12168_v60, 1 }
 0x403   :  { %v6706_v38 = vadd.f32 %v6186_v49, %v5040_v5  ;;  %v1541_v5 = vshrl.u32 %v12144_v28, 16 }
 0x404   :  { %v6188_v9 = vpop.f32.mrf.mxu3  ;;  %10531 = vst [vmem:[%s13937_s3 + $0x1b0] sm:$0xff] %v10065_v6  }
 0x405   :  { %v3779_v10 = vpop.f32.mrf.mxu1  ;;  %v6984_v18 = vadd.f32 %v11842_v0, %v6706_v38  ;;  %v1547_v38 = vrot.slane %v1545_v34, 1 }
 0x407   :  { %v7532_v25 = vmul.f32 0.2, %v6984_v18  ;;  %vm7258_vm10 = vcmp.gt.f32.partialorder %v6984_v18, 0.0 }
 0x408   :  { %9283 = vmatmul.msk.bf16.gmra.mxu1 %vm2098_vm1, %v12048_v37  ;;  %v4522_v16 = vpop.f32.mrf.mxu2  ;;  %v2803_v44 = vpop.f32.mrf.mxu0 }
 0x409   :  { %9573 = vmatmul.msk.bf16.gmra.mxu3 %vm2098_vm1, %v5338_v12  ;;  %v5041_v19 = vadd.f32 %v4522_v16, %v3777_v15  ;;  %v3780_v37 = vadd.f32 %v3779_v10, %v2803_v44  ;;  %v1543_v10 = vor.u32 %v1541_v5, %v1539_v55 }
 0x40b   :  { %v6707_v21 = vadd.f32 %v6188_v9, %v5041_v19  ;;  %9142 = vmatmul.msk.bf16.gmra.mxu0 %vm2098_vm1, %v12086_v51  ;;  %v7806_v51 = vsel %vm7258_vm10, %v6984_v18, %v7532_v25  ;;  %v5342_v9 = vsel %vm5207_vm2, %v5339_v26, %v5341_v31  ;;  %v12182_v44 = vsel %vm992_vm3, %v1543_v10, %v1547_v38 }
 0x40c   :  { %v6191_v22 = vpop.f32.mrf.mxu3 }
 0x40d   :  { %v3781_v45 = vpop.f32.mrf.mxu1  ;;  %v6985_v54 = vadd.f32 %v11842_v0, %v6707_v21  ;;  %9430 = vmatmul.msk.bf16.gmra.mxu2 %vm2098_vm1, %v12134_v48 }
 0x40f   :  { %vm7259_vm11 = vcmp.gt.f32.partialorder %v6985_v54, 0.0  ;;  %v7533_v58 = vmul.f32 0.2, %v6985_v54 }
 0x410   :  { %v4525_v14 = vpop.f32.mrf.mxu2  ;;  %v2805_v61 = vpop.f32.mrf.mxu0 }
 0x411   :  { %v7807_v43 = vsel %vm7259_vm11, %v6985_v54, %v7533_v58  ;;  %v5042_v35 = vadd.f32 %v4525_v14, %v3780_v37  ;;  %v3782_v57 = vadd.f32 %v3781_v45, %v2805_v61 }
 0x412   :  { %v10070_v40 = vpack.c.bf16 %v7807_v43, %v7806_v51 }
 0x413   :  { %v6708_v33 = vadd.f32 %v6191_v22, %v5042_v35  ;;  %v1549_v35 = vshrl.u32 %v12168_v60, 16 }
 0x414   :  { %v6193_v39 = vpop.f32.mrf.mxu3  ;;  %10532 = vst [vmem:[%s13937_s3 + $0x1b8] sm:$0xff] %v10070_v40  }
 0x415   :  { %v3784_v24 = vpop.f32.mrf.mxu1  ;;  %v6986_v47 = vadd.f32 %v11842_v0, %v6708_v33 }
 0x417   :  { %v7534_v49 = vmul.f32 0.2, %v6986_v47  ;;  %vm7260_vm12 = vcmp.gt.f32.partialorder %v6986_v47, 0.0 }
 0x418   :  { %9284 = vmatmul.msk.bf16.gmra.mxu1 %vm2098_vm1, %v12072_v2  ;;  %v4527_v46 = vpop.f32.mrf.mxu2  ;;  %v2808_v11 = vpop.f32.mrf.mxu0 }
 0x419   :  { %9574 = vmatmul.msk.bf16.gmra.mxu3 %vm2098_vm1, %v5340_v42  ;;  %v5043_v50 = vadd.f32 %v4527_v46, %v3782_v57  ;;  %v3785_v2 = vadd.f32 %v3784_v24, %v2808_v11  ;;  %v1551_v24 = vor.u32 %v1549_v35, %v1547_v38 }
 0x41b   :  { %v6709_v52 = vadd.f32 %v6193_v39, %v5043_v50  ;;  %9143 = vmatmul.msk.bf16.gmra.mxu0 %vm2098_vm1, %v12110_v17  ;;  %v7808_v17 = vsel %vm7260_vm12, %v6986_v47, %v7534_v49  ;;  %v12221_v49 = vld [vmem:[%s13935_s0 + $0x238] sm:$0xff] }
 0x41c   :  { %v6196_v53 = vpop.f32.mrf.mxu3 }
 0x41d   :  { %v3786_v56 = vpop.f32.mrf.mxu1  ;;  %v6987_v59 = vadd.f32 %v11842_v0, %v6709_v52  ;;  %9431 = vmatmul.msk.bf16.gmra.mxu2 %vm2098_vm1, %v12158_v23 }
 0x41f   :  { %vm7261_vm13 = vcmp.gt.f32.partialorder %v6987_v59, 0.0  ;;  %v7535_v62 = vmul.f32 0.2, %v6987_v59 }
 0x420   :  { %v4530_v4 = vpop.f32.mrf.mxu2  ;;  %v2810_v1 = vpop.f32.mrf.mxu0 }
 0x421   :  { %v7809_v7 = vsel %vm7261_vm13, %v6987_v59, %v7535_v62  ;;  %v5044_v3 = vadd.f32 %v4530_v4, %v3785_v2  ;;  %v3787_v12 = vadd.f32 %v3786_v56, %v2810_v1 }
 0x422   :  { %v10075_v32 = vpack.c.bf16 %v7809_v7, %v7808_v17  ;;  %v5345_v17 = vrot.slane %v12221_v49, 1 }
 0x423   :  { %v6710_v36 = vadd.f32 %v6196_v53, %v5044_v3 }
 0x424   :  { %v6198_v6 = vpop.f32.mrf.mxu3  ;;  %10533 = vst [vmem:[%s13937_s3 + $0x1c0] sm:$0xff] %v10075_v32  }
 0x425   :  { %v3789_v8 = vpop.f32.mrf.mxu1  ;;  %v6988_v15 = vadd.f32 %v11842_v0, %v6710_v36  ;;  %v12197_v0 = vld [vmem:[%s13935_s0 + $0x230] sm:$0xff] }
 0x426   :  { %v5343_v51 = vrot.slane %v12197_v0, 1  ;;  %v1553_v26 = vshll.u32 %v12197_v0, 16  ;;  %v1557_v3 = vshrl.u32 %v12197_v0, 16 }
 0x427   :  { %v7536_v22 = vmul.f32 0.2, %v6988_v15  ;;  %vm7262_vm14 = vcmp.gt.f32.partialorder %v6988_v15, 0.0 }
 0x428   :  { %9285 = vmatmul.msk.bf16.gmra.mxu1 %vm2098_vm1, %v12096_v30  ;;  %v4532_v13 = vpop.f32.mrf.mxu2  ;;  %v2813_v41 = vpop.f32.mrf.mxu0  ;;  %v12189_v30 = vld [vmem:[%s13936_s2] ss:$0 sm:$0xff]  ;;  %v5344_v39 = vsel %vm5207_vm2, %v5341_v31, %v5343_v51  ;;  %v1555_v33 = vrot.slane %v1553_v26, 1  ;;  %v1561_v31 = vshll.u32 %v12221_v49, 16 }
 0x429   :  { %9575 = vmatmul.msk.bf16.gmra.mxu3 %vm2098_vm1, %v5342_v9  ;;  %v5045_v16 = vadd.f32 %v4532_v13, %v3787_v12  ;;  %v3790_v25 = vadd.f32 %v3789_v8, %v2813_v41  ;;  %v7810_v58 = vsel %vm7262_vm14, %v6988_v15, %v7536_v22  ;;  %v12245_v22 = vld [vmem:[%s13935_s0 + $0x240] sm:$0xff] }
 0x42a   :  { %v12211_v11 = vsel %vm992_vm3, %v1551_v24, %v1555_v33  ;;  %v1559_v8 = vor.u32 %v1557_v3, %v1555_v33  ;;  %v1563_v36 = vrot.slane %v1561_v31, 1 }
 0x42b   :  { %v6711_v18 = vadd.f32 %v6198_v6, %v5045_v16  ;;  %9144 = vmatmul.msk.bf16.gmra.mxu0 %vm2098_vm1, %v12134_v48  ;;  %v5346_v6 = vsel %vm5207_vm2, %v5343_v51, %v5345_v17  ;;  %v1569_v51 = vshll.u32 %v12245_v22, 16 }
 0x42c   :  { %v6201_v19 = vpop.f32.mrf.mxu3  ;;  %v12235_v41 = vsel %vm992_vm3, %v1559_v8, %v1563_v36 }
 0x42d   :  { %v3791_v21 = vpop.f32.mrf.mxu1  ;;  %v6989_v45 = vadd.f32 %v12189_v30, %v6711_v18  ;;  %9432 = vmatmul.msk.bf16.gmra.mxu2 %vm2098_vm1, %v12182_v44 }
 0x42f   :  { %vm7263_vm15 = vcmp.gt.f32.partialorder %v6989_v45, 0.0  ;;  %v7537_v48 = vmul.f32 0.2, %v6989_v45 }
 0x430   :  { %v4535_v54 = vpop.f32.mrf.mxu2  ;;  %v2815_v37 = vpop.f32.mrf.mxu0 }
 0x431   :  { %v7811_v14 = vsel %vm7263_vm15, %v6989_v45, %v7537_v48  ;;  %v5046_v61 = vadd.f32 %v4535_v54, %v3790_v25  ;;  %v3792_v42 = vadd.f32 %v3791_v21, %v2815_v37 }
 0x432   :  { %v10080_v43 = vpack.c.bf16 %v7811_v14, %v7810_v58  ;;  %v5347_v58 = vrot.slane %v12245_v22, 1 }
 0x433   :  { %v6712_v29 = vadd.f32 %v6201_v19, %v5046_v61  ;;  %v1565_v61 = vshrl.u32 %v12221_v49, 16 }
 0x434   :  { %v6203_v40 = vpop.f32.mrf.mxu3  ;;  %10534 = vst [vmem:[%s13937_s3 + $0x1c8] sm:$0xff] %v10080_v43  }
 0x435   :  { %v3794_v20 = vpop.f32.mrf.mxu1  ;;  %v6990_v57 = vadd.f32 %v12189_v30, %v6712_v29  ;;  %v1571_v29 = vrot.slane %v1569_v51, 1 }
 0x437   :  { %v7538_v53 = vmul.f32 0.2, %v6990_v57  ;;  %vm7264_vm0 = vcmp.gt.f32.partialorder %v6990_v57, 0.0 }
 0x438   :  { %9286 = vmatmul.msk.bf16.gmra.mxu1 %vm2098_vm1, %v12120_v63  ;;  %v4537_v27 = vpop.f32.mrf.mxu2  ;;  %v2818_v55 = vpop.f32.mrf.mxu0 }
 0x439   :  { %9576 = vmatmul.msk.bf16.gmra.mxu3 %vm2098_vm1, %v5344_v39  ;;  %v5047_v46 = vadd.f32 %v4537_v27, %v3792_v42  ;;  %v3795_v63 = vadd.f32 %v3794_v20, %v2818_v55  ;;  %v1567_v20 = vor.u32 %v1565_v61, %v1563_v36 }
 0x43b   :  { %v6713_v47 = vadd.f32 %v6203_v40, %v5047_v46  ;;  %9145 = vmatmul.msk.bf16.gmra.mxu0 %vm2098_vm1, %v12158_v23  ;;  %v7812_v23 = vsel %vm7264_vm0, %v6990_v57, %v7538_v53  ;;  %v5348_v40 = vsel %vm5207_vm2, %v5345_v17, %v5347_v58  ;;  %v12259_v55 = vsel %vm992_vm3, %v1567_v20, %v1571_v29  ;;  %v12269_v53 = vld [vmem:[%s13935_s0 + $0x248] sm:$0xff] }
 0x43c   :  { %v6206_v50 = vpop.f32.mrf.mxu3  ;;  %v1577_v17 = vshll.u32 %v12269_v53, 16 }
 0x43d   :  { %v3796_v52 = vpop.f32.mrf.mxu1  ;;  %v6991_v56 = vadd.f32 %v12189_v30, %v6713_v47  ;;  %9433 = vmatmul.msk.bf16.gmra.mxu2 %vm2098_vm1, %v12211_v11 }
 0x43f   :  { %vm7265_vm4 = vcmp.gt.f32.partialorder %v6991_v56, 0.0  ;;  %v7539_v59 = vmul.f32 0.2, %v6991_v56 }
 0x440   :  { %v4540_v2 = vpop.f32.mrf.mxu2  ;;  %v2820_v62 = vpop.f32.mrf.mxu0 }
 0x441   :  { %v7813_v4 = vsel %vm7265_vm4, %v6991_v56, %v7539_v59  ;;  %v5048_v1 = vadd.f32 %v4540_v2, %v3795_v63  ;;  %v3797_v9 = vadd.f32 %v3796_v52, %v2820_v62 }
 0x442   :  { %v10085_v7 = vpack.c.bf16 %v7813_v4, %v7812_v23  ;;  %v5349_v23 = vrot.slane %v12269_v53, 1 }
 0x443   :  { %v6714_v34 = vadd.f32 %v6206_v50, %v5048_v1  ;;  %v1573_v1 = vshrl.u32 %v12245_v22, 16 }
 0x444   :  { %v6208_v32 = vpop.f32.mrf.mxu3  ;;  %10535 = vst [vmem:[%s13937_s3 + $0x1d0] sm:$0xff] %v10085_v7  }
 0x445   :  { %v3799_v5 = vpop.f32.mrf.mxu1  ;;  %v6992_v12 = vadd.f32 %v12189_v30, %v6714_v34  ;;  %v1579_v34 = vrot.slane %v1577_v17, 1 }
 0x447   :  { %v7540_v19 = vmul.f32 0.2, %v6992_v12  ;;  %vm7266_vm5 = vcmp.gt.f32.partialorder %v6992_v12, 0.0 }
 0x448   :  { %9287 = vmatmul.msk.bf16.gmra.mxu1 %vm2098_vm1, %v12144_v28  ;;  %v4542_v10 = vpop.f32.mrf.mxu2  ;;  %v2823_v38 = vpop.f32.mrf.mxu0 }
 0x449   :  { %9577 = vmatmul.msk.bf16.gmra.mxu3 %vm2098_vm1, %v5346_v6  ;;  %v5049_v13 = vadd.f32 %v4542_v10, %v3797_v9  ;;  %v3800_v28 = vadd.f32 %v3799_v5, %v2823_v38  ;;  %v1575_v5 = vor.u32 %v1573_v1, %v1571_v29 }
 0x44b   :  { %v6715_v15 = vadd.f32 %v6208_v32, %v5049_v13  ;;  %9146 = vmatmul.msk.bf16.gmra.mxu0 %vm2098_vm1, %v12182_v44  ;;  %v7814_v44 = vsel %vm7266_vm5, %v6992_v12, %v7540_v19  ;;  %v5350_v32 = vsel %vm5207_vm2, %v5347_v58, %v5349_v23  ;;  %v12283_v38 = vsel %vm992_vm3, %v1575_v5, %v1579_v34  ;;  %v12293_v19 = vld [vmem:[%s13935_s0 + $0x250] sm:$0xff] }
 0x44c   :  { %v6211_v16 = vpop.f32.mrf.mxu3  ;;  %v1585_v58 = vshll.u32 %v12293_v19, 16 }
 0x44d   :  { %v3801_v18 = vpop.f32.mrf.mxu1  ;;  %v6993_v21 = vadd.f32 %v12189_v30, %v6715_v15  ;;  %9434 = vmatmul.msk.bf16.gmra.mxu2 %vm2098_vm1, %v12235_v41 }
 0x44f   :  { %vm7267_vm6 = vcmp.gt.f32.partialorder %v6993_v21, 0.0  ;;  %v7541_v45 = vmul.f32 0.2, %v6993_v21 }
 0x450   :  { %v4545_v25 = vpop.f32.mrf.mxu2  ;;  %v2825_v48 = vpop.f32.mrf.mxu0 }
 0x451   :  { %v7815_v54 = vsel %vm7267_vm6, %v6993_v21, %v7541_v45  ;;  %v5050_v37 = vadd.f32 %v4545_v25, %v3800_v28  ;;  %v3802_v39 = vadd.f32 %v3801_v18, %v2825_v48 }
 0x452   :  { %v10090_v14 = vpack.c.bf16 %v7815_v54, %v7814_v44  ;;  %v5351_v44 = vrot.slane %v12293_v19, 1 }
 0x453   :  { %v6716_v26 = vadd.f32 %v6211_v16, %v5050_v37  ;;  %v1581_v37 = vshrl.u32 %v12269_v53, 16 }
 0x454   :  { %v6213_v43 = vpop.f32.mrf.mxu3  ;;  %10536 = vst [vmem:[%s13937_s3 + $0x1d8] sm:$0xff] %v10090_v14  }
 0x455   :  { %v3804_v35 = vpop.f32.mrf.mxu1  ;;  %v6994_v42 = vadd.f32 %v12189_v30, %v6716_v26  ;;  %v1587_v26 = vrot.slane %v1585_v58, 1 }
 0x457   :  { %v7542_v50 = vmul.f32 0.2, %v6994_v42  ;;  %vm7268_vm7 = vcmp.gt.f32.partialorder %v6994_v42, 0.0 }
 0x458   :  { %9288 = vmatmul.msk.bf16.gmra.mxu1 %vm2098_vm1, %v12168_v60  ;;  %v4547_v24 = vpop.f32.mrf.mxu2  ;;  %v2828_v33 = vpop.f32.mrf.mxu0 }
 0x459   :  { %9578 = vmatmul.msk.bf16.gmra.mxu3 %vm2098_vm1, %v5348_v40  ;;  %v5051_v27 = vadd.f32 %v4547_v24, %v3802_v39  ;;  %v3805_v60 = vadd.f32 %v3804_v35, %v2828_v33  ;;  %v1583_v35 = vor.u32 %v1581_v37, %v1579_v34 }
 0x45b   :  { %v6717_v57 = vadd.f32 %v6213_v43, %v5051_v27  ;;  %9147 = vmatmul.msk.bf16.gmra.mxu0 %vm2098_vm1, %v12211_v11  ;;  %v7816_v11 = vsel %vm7268_vm7, %v6994_v42, %v7542_v50  ;;  %v5352_v43 = vsel %vm5207_vm2, %v5349_v23, %v5351_v44  ;;  %v12307_v33 = vsel %vm992_vm3, %v1583_v35, %v1587_v26  ;;  %v12317_v50 = vld [vmem:[%s13935_s0 + $0x258] sm:$0xff] }
 0x45c   :  { %v6216_v46 = vpop.f32.mrf.mxu3  ;;  %v1593_v23 = vshll.u32 %v12317_v50, 16 }
 0x45d   :  { %v3806_v47 = vpop.f32.mrf.mxu1  ;;  %v6995_v52 = vadd.f32 %v12189_v30, %v6717_v57  ;;  %9435 = vmatmul.msk.bf16.gmra.mxu2 %vm2098_vm1, %v12259_v55 }
 0x45f   :  { %vm7269_vm8 = vcmp.gt.f32.partialorder %v6995_v52, 0.0  ;;  %v7543_v56 = vmul.f32 0.2, %v6995_v52 }
 0x460   :  { %v4550_v63 = vpop.f32.mrf.mxu2  ;;  %v2830_v59 = vpop.f32.mrf.mxu0 }
 0x461   :  { %v7817_v2 = vsel %vm7269_vm8, %v6995_v52, %v7543_v56  ;;  %v5052_v62 = vadd.f32 %v4550_v63, %v3805_v60  ;;  %v3807_v6 = vadd.f32 %v3806_v47, %v2830_v59 }
 0x462   :  { %v10095_v4 = vpack.c.bf16 %v7817_v2, %v7816_v11  ;;  %v5353_v11 = vrot.slane %v12317_v50, 1 }
 0x463   :  { %v6718_v31 = vadd.f32 %v6216_v46, %v5052_v62  ;;  %v1589_v62 = vshrl.u32 %v12293_v19, 16 }
 0x464   :  { %v6218_v7 = vpop.f32.mrf.mxu3  ;;  %10537 = vst [vmem:[%s13937_s3 + $0x1e0] sm:$0xff] %v10095_v4  }
 0x465   :  { %v3809_v3 = vpop.f32.mrf.mxu1  ;;  %v6996_v9 = vadd.f32 %v12189_v30, %v6718_v31  ;;  %v1595_v31 = vrot.slane %v1593_v23, 1 }
 0x467   :  { %v7544_v16 = vmul.f32 0.2, %v6996_v9  ;;  %vm7270_vm9 = vcmp.gt.f32.partialorder %v6996_v9, 0.0 }
 0x468   :  { %9289 = vmatmul.msk.bf16.gmra.mxu1 %vm2098_vm1, %v12197_v0  ;;  %v4552_v8 = vpop.f32.mrf.mxu2  ;;  %v2833_v36 = vpop.f32.mrf.mxu0 }
 0x469   :  { %9579 = vmatmul.msk.bf16.gmra.mxu3 %vm2098_vm1, %v5350_v32  ;;  %v5053_v10 = vadd.f32 %v4552_v8, %v3807_v6  ;;  %v3810_v0 = vadd.f32 %v3809_v3, %v2833_v36  ;;  %v1591_v3 = vor.u32 %v1589_v62, %v1587_v26 }
 0x46b   :  { %v6719_v12 = vadd.f32 %v6218_v7, %v5053_v10  ;;  %9148 = vmatmul.msk.bf16.gmra.mxu0 %vm2098_vm1, %v12235_v41  ;;  %v7818_v41 = vsel %vm7270_vm9, %v6996_v9, %v7544_v16  ;;  %v5354_v7 = vsel %vm5207_vm2, %v5351_v44, %v5353_v11  ;;  %v12331_v36 = vsel %vm992_vm3, %v1591_v3, %v1595_v31  ;;  %v12341_v16 = vld [vmem:[%s13935_s0 + $0x260] sm:$0xff] }
 0x46c   :  { %v6221_v13 = vpop.f32.mrf.mxu3  ;;  %v1601_v44 = vshll.u32 %v12341_v16, 16 }
 0x46d   :  { %v3811_v15 = vpop.f32.mrf.mxu1  ;;  %v6997_v18 = vadd.f32 %v12189_v30, %v6719_v12  ;;  %9436 = vmatmul.msk.bf16.gmra.mxu2 %vm2098_vm1, %v12283_v38 }
 0x46f   :  { %vm7271_vm10 = vcmp.gt.f32.partialorder %v6997_v18, 0.0  ;;  %v7545_v21 = vmul.f32 0.2, %v6997_v18 }
 0x470   :  { %v4555_v28 = vpop.f32.mrf.mxu2  ;;  %v2835_v45 = vpop.f32.mrf.mxu0 }
 0x471   :  { %v7819_v25 = vsel %vm7271_vm10, %v6997_v18, %v7545_v21  ;;  %v5054_v48 = vadd.f32 %v4555_v28, %v3810_v0  ;;  %v3812_v40 = vadd.f32 %v3811_v15, %v2835_v45 }
 0x472   :  { %v10100_v54 = vpack.c.bf16 %v7819_v25, %v7818_v41  ;;  %v5355_v41 = vrot.slane %v12341_v16, 1 }
 0x473   :  { %v6720_v51 = vadd.f32 %v6221_v13, %v5054_v48  ;;  %v1597_v48 = vshrl.u32 %v12317_v50, 16 }
 0x474   :  { %v6223_v14 = vpop.f32.mrf.mxu3  ;;  %10538 = vst [vmem:[%s13937_s3 + $0x1e8] sm:$0xff] %v10100_v54  }
 0x475   :  { %v3814_v61 = vpop.f32.mrf.mxu1  ;;  %v6998_v39 = vadd.f32 %v12189_v30, %v6720_v51  ;;  %v1603_v51 = vrot.slane %v1601_v44, 1 }
 0x477   :  { %v7546_v46 = vmul.f32 0.2, %v6998_v39  ;;  %vm7272_vm11 = vcmp.gt.f32.partialorder %v6998_v39, 0.0 }
 0x478   :  { %9290 = vmatmul.msk.bf16.gmra.mxu1 %vm2098_vm1, %v12221_v49  ;;  %v4557_v20 = vpop.f32.mrf.mxu2  ;;  %v2838_v29 = vpop.f32.mrf.mxu0 }
 0x479   :  { %9580 = vmatmul.msk.bf16.gmra.mxu3 %vm2098_vm1, %v5352_v43  ;;  %v5055_v24 = vadd.f32 %v4557_v20, %v3812_v40  ;;  %v3815_v49 = vadd.f32 %v3814_v61, %v2838_v29  ;;  %v1599_v61 = vor.u32 %v1597_v48, %v1595_v31 }
 0x47b   :  { %v6721_v42 = vadd.f32 %v6223_v14, %v5055_v24  ;;  %9149 = vmatmul.msk.bf16.gmra.mxu0 %vm2098_vm1, %v12259_v55  ;;  %v7820_v55 = vsel %vm7272_vm11, %v6998_v39, %v7546_v46  ;;  %v5356_v14 = vsel %vm5207_vm2, %v5353_v11, %v5355_v41  ;;  %v12355_v29 = vsel %vm992_vm3, %v1599_v61, %v1603_v51  ;;  %v12365_v46 = vld [vmem:[%s13935_s0 + $0x268] sm:$0xff] }
 0x47c   :  { %v6226_v27 = vpop.f32.mrf.mxu3  ;;  %v1609_v11 = vshll.u32 %v12365_v46, 16 }
 0x47d   :  { %v3816_v57 = vpop.f32.mrf.mxu1  ;;  %v6999_v47 = vadd.f32 %v12189_v30, %v6721_v42  ;;  %9437 = vmatmul.msk.bf16.gmra.mxu2 %vm2098_vm1, %v12307_v33 }
 0x47f   :  { %vm7273_vm12 = vcmp.gt.f32.partialorder %v6999_v47, 0.0  ;;  %v7547_v52 = vmul.f32 0.2, %v6999_v47 }
 0x480   :  { %v4560_v60 = vpop.f32.mrf.mxu2  ;;  %v2840_v56 = vpop.f32.mrf.mxu0 }
 0x481   :  { %v7821_v63 = vsel %vm7273_vm12, %v6999_v47, %v7547_v52  ;;  %v5056_v59 = vadd.f32 %v4560_v60, %v3815_v49  ;;  %v3817_v32 = vadd.f32 %v3816_v57, %v2840_v56 }
 0x482   :  { %v10105_v2 = vpack.c.bf16 %v7821_v63, %v7820_v55  ;;  %v5357_v55 = vrot.slane %v12365_v46, 1 }
 0x483   :  { %v6722_v17 = vadd.f32 %v6226_v27, %v5056_v59  ;;  %v1605_v59 = vshrl.u32 %v12341_v16, 16 }
 0x484   :  { %v6228_v4 = vpop.f32.mrf.mxu3  ;;  %10539 = vst [vmem:[%s13937_s3 + $0x1f0] sm:$0xff] %v10105_v2  }
 0x485   :  { %v3819_v1 = vpop.f32.mrf.mxu1  ;;  %v7000_v6 = vadd.f32 %v12189_v30, %v6722_v17  ;;  %v1611_v17 = vrot.slane %v1609_v11, 1 }
 0x487   :  { %v7548_v13 = vmul.f32 0.2, %v7000_v6  ;;  %vm7274_vm13 = vcmp.gt.f32.partialorder %v7000_v6, 0.0 }
 0x488   :  { %9291 = vmatmul.msk.bf16.gmra.mxu1 %vm2098_vm1, %v12245_v22  ;;  %v4562_v5 = vpop.f32.mrf.mxu2  ;;  %v2843_v34 = vpop.f32.mrf.mxu0 }
 0x489   :  { %9581 = vmatmul.msk.bf16.gmra.mxu3 %vm2098_vm1, %v5354_v7  ;;  %v5057_v8 = vadd.f32 %v4562_v5, %v3817_v32  ;;  %v3820_v22 = vadd.f32 %v3819_v1, %v2843_v34  ;;  %v1607_v1 = vor.u32 %v1605_v59, %v1603_v51 }
 0x48b   :  { %v6723_v9 = vadd.f32 %v6228_v4, %v5057_v8  ;;  %9150 = vmatmul.msk.bf16.gmra.mxu0 %vm2098_vm1, %v12283_v38  ;;  %v7822_v38 = vsel %vm7274_vm13, %v7000_v6, %v7548_v13  ;;  %v5358_v4 = vsel %vm5207_vm2, %v5355_v41, %v5357_v55  ;;  %v12379_v34 = vsel %vm992_vm3, %v1607_v1, %v1611_v17  ;;  %v12389_v13 = vld [vmem:[%s13935_s0 + $0x270] sm:$0xff] }
 0x48c   :  { %v6231_v10 = vpop.f32.mrf.mxu3  ;;  %v1617_v41 = vshll.u32 %v12389_v13, 16 }
 0x48d   :  { %v3821_v12 = vpop.f32.mrf.mxu1  ;;  %v7001_v15 = vadd.f32 %v12189_v30, %v6723_v9  ;;  %9438 = vmatmul.msk.bf16.gmra.mxu2 %vm2098_vm1, %v12331_v36 }
 0x48f   :  { %vm7275_vm14 = vcmp.gt.f32.partialorder %v7001_v15, 0.0  ;;  %v7549_v18 = vmul.f32 0.2, %v7001_v15 }
 0x490   :  { %v4565_v0 = vpop.f32.mrf.mxu2  ;;  %v2845_v21 = vpop.f32.mrf.mxu0 }
 0x491   :  { %v7823_v28 = vsel %vm7275_vm14, %v7001_v15, %v7549_v18  ;;  %v5058_v45 = vadd.f32 %v4565_v0, %v3820_v22  ;;  %v3822_v43 = vadd.f32 %v3821_v12, %v2845_v21 }
 0x492   :  { %v10110_v25 = vpack.c.bf16 %v7823_v28, %v7822_v38  ;;  %v5359_v38 = vrot.slane %v12389_v13, 1 }
 0x493   :  { %v6724_v58 = vadd.f32 %v6231_v10, %v5058_v45  ;;  %v1613_v45 = vshrl.u32 %v12365_v46, 16 }
 0x494   :  { %v6233_v54 = vpop.f32.mrf.mxu3  ;;  %10540 = vst [vmem:[%s13937_s3 + $0x1f8] sm:$0xff] %v10110_v25  }
 0x495   :  { %v3824_v37 = vpop.f32.mrf.mxu1  ;;  %v7002_v40 = vadd.f32 %v12189_v30, %v6724_v58  ;;  %v1619_v58 = vrot.slane %v1617_v41, 1 }
 0x497   :  { %v7550_v27 = vmul.f32 0.2, %v7002_v40  ;;  %vm7276_vm15 = vcmp.gt.f32.partialorder %v7002_v40, 0.0 }
 0x498   :  { %9292 = vmatmul.msk.bf16.gmra.mxu1 %vm2098_vm1, %v12269_v53  ;;  %v4567_v35 = vpop.f32.mrf.mxu2  ;;  %v2848_v26 = vpop.f32.mrf.mxu0 }
 0x499   :  { %9582 = vmatmul.msk.bf16.gmra.mxu3 %vm2098_vm1, %v5356_v14  ;;  %v5059_v20 = vadd.f32 %v4567_v35, %v3822_v43  ;;  %v3825_v53 = vadd.f32 %v3824_v37, %v2848_v26  ;;  %v1615_v37 = vor.u32 %v1613_v45, %v1611_v17 }
 0x49b   :  { %v6725_v39 = vadd.f32 %v6233_v54, %v5059_v20  ;;  %9151 = vmatmul.msk.bf16.gmra.mxu0 %vm2098_vm1, %v12307_v33  ;;  %v7824_v33 = vsel %vm7276_vm15, %v7002_v40, %v7550_v27  ;;  %v5360_v54 = vsel %vm5207_vm2, %v5357_v55, %v5359_v38  ;;  %v12403_v26 = vsel %vm992_vm3, %v1615_v37, %v1619_v58  ;;  %v12413_v27 = vld [vmem:[%s13935_s0 + $0x278] sm:$0xff] }
 0x49c   :  { %v6236_v24 = vpop.f32.mrf.mxu3  ;;  %v1625_v55 = vshll.u32 %v12413_v27, 16 }
 0x49d   :  { %v3826_v42 = vpop.f32.mrf.mxu1  ;;  %v7003_v57 = vadd.f32 %v12189_v30, %v6725_v39  ;;  %9439 = vmatmul.msk.bf16.gmra.mxu2 %vm2098_vm1, %v12355_v29 }
 0x49f   :  { %vm7277_vm0 = vcmp.gt.f32.partialorder %v7003_v57, 0.0  ;;  %v7551_v47 = vmul.f32 0.2, %v7003_v57 }
 0x4a0   :  { %v4570_v49 = vpop.f32.mrf.mxu2  ;;  %v2850_v52 = vpop.f32.mrf.mxu0 }
 0x4a1   :  { %v7825_v60 = vsel %vm7277_vm0, %v7003_v57, %v7551_v47  ;;  %v5060_v56 = vadd.f32 %v4570_v49, %v3825_v53  ;;  %v3827_v7 = vadd.f32 %v3826_v42, %v2850_v52 }
 0x4a2   :  { %v10115_v63 = vpack.c.bf16 %v7825_v60, %v7824_v33  ;;  %v5361_v33 = vrot.slane %v12413_v27, 1 }
 0x4a3   :  { %v6726_v23 = vadd.f32 %v6236_v24, %v5060_v56  ;;  %v1621_v56 = vshrl.u32 %v12389_v13, 16 }
 0x4a4   :  { %v6238_v2 = vpop.f32.mrf.mxu3  ;;  %10541 = vst [vmem:[%s13937_s3 + $0x200] sm:$0xff] %v10115_v63  }
 0x4a5   :  { %v3829_v62 = vpop.f32.mrf.mxu1  ;;  %v7004_v32 = vadd.f32 %v12189_v30, %v6726_v23  ;;  %v1627_v23 = vrot.slane %v1625_v55, 1 }
 0x4a7   :  { %v7552_v10 = vmul.f32 0.2, %v7004_v32  ;;  %vm7278_vm4 = vcmp.gt.f32.partialorder %v7004_v32, 0.0 }
 0x4a8   :  { %9293 = vmatmul.msk.bf16.gmra.mxu1 %vm2098_vm1, %v12293_v19  ;;  %v4572_v3 = vpop.f32.mrf.mxu2  ;;  %v2853_v31 = vpop.f32.mrf.mxu0 }
 0x4a9   :  { %9583 = vmatmul.msk.bf16.gmra.mxu3 %vm2098_vm1, %v5358_v4  ;;  %v5061_v5 = vadd.f32 %v4572_v3, %v3827_v7  ;;  %v3830_v19 = vadd.f32 %v3829_v62, %v2853_v31  ;;  %v1623_v62 = vor.u32 %v1621_v56, %v1619_v58 }
 0x4ab   :  { %v6727_v6 = vadd.f32 %v6238_v2, %v5061_v5  ;;  %9152 = vmatmul.msk.bf16.gmra.mxu0 %vm2098_vm1, %v12331_v36  ;;  %v7826_v36 = vsel %vm7278_vm4, %v7004_v32, %v7552_v10  ;;  %v5362_v2 = vsel %vm5207_vm2, %v5359_v38, %v5361_v33  ;;  %v12427_v31 = vsel %vm992_vm3, %v1623_v62, %v1627_v23  ;;  %v12437_v10 = vld [vmem:[%s13935_s0 + $0x280] sm:$0xff] }
 0x4ac   :  { %v6241_v8 = vpop.f32.mrf.mxu3  ;;  %v1633_v38 = vshll.u32 %v12437_v10, 16 }
 0x4ad   :  { %v3831_v9 = vpop.f32.mrf.mxu1  ;;  %v7005_v12 = vadd.f32 %v12189_v30, %v6727_v6  ;;  %9440 = vmatmul.msk.bf16.gmra.mxu2 %vm2098_vm1, %v12379_v34 }
 0x4af   :  { %vm7279_vm5 = vcmp.gt.f32.partialorder %v7005_v12, 0.0  ;;  %v7553_v15 = vmul.f32 0.2, %v7005_v12 }
 0x4b0   :  { %v4575_v22 = vpop.f32.mrf.mxu2  ;;  %v2855_v18 = vpop.f32.mrf.mxu0 }
 0x4b1   :  { %v7827_v0 = vsel %vm7279_vm5, %v7005_v12, %v7553_v15  ;;  %v5062_v21 = vadd.f32 %v4575_v22, %v3830_v19  ;;  %v3832_v14 = vadd.f32 %v3831_v9, %v2855_v18 }
 0x4b2   :  { %v10120_v28 = vpack.c.bf16 %v7827_v0, %v7826_v36  ;;  %v5363_v36 = vrot.slane %v12437_v10, 1 }
 0x4b3   :  { %v6728_v44 = vadd.f32 %v6241_v8, %v5062_v21  ;;  %v1629_v21 = vshrl.u32 %v12413_v27, 16 }
 0x4b4   :  { %v6243_v25 = vpop.f32.mrf.mxu3  ;;  %10542 = vst [vmem:[%s13937_s3 + $0x208] sm:$0xff] %v10120_v28  }
 0x4b5   :  { %v3834_v48 = vpop.f32.mrf.mxu1  ;;  %v7006_v43 = vadd.f32 %v12189_v30, %v6728_v44  ;;  %v1635_v44 = vrot.slane %v1633_v38, 1 }
 0x4b7   :  { %v7554_v24 = vmul.f32 0.2, %v7006_v43  ;;  %vm7280_vm6 = vcmp.gt.f32.partialorder %v7006_v43, 0.0 }
 0x4b8   :  { %9294 = vmatmul.msk.bf16.gmra.mxu1 %vm2098_vm1, %v12317_v50  ;;  %v4577_v61 = vpop.f32.mrf.mxu2  ;;  %v2858_v51 = vpop.f32.mrf.mxu0 }
 0x4b9   :  { %9584 = vmatmul.msk.bf16.gmra.mxu3 %vm2098_vm1, %v5360_v54  ;;  %v5063_v35 = vadd.f32 %v4577_v61, %v3832_v14  ;;  %v3835_v50 = vadd.f32 %v3834_v48, %v2858_v51  ;;  %v1631_v48 = vor.u32 %v1629_v21, %v1627_v23 }
 0x4bb   :  { %v6729_v40 = vadd.f32 %v6243_v25, %v5063_v35  ;;  %9153 = vmatmul.msk.bf16.gmra.mxu0 %vm2098_vm1, %v12355_v29  ;;  %v7828_v29 = vsel %vm7280_vm6, %v7006_v43, %v7554_v24  ;;  %v5364_v25 = vsel %vm5207_vm2, %v5361_v33, %v5363_v36  ;;  %v12451_v51 = vsel %vm992_vm3, %v1631_v48, %v1635_v44  ;;  %v12461_v24 = vld [vmem:[%s13935_s0 + $0x288] sm:$0xff] }
 0x4bc   :  { %v6246_v20 = vpop.f32.mrf.mxu3  ;;  %v1641_v33 = vshll.u32 %v12461_v24, 16 }
 0x4bd   :  { %v3836_v39 = vpop.f32.mrf.mxu1  ;;  %v7007_v42 = vadd.f32 %v12189_v30, %v6729_v40  ;;  %9441 = vmatmul.msk.bf16.gmra.mxu2 %vm2098_vm1, %v12403_v26 }
 0x4bf   :  { %vm7281_vm7 = vcmp.gt.f32.partialorder %v7007_v42, 0.0  ;;  %v7555_v57 = vmul.f32 0.2, %v7007_v42 }
 0x4c0   :  { %v4580_v53 = vpop.f32.mrf.mxu2  ;;  %v2860_v47 = vpop.f32.mrf.mxu0 }
 0x4c1   :  { %v7829_v49 = vsel %vm7281_vm7, %v7007_v42, %v7555_v57  ;;  %v5064_v52 = vadd.f32 %v4580_v53, %v3835_v50  ;;  %v3837_v4 = vadd.f32 %v3836_v39, %v2860_v47 }
 0x4c2   :  { %v10125_v60 = vpack.c.bf16 %v7829_v49, %v7828_v29  ;;  %v5365_v29 = vrot.slane %v12461_v24, 1 }
 0x4c3   :  { %v6730_v11 = vadd.f32 %v6246_v20, %v5064_v52  ;;  %v1637_v52 = vshrl.u32 %v12437_v10, 16 }
 0x4c4   :  { %v6248_v63 = vpop.f32.mrf.mxu3  ;;  %10543 = vst [vmem:[%s13937_s3 + $0x210] sm:$0xff] %v10125_v60  }
 0x4c5   :  { %v3839_v59 = vpop.f32.mrf.mxu1  ;;  %v7008_v7 = vadd.f32 %v12189_v30, %v6730_v11  ;;  %v1643_v11 = vrot.slane %v1641_v33, 1 }
 0x4c7   :  { %v7556_v8 = vmul.f32 0.2, %v7008_v7  ;;  %vm7282_vm8 = vcmp.gt.f32.partialorder %v7008_v7, 0.0 }
 0x4c8   :  { %9295 = vmatmul.msk.bf16.gmra.mxu1 %vm2098_vm1, %v12341_v16  ;;  %v4582_v1 = vpop.f32.mrf.mxu2  ;;  %v2863_v17 = vpop.f32.mrf.mxu0 }
 0x4c9   :  { %9585 = vmatmul.msk.bf16.gmra.mxu3 %vm2098_vm1, %v5362_v2  ;;  %v5065_v3 = vadd.f32 %v4582_v1, %v3837_v4  ;;  %v3840_v16 = vadd.f32 %v3839_v59, %v2863_v17  ;;  %v1639_v59 = vor.u32 %v1637_v52, %v1635_v44 }
 0x4cb   :  { %v6731_v32 = vadd.f32 %v6248_v63, %v5065_v3  ;;  %9154 = vmatmul.msk.bf16.gmra.mxu0 %vm2098_vm1, %v12379_v34  ;;  %v7830_v34 = vsel %vm7282_vm8, %v7008_v7, %v7556_v8  ;;  %v5366_v63 = vsel %vm5207_vm2, %v5363_v36, %v5365_v29  ;;  %v12475_v17 = vsel %vm992_vm3, %v1639_v59, %v1643_v11  ;;  %v12485_v8 = vld [vmem:[%s13935_s0 + $0x290] sm:$0xff] }
 0x4cc   :  { %v6251_v5 = vpop.f32.mrf.mxu3  ;;  %v1649_v36 = vshll.u32 %v12485_v8, 16 }
 0x4cd   :  { %v3841_v6 = vpop.f32.mrf.mxu1  ;;  %v7009_v9 = vadd.f32 %v12189_v30, %v6731_v32  ;;  %9442 = vmatmul.msk.bf16.gmra.mxu2 %vm2098_vm1, %v12427_v31 }
 0x4cf   :  { %vm7283_vm9 = vcmp.gt.f32.partialorder %v7009_v9, 0.0  ;;  %v7557_v12 = vmul.f32 0.2, %v7009_v9 }
 0x4d0   :  { %v4585_v19 = vpop.f32.mrf.mxu2  ;;  %v2865_v15 = vpop.f32.mrf.mxu0 }
 0x4d1   :  { %v7831_v22 = vsel %vm7283_vm9, %v7009_v9, %v7557_v12  ;;  %v5066_v18 = vadd.f32 %v4585_v19, %v3840_v16  ;;  %v3842_v54 = vadd.f32 %v3841_v6, %v2865_v15 }
 0x4d2   :  { %v10130_v0 = vpack.c.bf16 %v7831_v22, %v7830_v34  ;;  %v5367_v34 = vrot.slane %v12485_v8, 1 }
 0x4d3   :  { %v6732_v41 = vadd.f32 %v6251_v5, %v5066_v18  ;;  %v1645_v18 = vshrl.u32 %v12461_v24, 16 }
 0x4d4   :  { %v6253_v28 = vpop.f32.mrf.mxu3  ;;  %10544 = vst [vmem:[%s13937_s3 + $0x218] sm:$0xff] %v10130_v0  }
 0x4d5   :  { %v3844_v45 = vpop.f32.mrf.mxu1  ;;  %v7010_v14 = vadd.f32 %v12189_v30, %v6732_v41  ;;  %v1651_v41 = vrot.slane %v1649_v36, 1 }
 0x4d7   :  { %v7558_v20 = vmul.f32 0.2, %v7010_v14  ;;  %vm7284_vm10 = vcmp.gt.f32.partialorder %v7010_v14, 0.0 }
 0x4d8   :  { %9296 = vmatmul.msk.bf16.gmra.mxu1 %vm2098_vm1, %v12365_v46  ;;  %v4587_v37 = vpop.f32.mrf.mxu2  ;;  %v2868_v58 = vpop.f32.mrf.mxu0 }
 0x4d9   :  { %9586 = vmatmul.msk.bf16.gmra.mxu3 %vm2098_vm1, %v5364_v25  ;;  %v5067_v61 = vadd.f32 %v4587_v37, %v3842_v54  ;;  %v3845_v46 = vadd.f32 %v3844_v45, %v2868_v58  ;;  %v1647_v45 = vor.u32 %v1645_v18, %v1643_v11 }
 0x4db   :  { %v6733_v43 = vadd.f32 %v6253_v28, %v5067_v61  ;;  %9155 = vmatmul.msk.bf16.gmra.mxu0 %vm2098_vm1, %v12403_v26  ;;  %v7832_v26 = vsel %vm7284_vm10, %v7010_v14, %v7558_v20  ;;  %v5368_v28 = vsel %vm5207_vm2, %v5365_v29, %v5367_v34  ;;  %v12499_v58 = vsel %vm992_vm3, %v1647_v45, %v1651_v41  ;;  %v12509_v20 = vld [vmem:[%s13935_s0 + $0x298] sm:$0xff] }
 0x4dc   :  { %v6256_v35 = vpop.f32.mrf.mxu3  ;;  %v1657_v29 = vshll.u32 %v12509_v20, 16 }
 0x4dd   :  { %v3846_v40 = vpop.f32.mrf.mxu1  ;;  %v7011_v39 = vadd.f32 %v12189_v30, %v6733_v43  ;;  %9443 = vmatmul.msk.bf16.gmra.mxu2 %vm2098_vm1, %v12451_v51 }
 0x4df   :  { %vm7285_vm11 = vcmp.gt.f32.partialorder %v7011_v39, 0.0  ;;  %v7559_v42 = vmul.f32 0.2, %v7011_v39 }
 0x4e0   :  { %v4590_v50 = vpop.f32.mrf.mxu2  ;;  %v2870_v57 = vpop.f32.mrf.mxu0 }
 0x4e1   :  { %v7833_v53 = vsel %vm7285_vm11, %v7011_v39, %v7559_v42  ;;  %v5068_v47 = vadd.f32 %v4590_v50, %v3845_v46  ;;  %v3847_v2 = vadd.f32 %v3846_v40, %v2870_v57 }
 0x4e2   :  { %v10135_v49 = vpack.c.bf16 %v7833_v53, %v7832_v26  ;;  %v5369_v26 = vrot.slane %v12509_v20, 1 }
 0x4e3   :  { %v6734_v55 = vadd.f32 %v6256_v35, %v5068_v47  ;;  %v1653_v47 = vshrl.u32 %v12485_v8, 16 }
 0x4e4   :  { %v6258_v60 = vpop.f32.mrf.mxu3  ;;  %10545 = vst [vmem:[%s13937_s3 + $0x220] sm:$0xff] %v10135_v49  }
 0x4e5   :  { %v3849_v56 = vpop.f32.mrf.mxu1  ;;  %v7012_v4 = vadd.f32 %v12189_v30, %v6734_v55  ;;  %v1659_v55 = vrot.slane %v1657_v29, 1 }
 0x4e7   :  { %v7560_v5 = vmul.f32 0.2, %v7012_v4  ;;  %vm7286_vm12 = vcmp.gt.f32.partialorder %v7012_v4, 0.0 }
 0x4e8   :  { %9297 = vmatmul.msk.bf16.gmra.mxu1 %vm2098_vm1, %v12389_v13  ;;  %v4592_v62 = vpop.f32.mrf.mxu2  ;;  %v2873_v23 = vpop.f32.mrf.mxu0 }
 0x4e9   :  { %9587 = vmatmul.msk.bf16.gmra.mxu3 %vm2098_vm1, %v5366_v63  ;;  %v5069_v1 = vadd.f32 %v4592_v62, %v3847_v2  ;;  %v3850_v13 = vadd.f32 %v3849_v56, %v2873_v23  ;;  %v1655_v56 = vor.u32 %v1653_v47, %v1651_v41  ;;  %v12548_v41 = vld [vmem:[%s13936_s2] ss:$0 sm:$0xff] }
 0x4eb   :  { %v6735_v7 = vadd.f32 %v6258_v60, %v5069_v1  ;;  %9156 = vmatmul.msk.bf16.gmra.mxu0 %vm2098_vm1, %v12427_v31  ;;  %v7834_v31 = vsel %vm7286_vm12, %v7012_v4, %v7560_v5  ;;  %v5370_v60 = vsel %vm5207_vm2, %v5367_v34, %v5369_v26  ;;  %v12523_v23 = vsel %vm992_vm3, %v1655_v56, %v1659_v55  ;;  %v12533_v5 = vld [vmem:[%s13935_s0 + $0x2a0] sm:$0xff] }
 0x4ec   :  { %v6261_v3 = vpop.f32.mrf.mxu3 }
 0x4ed   :  { %v3851_v32 = vpop.f32.mrf.mxu1  ;;  %v7013_v6 = vadd.f32 %v12189_v30, %v6735_v7  ;;  %9444 = vmatmul.msk.bf16.gmra.mxu2 %vm2098_vm1, %v12475_v17 }
 0x4ef   :  { %vm7287_vm13 = vcmp.gt.f32.partialorder %v7013_v6, 0.0  ;;  %v7561_v9 = vmul.f32 0.2, %v7013_v6 }
 0x4f0   :  { %v4595_v16 = vpop.f32.mrf.mxu2  ;;  %v2875_v12 = vpop.f32.mrf.mxu0 }
 0x4f1   :  { %v7835_v19 = vsel %vm7287_vm13, %v7013_v6, %v7561_v9  ;;  %v5070_v15 = vadd.f32 %v4595_v16, %v3850_v13  ;;  %v3852_v25 = vadd.f32 %v3851_v32, %v2875_v12 }
 0x4f2   :  { %v10140_v22 = vpack.c.bf16 %v7835_v19, %v7834_v31  ;;  %v5371_v31 = vrot.slane %v12533_v5, 1  ;;  %v1661_v19 = vshrl.u32 %v12509_v20, 16 }
 0x4f3   :  { %v6736_v38 = vadd.f32 %v6261_v3, %v5070_v15  ;;  %v1665_v15 = vshll.u32 %v12533_v5, 16 }
 0x4f4   :  { %v6263_v0 = vpop.f32.mrf.mxu3  ;;  %10546 = vst [vmem:[%s13937_s3 + $0x228] sm:$0xff] %v10140_v22   ;;  %v5372_v36 = vsel %vm5207_vm2, %v5369_v26, %v5371_v31 }
 0x4f5   :  { %v3854_v21 = vpop.f32.mrf.mxu1  ;;  %v7014_v54 = vadd.f32 %v12189_v30, %v6736_v38 }
 0x4f7   :  { %v7562_v35 = vmul.f32 0.2, %v7014_v54  ;;  %vm7288_vm14 = vcmp.gt.f32.partialorder %v7014_v54, 0.0 }
 0x4f8   :  { %9298 = vmatmul.msk.bf16.gmra.mxu1 %vm2098_vm1, %v12413_v27  ;;  %v4597_v48 = vpop.f32.mrf.mxu2  ;;  %v2878_v44 = vpop.f32.mrf.mxu0 }
 0x4f9   :  { %9588 = vmatmul.msk.bf16.gmra.mxu3 %vm2098_vm1, %v5368_v28  ;;  %v5071_v37 = vadd.f32 %v4597_v48, %v3852_v25  ;;  %v3855_v27 = vadd.f32 %v3854_v21, %v2878_v44  ;;  %v1667_v21 = vrot.slane %v1665_v15, 1 }
 0x4fb   :  { %v6737_v14 = vadd.f32 %v6263_v0, %v5071_v37  ;;  %9157 = vmatmul.msk.bf16.gmra.mxu0 %vm2098_vm1, %v12451_v51  ;;  %v7836_v51 = vsel %vm7288_vm14, %v7014_v54, %v7562_v35  ;;  %v1663_v0 = vor.u32 %v1661_v19, %v1659_v55  ;;  %v12562_v35 = vld [vmem:[%s13935_s0 + $0x2a8] sm:$0xff] }
 0x4fc   :  { %v6266_v61 = vpop.f32.mrf.mxu3  ;;  %v1673_v26 = vshll.u32 %v12562_v35, 16 }
 0x4fd   :  { %v3856_v43 = vpop.f32.mrf.mxu1  ;;  %v7015_v40 = vadd.f32 %v12189_v30, %v6737_v14  ;;  %9445 = vmatmul.msk.bf16.gmra.mxu2 %vm2098_vm1, %v12499_v58  ;;  %v12552_v44 = vsel %vm992_vm3, %v1663_v0, %v1667_v21 }
 0x4ff   :  { %vm7289_vm15 = vcmp.gt.f32.partialorder %v7015_v40, 0.0  ;;  %v7563_v39 = vmul.f32 0.2, %v7015_v40 }
 0x500   :  { %v4600_v46 = vpop.f32.mrf.mxu2  ;;  %v2880_v42 = vpop.f32.mrf.mxu0 }
 0x501   :  { %v7837_v50 = vsel %vm7289_vm15, %v7015_v40, %v7563_v39  ;;  %v5072_v57 = vadd.f32 %v4600_v46, %v3855_v27  ;;  %v3857_v63 = vadd.f32 %v3856_v43, %v2880_v42 }
 0x502   :  { %v10145_v53 = vpack.c.bf16 %v7837_v50, %v7836_v51  ;;  %v5373_v51 = vrot.slane %v12562_v35, 1 }
 0x503   :  { %v6738_v33 = vadd.f32 %v6266_v61, %v5072_v57  ;;  %v1669_v57 = vshrl.u32 %v12533_v5, 16 }
 0x504   :  { %v6268_v49 = vpop.f32.mrf.mxu3  ;;  %10547 = vst [vmem:[%s13937_s3 + $0x230] sm:$0xff] %v10145_v53  }
 0x505   :  { %v3859_v52 = vpop.f32.mrf.mxu1  ;;  %v7016_v2 = vadd.f32 %v12189_v30, %v6738_v33  ;;  %v1675_v33 = vrot.slane %v1673_v26, 1 }
 0x507   :  { %v7564_v3 = vmul.f32 0.2, %v7016_v2  ;;  %vm7290_vm0 = vcmp.gt.f32.partialorder %v7016_v2, 0.0 }
 0x508   :  { %9299 = vmatmul.msk.bf16.gmra.mxu1 %vm2098_vm1, %v12437_v10  ;;  %v4602_v59 = vpop.f32.mrf.mxu2  ;;  %v2883_v11 = vpop.f32.mrf.mxu0 }
 0x509   :  { %9589 = vmatmul.msk.bf16.gmra.mxu3 %vm2098_vm1, %v5370_v60  ;;  %v5073_v62 = vadd.f32 %v4602_v59, %v3857_v63  ;;  %v3860_v10 = vadd.f32 %v3859_v52, %v2883_v11  ;;  %v1671_v52 = vor.u32 %v1669_v57, %v1667_v21 }
 0x50b   :  { %v6739_v4 = vadd.f32 %v6268_v49, %v5073_v62  ;;  %9158 = vmatmul.msk.bf16.gmra.mxu0 %vm2098_vm1, %v12475_v17  ;;  %v7838_v17 = vsel %vm7290_vm0, %v7016_v2, %v7564_v3  ;;  %v5374_v49 = vsel %vm5207_vm2, %v5371_v31, %v5373_v51  ;;  %v12576_v11 = vsel %vm992_vm3, %v1671_v52, %v1675_v33  ;;  %v12586_v3 = vld [vmem:[%s13935_s0 + $0x2b0] sm:$0xff] }
 0x50c   :  { %v6271_v1 = vpop.f32.mrf.mxu3  ;;  %v1681_v31 = vshll.u32 %v12586_v3, 16 }
 0x50d   :  { %v3861_v7 = vpop.f32.mrf.mxu1  ;;  %v7017_v32 = vadd.f32 %v12189_v30, %v6739_v4  ;;  %9446 = vmatmul.msk.bf16.gmra.mxu2 %vm2098_vm1, %v12523_v23 }
 0x50f   :  { %vm7291_vm4 = vcmp.gt.f32.partialorder %v7017_v32, 0.0  ;;  %v7565_v6 = vmul.f32 0.2, %v7017_v32 }
 0x510   :  { %v4605_v13 = vpop.f32.mrf.mxu2  ;;  %v2885_v9 = vpop.f32.mrf.mxu0 }
 0x511   :  { %v7839_v16 = vsel %vm7291_vm4, %v7017_v32, %v7565_v6  ;;  %v5074_v12 = vadd.f32 %v4605_v13, %v3860_v10  ;;  %v3862_v38 = vadd.f32 %v3861_v7, %v2885_v9 }
 0x512   :  { %v10150_v30 = vpack.c.bf16 %v7839_v16, %v7838_v17  ;;  %v5375_v17 = vrot.slane %v12586_v3, 1 }
 0x513   :  { %v6740_v18 = vadd.f32 %v6271_v1, %v5074_v12  ;;  %v1677_v12 = vshrl.u32 %v12562_v35, 16 }
 0x514   :  { %v6273_v34 = vpop.f32.mrf.mxu3  ;;  %10548 = vst [vmem:[%s13937_s3 + $0x238] sm:$0xff] %v10150_v30  }
 0x515   :  { %v3864_v22 = vpop.f32.mrf.mxu1  ;;  %v7018_v25 = vadd.f32 %v12548_v41, %v6740_v18  ;;  %v1683_v18 = vrot.slane %v1681_v31, 1 }
 0x517   :  { %v7566_v14 = vmul.f32 0.2, %v7018_v25  ;;  %vm7292_vm5 = vcmp.gt.f32.partialorder %v7018_v25, 0.0 }
 0x518   :  { %9300 = vmatmul.msk.bf16.gmra.mxu1 %vm2098_vm1, %v12461_v24  ;;  %v4607_v28 = vpop.f32.mrf.mxu2  ;;  %v2888_v45 = vpop.f32.mrf.mxu0 }
 0x519   :  { %9590 = vmatmul.msk.bf16.gmra.mxu3 %vm2098_vm1, %v5372_v36  ;;  %v5075_v48 = vadd.f32 %v4607_v28, %v3862_v38  ;;  %v3865_v43 = vadd.f32 %v3864_v22, %v2888_v45  ;;  %v1679_v22 = vor.u32 %v1677_v12, %v1675_v33 }
 0x51b   :  { %v6741_v54 = vadd.f32 %v6273_v34, %v5075_v48  ;;  %9159 = vmatmul.msk.bf16.gmra.mxu0 %vm2098_vm1, %v12499_v58  ;;  %v7840_v58 = vsel %vm7292_vm5, %v7018_v25, %v7566_v14  ;;  %v5376_v34 = vsel %vm5207_vm2, %v5373_v51, %v5375_v17  ;;  %v12600_v45 = vsel %vm992_vm3, %v1679_v22, %v1683_v18  ;;  %v12610_v14 = vld [vmem:[%s13935_s0 + $0x2b8] sm:$0xff] }
 0x51c   :  { %v6276_v24 = vpop.f32.mrf.mxu3  ;;  %v1689_v51 = vshll.u32 %v12610_v14, 16 }
 0x51d   :  { %v3866_v37 = vpop.f32.mrf.mxu1  ;;  %v7019_v61 = vadd.f32 %v12548_v41, %v6741_v54  ;;  %9447 = vmatmul.msk.bf16.gmra.mxu2 %vm2098_vm1, %v12552_v44 }
 0x51f   :  { %vm7293_vm6 = vcmp.gt.f32.partialorder %v7019_v61, 0.0  ;;  %v7567_v40 = vmul.f32 0.2, %v7019_v61 }
 0x520   :  { %v4610_v27 = vpop.f32.mrf.mxu2  ;;  %v2890_v39 = vpop.f32.mrf.mxu0 }
 0x521   :  { %v7841_v46 = vsel %vm7293_vm6, %v7019_v61, %v7567_v40  ;;  %v5076_v42 = vadd.f32 %v4610_v27, %v3865_v43  ;;  %v3867_v60 = vadd.f32 %v3866_v37, %v2890_v39 }
 0x522   :  { %v10155_v50 = vpack.c.bf16 %v7841_v46, %v7840_v58  ;;  %v5377_v58 = vrot.slane %v12610_v14, 1 }
 0x523   :  { %v6742_v29 = vadd.f32 %v6276_v24, %v5076_v42  ;;  %v1685_v42 = vshrl.u32 %v12586_v3, 16 }
 0x524   :  { %v6278_v53 = vpop.f32.mrf.mxu3  ;;  %10549 = vst [vmem:[%s13937_s3 + $0x240] sm:$0xff] %v10155_v50  }
 0x525   :  { %v3869_v47 = vpop.f32.mrf.mxu1  ;;  %v7020_v63 = vadd.f32 %v12548_v41, %v6742_v29  ;;  %v1691_v29 = vrot.slane %v1689_v51, 1 }
 0x527   :  { %v7568_v1 = vmul.f32 0.2, %v7020_v63  ;;  %vm7294_vm7 = vcmp.gt.f32.partialorder %v7020_v63, 0.0 }
 0x528   :  { %9301 = vmatmul.msk.bf16.gmra.mxu1 %vm2098_vm1, %v12485_v8  ;;  %v4612_v56 = vpop.f32.mrf.mxu2  ;;  %v2893_v55 = vpop.f32.mrf.mxu0 }
 0x529   :  { %9591 = vmatmul.msk.bf16.gmra.mxu3 %vm2098_vm1, %v5374_v49  ;;  %v5077_v59 = vadd.f32 %v4612_v56, %v3867_v60  ;;  %v3870_v8 = vadd.f32 %v3869_v47, %v2893_v55  ;;  %v1687_v47 = vor.u32 %v1685_v42, %v1683_v18 }
 0x52b   :  { %v6743_v2 = vadd.f32 %v6278_v53, %v5077_v59  ;;  %9160 = vmatmul.msk.bf16.gmra.mxu0 %vm2098_vm1, %v12523_v23  ;;  %v7842_v23 = vsel %vm7294_vm7, %v7020_v63, %v7568_v1  ;;  %v5378_v53 = vsel %vm5207_vm2, %v5375_v17, %v5377_v58  ;;  %v12624_v55 = vsel %vm992_vm3, %v1687_v47, %v1691_v29  ;;  %v12634_v1 = vld [vmem:[%s13935_s0 + $0x2c0] sm:$0xff] }
 0x52c   :  { %v6281_v62 = vpop.f32.mrf.mxu3  ;;  %v1697_v17 = vshll.u32 %v12634_v1, 16 }
 0x52d   :  { %v3871_v4 = vpop.f32.mrf.mxu1  ;;  %v7021_v7 = vadd.f32 %v12548_v41, %v6743_v2  ;;  %9448 = vmatmul.msk.bf16.gmra.mxu2 %vm2098_vm1, %v12576_v11 }
 0x52f   :  { %vm7295_vm8 = vcmp.gt.f32.partialorder %v7021_v7, 0.0  ;;  %v7569_v32 = vmul.f32 0.2, %v7021_v7 }
 0x530   :  { %v4615_v10 = vpop.f32.mrf.mxu2  ;;  %v2895_v6 = vpop.f32.mrf.mxu0 }
 0x531   :  { %v7843_v13 = vsel %vm7295_vm8, %v7021_v7, %v7569_v32  ;;  %v5078_v9 = vadd.f32 %v4615_v10, %v3870_v8  ;;  %v3872_v36 = vadd.f32 %v3871_v4, %v2895_v6 }
 0x532   :  { %v10160_v16 = vpack.c.bf16 %v7843_v13, %v7842_v23  ;;  %v5379_v23 = vrot.slane %v12634_v1, 1 }
 0x533   :  { %v6744_v15 = vadd.f32 %v6281_v62, %v5078_v9  ;;  %v1693_v9 = vshrl.u32 %v12610_v14, 16 }
 0x534   :  { %v6283_v30 = vpop.f32.mrf.mxu3  ;;  %10550 = vst [vmem:[%s13937_s3 + $0x248] sm:$0xff] %v10160_v16  }
 0x535   :  { %v3874_v19 = vpop.f32.mrf.mxu1  ;;  %v7022_v38 = vadd.f32 %v12548_v41, %v6744_v15  ;;  %v1699_v15 = vrot.slane %v1697_v17, 1 }
 0x537   :  { %v7570_v24 = vmul.f32 0.2, %v7022_v38  ;;  %vm7296_vm9 = vcmp.gt.f32.partialorder %v7022_v38, 0.0 }
 0x538   :  { %9302 = vmatmul.msk.bf16.gmra.mxu1 %vm2098_vm1, %v12509_v20  ;;  %v4617_v0 = vpop.f32.mrf.mxu2  ;;  %v2898_v21 = vpop.f32.mrf.mxu0 }
 0x539   :  { %9592 = vmatmul.msk.bf16.gmra.mxu3 %vm2098_vm1, %v5376_v34  ;;  %v5079_v28 = vadd.f32 %v4617_v0, %v3872_v36  ;;  %v3875_v20 = vadd.f32 %v3874_v19, %v2898_v21  ;;  %v1695_v19 = vor.u32 %v1693_v9, %v1691_v29 }
 0x53b   :  { %v6745_v25 = vadd.f32 %v6283_v30, %v5079_v28  ;;  %9161 = vmatmul.msk.bf16.gmra.mxu0 %vm2098_vm1, %v12552_v44  ;;  %v7844_v44 = vsel %vm7296_vm9, %v7022_v38, %v7570_v24  ;;  %v5380_v30 = vsel %vm5207_vm2, %v5377_v58, %v5379_v23  ;;  %v12648_v21 = vsel %vm992_vm3, %v1695_v19, %v1699_v15  ;;  %v12658_v24 = vld [vmem:[%s13935_s0 + $0x2c8] sm:$0xff] }
 0x53c   :  { %v6286_v48 = vpop.f32.mrf.mxu3  ;;  %v1705_v58 = vshll.u32 %v12658_v24, 16 }
 0x53d   :  { %v3876_v54 = vpop.f32.mrf.mxu1  ;;  %v7023_v37 = vadd.f32 %v12548_v41, %v6745_v25  ;;  %9449 = vmatmul.msk.bf16.gmra.mxu2 %vm2098_vm1, %v12600_v45 }
 0x53f   :  { %vm7297_vm10 = vcmp.gt.f32.partialorder %v7023_v37, 0.0  ;;  %v7571_v61 = vmul.f32 0.2, %v7023_v37 }
 0x540   :  { %v4620_v43 = vpop.f32.mrf.mxu2  ;;  %v2900_v40 = vpop.f32.mrf.mxu0 }
 0x541   :  { %v7845_v27 = vsel %vm7297_vm10, %v7023_v37, %v7571_v61  ;;  %v5080_v39 = vadd.f32 %v4620_v43, %v3875_v20  ;;  %v3877_v49 = vadd.f32 %v3876_v54, %v2900_v40 }
 0x542   :  { %v10165_v46 = vpack.c.bf16 %v7845_v27, %v7844_v44  ;;  %v5381_v44 = vrot.slane %v12658_v24, 1 }
 0x543   :  { %v6746_v26 = vadd.f32 %v6286_v48, %v5080_v39  ;;  %v1701_v39 = vshrl.u32 %v12634_v1, 16 }
 0x544   :  { %v6288_v50 = vpop.f32.mrf.mxu3  ;;  %10551 = vst [vmem:[%s13937_s3 + $0x250] sm:$0xff] %v10165_v46  }
 0x545   :  { %v3879_v57 = vpop.f32.mrf.mxu1  ;;  %v7024_v60 = vadd.f32 %v12548_v41, %v6746_v26  ;;  %v1707_v26 = vrot.slane %v1705_v58, 1 }
 0x547   :  { %v7572_v62 = vmul.f32 0.2, %v7024_v60  ;;  %vm7298_vm11 = vcmp.gt.f32.partialorder %v7024_v60, 0.0 }
 0x548   :  { %9303 = vmatmul.msk.bf16.gmra.mxu1 %vm2098_vm1, %v12533_v5  ;;  %v4622_v52 = vpop.f32.mrf.mxu2  ;;  %v2903_v33 = vpop.f32.mrf.mxu0 }
 0x549   :  { %9593 = vmatmul.msk.bf16.gmra.mxu3 %vm2098_vm1, %v5378_v53  ;;  %v5081_v56 = vadd.f32 %v4622_v52, %v3877_v49  ;;  %v3880_v5 = vadd.f32 %v3879_v57, %v2903_v33  ;;  %v1703_v57 = vor.u32 %v1701_v39, %v1699_v15 }
 0x54b   :  { %v6747_v63 = vadd.f32 %v6288_v50, %v5081_v56  ;;  %9162 = vmatmul.msk.bf16.gmra.mxu0 %vm2098_vm1, %v12576_v11  ;;  %v7846_v11 = vsel %vm7298_vm11, %v7024_v60, %v7572_v62  ;;  %v5382_v50 = vsel %vm5207_vm2, %v5379_v23, %v5381_v44  ;;  %v12672_v33 = vsel %vm992_vm3, %v1703_v57, %v1707_v26  ;;  %v12682_v62 = vld [vmem:[%s13935_s0 + $0x2d0] sm:$0xff] }
 0x54c   :  { %v6291_v59 = vpop.f32.mrf.mxu3  ;;  %v1713_v23 = vshll.u32 %v12682_v62, 16 }
 0x54d   :  { %v3881_v2 = vpop.f32.mrf.mxu1  ;;  %v7025_v4 = vadd.f32 %v12548_v41, %v6747_v63  ;;  %9450 = vmatmul.msk.bf16.gmra.mxu2 %vm2098_vm1, %v12624_v55 }
 0x54f   :  { %vm7299_vm12 = vcmp.gt.f32.partialorder %v7025_v4, 0.0  ;;  %v7573_v7 = vmul.f32 0.2, %v7025_v4 }
 0x550   :  { %v4625_v8 = vpop.f32.mrf.mxu2  ;;  %v2905_v32 = vpop.f32.mrf.mxu0 }
 0x551   :  { %v7847_v10 = vsel %vm7299_vm12, %v7025_v4, %v7573_v7  ;;  %v5082_v6 = vadd.f32 %v4625_v8, %v3880_v5  ;;  %v3882_v34 = vadd.f32 %v3881_v2, %v2905_v32 }
 0x552   :  { %v10170_v13 = vpack.c.bf16 %v7847_v10, %v7846_v11  ;;  %v5383_v11 = vrot.slane %v12682_v62, 1 }
 0x553   :  { %v6748_v31 = vadd.f32 %v6291_v59, %v5082_v6  ;;  %v1709_v6 = vshrl.u32 %v12658_v24, 16 }
 0x554   :  { %v6293_v16 = vpop.f32.mrf.mxu3  ;;  %10552 = vst [vmem:[%s13937_s3 + $0x258] sm:$0xff] %v10170_v13  }
 0x555   :  { %v3884_v12 = vpop.f32.mrf.mxu1  ;;  %v7026_v36 = vadd.f32 %v12548_v41, %v6748_v31  ;;  %v1715_v31 = vrot.slane %v1713_v23, 1 }
 0x557   :  { %v7574_v48 = vmul.f32 0.2, %v7026_v36  ;;  %vm7300_vm13 = vcmp.gt.f32.partialorder %v7026_v36, 0.0 }
 0x558   :  { %9304 = vmatmul.msk.bf16.gmra.mxu1 %vm2098_vm1, %v12562_v35  ;;  %v4627_v22 = vpop.f32.mrf.mxu2  ;;  %v2908_v18 = vpop.f32.mrf.mxu0 }
 0x559   :  { %9594 = vmatmul.msk.bf16.gmra.mxu3 %vm2098_vm1, %v5380_v30  ;;  %v5083_v0 = vadd.f32 %v4627_v22, %v3882_v34  ;;  %v3885_v35 = vadd.f32 %v3884_v12, %v2908_v18  ;;  %v1711_v12 = vor.u32 %v1709_v6, %v1707_v26 }
 0x55b   :  { %v6749_v38 = vadd.f32 %v6293_v16, %v5083_v0  ;;  %9163 = vmatmul.msk.bf16.gmra.mxu0 %vm2098_vm1, %v12600_v45  ;;  %v7848_v45 = vsel %vm7300_vm13, %v7026_v36, %v7574_v48  ;;  %v5384_v16 = vsel %vm5207_vm2, %v5381_v44, %v5383_v11  ;;  %v12696_v18 = vsel %vm992_vm3, %v1711_v12, %v1715_v31  ;;  %v12706_v48 = vld [vmem:[%s13935_s0 + $0x2d8] sm:$0xff] }
 0x55c   :  { %v6296_v28 = vpop.f32.mrf.mxu3  ;;  %v1721_v44 = vshll.u32 %v12706_v48, 16 }
 0x55d   :  { %v3886_v25 = vpop.f32.mrf.mxu1  ;;  %v7027_v54 = vadd.f32 %v12548_v41, %v6749_v38  ;;  %9451 = vmatmul.msk.bf16.gmra.mxu2 %vm2098_vm1, %v12648_v21 }
 0x55f   :  { %vm7301_vm14 = vcmp.gt.f32.partialorder %v7027_v54, 0.0  ;;  %v7575_v37 = vmul.f32 0.2, %v7027_v54 }
 0x560   :  { %v4630_v20 = vpop.f32.mrf.mxu2  ;;  %v2910_v61 = vpop.f32.mrf.mxu0 }
 0x561   :  { %v7849_v43 = vsel %vm7301_vm14, %v7027_v54, %v7575_v37  ;;  %v5084_v40 = vadd.f32 %v4630_v20, %v3885_v35  ;;  %v3887_v53 = vadd.f32 %v3886_v25, %v2910_v61 }
 0x562   :  { %v10175_v27 = vpack.c.bf16 %v7849_v43, %v7848_v45  ;;  %v5385_v45 = vrot.slane %v12706_v48, 1 }
 0x563   :  { %v6750_v51 = vadd.f32 %v6296_v28, %v5084_v40  ;;  %v1717_v40 = vshrl.u32 %v12682_v62, 16 }
 0x564   :  { %v6298_v46 = vpop.f32.mrf.mxu3  ;;  %10553 = vst [vmem:[%s13937_s3 + $0x260] sm:$0xff] %v10175_v27  }
 0x565   :  { %v3889_v42 = vpop.f32.mrf.mxu1  ;;  %v7028_v49 = vadd.f32 %v12548_v41, %v6750_v51  ;;  %v1723_v51 = vrot.slane %v1721_v44, 1 }
 0x567   :  { %v7576_v59 = vmul.f32 0.2, %v7028_v49  ;;  %vm7302_vm15 = vcmp.gt.f32.partialorder %v7028_v49, 0.0 }
 0x568   :  { %9305 = vmatmul.msk.bf16.gmra.mxu1 %vm2098_vm1, %v12586_v3  ;;  %v4632_v47 = vpop.f32.mrf.mxu2  ;;  %v2913_v29 = vpop.f32.mrf.mxu0 }
 0x569   :  { %9595 = vmatmul.msk.bf16.gmra.mxu3 %vm2098_vm1, %v5382_v50  ;;  %v5085_v52 = vadd.f32 %v4632_v47, %v3887_v53  ;;  %v3890_v3 = vadd.f32 %v3889_v42, %v2913_v29  ;;  %v1719_v42 = vor.u32 %v1717_v40, %v1715_v31 }
 0x56b   :  { %v6751_v60 = vadd.f32 %v6298_v46, %v5085_v52  ;;  %9164 = vmatmul.msk.bf16.gmra.mxu0 %vm2098_vm1, %v12624_v55  ;;  %v7850_v55 = vsel %vm7302_vm15, %v7028_v49, %v7576_v59  ;;  %v5386_v46 = vsel %vm5207_vm2, %v5383_v11, %v5385_v45  ;;  %v12720_v29 = vsel %vm992_vm3, %v1719_v42, %v1723_v51  ;;  %v12730_v59 = vld [vmem:[%s13935_s0 + $0x2e0] sm:$0xff] }
 0x56c   :  { %v6301_v56 = vpop.f32.mrf.mxu3  ;;  %v1729_v11 = vshll.u32 %v12730_v59, 16 }
 0x56d   :  { %v3891_v63 = vpop.f32.mrf.mxu1  ;;  %v7029_v2 = vadd.f32 %v12548_v41, %v6751_v60  ;;  %9452 = vmatmul.msk.bf16.gmra.mxu2 %vm2098_vm1, %v12672_v33 }
 0x56f   :  { %vm7303_vm0 = vcmp.gt.f32.partialorder %v7029_v2, 0.0  ;;  %v7577_v4 = vmul.f32 0.2, %v7029_v2 }
 0x570   :  { %v4635_v5 = vpop.f32.mrf.mxu2  ;;  %v2915_v7 = vpop.f32.mrf.mxu0 }
 0x571   :  { %v7851_v8 = vsel %vm7303_vm0, %v7029_v2, %v7577_v4  ;;  %v5086_v32 = vadd.f32 %v4635_v5, %v3890_v3  ;;  %v3892_v30 = vadd.f32 %v3891_v63, %v2915_v7 }
 0x572   :  { %v10180_v10 = vpack.c.bf16 %v7851_v8, %v7850_v55  ;;  %v5387_v55 = vrot.slane %v12730_v59, 1 }
 0x573   :  { %v6752_v17 = vadd.f32 %v6301_v56, %v5086_v32  ;;  %v1725_v32 = vshrl.u32 %v12706_v48, 16 }
 0x574   :  { %v6303_v13 = vpop.f32.mrf.mxu3  ;;  %10554 = vst [vmem:[%s13937_s3 + $0x268] sm:$0xff] %v10180_v10  }
 0x575   :  { %v3894_v9 = vpop.f32.mrf.mxu1  ;;  %v7030_v34 = vadd.f32 %v12548_v41, %v6752_v17  ;;  %v1731_v17 = vrot.slane %v1729_v11, 1 }
 0x577   :  { %v7578_v28 = vmul.f32 0.2, %v7030_v34  ;;  %vm7304_vm4 = vcmp.gt.f32.partialorder %v7030_v34, 0.0 }
 0x578   :  { %9306 = vmatmul.msk.bf16.gmra.mxu1 %vm2098_vm1, %v12610_v14  ;;  %v4637_v19 = vpop.f32.mrf.mxu2  ;;  %v2918_v15 = vpop.f32.mrf.mxu0 }
 0x579   :  { %9596 = vmatmul.msk.bf16.gmra.mxu3 %vm2098_vm1, %v5384_v16  ;;  %v5087_v22 = vadd.f32 %v4637_v19, %v3892_v30  ;;  %v3895_v14 = vadd.f32 %v3894_v9, %v2918_v15  ;;  %v1727_v9 = vor.u32 %v1725_v32, %v1723_v51 }
 0x57b   :  { %v6753_v36 = vadd.f32 %v6303_v13, %v5087_v22  ;;  %9165 = vmatmul.msk.bf16.gmra.mxu0 %vm2098_vm1, %v12648_v21  ;;  %v7852_v21 = vsel %vm7304_vm4, %v7030_v34, %v7578_v28  ;;  %v5388_v13 = vsel %vm5207_vm2, %v5385_v45, %v5387_v55  ;;  %v12744_v15 = vsel %vm992_vm3, %v1727_v9, %v1731_v17  ;;  %v12754_v28 = vld [vmem:[%s13935_s0 + $0x2e8] sm:$0xff] }
 0x57c   :  { %v6306_v0 = vpop.f32.mrf.mxu3  ;;  %v1737_v45 = vshll.u32 %v12754_v28, 16 }
 0x57d   :  { %v3896_v38 = vpop.f32.mrf.mxu1  ;;  %v7031_v25 = vadd.f32 %v12548_v41, %v6753_v36  ;;  %9453 = vmatmul.msk.bf16.gmra.mxu2 %vm2098_vm1, %v12696_v18 }
 0x57f   :  { %vm7305_vm5 = vcmp.gt.f32.partialorder %v7031_v25, 0.0  ;;  %v7579_v54 = vmul.f32 0.2, %v7031_v25 }
 0x580   :  { %v4640_v35 = vpop.f32.mrf.mxu2  ;;  %v2920_v37 = vpop.f32.mrf.mxu0 }
 0x581   :  { %v7853_v20 = vsel %vm7305_vm5, %v7031_v25, %v7579_v54  ;;  %v5088_v61 = vadd.f32 %v4640_v35, %v3895_v14  ;;  %v3897_v50 = vadd.f32 %v3896_v38, %v2920_v37 }
 0x582   :  { %v10185_v43 = vpack.c.bf16 %v7853_v20, %v7852_v21  ;;  %v5389_v21 = vrot.slane %v12754_v28, 1 }
 0x583   :  { %v6754_v58 = vadd.f32 %v6306_v0, %v5088_v61  ;;  %v1733_v61 = vshrl.u32 %v12730_v59, 16 }
 0x584   :  { %v6308_v27 = vpop.f32.mrf.mxu3  ;;  %10555 = vst [vmem:[%s13937_s3 + $0x270] sm:$0xff] %v10185_v43  }
 0x585   :  { %v3899_v39 = vpop.f32.mrf.mxu1  ;;  %v7032_v53 = vadd.f32 %v12548_v41, %v6754_v58  ;;  %v1739_v58 = vrot.slane %v1737_v45, 1 }
 0x587   :  { %v7580_v56 = vmul.f32 0.2, %v7032_v53  ;;  %vm7306_vm6 = vcmp.gt.f32.partialorder %v7032_v53, 0.0 }
 0x588   :  { %9307 = vmatmul.msk.bf16.gmra.mxu1 %vm2098_vm1, %v12634_v1  ;;  %v4642_v57 = vpop.f32.mrf.mxu2  ;;  %v2923_v26 = vpop.f32.mrf.mxu0 }
 0x589   :  { %9597 = vmatmul.msk.bf16.gmra.mxu3 %vm2098_vm1, %v5386_v46  ;;  %v5089_v47 = vadd.f32 %v4642_v57, %v3897_v50  ;;  %v3900_v1 = vadd.f32 %v3899_v39, %v2923_v26  ;;  %v1735_v39 = vor.u32 %v1733_v61, %v1731_v17 }
 0x58b   :  { %v6755_v49 = vadd.f32 %v6308_v27, %v5089_v47  ;;  %9166 = vmatmul.msk.bf16.gmra.mxu0 %vm2098_vm1, %v12672_v33  ;;  %v7854_v33 = vsel %vm7306_vm6, %v7032_v53, %v7580_v56  ;;  %v5390_v27 = vsel %vm5207_vm2, %v5387_v55, %v5389_v21  ;;  %v12768_v26 = vsel %vm992_vm3, %v1735_v39, %v1739_v58  ;;  %v12778_v56 = vld [vmem:[%s13935_s0 + $0x2f0] sm:$0xff] }
 0x58c   :  { %v6311_v52 = vpop.f32.mrf.mxu3  ;;  %v1745_v55 = vshll.u32 %v12778_v56, 16 }
 0x58d   :  { %v3901_v60 = vpop.f32.mrf.mxu1  ;;  %v7033_v63 = vadd.f32 %v12548_v41, %v6755_v49  ;;  %9454 = vmatmul.msk.bf16.gmra.mxu2 %vm2098_vm1, %v12720_v29 }
 0x58f   :  { %vm7307_vm7 = vcmp.gt.f32.partialorder %v7033_v63, 0.0  ;;  %v7581_v2 = vmul.f32 0.2, %v7033_v63 }
 0x590   :  { %v4645_v3 = vpop.f32.mrf.mxu2  ;;  %v2925_v4 = vpop.f32.mrf.mxu0 }
 0x591   :  { %v7855_v5 = vsel %vm7307_vm7, %v7033_v63, %v7581_v2  ;;  %v5090_v7 = vadd.f32 %v4645_v3, %v3900_v1  ;;  %v3902_v16 = vadd.f32 %v3901_v60, %v2925_v4 }
 0x592   :  { %v10190_v8 = vpack.c.bf16 %v7855_v5, %v7854_v33  ;;  %v5391_v33 = vrot.slane %v12778_v56, 1 }
 0x593   :  { %v6756_v23 = vadd.f32 %v6311_v52, %v5090_v7  ;;  %v1741_v7 = vshrl.u32 %v12754_v28, 16 }
 0x594   :  { %v6313_v10 = vpop.f32.mrf.mxu3  ;;  %10556 = vst [vmem:[%s13937_s3 + $0x278] sm:$0xff] %v10190_v8  }
 0x595   :  { %v3904_v6 = vpop.f32.mrf.mxu1  ;;  %v7034_v30 = vadd.f32 %v12548_v41, %v6756_v23  ;;  %v1747_v23 = vrot.slane %v1745_v55, 1 }
 0x597   :  { %v7582_v0 = vmul.f32 0.2, %v7034_v30  ;;  %vm7308_vm8 = vcmp.gt.f32.partialorder %v7034_v30, 0.0 }
 0x598   :  { %9308 = vmatmul.msk.bf16.gmra.mxu1 %vm2098_vm1, %v12658_v24  ;;  %v4647_v12 = vpop.f32.mrf.mxu2  ;;  %v2928_v31 = vpop.f32.mrf.mxu0 }
 0x599   :  { %9598 = vmatmul.msk.bf16.gmra.mxu3 %vm2098_vm1, %v5388_v13  ;;  %v5091_v19 = vadd.f32 %v4647_v12, %v3902_v16  ;;  %v3905_v24 = vadd.f32 %v3904_v6, %v2928_v31  ;;  %v1743_v6 = vor.u32 %v1741_v7, %v1739_v58 }
 0x59b   :  { %v6757_v34 = vadd.f32 %v6313_v10, %v5091_v19  ;;  %9167 = vmatmul.msk.bf16.gmra.mxu0 %vm2098_vm1, %v12696_v18  ;;  %v7856_v18 = vsel %vm7308_vm8, %v7034_v30, %v7582_v0  ;;  %v5392_v10 = vsel %vm5207_vm2, %v5389_v21, %v5391_v33  ;;  %v12792_v31 = vsel %vm992_vm3, %v1743_v6, %v1747_v23  ;;  %v12802_v0 = vld [vmem:[%s13935_s0 + $0x2f8] sm:$0xff] }
 0x59c   :  { %v6316_v22 = vpop.f32.mrf.mxu3  ;;  %v1753_v21 = vshll.u32 %v12802_v0, 16 }
 0x59d   :  { %v3906_v36 = vpop.f32.mrf.mxu1  ;;  %v7035_v38 = vadd.f32 %v12548_v41, %v6757_v34  ;;  %9455 = vmatmul.msk.bf16.gmra.mxu2 %vm2098_vm1, %v12744_v15 }
 0x59f   :  { %vm7309_vm9 = vcmp.gt.f32.partialorder %v7035_v38, 0.0  ;;  %v7583_v25 = vmul.f32 0.2, %v7035_v38 }
 0x5a0   :  { %v4650_v14 = vpop.f32.mrf.mxu2  ;;  %v2930_v54 = vpop.f32.mrf.mxu0 }
 0x5a1   :  { %v7857_v35 = vsel %vm7309_vm9, %v7035_v38, %v7583_v25  ;;  %v5092_v37 = vadd.f32 %v4650_v14, %v3905_v24  ;;  %v3907_v46 = vadd.f32 %v3906_v36, %v2930_v54 }
 0x5a2   :  { %v10195_v20 = vpack.c.bf16 %v7857_v35, %v7856_v18  ;;  %v5393_v18 = vrot.slane %v12802_v0, 1 }
 0x5a3   :  { %v6758_v44 = vadd.f32 %v6316_v22, %v5092_v37  ;;  %v1749_v37 = vshrl.u32 %v12778_v56, 16 }
 0x5a4   :  { %v6318_v43 = vpop.f32.mrf.mxu3  ;;  %10557 = vst [vmem:[%s13937_s3 + $0x280] sm:$0xff] %v10195_v20  }
 0x5a5   :  { %v3909_v40 = vpop.f32.mrf.mxu1  ;;  %v7036_v50 = vadd.f32 %v12548_v41, %v6758_v44  ;;  %v1755_v44 = vrot.slane %v1753_v21, 1 }
 0x5a7   :  { %v7584_v52 = vmul.f32 0.2, %v7036_v50  ;;  %vm7310_vm10 = vcmp.gt.f32.partialorder %v7036_v50, 0.0 }
 0x5a8   :  { %9309 = vmatmul.msk.bf16.gmra.mxu1 %vm2098_vm1, %v12682_v62  ;;  %v4652_v42 = vpop.f32.mrf.mxu2  ;;  %v2933_v51 = vpop.f32.mrf.mxu0 }
 0x5a9   :  { %9599 = vmatmul.msk.bf16.gmra.mxu3 %vm2098_vm1, %v5390_v27  ;;  %v5093_v57 = vadd.f32 %v4652_v42, %v3907_v46  ;;  %v3910_v62 = vadd.f32 %v3909_v40, %v2933_v51  ;;  %v1751_v40 = vor.u32 %v1749_v37, %v1747_v23 }
 0x5ab   :  { %v6759_v53 = vadd.f32 %v6318_v43, %v5093_v57  ;;  %9168 = vmatmul.msk.bf16.gmra.mxu0 %vm2098_vm1, %v12720_v29  ;;  %v7858_v29 = vsel %vm7310_vm10, %v7036_v50, %v7584_v52  ;;  %v5394_v43 = vsel %vm5207_vm2, %v5391_v33, %v5393_v18  ;;  %v12816_v51 = vsel %vm992_vm3, %v1751_v40, %v1755_v44  ;;  %v12826_v52 = vld [vmem:[%s13935_s0 + $0x300] sm:$0xff] }
 0x5ac   :  { %v6321_v47 = vpop.f32.mrf.mxu3  ;;  %v1761_v33 = vshll.u32 %v12826_v52, 16 }
 0x5ad   :  { %v3911_v49 = vpop.f32.mrf.mxu1  ;;  %v7037_v60 = vadd.f32 %v12548_v41, %v6759_v53  ;;  %9456 = vmatmul.msk.bf16.gmra.mxu2 %vm2098_vm1, %v12768_v26 }
 0x5af   :  { %vm7311_vm11 = vcmp.gt.f32.partialorder %v7037_v60, 0.0  ;;  %v7585_v63 = vmul.f32 0.2, %v7037_v60 }
 0x5b0   :  { %v4655_v1 = vpop.f32.mrf.mxu2  ;;  %v2935_v2 = vpop.f32.mrf.mxu0 }
 0x5b1   :  { %v7859_v3 = vsel %vm7311_vm11, %v7037_v60, %v7585_v63  ;;  %v5094_v4 = vadd.f32 %v4655_v1, %v3910_v62  ;;  %v3912_v13 = vadd.f32 %v3911_v49, %v2935_v2 }
 0x5b2   :  { %v10200_v5 = vpack.c.bf16 %v7859_v3, %v7858_v29  ;;  %v5395_v29 = vrot.slane %v12826_v52, 1 }
 0x5b3   :  { %v6760_v11 = vadd.f32 %v6321_v47, %v5094_v4  ;;  %v1757_v4 = vshrl.u32 %v12802_v0, 16 }
 0x5b4   :  { %v6323_v8 = vpop.f32.mrf.mxu3  ;;  %10558 = vst [vmem:[%s13937_s3 + $0x288] sm:$0xff] %v10200_v5  }
 0x5b5   :  { %v3914_v32 = vpop.f32.mrf.mxu1  ;;  %v7038_v16 = vadd.f32 %v12548_v41, %v6760_v11  ;;  %v1763_v11 = vrot.slane %v1761_v33, 1 }
 0x5b7   :  { %v7586_v22 = vmul.f32 0.2, %v7038_v16  ;;  %vm7312_vm12 = vcmp.gt.f32.partialorder %v7038_v16, 0.0 }
 0x5b8   :  { %9310 = vmatmul.msk.bf16.gmra.mxu1 %vm2098_vm1, %v12706_v48  ;;  %v4657_v9 = vpop.f32.mrf.mxu2  ;;  %v2938_v17 = vpop.f32.mrf.mxu0 }
 0x5b9   :  { %9600 = vmatmul.msk.bf16.gmra.mxu3 %vm2098_vm1, %v5392_v10  ;;  %v5095_v12 = vadd.f32 %v4657_v9, %v3912_v13  ;;  %v3915_v48 = vadd.f32 %v3914_v32, %v2938_v17  ;;  %v1759_v32 = vor.u32 %v1757_v4, %v1755_v44 }
 0x5bb   :  { %v6761_v30 = vadd.f32 %v6323_v8, %v5095_v12  ;;  %9169 = vmatmul.msk.bf16.gmra.mxu0 %vm2098_vm1, %v12744_v15  ;;  %v7860_v15 = vsel %vm7312_vm12, %v7038_v16, %v7586_v22  ;;  %v5396_v8 = vsel %vm5207_vm2, %v5393_v18, %v5395_v29  ;;  %v12840_v17 = vsel %vm992_vm3, %v1759_v32, %v1763_v11  ;;  %v12850_v22 = vld [vmem:[%s13935_s0 + $0x308] sm:$0xff] }
 0x5bc   :  { %v6326_v19 = vpop.f32.mrf.mxu3  ;;  %v1769_v18 = vshll.u32 %v12850_v22, 16 }
 0x5bd   :  { %v3916_v34 = vpop.f32.mrf.mxu1  ;;  %v7039_v36 = vadd.f32 %v12548_v41, %v6761_v30  ;;  %9457 = vmatmul.msk.bf16.gmra.mxu2 %vm2098_vm1, %v12792_v31 }
 0x5bf   :  { %vm7313_vm13 = vcmp.gt.f32.partialorder %v7039_v36, 0.0  ;;  %v7587_v38 = vmul.f32 0.2, %v7039_v36 }
 0x5c0   :  { %v4660_v24 = vpop.f32.mrf.mxu2  ;;  %v2940_v25 = vpop.f32.mrf.mxu0 }
 0x5c1   :  { %v7861_v14 = vsel %vm7313_vm13, %v7039_v36, %v7587_v38  ;;  %v5096_v54 = vadd.f32 %v4660_v24, %v3915_v48  ;;  %v3917_v27 = vadd.f32 %v3916_v34, %v2940_v25 }
 0x5c2   :  { %v10205_v35 = vpack.c.bf16 %v7861_v14, %v7860_v15  ;;  %v5397_v15 = vrot.slane %v12850_v22, 1 }
 0x5c3   :  { %v6762_v45 = vadd.f32 %v6326_v19, %v5096_v54  ;;  %v1765_v54 = vshrl.u32 %v12826_v52, 16 }
 0x5c4   :  { %v6328_v20 = vpop.f32.mrf.mxu3  ;;  %10559 = vst [vmem:[%s13937_s3 + $0x290] sm:$0xff] %v10205_v35  }
 0x5c5   :  { %v3919_v61 = vpop.f32.mrf.mxu1  ;;  %v7040_v46 = vadd.f32 %v12548_v41, %v6762_v45  ;;  %v1771_v45 = vrot.slane %v1769_v18, 1 }
 0x5c7   :  { %v7588_v47 = vmul.f32 0.2, %v7040_v46  ;;  %vm7314_vm14 = vcmp.gt.f32.partialorder %v7040_v46, 0.0 }
 0x5c8   :  { %9311 = vmatmul.msk.bf16.gmra.mxu1 %vm2098_vm1, %v12730_v59  ;;  %v4662_v39 = vpop.f32.mrf.mxu2  ;;  %v2943_v58 = vpop.f32.mrf.mxu0 }
 0x5c9   :  { %9601 = vmatmul.msk.bf16.gmra.mxu3 %vm2098_vm1, %v5394_v43  ;;  %v5097_v42 = vadd.f32 %v4662_v39, %v3917_v27  ;;  %v3920_v59 = vadd.f32 %v3919_v61, %v2943_v58  ;;  %v1767_v61 = vor.u32 %v1765_v54, %v1763_v11 }
 0x5cb   :  { %v6763_v50 = vadd.f32 %v6328_v20, %v5097_v42  ;;  %9170 = vmatmul.msk.bf16.gmra.mxu0 %vm2098_vm1, %v12768_v26  ;;  %v7862_v26 = vsel %vm7314_vm14, %v7040_v46, %v7588_v47  ;;  %v5398_v20 = vsel %vm5207_vm2, %v5395_v29, %v5397_v15  ;;  %v12864_v58 = vsel %vm992_vm3, %v1767_v61, %v1771_v45  ;;  %v12874_v47 = vld [vmem:[%s13935_s0 + $0x310] sm:$0xff] }
 0x5cc   :  { %v6331_v57 = vpop.f32.mrf.mxu3  ;;  %v1777_v29 = vshll.u32 %v12874_v47, 16 }
 0x5cd   :  { %v3921_v53 = vpop.f32.mrf.mxu1  ;;  %v7041_v49 = vadd.f32 %v12548_v41, %v6763_v50  ;;  %9458 = vmatmul.msk.bf16.gmra.mxu2 %vm2098_vm1, %v12816_v51 }
 0x5cf   :  { %vm7315_vm15 = vcmp.gt.f32.partialorder %v7041_v49, 0.0  ;;  %v7589_v60 = vmul.f32 0.2, %v7041_v49 }
 0x5d0   :  { %v4665_v62 = vpop.f32.mrf.mxu2  ;;  %v2945_v63 = vpop.f32.mrf.mxu0 }
 0x5d1   :  { %v7863_v1 = vsel %vm7315_vm15, %v7041_v49, %v7589_v60  ;;  %v5098_v2 = vadd.f32 %v4665_v62, %v3920_v59  ;;  %v3922_v10 = vadd.f32 %v3921_v53, %v2945_v63 }
 0x5d2   :  { %v10210_v3 = vpack.c.bf16 %v7863_v1, %v7862_v26  ;;  %v5399_v26 = vrot.slane %v12874_v47, 1 }
 0x5d3   :  { %v6764_v55 = vadd.f32 %v6331_v57, %v5098_v2  ;;  %v1773_v2 = vshrl.u32 %v12850_v22, 16 }
 0x5d4   :  { %v6333_v5 = vpop.f32.mrf.mxu3  ;;  %10560 = vst [vmem:[%s13937_s3 + $0x298] sm:$0xff] %v10210_v3  }
 0x5d5   :  { %v3924_v7 = vpop.f32.mrf.mxu1  ;;  %v7042_v13 = vadd.f32 %v12548_v41, %v6764_v55  ;;  %v1779_v55 = vrot.slane %v1777_v29, 1 }
 0x5d7   :  { %v7590_v19 = vmul.f32 0.2, %v7042_v13  ;;  %vm7316_vm0 = vcmp.gt.f32.partialorder %v7042_v13, 0.0 }
 0x5d8   :  { %9312 = vmatmul.msk.bf16.gmra.mxu1 %vm2098_vm1, %v12754_v28  ;;  %v4667_v6 = vpop.f32.mrf.mxu2  ;;  %v2948_v23 = vpop.f32.mrf.mxu0 }
 0x5d9   :  { %9602 = vmatmul.msk.bf16.gmra.mxu3 %vm2098_vm1, %v5396_v8  ;;  %v5099_v9 = vadd.f32 %v4667_v6, %v3922_v10  ;;  %v3925_v28 = vadd.f32 %v3924_v7, %v2948_v23  ;;  %v1775_v7 = vor.u32 %v1773_v2, %v1771_v45 }
 0x5db   :  { %v6765_v16 = vadd.f32 %v6333_v5, %v5099_v9  ;;  %9171 = vmatmul.msk.bf16.gmra.mxu0 %vm2098_vm1, %v12792_v31  ;;  %v7864_v31 = vsel %vm7316_vm0, %v7042_v13, %v7590_v19  ;;  %v5400_v5 = vsel %vm5207_vm2, %v5397_v15, %v5399_v26  ;;  %v12888_v23 = vsel %vm992_vm3, %v1775_v7, %v1779_v55 }
 0x5dc   :  { %v6336_v12 = vpop.f32.mrf.mxu3 }
 0x5dd   :  { %v3926_v30 = vpop.f32.mrf.mxu1  ;;  %v7043_v34 = vadd.f32 %v12548_v41, %v6765_v16  ;;  %9459 = vmatmul.msk.bf16.gmra.mxu2 %vm2098_vm1, %v12840_v17 }
 0x5df   :  { %vm7317_vm4 = vcmp.gt.f32.partialorder %v7043_v34, 0.0  ;;  %v7591_v36 = vmul.f32 0.2, %v7043_v34 }
 0x5e0   :  { %v4670_v48 = vpop.f32.mrf.mxu2  ;;  %v2950_v38 = vpop.f32.mrf.mxu0 }
 0x5e1   :  { %v7865_v24 = vsel %vm7317_vm4, %v7043_v34, %v7591_v36  ;;  %v5100_v25 = vadd.f32 %v4670_v48, %v3925_v28  ;;  %v3927_v43 = vadd.f32 %v3926_v30, %v2950_v38 }
 0x5e2   :  { %v10215_v14 = vpack.c.bf16 %v7865_v24, %v7864_v31 }
 0x5e3   :  { %v6766_v21 = vadd.f32 %v6336_v12, %v5100_v25  ;;  %v1781_v25 = vshrl.u32 %v12874_v47, 16 }
 0x5e4   :  { %v6338_v35 = vpop.f32.mrf.mxu3  ;;  %10561 = vst [vmem:[%s13937_s3 + $0x2a0] sm:$0xff] %v10215_v14  }
 0x5e5   :  { %v3929_v37 = vpop.f32.mrf.mxu1  ;;  %v7044_v27 = vadd.f32 %v12548_v41, %v6766_v21 }
 0x5e7   :  { %v7592_v57 = vmul.f32 0.2, %v7044_v27  ;;  %vm7318_vm5 = vcmp.gt.f32.partialorder %v7044_v27, 0.0 }
 0x5e8   :  { %9313 = vmatmul.msk.bf16.gmra.mxu1 %vm2098_vm1, %v12778_v56  ;;  %v4672_v40 = vpop.f32.mrf.mxu2  ;;  %v2953_v44 = vpop.f32.mrf.mxu0 }
 0x5e9   :  { %9603 = vmatmul.msk.bf16.gmra.mxu3 %vm2098_vm1, %v5398_v20  ;;  %v5101_v39 = vadd.f32 %v4672_v40, %v3927_v43  ;;  %v3930_v56 = vadd.f32 %v3929_v37, %v2953_v44  ;;  %v1783_v37 = vor.u32 %v1781_v25, %v1779_v55 }
 0x5eb   :  { %v6767_v46 = vadd.f32 %v6338_v35, %v5101_v39  ;;  %9172 = vmatmul.msk.bf16.gmra.mxu0 %vm2098_vm1, %v12816_v51  ;;  %v7866_v51 = vsel %vm7318_vm5, %v7044_v27, %v7592_v57  ;;  %v12927_v57 = vld [vmem:[%s13935_s0 + $0x320] sm:$0xff] }
 0x5ec   :  { %v6341_v42 = vpop.f32.mrf.mxu3 }
 0x5ed   :  { %v3931_v50 = vpop.f32.mrf.mxu1  ;;  %v7045_v53 = vadd.f32 %v12548_v41, %v6767_v46  ;;  %9460 = vmatmul.msk.bf16.gmra.mxu2 %vm2098_vm1, %v12864_v58 }
 0x5ef   :  { %vm7319_vm6 = vcmp.gt.f32.partialorder %v7045_v53, 0.0  ;;  %v7593_v49 = vmul.f32 0.2, %v7045_v53 }
 0x5f0   :  { %v4675_v59 = vpop.f32.mrf.mxu2  ;;  %v2955_v60 = vpop.f32.mrf.mxu0 }
 0x5f1   :  { %v7867_v62 = vsel %vm7319_vm6, %v7045_v53, %v7593_v49  ;;  %v5102_v63 = vadd.f32 %v4675_v59, %v3930_v56  ;;  %v3932_v8 = vadd.f32 %v3931_v50, %v2955_v60 }
 0x5f2   :  { %v10220_v1 = vpack.c.bf16 %v7867_v62, %v7866_v51  ;;  %v5403_v51 = vrot.slane %v12927_v57, 1 }
 0x5f3   :  { %v6768_v33 = vadd.f32 %v6341_v42, %v5102_v63 }
 0x5f4   :  { %v6343_v3 = vpop.f32.mrf.mxu3  ;;  %10562 = vst [vmem:[%s13937_s3 + $0x2a8] sm:$0xff] %v10220_v1  }
 0x5f5   :  { %v3934_v4 = vpop.f32.mrf.mxu1  ;;  %v7046_v10 = vadd.f32 %v12548_v41, %v6768_v33  ;;  %v12903_v41 = vld [vmem:[%s13935_s0 + $0x318] sm:$0xff] }
 0x5f6   :  { %v5401_v31 = vrot.slane %v12903_v41, 1  ;;  %v1785_v15 = vshll.u32 %v12903_v41, 16  ;;  %v1789_v63 = vshrl.u32 %v12903_v41, 16 }
 0x5f7   :  { %v7594_v12 = vmul.f32 0.2, %v7046_v10  ;;  %vm7320_vm7 = vcmp.gt.f32.partialorder %v7046_v10, 0.0 }
 0x5f8   :  { %9314 = vmatmul.msk.bf16.gmra.mxu1 %vm2098_vm1, %v12802_v0  ;;  %v4677_v32 = vpop.f32.mrf.mxu2  ;;  %v2958_v11 = vpop.f32.mrf.mxu0  ;;  %v12895_v0 = vld [vmem:[%s13936_s2] ss:$0 sm:$0xff]  ;;  %v5402_v35 = vsel %vm5207_vm2, %v5399_v26, %v5401_v31  ;;  %v1787_v21 = vrot.slane %v1785_v15, 1  ;;  %v1793_v26 = vshll.u32 %v12927_v57, 16 }
 0x5f9   :  { %9604 = vmatmul.msk.bf16.gmra.mxu3 %vm2098_vm1, %v5400_v5  ;;  %v5103_v6 = vadd.f32 %v4677_v32, %v3932_v8  ;;  %v3935_v19 = vadd.f32 %v3934_v4, %v2958_v11  ;;  %v7868_v36 = vsel %vm7320_vm7, %v7046_v10, %v7594_v12  ;;  %v12951_v12 = vld [vmem:[%s13935_s0 + $0x328] sm:$0xff] }
 0x5fa   :  { %v12917_v44 = vsel %vm992_vm3, %v1783_v37, %v1787_v21  ;;  %v1791_v4 = vor.u32 %v1789_v63, %v1787_v21  ;;  %v1795_v33 = vrot.slane %v1793_v26, 1 }
 0x5fb   :  { %v6769_v13 = vadd.f32 %v6343_v3, %v5103_v6  ;;  %9173 = vmatmul.msk.bf16.gmra.mxu0 %vm2098_vm1, %v12840_v17  ;;  %v5404_v3 = vsel %vm5207_vm2, %v5401_v31, %v5403_v51  ;;  %v1801_v31 = vshll.u32 %v12951_v12, 16 }
 0x5fc   :  { %v6346_v9 = vpop.f32.mrf.mxu3  ;;  %v12941_v11 = vsel %vm992_vm3, %v1791_v4, %v1795_v33 }
 0x5fd   :  { %v3936_v16 = vpop.f32.mrf.mxu1  ;;  %v7047_v30 = vadd.f32 %v12895_v0, %v6769_v13  ;;  %9461 = vmatmul.msk.bf16.gmra.mxu2 %vm2098_vm1, %v12888_v23 }
 0x5ff   :  { %vm7321_vm8 = vcmp.gt.f32.partialorder %v7047_v30, 0.0  ;;  %v7595_v17 = vmul.f32 0.2, %v7047_v30 }
 0x600   :  { %v4680_v34 = vpop.f32.mrf.mxu2  ;;  %v2960_v28 = vpop.f32.mrf.mxu0 }
 0x601   :  { %v7869_v48 = vsel %vm7321_vm8, %v7047_v30, %v7595_v17  ;;  %v5104_v38 = vadd.f32 %v4680_v34, %v3935_v19  ;;  %v3937_v20 = vadd.f32 %v3936_v16, %v2960_v28 }
 0x602   :  { %v10225_v24 = vpack.c.bf16 %v7869_v48, %v7868_v36  ;;  %v5405_v36 = vrot.slane %v12951_v12, 1 }
 0x603   :  { %v6770_v18 = vadd.f32 %v6346_v9, %v5104_v38  ;;  %v1797_v38 = vshrl.u32 %v12927_v57, 16 }
 0x604   :  { %v6348_v14 = vpop.f32.mrf.mxu3  ;;  %10563 = vst [vmem:[%s13937_s3 + $0x2b0] sm:$0xff] %v10225_v24  }
 0x605   :  { %v3939_v54 = vpop.f32.mrf.mxu1  ;;  %v7048_v43 = vadd.f32 %v12895_v0, %v6770_v18  ;;  %v1803_v18 = vrot.slane %v1801_v31, 1 }
 0x607   :  { %v7596_v42 = vmul.f32 0.2, %v7048_v43  ;;  %vm7322_vm9 = vcmp.gt.f32.partialorder %v7048_v43, 0.0 }
 0x608   :  { %9315 = vmatmul.msk.bf16.gmra.mxu1 %vm2098_vm1, %v12826_v52  ;;  %v4682_v61 = vpop.f32.mrf.mxu2  ;;  %v2963_v45 = vpop.f32.mrf.mxu0 }
 0x609   :  { %9605 = vmatmul.msk.bf16.gmra.mxu3 %vm2098_vm1, %v5402_v35  ;;  %v5105_v40 = vadd.f32 %v4682_v61, %v3937_v20  ;;  %v3940_v52 = vadd.f32 %v3939_v54, %v2963_v45  ;;  %v1799_v54 = vor.u32 %v1797_v38, %v1795_v33 }
 0x60b   :  { %v6771_v27 = vadd.f32 %v6348_v14, %v5105_v40  ;;  %9174 = vmatmul.msk.bf16.gmra.mxu0 %vm2098_vm1, %v12864_v58  ;;  %v7870_v58 = vsel %vm7322_vm9, %v7048_v43, %v7596_v42  ;;  %v5406_v14 = vsel %vm5207_vm2, %v5403_v51, %v5405_v36  ;;  %v12965_v45 = vsel %vm992_vm3, %v1799_v54, %v1803_v18  ;;  %v12975_v42 = vld [vmem:[%s13935_s0 + $0x330] sm:$0xff] }
 0x60c   :  { %v6351_v39 = vpop.f32.mrf.mxu3  ;;  %v1809_v51 = vshll.u32 %v12975_v42, 16 }
 0x60d   :  { %v3941_v46 = vpop.f32.mrf.mxu1  ;;  %v7049_v50 = vadd.f32 %v12895_v0, %v6771_v27  ;;  %9462 = vmatmul.msk.bf16.gmra.mxu2 %vm2098_vm1, %v12917_v44 }
 0x60f   :  { %vm7323_vm10 = vcmp.gt.f32.partialorder %v7049_v50, 0.0  ;;  %v7597_v53 = vmul.f32 0.2, %v7049_v50 }
 0x610   :  { %v4685_v56 = vpop.f32.mrf.mxu2  ;;  %v2965_v49 = vpop.f32.mrf.mxu0 }
 0x611   :  { %v7871_v59 = vsel %vm7323_vm10, %v7049_v50, %v7597_v53  ;;  %v5106_v60 = vadd.f32 %v4685_v56, %v3940_v52  ;;  %v3942_v5 = vadd.f32 %v3941_v46, %v2965_v49 }
 0x612   :  { %v10230_v62 = vpack.c.bf16 %v7871_v59, %v7870_v58  ;;  %v5407_v58 = vrot.slane %v12975_v42, 1 }
 0x613   :  { %v6772_v29 = vadd.f32 %v6351_v39, %v5106_v60  ;;  %v1805_v60 = vshrl.u32 %v12951_v12, 16 }
 0x614   :  { %v6353_v1 = vpop.f32.mrf.mxu3  ;;  %10564 = vst [vmem:[%s13937_s3 + $0x2b8] sm:$0xff] %v10230_v62  }
 0x615   :  { %v3944_v2 = vpop.f32.mrf.mxu1  ;;  %v7050_v8 = vadd.f32 %v12895_v0, %v6772_v29  ;;  %v1811_v29 = vrot.slane %v1809_v51, 1 }
 0x617   :  { %v7598_v9 = vmul.f32 0.2, %v7050_v8  ;;  %vm7324_vm11 = vcmp.gt.f32.partialorder %v7050_v8, 0.0 }
 0x618   :  { %9316 = vmatmul.msk.bf16.gmra.mxu1 %vm2098_vm1, %v12850_v22  ;;  %v4687_v7 = vpop.f32.mrf.mxu2  ;;  %v2968_v55 = vpop.f32.mrf.mxu0 }
 0x619   :  { %9606 = vmatmul.msk.bf16.gmra.mxu3 %vm2098_vm1, %v5404_v3  ;;  %v5107_v32 = vadd.f32 %v4687_v7, %v3942_v5  ;;  %v3945_v22 = vadd.f32 %v3944_v2, %v2968_v55  ;;  %v1807_v2 = vor.u32 %v1805_v60, %v1803_v18 }
 0x61b   :  { %v6773_v10 = vadd.f32 %v6353_v1, %v5107_v32  ;;  %9175 = vmatmul.msk.bf16.gmra.mxu0 %vm2098_vm1, %v12888_v23  ;;  %v7872_v23 = vsel %vm7324_vm11, %v7050_v8, %v7598_v9  ;;  %v5408_v1 = vsel %vm5207_vm2, %v5405_v36, %v5407_v58  ;;  %v12989_v55 = vsel %vm992_vm3, %v1807_v2, %v1811_v29  ;;  %v12999_v9 = vld [vmem:[%s13935_s0 + $0x338] sm:$0xff] }
 0x61c   :  { %v6356_v6 = vpop.f32.mrf.mxu3  ;;  %v1817_v36 = vshll.u32 %v12999_v9, 16 }
 0x61d   :  { %v3946_v13 = vpop.f32.mrf.mxu1  ;;  %v7051_v16 = vadd.f32 %v12895_v0, %v6773_v10  ;;  %9463 = vmatmul.msk.bf16.gmra.mxu2 %vm2098_vm1, %v12941_v11 }
 0x61f   :  { %vm7325_vm12 = vcmp.gt.f32.partialorder %v7051_v16, 0.0  ;;  %v7599_v30 = vmul.f32 0.2, %v7051_v16 }
 0x620   :  { %v4690_v19 = vpop.f32.mrf.mxu2  ;;  %v2970_v17 = vpop.f32.mrf.mxu0 }
 0x621   :  { %v7873_v34 = vsel %vm7325_vm12, %v7051_v16, %v7599_v30  ;;  %v5108_v28 = vadd.f32 %v4690_v19, %v3945_v22  ;;  %v3947_v35 = vadd.f32 %v3946_v13, %v2970_v17 }
 0x622   :  { %v10235_v48 = vpack.c.bf16 %v7873_v34, %v7872_v23  ;;  %v5409_v23 = vrot.slane %v12999_v9, 1 }
 0x623   :  { %v6774_v15 = vadd.f32 %v6356_v6, %v5108_v28  ;;  %v1813_v28 = vshrl.u32 %v12975_v42, 16 }
 0x624   :  { %v6358_v24 = vpop.f32.mrf.mxu3  ;;  %10565 = vst [vmem:[%s13937_s3 + $0x2c0] sm:$0xff] %v10235_v48  }
 0x625   :  { %v3949_v25 = vpop.f32.mrf.mxu1  ;;  %v7052_v20 = vadd.f32 %v12895_v0, %v6774_v15  ;;  %v1819_v15 = vrot.slane %v1817_v36, 1 }
 0x627   :  { %v7600_v39 = vmul.f32 0.2, %v7052_v20  ;;  %vm7326_vm13 = vcmp.gt.f32.partialorder %v7052_v20, 0.0 }
 0x628   :  { %9317 = vmatmul.msk.bf16.gmra.mxu1 %vm2098_vm1, %v12874_v47  ;;  %v4692_v37 = vpop.f32.mrf.mxu2  ;;  %v2973_v21 = vpop.f32.mrf.mxu0 }
 0x629   :  { %9607 = vmatmul.msk.bf16.gmra.mxu3 %vm2098_vm1, %v5406_v14  ;;  %v5109_v61 = vadd.f32 %v4692_v37, %v3947_v35  ;;  %v3950_v47 = vadd.f32 %v3949_v25, %v2973_v21  ;;  %v1815_v25 = vor.u32 %v1813_v28, %v1811_v29 }
 0x62b   :  { %v6775_v43 = vadd.f32 %v6358_v24, %v5109_v61  ;;  %9176 = vmatmul.msk.bf16.gmra.mxu0 %vm2098_vm1, %v12917_v44  ;;  %v7874_v44 = vsel %vm7326_vm13, %v7052_v20, %v7600_v39  ;;  %v5410_v24 = vsel %vm5207_vm2, %v5407_v58, %v5409_v23  ;;  %v13013_v21 = vsel %vm992_vm3, %v1815_v25, %v1819_v15  ;;  %v13023_v39 = vld [vmem:[%s13935_s0 + $0x340] sm:$0xff] }
 0x62c   :  { %v6361_v40 = vpop.f32.mrf.mxu3  ;;  %v1825_v58 = vshll.u32 %v13023_v39, 16 }
 0x62d   :  { %v3951_v27 = vpop.f32.mrf.mxu1  ;;  %v7053_v46 = vadd.f32 %v12895_v0, %v6775_v43  ;;  %9464 = vmatmul.msk.bf16.gmra.mxu2 %vm2098_vm1, %v12965_v45 }
 0x62f   :  { %vm7327_vm14 = vcmp.gt.f32.partialorder %v7053_v46, 0.0  ;;  %v7601_v50 = vmul.f32 0.2, %v7053_v46 }
 0x630   :  { %v4695_v52 = vpop.f32.mrf.mxu2  ;;  %v2975_v53 = vpop.f32.mrf.mxu0 }
 0x631   :  { %v7875_v56 = vsel %vm7327_vm14, %v7053_v46, %v7601_v50  ;;  %v5110_v49 = vadd.f32 %v4695_v52, %v3950_v47  ;;  %v3952_v3 = vadd.f32 %v3951_v27, %v2975_v53 }
 0x632   :  { %v10240_v59 = vpack.c.bf16 %v7875_v56, %v7874_v44  ;;  %v5411_v44 = vrot.slane %v13023_v39, 1 }
 0x633   :  { %v6776_v26 = vadd.f32 %v6361_v40, %v5110_v49  ;;  %v1821_v49 = vshrl.u32 %v12999_v9, 16 }
 0x634   :  { %v6363_v62 = vpop.f32.mrf.mxu3  ;;  %10566 = vst [vmem:[%s13937_s3 + $0x2c8] sm:$0xff] %v10240_v59  }
 0x635   :  { %v3954_v63 = vpop.f32.mrf.mxu1  ;;  %v7054_v5 = vadd.f32 %v12895_v0, %v6776_v26  ;;  %v1827_v26 = vrot.slane %v1825_v58, 1 }
 0x637   :  { %v7602_v6 = vmul.f32 0.2, %v7054_v5  ;;  %vm7328_vm15 = vcmp.gt.f32.partialorder %v7054_v5, 0.0 }
 0x638   :  { %9318 = vmatmul.msk.bf16.gmra.mxu1 %vm2098_vm1, %v12903_v41  ;;  %v4697_v4 = vpop.f32.mrf.mxu2  ;;  %v2978_v33 = vpop.f32.mrf.mxu0 }
 0x639   :  { %9608 = vmatmul.msk.bf16.gmra.mxu3 %vm2098_vm1, %v5408_v1  ;;  %v5111_v7 = vadd.f32 %v4697_v4, %v3952_v3  ;;  %v3955_v41 = vadd.f32 %v3954_v63, %v2978_v33  ;;  %v1823_v63 = vor.u32 %v1821_v49, %v1819_v15 }
 0x63b   :  { %v6777_v8 = vadd.f32 %v6363_v62, %v5111_v7  ;;  %9177 = vmatmul.msk.bf16.gmra.mxu0 %vm2098_vm1, %v12941_v11  ;;  %v7876_v11 = vsel %vm7328_vm15, %v7054_v5, %v7602_v6  ;;  %v5412_v62 = vsel %vm5207_vm2, %v5409_v23, %v5411_v44  ;;  %v13037_v33 = vsel %vm992_vm3, %v1823_v63, %v1827_v26  ;;  %v13047_v6 = vld [vmem:[%s13935_s0 + $0x348] sm:$0xff] }
 0x63c   :  { %v6366_v32 = vpop.f32.mrf.mxu3  ;;  %v1833_v23 = vshll.u32 %v13047_v6, 16 }
 0x63d   :  { %v3956_v10 = vpop.f32.mrf.mxu1  ;;  %v7055_v13 = vadd.f32 %v12895_v0, %v6777_v8  ;;  %9465 = vmatmul.msk.bf16.gmra.mxu2 %vm2098_vm1, %v12989_v55 }
 0x63f   :  { %vm7329_vm0 = vcmp.gt.f32.partialorder %v7055_v13, 0.0  ;;  %v7603_v16 = vmul.f32 0.2, %v7055_v13 }
 0x640   :  { %v4700_v22 = vpop.f32.mrf.mxu2  ;;  %v2980_v30 = vpop.f32.mrf.mxu0 }
 0x641   :  { %v7877_v19 = vsel %vm7329_vm0, %v7055_v13, %v7603_v16  ;;  %v5112_v17 = vadd.f32 %v4700_v22, %v3955_v41  ;;  %v3957_v14 = vadd.f32 %v3956_v10, %v2980_v30 }
 0x642   :  { %v10245_v34 = vpack.c.bf16 %v7877_v19, %v7876_v11  ;;  %v5413_v11 = vrot.slane %v13047_v6, 1 }
 0x643   :  { %v6778_v31 = vadd.f32 %v6366_v32, %v5112_v17  ;;  %v1829_v17 = vshrl.u32 %v13023_v39, 16 }
 0x644   :  { %v6368_v48 = vpop.f32.mrf.mxu3  ;;  %10567 = vst [vmem:[%s13937_s3 + $0x2d0] sm:$0xff] %v10245_v34  }
 0x645   :  { %v3959_v38 = vpop.f32.mrf.mxu1  ;;  %v7056_v35 = vadd.f32 %v12895_v0, %v6778_v31  ;;  %v1835_v31 = vrot.slane %v1833_v23, 1 }
 0x647   :  { %v7604_v40 = vmul.f32 0.2, %v7056_v35  ;;  %vm7330_vm4 = vcmp.gt.f32.partialorder %v7056_v35, 0.0 }
 0x648   :  { %9319 = vmatmul.msk.bf16.gmra.mxu1 %vm2098_vm1, %v12927_v57  ;;  %v4702_v54 = vpop.f32.mrf.mxu2  ;;  %v2983_v18 = vpop.f32.mrf.mxu0 }
 0x649   :  { %9609 = vmatmul.msk.bf16.gmra.mxu3 %vm2098_vm1, %v5410_v24  ;;  %v5113_v37 = vadd.f32 %v4702_v54, %v3957_v14  ;;  %v3960_v57 = vadd.f32 %v3959_v38, %v2983_v18  ;;  %v1831_v38 = vor.u32 %v1829_v17, %v1827_v26 }
 0x64b   :  { %v6779_v20 = vadd.f32 %v6368_v48, %v5113_v37  ;;  %9178 = vmatmul.msk.bf16.gmra.mxu0 %vm2098_vm1, %v12965_v45  ;;  %v7878_v45 = vsel %vm7330_vm4, %v7056_v35, %v7604_v40  ;;  %v5414_v48 = vsel %vm5207_vm2, %v5411_v44, %v5413_v11  ;;  %v13061_v18 = vsel %vm992_vm3, %v1831_v38, %v1835_v31  ;;  %v13071_v40 = vld [vmem:[%s13935_s0 + $0x350] sm:$0xff] }
 0x64c   :  { %v6371_v61 = vpop.f32.mrf.mxu3  ;;  %v1841_v44 = vshll.u32 %v13071_v40, 16 }
 0x64d   :  { %v3961_v43 = vpop.f32.mrf.mxu1  ;;  %v7057_v27 = vadd.f32 %v12895_v0, %v6779_v20  ;;  %9466 = vmatmul.msk.bf16.gmra.mxu2 %vm2098_vm1, %v13013_v21 }
 0x64f   :  { %vm7331_vm5 = vcmp.gt.f32.partialorder %v7057_v27, 0.0  ;;  %v7605_v46 = vmul.f32 0.2, %v7057_v27 }
 0x650   :  { %v4705_v47 = vpop.f32.mrf.mxu2  ;;  %v2985_v50 = vpop.f32.mrf.mxu0 }
 0x651   :  { %v7879_v52 = vsel %vm7331_vm5, %v7057_v27, %v7605_v46  ;;  %v5114_v53 = vadd.f32 %v4705_v47, %v3960_v57  ;;  %v3962_v1 = vadd.f32 %v3961_v43, %v2985_v50 }
 0x652   :  { %v10250_v56 = vpack.c.bf16 %v7879_v52, %v7878_v45  ;;  %v5415_v45 = vrot.slane %v13071_v40, 1 }
 0x653   :  { %v6780_v51 = vadd.f32 %v6371_v61, %v5114_v53  ;;  %v1837_v53 = vshrl.u32 %v13047_v6, 16 }
 0x654   :  { %v6373_v59 = vpop.f32.mrf.mxu3  ;;  %10568 = vst [vmem:[%s13937_s3 + $0x2d8] sm:$0xff] %v10250_v56  }
 0x655   :  { %v3964_v60 = vpop.f32.mrf.mxu1  ;;  %v7058_v3 = vadd.f32 %v12895_v0, %v6780_v51  ;;  %v1843_v51 = vrot.slane %v1841_v44, 1 }
 0x657   :  { %v7606_v32 = vmul.f32 0.2, %v7058_v3  ;;  %vm7332_vm6 = vcmp.gt.f32.partialorder %v7058_v3, 0.0 }
 0x658   :  { %9320 = vmatmul.msk.bf16.gmra.mxu1 %vm2098_vm1, %v12951_v12  ;;  %v4707_v2 = vpop.f32.mrf.mxu2  ;;  %v2988_v29 = vpop.f32.mrf.mxu0 }
 0x659   :  { %9610 = vmatmul.msk.bf16.gmra.mxu3 %vm2098_vm1, %v5412_v62  ;;  %v5115_v4 = vadd.f32 %v4707_v2, %v3962_v1  ;;  %v3965_v12 = vadd.f32 %v3964_v60, %v2988_v29  ;;  %v1839_v60 = vor.u32 %v1837_v53, %v1835_v31 }
 0x65b   :  { %v6781_v5 = vadd.f32 %v6373_v59, %v5115_v4  ;;  %9179 = vmatmul.msk.bf16.gmra.mxu0 %vm2098_vm1, %v12989_v55  ;;  %v7880_v55 = vsel %vm7332_vm6, %v7058_v3, %v7606_v32  ;;  %v5416_v59 = vsel %vm5207_vm2, %v5413_v11, %v5415_v45  ;;  %v13085_v29 = vsel %vm992_vm3, %v1839_v60, %v1843_v51  ;;  %v13095_v32 = vld [vmem:[%s13935_s0 + $0x358] sm:$0xff] }
 0x65c   :  { %v6376_v7 = vpop.f32.mrf.mxu3  ;;  %v1849_v11 = vshll.u32 %v13095_v32, 16 }
 0x65d   :  { %v3966_v8 = vpop.f32.mrf.mxu1  ;;  %v7059_v10 = vadd.f32 %v12895_v0, %v6781_v5  ;;  %9467 = vmatmul.msk.bf16.gmra.mxu2 %vm2098_vm1, %v13037_v33 }
 0x65f   :  { %vm7333_vm7 = vcmp.gt.f32.partialorder %v7059_v10, 0.0  ;;  %v7607_v13 = vmul.f32 0.2, %v7059_v10 }
 0x660   :  { %v4710_v41 = vpop.f32.mrf.mxu2  ;;  %v2990_v16 = vpop.f32.mrf.mxu0 }
 0x661   :  { %v7881_v22 = vsel %vm7333_vm7, %v7059_v10, %v7607_v13  ;;  %v5116_v30 = vadd.f32 %v4710_v41, %v3965_v12  ;;  %v3967_v24 = vadd.f32 %v3966_v8, %v2990_v16 }
 0x662   :  { %v10255_v19 = vpack.c.bf16 %v7881_v22, %v7880_v55  ;;  %v5417_v55 = vrot.slane %v13095_v32, 1 }
 0x663   :  { %v6782_v36 = vadd.f32 %v6376_v7, %v5116_v30  ;;  %v1845_v30 = vshrl.u32 %v13071_v40, 16 }
 0x664   :  { %v6378_v34 = vpop.f32.mrf.mxu3  ;;  %10569 = vst [vmem:[%s13937_s3 + $0x2e0] sm:$0xff] %v10255_v19  }
 0x665   :  { %v3969_v28 = vpop.f32.mrf.mxu1  ;;  %v7060_v14 = vadd.f32 %v12895_v0, %v6782_v36  ;;  %v1851_v36 = vrot.slane %v1849_v11, 1 }
 0x667   :  { %v7608_v61 = vmul.f32 0.2, %v7060_v14  ;;  %vm7334_vm8 = vcmp.gt.f32.partialorder %v7060_v14, 0.0 }
 0x668   :  { %9321 = vmatmul.msk.bf16.gmra.mxu1 %vm2098_vm1, %v12975_v42  ;;  %v4712_v25 = vpop.f32.mrf.mxu2  ;;  %v2993_v15 = vpop.f32.mrf.mxu0 }
 0x669   :  { %9611 = vmatmul.msk.bf16.gmra.mxu3 %vm2098_vm1, %v5414_v48  ;;  %v5117_v54 = vadd.f32 %v4712_v25, %v3967_v24  ;;  %v3970_v42 = vadd.f32 %v3969_v28, %v2993_v15  ;;  %v1847_v28 = vor.u32 %v1845_v30, %v1843_v51 }
 0x66b   :  { %v6783_v35 = vadd.f32 %v6378_v34, %v5117_v54  ;;  %9180 = vmatmul.msk.bf16.gmra.mxu0 %vm2098_vm1, %v13013_v21  ;;  %v7882_v21 = vsel %vm7334_vm8, %v7060_v14, %v7608_v61  ;;  %v5418_v34 = vsel %vm5207_vm2, %v5415_v45, %v5417_v55  ;;  %v13109_v15 = vsel %vm992_vm3, %v1847_v28, %v1851_v36  ;;  %v13119_v61 = vld [vmem:[%s13935_s0 + $0x360] sm:$0xff] }
 0x66c   :  { %v6381_v37 = vpop.f32.mrf.mxu3  ;;  %v1857_v45 = vshll.u32 %v13119_v61, 16 }
 0x66d   :  { %v3971_v20 = vpop.f32.mrf.mxu1  ;;  %v7061_v43 = vadd.f32 %v12895_v0, %v6783_v35  ;;  %9468 = vmatmul.msk.bf16.gmra.mxu2 %vm2098_vm1, %v13061_v18 }
 0x66f   :  { %vm7335_vm9 = vcmp.gt.f32.partialorder %v7061_v43, 0.0  ;;  %v7609_v27 = vmul.f32 0.2, %v7061_v43 }
 0x670   :  { %v4715_v57 = vpop.f32.mrf.mxu2  ;;  %v2995_v46 = vpop.f32.mrf.mxu0 }
 0x671   :  { %v7883_v47 = vsel %vm7335_vm9, %v7061_v43, %v7609_v27  ;;  %v5118_v50 = vadd.f32 %v4715_v57, %v3970_v42  ;;  %v3972_v62 = vadd.f32 %v3971_v20, %v2995_v46 }
 0x672   :  { %v10260_v52 = vpack.c.bf16 %v7883_v47, %v7882_v21  ;;  %v5419_v21 = vrot.slane %v13119_v61, 1 }
 0x673   :  { %v6784_v58 = vadd.f32 %v6381_v37, %v5118_v50  ;;  %v1853_v50 = vshrl.u32 %v13095_v32, 16 }
 0x674   :  { %v6383_v56 = vpop.f32.mrf.mxu3  ;;  %10570 = vst [vmem:[%s13937_s3 + $0x2e8] sm:$0xff] %v10260_v52  }
 0x675   :  { %v3974_v49 = vpop.f32.mrf.mxu1  ;;  %v7062_v1 = vadd.f32 %v12895_v0, %v6784_v58  ;;  %v1859_v58 = vrot.slane %v1857_v45, 1 }
 0x677   :  { %v7610_v7 = vmul.f32 0.2, %v7062_v1  ;;  %vm7336_vm10 = vcmp.gt.f32.partialorder %v7062_v1, 0.0 }
 0x678   :  { %9322 = vmatmul.msk.bf16.gmra.mxu1 %vm2098_vm1, %v12999_v9  ;;  %v4717_v63 = vpop.f32.mrf.mxu2  ;;  %v2998_v26 = vpop.f32.mrf.mxu0 }
 0x679   :  { %9612 = vmatmul.msk.bf16.gmra.mxu3 %vm2098_vm1, %v5416_v59  ;;  %v5119_v2 = vadd.f32 %v4717_v63, %v3972_v62  ;;  %v3975_v9 = vadd.f32 %v3974_v49, %v2998_v26  ;;  %v1855_v49 = vor.u32 %v1853_v50, %v1851_v36 }
 0x67b   :  { %v6785_v3 = vadd.f32 %v6383_v56, %v5119_v2  ;;  %9181 = vmatmul.msk.bf16.gmra.mxu0 %vm2098_vm1, %v13037_v33  ;;  %v7884_v33 = vsel %vm7336_vm10, %v7062_v1, %v7610_v7  ;;  %v5420_v56 = vsel %vm5207_vm2, %v5417_v55, %v5419_v21  ;;  %v13133_v26 = vsel %vm992_vm3, %v1855_v49, %v1859_v58  ;;  %v13143_v7 = vld [vmem:[%s13935_s0 + $0x368] sm:$0xff] }
 0x67c   :  { %v6386_v4 = vpop.f32.mrf.mxu3  ;;  %v1865_v55 = vshll.u32 %v13143_v7, 16 }
 0x67d   :  { %v3976_v5 = vpop.f32.mrf.mxu1  ;;  %v7063_v8 = vadd.f32 %v12895_v0, %v6785_v3  ;;  %9469 = vmatmul.msk.bf16.gmra.mxu2 %vm2098_vm1, %v13085_v29 }
 0x67f   :  { %vm7337_vm11 = vcmp.gt.f32.partialorder %v7063_v8, 0.0  ;;  %v7611_v10 = vmul.f32 0.2, %v7063_v8 }
 0x680   :  { %v4720_v12 = vpop.f32.mrf.mxu2  ;;  %v3000_v13 = vpop.f32.mrf.mxu0 }
 0x681   :  { %v7885_v41 = vsel %vm7337_vm11, %v7063_v8, %v7611_v10  ;;  %v5120_v16 = vadd.f32 %v4720_v12, %v3975_v9  ;;  %v3977_v48 = vadd.f32 %v3976_v5, %v3000_v13 }
 0x682   :  { %v10265_v22 = vpack.c.bf16 %v7885_v41, %v7884_v33  ;;  %v5421_v33 = vrot.slane %v13143_v7, 1 }
 0x683   :  { %v6786_v23 = vadd.f32 %v6386_v4, %v5120_v16  ;;  %v1861_v16 = vshrl.u32 %v13119_v61, 16 }
 0x684   :  { %v6388_v19 = vpop.f32.mrf.mxu3  ;;  %10571 = vst [vmem:[%s13937_s3 + $0x2f0] sm:$0xff] %v10265_v22  }
 0x685   :  { %v3979_v17 = vpop.f32.mrf.mxu1  ;;  %v7064_v24 = vadd.f32 %v12895_v0, %v6786_v23  ;;  %v1867_v23 = vrot.slane %v1865_v55, 1 }
 0x687   :  { %v7612_v37 = vmul.f32 0.2, %v7064_v24  ;;  %vm7338_vm12 = vcmp.gt.f32.partialorder %v7064_v24, 0.0 }
 0x688   :  { %9323 = vmatmul.msk.bf16.gmra.mxu1 %vm2098_vm1, %v13023_v39  ;;  %v4722_v38 = vpop.f32.mrf.mxu2  ;;  %v3003_v31 = vpop.f32.mrf.mxu0 }
 0x689   :  { %9613 = vmatmul.msk.bf16.gmra.mxu3 %vm2098_vm1, %v5418_v34  ;;  %v5121_v25 = vadd.f32 %v4722_v38, %v3977_v48  ;;  %v3980_v39 = vadd.f32 %v3979_v17, %v3003_v31  ;;  %v1863_v17 = vor.u32 %v1861_v16, %v1859_v58 }
 0x68b   :  { %v6787_v14 = vadd.f32 %v6388_v19, %v5121_v25  ;;  %9182 = vmatmul.msk.bf16.gmra.mxu0 %vm2098_vm1, %v13061_v18  ;;  %v7886_v18 = vsel %vm7338_vm12, %v7064_v24, %v7612_v37  ;;  %v5422_v19 = vsel %vm5207_vm2, %v5419_v21, %v5421_v33  ;;  %v13157_v31 = vsel %vm992_vm3, %v1863_v17, %v1867_v23  ;;  %v13167_v37 = vld [vmem:[%s13935_s0 + $0x370] sm:$0xff] }
 0x68c   :  { %v6391_v54 = vpop.f32.mrf.mxu3  ;;  %v1873_v21 = vshll.u32 %v13167_v37, 16 }
 0x68d   :  { %v3981_v35 = vpop.f32.mrf.mxu1  ;;  %v7065_v20 = vadd.f32 %v12895_v0, %v6787_v14  ;;  %9470 = vmatmul.msk.bf16.gmra.mxu2 %vm2098_vm1, %v13109_v15 }
 0x68f   :  { %vm7339_vm13 = vcmp.gt.f32.partialorder %v7065_v20, 0.0  ;;  %v7613_v43 = vmul.f32 0.2, %v7065_v20 }
 0x690   :  { %v4725_v42 = vpop.f32.mrf.mxu2  ;;  %v3005_v27 = vpop.f32.mrf.mxu0 }
 0x691   :  { %v7887_v57 = vsel %vm7339_vm13, %v7065_v20, %v7613_v43  ;;  %v5122_v46 = vadd.f32 %v4725_v42, %v3980_v39  ;;  %v3982_v59 = vadd.f32 %v3981_v35, %v3005_v27 }
 0x692   :  { %v10270_v47 = vpack.c.bf16 %v7887_v57, %v7886_v18  ;;  %v5423_v18 = vrot.slane %v13167_v37, 1 }
 0x693   :  { %v6788_v44 = vadd.f32 %v6391_v54, %v5122_v46  ;;  %v1869_v46 = vshrl.u32 %v13143_v7, 16 }
 0x694   :  { %v6393_v52 = vpop.f32.mrf.mxu3  ;;  %10572 = vst [vmem:[%s13937_s3 + $0x2f8] sm:$0xff] %v10270_v47  }
 0x695   :  { %v3984_v53 = vpop.f32.mrf.mxu1  ;;  %v7066_v62 = vadd.f32 %v12895_v0, %v6788_v44  ;;  %v1875_v44 = vrot.slane %v1873_v21, 1 }
 0x697   :  { %v7614_v4 = vmul.f32 0.2, %v7066_v62  ;;  %vm7340_vm14 = vcmp.gt.f32.partialorder %v7066_v62, 0.0 }
 0x698   :  { %9324 = vmatmul.msk.bf16.gmra.mxu1 %vm2098_vm1, %v13047_v6  ;;  %v4727_v60 = vpop.f32.mrf.mxu2  ;;  %v3008_v51 = vpop.f32.mrf.mxu0 }
 0x699   :  { %9614 = vmatmul.msk.bf16.gmra.mxu3 %vm2098_vm1, %v5420_v56  ;;  %v5123_v63 = vadd.f32 %v4727_v60, %v3982_v59  ;;  %v3985_v6 = vadd.f32 %v3984_v53, %v3008_v51  ;;  %v1871_v53 = vor.u32 %v1869_v46, %v1867_v23 }
 0x69b   :  { %v6789_v1 = vadd.f32 %v6393_v52, %v5123_v63  ;;  %9183 = vmatmul.msk.bf16.gmra.mxu0 %vm2098_vm1, %v13085_v29  ;;  %v7888_v29 = vsel %vm7340_vm14, %v7066_v62, %v7614_v4  ;;  %v5424_v52 = vsel %vm5207_vm2, %v5421_v33, %v5423_v18  ;;  %v13181_v51 = vsel %vm992_vm3, %v1871_v53, %v1875_v44  ;;  %v13191_v4 = vld [vmem:[%s13935_s0 + $0x378] sm:$0xff] }
 0x69c   :  { %v6396_v2 = vpop.f32.mrf.mxu3  ;;  %v1881_v33 = vshll.u32 %v13191_v4, 16 }
 0x69d   :  { %v3986_v3 = vpop.f32.mrf.mxu1  ;;  %v7067_v5 = vadd.f32 %v12895_v0, %v6789_v1  ;;  %9471 = vmatmul.msk.bf16.gmra.mxu2 %vm2098_vm1, %v13133_v26 }
 0x69f   :  { %vm7341_vm15 = vcmp.gt.f32.partialorder %v7067_v5, 0.0  ;;  %v7615_v8 = vmul.f32 0.2, %v7067_v5 }
 0x6a0   :  { %v4730_v9 = vpop.f32.mrf.mxu2  ;;  %v3010_v10 = vpop.f32.mrf.mxu0 }
 0x6a1   :  { %v7889_v12 = vsel %vm7341_vm15, %v7067_v5, %v7615_v8  ;;  %v5124_v13 = vadd.f32 %v4730_v9, %v3985_v6  ;;  %v3987_v34 = vadd.f32 %v3986_v3, %v3010_v10 }
 0x6a2   :  { %v10275_v41 = vpack.c.bf16 %v7889_v12, %v7888_v29  ;;  %v5425_v29 = vrot.slane %v13191_v4, 1 }
 0x6a3   :  { %v6790_v11 = vadd.f32 %v6396_v2, %v5124_v13  ;;  %v1877_v13 = vshrl.u32 %v13167_v37, 16 }
 0x6a4   :  { %v6398_v22 = vpop.f32.mrf.mxu3  ;;  %10573 = vst [vmem:[%s13937_s3 + $0x300] sm:$0xff] %v10275_v41  }
 0x6a5   :  { %v3989_v30 = vpop.f32.mrf.mxu1  ;;  %v7068_v48 = vadd.f32 %v12895_v0, %v6790_v11  ;;  %v1883_v11 = vrot.slane %v1881_v33, 1 }
 0x6a7   :  { %v7616_v54 = vmul.f32 0.2, %v7068_v48  ;;  %vm7342_vm0 = vcmp.gt.f32.partialorder %v7068_v48, 0.0 }
 0x6a8   :  { %9325 = vmatmul.msk.bf16.gmra.mxu1 %vm2098_vm1, %v13071_v40  ;;  %v4732_v28 = vpop.f32.mrf.mxu2  ;;  %v3013_v36 = vpop.f32.mrf.mxu0 }
 0x6a9   :  { %9615 = vmatmul.msk.bf16.gmra.mxu3 %vm2098_vm1, %v5422_v19  ;;  %v5125_v38 = vadd.f32 %v4732_v28, %v3987_v34  ;;  %v3990_v40 = vadd.f32 %v3989_v30, %v3013_v36  ;;  %v1879_v30 = vor.u32 %v1877_v13, %v1875_v44 }
 0x6ab   :  { %v6791_v24 = vadd.f32 %v6398_v22, %v5125_v38  ;;  %9184 = vmatmul.msk.bf16.gmra.mxu0 %vm2098_vm1, %v13109_v15  ;;  %v7890_v15 = vsel %vm7342_vm0, %v7068_v48, %v7616_v54  ;;  %v5426_v22 = vsel %vm5207_vm2, %v5423_v18, %v5425_v29  ;;  %v13205_v36 = vsel %vm992_vm3, %v1879_v30, %v1883_v11  ;;  %v13215_v54 = vld [vmem:[%s13935_s0 + $0x380] sm:$0xff] }
 0x6ac   :  { %v6401_v25 = vpop.f32.mrf.mxu3  ;;  %v1889_v18 = vshll.u32 %v13215_v54, 16 }
 0x6ad   :  { %v3991_v14 = vpop.f32.mrf.mxu1  ;;  %v7069_v35 = vadd.f32 %v12895_v0, %v6791_v24  ;;  %9472 = vmatmul.msk.bf16.gmra.mxu2 %vm2098_vm1, %v13157_v31 }
 0x6af   :  { %vm7343_vm4 = vcmp.gt.f32.partialorder %v7069_v35, 0.0  ;;  %v7617_v20 = vmul.f32 0.2, %v7069_v35 }
 0x6b0   :  { %v4735_v39 = vpop.f32.mrf.mxu2  ;;  %v3015_v43 = vpop.f32.mrf.mxu0 }
 0x6b1   :  { %v7891_v42 = vsel %vm7343_vm4, %v7069_v35, %v7617_v20  ;;  %v5126_v27 = vadd.f32 %v4735_v39, %v3990_v40  ;;  %v3992_v56 = vadd.f32 %v3991_v14, %v3015_v43 }
 0x6b2   :  { %v10280_v57 = vpack.c.bf16 %v7891_v42, %v7890_v15  ;;  %v5427_v15 = vrot.slane %v13215_v54, 1 }
 0x6b3   :  { %v6792_v45 = vadd.f32 %v6401_v25, %v5126_v27  ;;  %v1885_v27 = vshrl.u32 %v13191_v4, 16 }
 0x6b4   :  { %v6403_v47 = vpop.f32.mrf.mxu3  ;;  %10574 = vst [vmem:[%s13937_s3 + $0x308] sm:$0xff] %v10280_v57  }
 0x6b5   :  { %v3994_v50 = vpop.f32.mrf.mxu1  ;;  %v7070_v59 = vadd.f32 %v12895_v0, %v6792_v45  ;;  %v1891_v45 = vrot.slane %v1889_v18, 1 }
 0x6b7   :  { %v7618_v2 = vmul.f32 0.2, %v7070_v59  ;;  %vm7344_vm5 = vcmp.gt.f32.partialorder %v7070_v59, 0.0 }
 0x6b8   :  { %9326 = vmatmul.msk.bf16.gmra.mxu1 %vm2098_vm1, %v13095_v32  ;;  %v4737_v49 = vpop.f32.mrf.mxu2  ;;  %v3018_v58 = vpop.f32.mrf.mxu0 }
 0x6b9   :  { %9616 = vmatmul.msk.bf16.gmra.mxu3 %vm2098_vm1, %v5424_v52  ;;  %v5127_v60 = vadd.f32 %v4737_v49, %v3992_v56  ;;  %v3995_v32 = vadd.f32 %v3994_v50, %v3018_v58  ;;  %v1887_v50 = vor.u32 %v1885_v27, %v1883_v11  ;;  %v13254_v11 = vld [vmem:[%s13936_s2] ss:$0 sm:$0xff] }
 0x6bb   :  { %v6793_v62 = vadd.f32 %v6403_v47, %v5127_v60  ;;  %9185 = vmatmul.msk.bf16.gmra.mxu0 %vm2098_vm1, %v13133_v26  ;;  %v7892_v26 = vsel %vm7344_vm5, %v7070_v59, %v7618_v2  ;;  %v5428_v47 = vsel %vm5207_vm2, %v5425_v29, %v5427_v15  ;;  %v13229_v58 = vsel %vm992_vm3, %v1887_v50, %v1891_v45  ;;  %v13239_v2 = vld [vmem:[%s13935_s0 + $0x388] sm:$0xff] }
 0x6bc   :  { %v6406_v63 = vpop.f32.mrf.mxu3 }
 0x6bd   :  { %v3996_v1 = vpop.f32.mrf.mxu1  ;;  %v7071_v3 = vadd.f32 %v12895_v0, %v6793_v62  ;;  %9473 = vmatmul.msk.bf16.gmra.mxu2 %vm2098_vm1, %v13181_v51 }
 0x6bf   :  { %vm7345_vm6 = vcmp.gt.f32.partialorder %v7071_v3, 0.0  ;;  %v7619_v5 = vmul.f32 0.2, %v7071_v3 }
 0x6c0   :  { %v4740_v6 = vpop.f32.mrf.mxu2  ;;  %v3020_v8 = vpop.f32.mrf.mxu0 }
 0x6c1   :  { %v7893_v9 = vsel %vm7345_vm6, %v7071_v3, %v7619_v5  ;;  %v5128_v10 = vadd.f32 %v4740_v6, %v3995_v32  ;;  %v3997_v19 = vadd.f32 %v3996_v1, %v3020_v8 }
 0x6c2   :  { %v10285_v12 = vpack.c.bf16 %v7893_v9, %v7892_v26  ;;  %v5429_v26 = vrot.slane %v13239_v2, 1  ;;  %v1893_v9 = vshrl.u32 %v13215_v54, 16 }
 0x6c3   :  { %v6794_v55 = vadd.f32 %v6406_v63, %v5128_v10  ;;  %v1897_v10 = vshll.u32 %v13239_v2, 16 }
 0x6c4   :  { %v6408_v41 = vpop.f32.mrf.mxu3  ;;  %10575 = vst [vmem:[%s13937_s3 + $0x310] sm:$0xff] %v10285_v12   ;;  %v5430_v33 = vsel %vm5207_vm2, %v5427_v15, %v5429_v26 }
 0x6c5   :  { %v3999_v16 = vpop.f32.mrf.mxu1  ;;  %v7072_v34 = vadd.f32 %v12895_v0, %v6794_v55 }
 0x6c7   :  { %v7620_v25 = vmul.f32 0.2, %v7072_v34  ;;  %vm7346_vm7 = vcmp.gt.f32.partialorder %v7072_v34, 0.0 }
 0x6c8   :  { %9327 = vmatmul.msk.bf16.gmra.mxu1 %vm2098_vm1, %v13119_v61  ;;  %v4742_v17 = vpop.f32.mrf.mxu2  ;;  %v3023_v23 = vpop.f32.mrf.mxu0 }
 0x6c9   :  { %9617 = vmatmul.msk.bf16.gmra.mxu3 %vm2098_vm1, %v5426_v22  ;;  %v5129_v28 = vadd.f32 %v4742_v17, %v3997_v19  ;;  %v4000_v61 = vadd.f32 %v3999_v16, %v3023_v23  ;;  %v1899_v16 = vrot.slane %v1897_v10, 1 }
 0x6cb   :  { %v6795_v48 = vadd.f32 %v6408_v41, %v5129_v28  ;;  %9186 = vmatmul.msk.bf16.gmra.mxu0 %vm2098_vm1, %v13157_v31  ;;  %v7894_v31 = vsel %vm7346_vm7, %v7072_v34, %v7620_v25  ;;  %v1895_v41 = vor.u32 %v1893_v9, %v1891_v45  ;;  %v13268_v25 = vld [vmem:[%s13935_s0 + $0x390] sm:$0xff] }
 0x6cc   :  { %v6411_v38 = vpop.f32.mrf.mxu3  ;;  %v1905_v15 = vshll.u32 %v13268_v25, 16 }
 0x6cd   :  { %v4001_v24 = vpop.f32.mrf.mxu1  ;;  %v7073_v14 = vadd.f32 %v12895_v0, %v6795_v48  ;;  %9474 = vmatmul.msk.bf16.gmra.mxu2 %vm2098_vm1, %v13205_v36  ;;  %v13258_v23 = vsel %vm992_vm3, %v1895_v41, %v1899_v16 }
 0x6cf   :  { %vm7347_vm8 = vcmp.gt.f32.partialorder %v7073_v14, 0.0  ;;  %v7621_v35 = vmul.f32 0.2, %v7073_v14 }
 0x6d0   :  { %v4745_v40 = vpop.f32.mrf.mxu2  ;;  %v3025_v20 = vpop.f32.mrf.mxu0 }
 0x6d1   :  { %v7895_v39 = vsel %vm7347_vm8, %v7073_v14, %v7621_v35  ;;  %v5130_v43 = vadd.f32 %v4745_v40, %v4000_v61  ;;  %v4002_v52 = vadd.f32 %v4001_v24, %v3025_v20 }
 0x6d2   :  { %v10290_v42 = vpack.c.bf16 %v7895_v39, %v7894_v31  ;;  %v5431_v31 = vrot.slane %v13268_v25, 1 }
 0x6d3   :  { %v6796_v21 = vadd.f32 %v6411_v38, %v5130_v43  ;;  %v1901_v43 = vshrl.u32 %v13239_v2, 16 }
 0x6d4   :  { %v6413_v57 = vpop.f32.mrf.mxu3  ;;  %10576 = vst [vmem:[%s13937_s3 + $0x318] sm:$0xff] %v10290_v42  }
 0x6d5   :  { %v4004_v46 = vpop.f32.mrf.mxu1  ;;  %v7074_v56 = vadd.f32 %v12895_v0, %v6796_v21  ;;  %v1907_v21 = vrot.slane %v1905_v15, 1 }
 0x6d7   :  { %v7622_v63 = vmul.f32 0.2, %v7074_v56  ;;  %vm7348_vm9 = vcmp.gt.f32.partialorder %v7074_v56, 0.0 }
 0x6d8   :  { %9328 = vmatmul.msk.bf16.gmra.mxu1 %vm2098_vm1, %v13143_v7  ;;  %v4747_v53 = vpop.f32.mrf.mxu2  ;;  %v3028_v44 = vpop.f32.mrf.mxu0 }
 0x6d9   :  { %9618 = vmatmul.msk.bf16.gmra.mxu3 %vm2098_vm1, %v5428_v47  ;;  %v5131_v49 = vadd.f32 %v4747_v53, %v4002_v52  ;;  %v4005_v7 = vadd.f32 %v4004_v46, %v3028_v44  ;;  %v1903_v46 = vor.u32 %v1901_v43, %v1899_v16 }
 0x6db   :  { %v6797_v59 = vadd.f32 %v6413_v57, %v5131_v49  ;;  %9187 = vmatmul.msk.bf16.gmra.mxu0 %vm2098_vm1, %v13181_v51  ;;  %v7896_v51 = vsel %vm7348_vm9, %v7074_v56, %v7622_v63  ;;  %v5432_v57 = vsel %vm5207_vm2, %v5429_v26, %v5431_v31  ;;  %v13282_v44 = vsel %vm992_vm3, %v1903_v46, %v1907_v21  ;;  %v13292_v63 = vld [vmem:[%s13935_s0 + $0x398] sm:$0xff] }
 0x6dc   :  { %v6416_v60 = vpop.f32.mrf.mxu3  ;;  %v1913_v26 = vshll.u32 %v13292_v63, 16 }
 0x6dd   :  { %v4006_v62 = vpop.f32.mrf.mxu1  ;;  %v7075_v1 = vadd.f32 %v12895_v0, %v6797_v59  ;;  %9475 = vmatmul.msk.bf16.gmra.mxu2 %vm2098_vm1, %v13229_v58 }
 0x6df   :  { %vm7349_vm10 = vcmp.gt.f32.partialorder %v7075_v1, 0.0  ;;  %v7623_v3 = vmul.f32 0.2, %v7075_v1 }
 0x6e0   :  { %v4750_v32 = vpop.f32.mrf.mxu2  ;;  %v3030_v5 = vpop.f32.mrf.mxu0 }
 0x6e1   :  { %v7897_v6 = vsel %vm7349_vm10, %v7075_v1, %v7623_v3  ;;  %v5132_v8 = vadd.f32 %v4750_v32, %v4005_v7  ;;  %v4007_v55 = vadd.f32 %v4006_v62, %v3030_v5 }
 0x6e2   :  { %v10295_v0 = vpack.c.bf16 %v7897_v6, %v7896_v51  ;;  %v5433_v51 = vrot.slane %v13292_v63, 1 }
 0x6e3   :  { %v6798_v13 = vadd.f32 %v6416_v60, %v5132_v8  ;;  %v1909_v8 = vshrl.u32 %v13268_v25, 16 }
 0x6e4   :  { %v6418_v29 = vpop.f32.mrf.mxu3  ;;  %10577 = vst [vmem:[%s13937_s3 + $0x320] sm:$0xff] %v10295_v0  }
 0x6e5   :  { %v4009_v12 = vpop.f32.mrf.mxu1  ;;  %v7076_v19 = vadd.f32 %v13254_v11, %v6798_v13  ;;  %v1915_v13 = vrot.slane %v1913_v26, 1 }
 0x6e7   :  { %v7624_v48 = vmul.f32 0.2, %v7076_v19  ;;  %vm7350_vm11 = vcmp.gt.f32.partialorder %v7076_v19, 0.0 }
 0x6e8   :  { %9329 = vmatmul.msk.bf16.gmra.mxu1 %vm2098_vm1, %v13167_v37  ;;  %v4752_v22 = vpop.f32.mrf.mxu2  ;;  %v3033_v30 = vpop.f32.mrf.mxu0 }
 0x6e9   :  { %9619 = vmatmul.msk.bf16.gmra.mxu3 %vm2098_vm1, %v5430_v33  ;;  %v5133_v17 = vadd.f32 %v4752_v22, %v4007_v55  ;;  %v4010_v24 = vadd.f32 %v4009_v12, %v3033_v30  ;;  %v1911_v12 = vor.u32 %v1909_v8, %v1907_v21 }
 0x6eb   :  { %v6799_v34 = vadd.f32 %v6418_v29, %v5133_v17  ;;  %9188 = vmatmul.msk.bf16.gmra.mxu0 %vm2098_vm1, %v13205_v36  ;;  %v7898_v36 = vsel %vm7350_vm11, %v7076_v19, %v7624_v48  ;;  %v5434_v29 = vsel %vm5207_vm2, %v5431_v31, %v5433_v51  ;;  %v13306_v30 = vsel %vm992_vm3, %v1911_v12, %v1915_v13  ;;  %v13316_v48 = vld [vmem:[%s13935_s0 + $0x3a0] sm:$0xff] }
 0x6ec   :  { %v6421_v37 = vpop.f32.mrf.mxu3  ;;  %v1921_v31 = vshll.u32 %v13316_v48, 16 }
 0x6ed   :  { %v4011_v28 = vpop.f32.mrf.mxu1  ;;  %v7077_v38 = vadd.f32 %v13254_v11, %v6799_v34  ;;  %9476 = vmatmul.msk.bf16.gmra.mxu2 %vm2098_vm1, %v13258_v23 }
 0x6ef   :  { %vm7351_vm12 = vcmp.gt.f32.partialorder %v7077_v38, 0.0  ;;  %v7625_v14 = vmul.f32 0.2, %v7077_v38 }
 0x6f0   :  { %v4755_v61 = vpop.f32.mrf.mxu2  ;;  %v3035_v35 = vpop.f32.mrf.mxu0 }
 0x6f1   :  { %v7899_v40 = vsel %vm7351_vm12, %v7077_v38, %v7625_v14  ;;  %v5134_v20 = vadd.f32 %v4755_v61, %v4010_v24  ;;  %v4012_v47 = vadd.f32 %v4011_v28, %v3035_v35 }
 0x6f2   :  { %v10300_v39 = vpack.c.bf16 %v7899_v40, %v7898_v36  ;;  %v5435_v36 = vrot.slane %v13316_v48, 1 }
 0x6f3   :  { %v6800_v18 = vadd.f32 %v6421_v37, %v5134_v20  ;;  %v1917_v20 = vshrl.u32 %v13292_v63, 16 }
 0x6f4   :  { %v6423_v42 = vpop.f32.mrf.mxu3  ;;  %10578 = vst [vmem:[%s13937_s3 + $0x328] sm:$0xff] %v10300_v39  }
 0x6f5   :  { %v4014_v27 = vpop.f32.mrf.mxu1  ;;  %v7078_v52 = vadd.f32 %v13254_v11, %v6800_v18  ;;  %v1923_v18 = vrot.slane %v1921_v31, 1 }
 0x6f7   :  { %v7626_v60 = vmul.f32 0.2, %v7078_v52  ;;  %vm7352_vm13 = vcmp.gt.f32.partialorder %v7078_v52, 0.0 }
 0x6f8   :  { %9330 = vmatmul.msk.bf16.gmra.mxu1 %vm2098_vm1, %v13191_v4  ;;  %v4757_v50 = vpop.f32.mrf.mxu2  ;;  %v3038_v45 = vpop.f32.mrf.mxu0 }
 0x6f9   :  { %9620 = vmatmul.msk.bf16.gmra.mxu3 %vm2098_vm1, %v5432_v57  ;;  %v5135_v53 = vadd.f32 %v4757_v50, %v4012_v47  ;;  %v4015_v4 = vadd.f32 %v4014_v27, %v3038_v45  ;;  %v1919_v27 = vor.u32 %v1917_v20, %v1915_v13 }
 0x6fb   :  { %v6801_v56 = vadd.f32 %v6423_v42, %v5135_v53  ;;  %9189 = vmatmul.msk.bf16.gmra.mxu0 %vm2098_vm1, %v13229_v58  ;;  %v7900_v58 = vsel %vm7352_vm13, %v7078_v52, %v7626_v60  ;;  %v5436_v42 = vsel %vm5207_vm2, %v5433_v51, %v5435_v36  ;;  %v13330_v45 = vsel %vm992_vm3, %v1919_v27, %v1923_v18  ;;  %v13340_v60 = vld [vmem:[%s13935_s0 + $0x3a8] sm:$0xff] }
 0x6fc   :  { %v6426_v49 = vpop.f32.mrf.mxu3  ;;  %v1929_v51 = vshll.u32 %v13340_v60, 16 }
 0x6fd   :  { %v4016_v59 = vpop.f32.mrf.mxu1  ;;  %v7079_v62 = vadd.f32 %v13254_v11, %v6801_v56  ;;  %9477 = vmatmul.msk.bf16.gmra.mxu2 %vm2098_vm1, %v13282_v44 }
 0x6ff   :  { %vm7353_vm14 = vcmp.gt.f32.partialorder %v7079_v62, 0.0  ;;  %v7627_v1 = vmul.f32 0.2, %v7079_v62 }
 0x700   :  { %v4760_v7 = vpop.f32.mrf.mxu2  ;;  %v3040_v3 = vpop.f32.mrf.mxu0 }
 0x701   :  { %v7901_v32 = vsel %vm7353_vm14, %v7079_v62, %v7627_v1  ;;  %v5136_v5 = vadd.f32 %v4760_v7, %v4015_v4  ;;  %v4017_v33 = vadd.f32 %v4016_v59, %v3040_v3 }
 0x702   :  { %v10305_v6 = vpack.c.bf16 %v7901_v32, %v7900_v58  ;;  %v5437_v58 = vrot.slane %v13340_v60, 1 }
 0x703   :  { %v6802_v10 = vadd.f32 %v6426_v49, %v5136_v5  ;;  %v1925_v5 = vshrl.u32 %v13316_v48, 16 }
 0x704   :  { %v6428_v0 = vpop.f32.mrf.mxu3  ;;  %10579 = vst [vmem:[%s13937_s3 + $0x330] sm:$0xff] %v10305_v6  }
 0x705   :  { %v4019_v9 = vpop.f32.mrf.mxu1  ;;  %v7080_v55 = vadd.f32 %v13254_v11, %v6802_v10  ;;  %v1931_v10 = vrot.slane %v1929_v51, 1 }
 0x707   :  { %v7628_v37 = vmul.f32 0.2, %v7080_v55  ;;  %vm7354_vm15 = vcmp.gt.f32.partialorder %v7080_v55, 0.0 }
 0x708   :  { %9331 = vmatmul.msk.bf16.gmra.mxu1 %vm2098_vm1, %v13215_v54  ;;  %v4762_v41 = vpop.f32.mrf.mxu2  ;;  %v3043_v16 = vpop.f32.mrf.mxu0 }
 0x709   :  { %9621 = vmatmul.msk.bf16.gmra.mxu3 %vm2098_vm1, %v5434_v29  ;;  %v5137_v22 = vadd.f32 %v4762_v41, %v4017_v33  ;;  %v4020_v54 = vadd.f32 %v4019_v9, %v3043_v16  ;;  %v1927_v9 = vor.u32 %v1925_v5, %v1923_v18 }
 0x70b   :  { %v6803_v19 = vadd.f32 %v6428_v0, %v5137_v22  ;;  %9190 = vmatmul.msk.bf16.gmra.mxu0 %vm2098_vm1, %v13258_v23  ;;  %v7902_v23 = vsel %vm7354_vm15, %v7080_v55, %v7628_v37  ;;  %v5438_v0 = vsel %vm5207_vm2, %v5435_v36, %v5437_v58  ;;  %v13354_v16 = vsel %vm992_vm3, %v1927_v9, %v1931_v10  ;;  %v13364_v37 = vld [vmem:[%s13935_s0 + $0x3b0] sm:$0xff] }
 0x70c   :  { %v6431_v17 = vpop.f32.mrf.mxu3  ;;  %v1937_v36 = vshll.u32 %v13364_v37, 16 }
 0x70d   :  { %v4021_v34 = vpop.f32.mrf.mxu1  ;;  %v7081_v28 = vadd.f32 %v13254_v11, %v6803_v19  ;;  %9478 = vmatmul.msk.bf16.gmra.mxu2 %vm2098_vm1, %v13306_v30 }
 0x70f   :  { %vm7355_vm0 = vcmp.gt.f32.partialorder %v7081_v28, 0.0  ;;  %v7629_v38 = vmul.f32 0.2, %v7081_v28 }
 0x710   :  { %v4765_v24 = vpop.f32.mrf.mxu2  ;;  %v3045_v14 = vpop.f32.mrf.mxu0 }
 0x711   :  { %v7903_v61 = vsel %vm7355_vm0, %v7081_v28, %v7629_v38  ;;  %v5138_v35 = vadd.f32 %v4765_v24, %v4020_v54  ;;  %v4022_v57 = vadd.f32 %v4021_v34, %v3045_v14 }
 0x712   :  { %v10310_v40 = vpack.c.bf16 %v7903_v61, %v7902_v23  ;;  %v5439_v23 = vrot.slane %v13364_v37, 1 }
 0x713   :  { %v6804_v15 = vadd.f32 %v6431_v17, %v5138_v35  ;;  %v1933_v35 = vshrl.u32 %v13340_v60, 16 }
 0x714   :  { %v6433_v39 = vpop.f32.mrf.mxu3  ;;  %10580 = vst [vmem:[%s13937_s3 + $0x338] sm:$0xff] %v10310_v40  }
 0x715   :  { %v4024_v43 = vpop.f32.mrf.mxu1  ;;  %v7082_v47 = vadd.f32 %v13254_v11, %v6804_v15  ;;  %v1939_v15 = vrot.slane %v1937_v36, 1 }
 0x717   :  { %v7630_v49 = vmul.f32 0.2, %v7082_v47  ;;  %vm7356_vm4 = vcmp.gt.f32.partialorder %v7082_v47, 0.0 }
 0x718   :  { %9332 = vmatmul.msk.bf16.gmra.mxu1 %vm2098_vm1, %v13239_v2  ;;  %v4767_v46 = vpop.f32.mrf.mxu2  ;;  %v3048_v21 = vpop.f32.mrf.mxu0 }
 0x719   :  { %9622 = vmatmul.msk.bf16.gmra.mxu3 %vm2098_vm1, %v5436_v42  ;;  %v5139_v50 = vadd.f32 %v4767_v46, %v4022_v57  ;;  %v4025_v2 = vadd.f32 %v4024_v43, %v3048_v21  ;;  %v1935_v43 = vor.u32 %v1933_v35, %v1931_v10 }
 0x71b   :  { %v6805_v52 = vadd.f32 %v6433_v39, %v5139_v50  ;;  %9191 = vmatmul.msk.bf16.gmra.mxu0 %vm2098_vm1, %v13282_v44  ;;  %v7904_v44 = vsel %vm7356_vm4, %v7082_v47, %v7630_v49  ;;  %v5440_v39 = vsel %vm5207_vm2, %v5437_v58, %v5439_v23  ;;  %v13378_v21 = vsel %vm992_vm3, %v1935_v43, %v1939_v15  ;;  %v13388_v49 = vld [vmem:[%s13935_s0 + $0x3b8] sm:$0xff] }
 0x71c   :  { %v6436_v53 = vpop.f32.mrf.mxu3  ;;  %v1945_v58 = vshll.u32 %v13388_v49, 16 }
 0x71d   :  { %v4026_v56 = vpop.f32.mrf.mxu1  ;;  %v7083_v59 = vadd.f32 %v13254_v11, %v6805_v52  ;;  %9479 = vmatmul.msk.bf16.gmra.mxu2 %vm2098_vm1, %v13330_v45 }
 0x71f   :  { %vm7357_vm5 = vcmp.gt.f32.partialorder %v7083_v59, 0.0  ;;  %v7631_v62 = vmul.f32 0.2, %v7083_v59 }
 0x720   :  { %v4770_v4 = vpop.f32.mrf.mxu2  ;;  %v3050_v1 = vpop.f32.mrf.mxu0 }
 0x721   :  { %v7905_v7 = vsel %vm7357_vm5, %v7083_v59, %v7631_v62  ;;  %v5140_v3 = vadd.f32 %v4770_v4, %v4025_v2  ;;  %v4027_v29 = vadd.f32 %v4026_v56, %v3050_v1 }
 0x722   :  { %v10315_v32 = vpack.c.bf16 %v7905_v7, %v7904_v44  ;;  %v5441_v44 = vrot.slane %v13388_v49, 1 }
 0x723   :  { %v6806_v26 = vadd.f32 %v6436_v53, %v5140_v3  ;;  %v1941_v3 = vshrl.u32 %v13364_v37, 16 }
 0x724   :  { %v6438_v6 = vpop.f32.mrf.mxu3  ;;  %10581 = vst [vmem:[%s13937_s3 + $0x340] sm:$0xff] %v10315_v32  }
 0x725   :  { %v4029_v8 = vpop.f32.mrf.mxu1  ;;  %v7084_v33 = vadd.f32 %v13254_v11, %v6806_v26  ;;  %v1947_v26 = vrot.slane %v1945_v58, 1 }
 0x727   :  { %v7632_v17 = vmul.f32 0.2, %v7084_v33  ;;  %vm7358_vm6 = vcmp.gt.f32.partialorder %v7084_v33, 0.0 }
 0x728   :  { %9333 = vmatmul.msk.bf16.gmra.mxu1 %vm2098_vm1, %v13268_v25  ;;  %v4772_v12 = vpop.f32.mrf.mxu2  ;;  %v3053_v13 = vpop.f32.mrf.mxu0 }
 0x729   :  { %9623 = vmatmul.msk.bf16.gmra.mxu3 %vm2098_vm1, %v5438_v0  ;;  %v5141_v41 = vadd.f32 %v4772_v12, %v4027_v29  ;;  %v4030_v25 = vadd.f32 %v4029_v8, %v3053_v13  ;;  %v1943_v8 = vor.u32 %v1941_v3, %v1939_v15 }
 0x72b   :  { %v6807_v55 = vadd.f32 %v6438_v6, %v5141_v41  ;;  %9192 = vmatmul.msk.bf16.gmra.mxu0 %vm2098_vm1, %v13306_v30  ;;  %v7906_v30 = vsel %vm7358_vm6, %v7084_v33, %v7632_v17  ;;  %v5442_v6 = vsel %vm5207_vm2, %v5439_v23, %v5441_v44  ;;  %v13402_v13 = vsel %vm992_vm3, %v1943_v8, %v1947_v26  ;;  %v13412_v17 = vld [vmem:[%s13935_s0 + $0x3c0] sm:$0xff] }
 0x72c   :  { %v6441_v22 = vpop.f32.mrf.mxu3  ;;  %v1953_v23 = vshll.u32 %v13412_v17, 16 }
 0x72d   :  { %v4031_v19 = vpop.f32.mrf.mxu1  ;;  %v7085_v34 = vadd.f32 %v13254_v11, %v6807_v55  ;;  %9480 = vmatmul.msk.bf16.gmra.mxu2 %vm2098_vm1, %v13354_v16 }
 0x72f   :  { %vm7359_vm7 = vcmp.gt.f32.partialorder %v7085_v34, 0.0  ;;  %v7633_v28 = vmul.f32 0.2, %v7085_v34 }
 0x730   :  { %v4775_v54 = vpop.f32.mrf.mxu2  ;;  %v3055_v38 = vpop.f32.mrf.mxu0 }
 0x731   :  { %v7907_v24 = vsel %vm7359_vm7, %v7085_v34, %v7633_v28  ;;  %v5142_v14 = vadd.f32 %v4775_v54, %v4030_v25  ;;  %v4032_v42 = vadd.f32 %v4031_v19, %v3055_v38 }
 0x732   :  { %v10320_v61 = vpack.c.bf16 %v7907_v24, %v7906_v30  ;;  %v5443_v30 = vrot.slane %v13412_v17, 1 }
 0x733   :  { %v6808_v31 = vadd.f32 %v6441_v22, %v5142_v14  ;;  %v1949_v14 = vshrl.u32 %v13388_v49, 16 }
 0x734   :  { %v6443_v40 = vpop.f32.mrf.mxu3  ;;  %10582 = vst [vmem:[%s13937_s3 + $0x348] sm:$0xff] %v10320_v61  }
 0x735   :  { %v4034_v20 = vpop.f32.mrf.mxu1  ;;  %v7086_v57 = vadd.f32 %v13254_v11, %v6808_v31  ;;  %v1955_v31 = vrot.slane %v1953_v23, 1 }
 0x737   :  { %v7634_v53 = vmul.f32 0.2, %v7086_v57  ;;  %vm7360_vm8 = vcmp.gt.f32.partialorder %v7086_v57, 0.0 }
 0x738   :  { %9334 = vmatmul.msk.bf16.gmra.mxu1 %vm2098_vm1, %v13292_v63  ;;  %v4777_v27 = vpop.f32.mrf.mxu2  ;;  %v3058_v18 = vpop.f32.mrf.mxu0 }
 0x739   :  { %9624 = vmatmul.msk.bf16.gmra.mxu3 %vm2098_vm1, %v5440_v39  ;;  %v5143_v46 = vadd.f32 %v4777_v27, %v4032_v42  ;;  %v4035_v63 = vadd.f32 %v4034_v20, %v3058_v18  ;;  %v1951_v20 = vor.u32 %v1949_v14, %v1947_v26 }
 0x73b   :  { %v6809_v47 = vadd.f32 %v6443_v40, %v5143_v46  ;;  %9193 = vmatmul.msk.bf16.gmra.mxu0 %vm2098_vm1, %v13330_v45  ;;  %v7908_v45 = vsel %vm7360_vm8, %v7086_v57, %v7634_v53  ;;  %v5444_v40 = vsel %vm5207_vm2, %v5441_v44, %v5443_v30  ;;  %v13426_v18 = vsel %vm992_vm3, %v1951_v20, %v1955_v31  ;;  %v13436_v53 = vld [vmem:[%s13935_s0 + $0x3c8] sm:$0xff] }
 0x73c   :  { %v6446_v50 = vpop.f32.mrf.mxu3  ;;  %v1961_v44 = vshll.u32 %v13436_v53, 16 }
 0x73d   :  { %v4036_v52 = vpop.f32.mrf.mxu1  ;;  %v7087_v56 = vadd.f32 %v13254_v11, %v6809_v47  ;;  %9481 = vmatmul.msk.bf16.gmra.mxu2 %vm2098_vm1, %v13378_v21 }
 0x73f   :  { %vm7361_vm9 = vcmp.gt.f32.partialorder %v7087_v56, 0.0  ;;  %v7635_v59 = vmul.f32 0.2, %v7087_v56 }
 0x740   :  { %v4780_v2 = vpop.f32.mrf.mxu2  ;;  %v3060_v62 = vpop.f32.mrf.mxu0 }
 0x741   :  { %v7909_v4 = vsel %vm7361_vm9, %v7087_v56, %v7635_v59  ;;  %v5144_v1 = vadd.f32 %v4780_v2, %v4035_v63  ;;  %v4037_v0 = vadd.f32 %v4036_v52, %v3060_v62 }
 0x742   :  { %v10325_v7 = vpack.c.bf16 %v7909_v4, %v7908_v45  ;;  %v5445_v45 = vrot.slane %v13436_v53, 1 }
 0x743   :  { %v6810_v51 = vadd.f32 %v6446_v50, %v5144_v1  ;;  %v1957_v1 = vshrl.u32 %v13412_v17, 16 }
 0x744   :  { %v6448_v32 = vpop.f32.mrf.mxu3  ;;  %10583 = vst [vmem:[%s13937_s3 + $0x350] sm:$0xff] %v10325_v7  }
 0x745   :  { %v4039_v5 = vpop.f32.mrf.mxu1  ;;  %v7088_v29 = vadd.f32 %v13254_v11, %v6810_v51  ;;  %v1963_v51 = vrot.slane %v1961_v44, 1 }
 0x747   :  { %v7636_v22 = vmul.f32 0.2, %v7088_v29  ;;  %vm7362_vm10 = vcmp.gt.f32.partialorder %v7088_v29, 0.0 }
 0x748   :  { %9335 = vmatmul.msk.bf16.gmra.mxu1 %vm2098_vm1, %v13316_v48  ;;  %v4782_v9 = vpop.f32.mrf.mxu2  ;;  %v3063_v10 = vpop.f32.mrf.mxu0 }
 0x749   :  { %9625 = vmatmul.msk.bf16.gmra.mxu3 %vm2098_vm1, %v5442_v6  ;;  %v5145_v12 = vadd.f32 %v4782_v9, %v4037_v0  ;;  %v4040_v48 = vadd.f32 %v4039_v5, %v3063_v10  ;;  %v1959_v5 = vor.u32 %v1957_v1, %v1955_v31 }
 0x74b   :  { %v6811_v33 = vadd.f32 %v6448_v32, %v5145_v12  ;;  %9194 = vmatmul.msk.bf16.gmra.mxu0 %vm2098_vm1, %v13354_v16  ;;  %v7910_v16 = vsel %vm7362_vm10, %v7088_v29, %v7636_v22  ;;  %v5446_v32 = vsel %vm5207_vm2, %v5443_v30, %v5445_v45  ;;  %v13450_v10 = vsel %vm992_vm3, %v1959_v5, %v1963_v51  ;;  %v13460_v22 = vld [vmem:[%s13935_s0 + $0x3d0] sm:$0xff] }
 0x74c   :  { %v6451_v41 = vpop.f32.mrf.mxu3  ;;  %v1969_v30 = vshll.u32 %v13460_v22, 16 }
 0x74d   :  { %v4041_v55 = vpop.f32.mrf.mxu1  ;;  %v7089_v19 = vadd.f32 %v13254_v11, %v6811_v33  ;;  %9482 = vmatmul.msk.bf16.gmra.mxu2 %vm2098_vm1, %v13402_v13 }
 0x74f   :  { %vm7363_vm11 = vcmp.gt.f32.partialorder %v7089_v19, 0.0  ;;  %v7637_v34 = vmul.f32 0.2, %v7089_v19 }
 0x750   :  { %v4785_v25 = vpop.f32.mrf.mxu2  ;;  %v3065_v28 = vpop.f32.mrf.mxu0 }
 0x751   :  { %v7911_v54 = vsel %vm7363_vm11, %v7089_v19, %v7637_v34  ;;  %v5146_v38 = vadd.f32 %v4785_v25, %v4040_v48  ;;  %v4042_v39 = vadd.f32 %v4041_v55, %v3065_v28 }
 0x752   :  { %v10330_v24 = vpack.c.bf16 %v7911_v54, %v7910_v16  ;;  %v5447_v16 = vrot.slane %v13460_v22, 1 }
 0x753   :  { %v6812_v36 = vadd.f32 %v6451_v41, %v5146_v38  ;;  %v1965_v38 = vshrl.u32 %v13436_v53, 16 }
 0x754   :  { %v6453_v61 = vpop.f32.mrf.mxu3  ;;  %10584 = vst [vmem:[%s13937_s3 + $0x358] sm:$0xff] %v10330_v24  }
 0x755   :  { %v4044_v35 = vpop.f32.mrf.mxu1  ;;  %v7090_v42 = vadd.f32 %v13254_v11, %v6812_v36  ;;  %v1971_v36 = vrot.slane %v1969_v30, 1 }
 0x757   :  { %v7638_v50 = vmul.f32 0.2, %v7090_v42  ;;  %vm7364_vm12 = vcmp.gt.f32.partialorder %v7090_v42, 0.0 }
 0x758   :  { %9336 = vmatmul.msk.bf16.gmra.mxu1 %vm2098_vm1, %v13340_v60  ;;  %v4787_v43 = vpop.f32.mrf.mxu2  ;;  %v3068_v15 = vpop.f32.mrf.mxu0 }
 0x759   :  { %9626 = vmatmul.msk.bf16.gmra.mxu3 %vm2098_vm1, %v5444_v40  ;;  %v5147_v27 = vadd.f32 %v4787_v43, %v4042_v39  ;;  %v4045_v60 = vadd.f32 %v4044_v35, %v3068_v15  ;;  %v1967_v35 = vor.u32 %v1965_v38, %v1963_v51 }
 0x75b   :  { %v6813_v57 = vadd.f32 %v6453_v61, %v5147_v27  ;;  %9195 = vmatmul.msk.bf16.gmra.mxu0 %vm2098_vm1, %v13378_v21  ;;  %v7912_v21 = vsel %vm7364_vm12, %v7090_v42, %v7638_v50  ;;  %v5448_v61 = vsel %vm5207_vm2, %v5445_v45, %v5447_v16  ;;  %v13474_v15 = vsel %vm992_vm3, %v1967_v35, %v1971_v36  ;;  %v13484_v50 = vld [vmem:[%s13935_s0 + $0x3d8] sm:$0xff] }
 0x75c   :  { %v6456_v46 = vpop.f32.mrf.mxu3  ;;  %v1977_v45 = vshll.u32 %v13484_v50, 16 }
 0x75d   :  { %v4046_v47 = vpop.f32.mrf.mxu1  ;;  %v7091_v52 = vadd.f32 %v13254_v11, %v6813_v57  ;;  %9483 = vmatmul.msk.bf16.gmra.mxu2 %vm2098_vm1, %v13426_v18 }
 0x75f   :  { %vm7365_vm13 = vcmp.gt.f32.partialorder %v7091_v52, 0.0  ;;  %v7639_v56 = vmul.f32 0.2, %v7091_v52 }
 0x760   :  { %v4790_v63 = vpop.f32.mrf.mxu2  ;;  %v3070_v59 = vpop.f32.mrf.mxu0 }
 0x761   :  { %v7913_v2 = vsel %vm7365_vm13, %v7091_v52, %v7639_v56  ;;  %v5148_v62 = vadd.f32 %v4790_v63, %v4045_v60  ;;  %v4047_v6 = vadd.f32 %v4046_v47, %v3070_v59 }
 0x762   :  { %v10335_v4 = vpack.c.bf16 %v7913_v2, %v7912_v21  ;;  %v5449_v21 = vrot.slane %v13484_v50, 1 }
 0x763   :  { %v6814_v58 = vadd.f32 %v6456_v46, %v5148_v62  ;;  %v1973_v62 = vshrl.u32 %v13460_v22, 16 }
 0x764   :  { %v6458_v7 = vpop.f32.mrf.mxu3  ;;  %10585 = vst [vmem:[%s13937_s3 + $0x360] sm:$0xff] %v10335_v4  }
 0x765   :  { %v4049_v3 = vpop.f32.mrf.mxu1  ;;  %v7092_v0 = vadd.f32 %v13254_v11, %v6814_v58  ;;  %v1979_v58 = vrot.slane %v1977_v45, 1 }
 0x767   :  { %v7640_v41 = vmul.f32 0.2, %v7092_v0  ;;  %vm7366_vm14 = vcmp.gt.f32.partialorder %v7092_v0, 0.0 }
 0x768   :  { %9337 = vmatmul.msk.bf16.gmra.mxu1 %vm2098_vm1, %v13364_v37  ;;  %v4792_v8 = vpop.f32.mrf.mxu2  ;;  %v3073_v26 = vpop.f32.mrf.mxu0 }
 0x769   :  { %9627 = vmatmul.msk.bf16.gmra.mxu3 %vm2098_vm1, %v5446_v32  ;;  %v5149_v9 = vadd.f32 %v4792_v8, %v4047_v6  ;;  %v4050_v37 = vadd.f32 %v4049_v3, %v3073_v26  ;;  %v1975_v3 = vor.u32 %v1973_v62, %v1971_v36 }
 0x76b   :  { %v6815_v29 = vadd.f32 %v6458_v7, %v5149_v9  ;;  %9196 = vmatmul.msk.bf16.gmra.mxu0 %vm2098_vm1, %v13402_v13  ;;  %v7914_v13 = vsel %vm7366_vm14, %v7092_v0, %v7640_v41  ;;  %v5450_v7 = vsel %vm5207_vm2, %v5447_v16, %v5449_v21  ;;  %v13498_v26 = vsel %vm992_vm3, %v1975_v3, %v1979_v58  ;;  %v13508_v41 = vld [vmem:[%s13935_s0 + $0x3e0] sm:$0xff] }
 0x76c   :  { %v6461_v12 = vpop.f32.mrf.mxu3  ;;  %v1985_v16 = vshll.u32 %v13508_v41, 16 }
 0x76d   :  { %v4051_v33 = vpop.f32.mrf.mxu1  ;;  %v7093_v55 = vadd.f32 %v13254_v11, %v6815_v29  ;;  %9484 = vmatmul.msk.bf16.gmra.mxu2 %vm2098_vm1, %v13450_v10 }
 0x76f   :  { %vm7367_vm15 = vcmp.gt.f32.partialorder %v7093_v55, 0.0  ;;  %v7641_v19 = vmul.f32 0.2, %v7093_v55 }
 0x770   :  { %v4795_v48 = vpop.f32.mrf.mxu2  ;;  %v3075_v34 = vpop.f32.mrf.mxu0 }
 0x771   :  { %v7915_v25 = vsel %vm7367_vm15, %v7093_v55, %v7641_v19  ;;  %v5150_v28 = vadd.f32 %v4795_v48, %v4050_v37  ;;  %v4052_v40 = vadd.f32 %v4051_v33, %v3075_v34 }
 0x772   :  { %v10340_v54 = vpack.c.bf16 %v7915_v25, %v7914_v13  ;;  %v5451_v13 = vrot.slane %v13508_v41, 1 }
 0x773   :  { %v6816_v23 = vadd.f32 %v6461_v12, %v5150_v28  ;;  %v1981_v28 = vshrl.u32 %v13484_v50, 16 }
 0x774   :  { %v6463_v24 = vpop.f32.mrf.mxu3  ;;  %10586 = vst [vmem:[%s13937_s3 + $0x368] sm:$0xff] %v10340_v54  }
 0x775   :  { %v4054_v14 = vpop.f32.mrf.mxu1  ;;  %v7094_v39 = vadd.f32 %v13254_v11, %v6816_v23  ;;  %v1987_v23 = vrot.slane %v1985_v16, 1 }
 0x777   :  { %v7642_v46 = vmul.f32 0.2, %v7094_v39  ;;  %vm7368_vm0 = vcmp.gt.f32.partialorder %v7094_v39, 0.0 }
 0x778   :  { %9338 = vmatmul.msk.bf16.gmra.mxu1 %vm2098_vm1, %v13388_v49  ;;  %v4797_v20 = vpop.f32.mrf.mxu2  ;;  %v3078_v31 = vpop.f32.mrf.mxu0 }
 0x779   :  { %9628 = vmatmul.msk.bf16.gmra.mxu3 %vm2098_vm1, %v5448_v61  ;;  %v5151_v43 = vadd.f32 %v4797_v20, %v4052_v40  ;;  %v4055_v49 = vadd.f32 %v4054_v14, %v3078_v31  ;;  %v1983_v14 = vor.u32 %v1981_v28, %v1979_v58 }
 0x77b   :  { %v6817_v42 = vadd.f32 %v6463_v24, %v5151_v43  ;;  %9197 = vmatmul.msk.bf16.gmra.mxu0 %vm2098_vm1, %v13426_v18  ;;  %v7916_v18 = vsel %vm7368_vm0, %v7094_v39, %v7642_v46  ;;  %v5452_v24 = vsel %vm5207_vm2, %v5449_v21, %v5451_v13  ;;  %v13522_v31 = vsel %vm992_vm3, %v1983_v14, %v1987_v23  ;;  %v13532_v46 = vld [vmem:[%s13935_s0 + $0x3e8] sm:$0xff] }
 0x77c   :  { %v6466_v27 = vpop.f32.mrf.mxu3  ;;  %v1993_v21 = vshll.u32 %v13532_v46, 16 }
 0x77d   :  { %v4056_v57 = vpop.f32.mrf.mxu1  ;;  %v7095_v47 = vadd.f32 %v13254_v11, %v6817_v42  ;;  %9485 = vmatmul.msk.bf16.gmra.mxu2 %vm2098_vm1, %v13474_v15 }
 0x77f   :  { %vm7369_vm4 = vcmp.gt.f32.partialorder %v7095_v47, 0.0  ;;  %v7643_v52 = vmul.f32 0.2, %v7095_v47 }
 0x780   :  { %v4800_v60 = vpop.f32.mrf.mxu2  ;;  %v3080_v56 = vpop.f32.mrf.mxu0 }
 0x781   :  { %v7917_v63 = vsel %vm7369_vm4, %v7095_v47, %v7643_v52  ;;  %v5152_v59 = vadd.f32 %v4800_v60, %v4055_v49  ;;  %v4057_v32 = vadd.f32 %v4056_v57, %v3080_v56 }
 0x782   :  { %v10345_v2 = vpack.c.bf16 %v7917_v63, %v7916_v18  ;;  %v5453_v18 = vrot.slane %v13532_v46, 1 }
 0x783   :  { %v6818_v44 = vadd.f32 %v6466_v27, %v5152_v59  ;;  %v1989_v59 = vshrl.u32 %v13508_v41, 16 }
 0x784   :  { %v6468_v4 = vpop.f32.mrf.mxu3  ;;  %10587 = vst [vmem:[%s13937_s3 + $0x370] sm:$0xff] %v10345_v2  }
 0x785   :  { %v4059_v1 = vpop.f32.mrf.mxu1  ;;  %v7096_v6 = vadd.f32 %v13254_v11, %v6818_v44  ;;  %v1995_v44 = vrot.slane %v1993_v21, 1 }
 0x787   :  { %v7644_v12 = vmul.f32 0.2, %v7096_v6  ;;  %vm7370_vm5 = vcmp.gt.f32.partialorder %v7096_v6, 0.0 }
 0x788   :  { %9339 = vmatmul.msk.bf16.gmra.mxu1 %vm2098_vm1, %v13412_v17  ;;  %v4802_v5 = vpop.f32.mrf.mxu2  ;;  %v3083_v51 = vpop.f32.mrf.mxu0 }
 0x789   :  { %9629 = vmatmul.msk.bf16.gmra.mxu3 %vm2098_vm1, %v5450_v7  ;;  %v5153_v8 = vadd.f32 %v4802_v5, %v4057_v32  ;;  %v4060_v17 = vadd.f32 %v4059_v1, %v3083_v51  ;;  %v1991_v1 = vor.u32 %v1989_v59, %v1987_v23 }
 0x78b   :  { %v6819_v0 = vadd.f32 %v6468_v4, %v5153_v8  ;;  %9198 = vmatmul.msk.bf16.gmra.mxu0 %vm2098_vm1, %v13450_v10  ;;  %v7918_v10 = vsel %vm7370_vm5, %v7096_v6, %v7644_v12  ;;  %v5454_v4 = vsel %vm5207_vm2, %v5451_v13, %v5453_v18  ;;  %v13546_v51 = vsel %vm992_vm3, %v1991_v1, %v1995_v44  ;;  %v13556_v12 = vld [vmem:[%s13935_s0 + $0x3f0] sm:$0xff] }
 0x78c   :  { %v6471_v9 = vpop.f32.mrf.mxu3  ;;  %v2001_v13 = vshll.u32 %v13556_v12, 16 }
 0x78d   :  { %v4061_v29 = vpop.f32.mrf.mxu1  ;;  %v7097_v33 = vadd.f32 %v13254_v11, %v6819_v0  ;;  %9486 = vmatmul.msk.bf16.gmra.mxu2 %vm2098_vm1, %v13498_v26 }
 0x78f   :  { %vm7371_vm6 = vcmp.gt.f32.partialorder %v7097_v33, 0.0  ;;  %v7645_v55 = vmul.f32 0.2, %v7097_v33 }
 0x790   :  { %v4805_v37 = vpop.f32.mrf.mxu2  ;;  %v3085_v19 = vpop.f32.mrf.mxu0 }
 0x791   :  { %v7919_v48 = vsel %vm7371_vm6, %v7097_v33, %v7645_v55  ;;  %v5154_v34 = vadd.f32 %v4805_v37, %v4060_v17  ;;  %v4062_v61 = vadd.f32 %v4061_v29, %v3085_v19 }
 0x792   :  { %v10350_v25 = vpack.c.bf16 %v7919_v48, %v7918_v10  ;;  %v5455_v10 = vrot.slane %v13556_v12, 1 }
 0x793   :  { %v6820_v30 = vadd.f32 %v6471_v9, %v5154_v34  ;;  %v1997_v34 = vshrl.u32 %v13532_v46, 16 }
 0x794   :  { %v6473_v54 = vpop.f32.mrf.mxu3  ;;  %10588 = vst [vmem:[%s13937_s3 + $0x378] sm:$0xff] %v10350_v25  }
 0x795   :  { %v4064_v38 = vpop.f32.mrf.mxu1  ;;  %v7098_v40 = vadd.f32 %v13254_v11, %v6820_v30  ;;  %v2003_v30 = vrot.slane %v2001_v13, 1 }
 0x797   :  { %v7646_v27 = vmul.f32 0.2, %v7098_v40  ;;  %vm7372_vm7 = vcmp.gt.f32.partialorder %v7098_v40, 0.0 }
 0x798   :  { %9340 = vmatmul.msk.bf16.gmra.mxu1 %vm2098_vm1, %v13436_v53  ;;  %v4807_v35 = vpop.f32.mrf.mxu2  ;;  %v3088_v36 = vpop.f32.mrf.mxu0 }
 0x799   :  { %9630 = vmatmul.msk.bf16.gmra.mxu3 %vm2098_vm1, %v5452_v24  ;;  %v5155_v20 = vadd.f32 %v4807_v35, %v4062_v61  ;;  %v4065_v53 = vadd.f32 %v4064_v38, %v3088_v36  ;;  %v1999_v38 = vor.u32 %v1997_v34, %v1995_v44 }
 0x79b   :  { %v6821_v39 = vadd.f32 %v6473_v54, %v5155_v20  ;;  %9199 = vmatmul.msk.bf16.gmra.mxu0 %vm2098_vm1, %v13474_v15  ;;  %v7920_v15 = vsel %vm7372_vm7, %v7098_v40, %v7646_v27  ;;  %v5456_v54 = vsel %vm5207_vm2, %v5453_v18, %v5455_v10  ;;  %v13570_v36 = vsel %vm992_vm3, %v1999_v38, %v2003_v30  ;;  %v13580_v27 = vld [vmem:[%s13935_s0 + $0x3f8] sm:$0xff] }
 0x79c   :  { %v6476_v43 = vpop.f32.mrf.mxu3  ;;  %v2009_v18 = vshll.u32 %v13580_v27, 16 }
 0x79d   :  { %v4066_v42 = vpop.f32.mrf.mxu1  ;;  %v7099_v57 = vadd.f32 %v13254_v11, %v6821_v39  ;;  %9487 = vmatmul.msk.bf16.gmra.mxu2 %vm2098_vm1, %v13522_v31 }
 0x79f   :  { %vm7373_vm8 = vcmp.gt.f32.partialorder %v7099_v57, 0.0  ;;  %v7647_v47 = vmul.f32 0.2, %v7099_v57 }
 0x7a0   :  { %v4810_v49 = vpop.f32.mrf.mxu2  ;;  %v3090_v52 = vpop.f32.mrf.mxu0 }
 0x7a1   :  { %v7921_v60 = vsel %vm7373_vm8, %v7099_v57, %v7647_v47  ;;  %v5156_v56 = vadd.f32 %v4810_v49, %v4065_v53  ;;  %v4067_v7 = vadd.f32 %v4066_v42, %v3090_v52 }
 0x7a2   :  { %v10355_v63 = vpack.c.bf16 %v7921_v60, %v7920_v15  ;;  %v5457_v15 = vrot.slane %v13580_v27, 1 }
 0x7a3   :  { %v6822_v45 = vadd.f32 %v6476_v43, %v5156_v56  ;;  %v2005_v56 = vshrl.u32 %v13556_v12, 16 }
 0x7a4   :  { %v6478_v2 = vpop.f32.mrf.mxu3  ;;  %10589 = vst [vmem:[%s13937_s3 + $0x380] sm:$0xff] %v10355_v63  }
 0x7a5   :  { %v4069_v62 = vpop.f32.mrf.mxu1  ;;  %v7100_v32 = vadd.f32 %v13254_v11, %v6822_v45  ;;  %v2011_v45 = vrot.slane %v2009_v18, 1 }
 0x7a7   :  { %v7648_v9 = vmul.f32 0.2, %v7100_v32  ;;  %vm7374_vm9 = vcmp.gt.f32.partialorder %v7100_v32, 0.0 }
 0x7a8   :  { %9341 = vmatmul.msk.bf16.gmra.mxu1 %vm2098_vm1, %v13460_v22  ;;  %v4812_v3 = vpop.f32.mrf.mxu2  ;;  %v3093_v58 = vpop.f32.mrf.mxu0 }
 0x7a9   :  { %9631 = vmatmul.msk.bf16.gmra.mxu3 %vm2098_vm1, %v5454_v4  ;;  %v5157_v5 = vadd.f32 %v4812_v3, %v4067_v7  ;;  %v4070_v22 = vadd.f32 %v4069_v62, %v3093_v58  ;;  %v2007_v62 = vor.u32 %v2005_v56, %v2003_v30 }
 0x7ab   :  { %v6823_v6 = vadd.f32 %v6478_v2, %v5157_v5  ;;  %9200 = vmatmul.msk.bf16.gmra.mxu0 %vm2098_vm1, %v13498_v26  ;;  %v7922_v26 = vsel %vm7374_vm9, %v7100_v32, %v7648_v9  ;;  %v5458_v2 = vsel %vm5207_vm2, %v5455_v10, %v5457_v15  ;;  %v13594_v58 = vsel %vm992_vm3, %v2007_v62, %v2011_v45 }
 0x7ac   :  { %v6481_v8 = vpop.f32.mrf.mxu3 }
 0x7ad   :  { %v4071_v0 = vpop.f32.mrf.mxu1  ;;  %v7101_v29 = vadd.f32 %v13254_v11, %v6823_v6  ;;  %9488 = vmatmul.msk.bf16.gmra.mxu2 %vm2098_vm1, %v13546_v51 }
 0x7af   :  { %vm7375_vm10 = vcmp.gt.f32.partialorder %v7101_v29, 0.0  ;;  %v7649_v33 = vmul.f32 0.2, %v7101_v29 }
 0x7b0   :  { %v4815_v17 = vpop.f32.mrf.mxu2  ;;  %v3095_v55 = vpop.f32.mrf.mxu0 }
 0x7b1   :  { %v7923_v37 = vsel %vm7375_vm10, %v7101_v29, %v7649_v33  ;;  %v5158_v19 = vadd.f32 %v4815_v17, %v4070_v22  ;;  %v4072_v24 = vadd.f32 %v4071_v0, %v3095_v55 }
 0x7b2   :  { %v10360_v48 = vpack.c.bf16 %v7923_v37, %v7922_v26 }
 0x7b3   :  { %v6824_v16 = vadd.f32 %v6481_v8, %v5158_v19  ;;  %v2013_v19 = vshrl.u32 %v13580_v27, 16 }
 0x7b4   :  { %v6483_v25 = vpop.f32.mrf.mxu3  ;;  %10590 = vst [vmem:[%s13937_s3 + $0x388] sm:$0xff] %v10360_v48  }
 0x7b5   :  { %v4074_v28 = vpop.f32.mrf.mxu1  ;;  %v7102_v61 = vadd.f32 %v13254_v11, %v6824_v16 }
 0x7b7   :  { %v7650_v43 = vmul.f32 0.2, %v7102_v61  ;;  %vm7376_vm11 = vcmp.gt.f32.partialorder %v7102_v61, 0.0 }
 0x7b8   :  { %9342 = vmatmul.msk.bf16.gmra.mxu1 %vm2098_vm1, %v13484_v50  ;;  %v4817_v14 = vpop.f32.mrf.mxu2  ;;  %v3098_v23 = vpop.f32.mrf.mxu0 }
 0x7b9   :  { %9632 = vmatmul.msk.bf16.gmra.mxu3 %vm2098_vm1, %v5456_v54  ;;  %v5159_v35 = vadd.f32 %v4817_v14, %v4072_v24  ;;  %v4075_v50 = vadd.f32 %v4074_v28, %v3098_v23  ;;  %v2015_v28 = vor.u32 %v2013_v19, %v2011_v45 }
 0x7bb   :  { %v6825_v40 = vadd.f32 %v6483_v25, %v5159_v35  ;;  %9201 = vmatmul.msk.bf16.gmra.mxu0 %vm2098_vm1, %v13522_v31  ;;  %v7924_v31 = vsel %vm7376_vm11, %v7102_v61, %v7650_v43  ;;  %v13633_v43 = vld [vmem:[%s13935_s0 + $0x408] sm:$0xff] }
 0x7bc   :  { %v6486_v20 = vpop.f32.mrf.mxu3 }
 0x7bd   :  { %v4076_v39 = vpop.f32.mrf.mxu1  ;;  %v7103_v42 = vadd.f32 %v13254_v11, %v6825_v40  ;;  %9489 = vmatmul.msk.bf16.gmra.mxu2 %vm2098_vm1, %v13570_v36 }
 0x7bf   :  { %vm7377_vm12 = vcmp.gt.f32.partialorder %v7103_v42, 0.0  ;;  %v7651_v57 = vmul.f32 0.2, %v7103_v42 }
 0x7c0   :  { %v4820_v53 = vpop.f32.mrf.mxu2  ;;  %v3100_v47 = vpop.f32.mrf.mxu0 }
 0x7c1   :  { %v7925_v49 = vsel %vm7377_vm12, %v7103_v42, %v7651_v57  ;;  %v5160_v52 = vadd.f32 %v4820_v53, %v4075_v50  ;;  %v4077_v4 = vadd.f32 %v4076_v39, %v3100_v47 }
 0x7c2   :  { %v10365_v60 = vpack.c.bf16 %v7925_v49, %v7924_v31  ;;  %v5461_v31 = vrot.slane %v13633_v43, 1 }
 0x7c3   :  { %v6826_v21 = vadd.f32 %v6486_v20, %v5160_v52 }
 0x7c4   :  { %v6488_v63 = vpop.f32.mrf.mxu3  ;;  %10591 = vst [vmem:[%s13937_s3 + $0x390] sm:$0xff] %v10365_v60  }
 0x7c5   :  { %v4079_v59 = vpop.f32.mrf.mxu1  ;;  %v7104_v7 = vadd.f32 %v13254_v11, %v6826_v21  ;;  %v13609_v11 = vld [vmem:[%s13935_s0 + $0x400] sm:$0xff] }
 0x7c6   :  { %v5459_v26 = vrot.slane %v13609_v11, 1  ;;  %v2017_v10 = vshll.u32 %v13609_v11, 16  ;;  %v2021_v52 = vshrl.u32 %v13609_v11, 16 }
 0x7c7   :  { %v7652_v8 = vmul.f32 0.2, %v7104_v7  ;;  %vm7378_vm13 = vcmp.gt.f32.partialorder %v7104_v7, 0.0 }
 0x7c8   :  { %9343 = vmatmul.msk.bf16.gmra.mxu1 %vm2098_vm1, %v13508_v41  ;;  %v4822_v1 = vpop.f32.mrf.mxu2  ;;  %v3103_v44 = vpop.f32.mrf.mxu0  ;;  %v13601_v41 = vld [vmem:[%s13936_s2] ss:$0 sm:$0xff]  ;;  %v5460_v25 = vsel %vm5207_vm2, %v5457_v15, %v5459_v26  ;;  %v2019_v16 = vrot.slane %v2017_v10, 1  ;;  %v2025_v15 = vshll.u32 %v13633_v43, 16 }
 0x7c9   :  { %9633 = vmatmul.msk.bf16.gmra.mxu3 %vm2098_vm1, %v5458_v2  ;;  %v5161_v3 = vadd.f32 %v4822_v1, %v4077_v4  ;;  %v4080_v9 = vadd.f32 %v4079_v59, %v3103_v44  ;;  %v7926_v33 = vsel %vm7378_vm13, %v7104_v7, %v7652_v8  ;;  %v13657_v8 = vld [vmem:[%s13935_s0 + $0x410] sm:$0xff] }
 0x7ca   :  { %v13623_v23 = vsel %vm992_vm3, %v2015_v28, %v2019_v16  ;;  %v2023_v59 = vor.u32 %v2021_v52, %v2019_v16  ;;  %v2027_v21 = vrot.slane %v2025_v15, 1 }
 0x7cb   :  { %v6827_v32 = vadd.f32 %v6488_v63, %v5161_v3  ;;  %9202 = vmatmul.msk.bf16.gmra.mxu0 %vm2098_vm1, %v13546_v51  ;;  %v5462_v63 = vsel %vm5207_vm2, %v5459_v26, %v5461_v31  ;;  %v2033_v26 = vshll.u32 %v13657_v8, 16 }
 0x7cc   :  { %v6491_v5 = vpop.f32.mrf.mxu3  ;;  %v13647_v44 = vsel %vm992_vm3, %v2023_v59, %v2027_v21 }
 0x7cd   :  { %v4081_v6 = vpop.f32.mrf.mxu1  ;;  %v7105_v0 = vadd.f32 %v13601_v41, %v6827_v32  ;;  %9490 = vmatmul.msk.bf16.gmra.mxu2 %vm2098_vm1, %v13594_v58 }
 0x7cf   :  { %vm7379_vm14 = vcmp.gt.f32.partialorder %v7105_v0, 0.0  ;;  %v7653_v51 = vmul.f32 0.2, %v7105_v0 }
 0x7d0   :  { %v4825_v29 = vpop.f32.mrf.mxu2  ;;  %v3105_v22 = vpop.f32.mrf.mxu0 }
 0x7d1   :  { %v7927_v17 = vsel %vm7379_vm14, %v7105_v0, %v7653_v51  ;;  %v5162_v55 = vadd.f32 %v4825_v29, %v4080_v9  ;;  %v4082_v54 = vadd.f32 %v4081_v6, %v3105_v22 }
 0x7d2   :  { %v10370_v37 = vpack.c.bf16 %v7927_v17, %v7926_v33  ;;  %v5463_v33 = vrot.slane %v13657_v8, 1 }
 0x7d3   :  { %v6828_v13 = vadd.f32 %v6491_v5, %v5162_v55  ;;  %v2029_v55 = vshrl.u32 %v13633_v43, 16 }
 0x7d4   :  { %v6493_v48 = vpop.f32.mrf.mxu3  ;;  %10592 = vst [vmem:[%s13937_s3 + $0x398] sm:$0xff] %v10370_v37  }
 0x7d5   :  { %v4084_v34 = vpop.f32.mrf.mxu1  ;;  %v7106_v24 = vadd.f32 %v13601_v41, %v6828_v13  ;;  %v2035_v13 = vrot.slane %v2033_v26, 1 }
 0x7d7   :  { %v7654_v20 = vmul.f32 0.2, %v7106_v24  ;;  %vm7380_vm15 = vcmp.gt.f32.partialorder %v7106_v24, 0.0 }
 0x7d8   :  { %9344 = vmatmul.msk.bf16.gmra.mxu1 %vm2098_vm1, %v13532_v46  ;;  %v4827_v38 = vpop.f32.mrf.mxu2  ;;  %v3108_v30 = vpop.f32.mrf.mxu0 }
 0x7d9   :  { %9634 = vmatmul.msk.bf16.gmra.mxu3 %vm2098_vm1, %v5460_v25  ;;  %v5163_v14 = vadd.f32 %v4827_v38, %v4082_v54  ;;  %v4085_v46 = vadd.f32 %v4084_v34, %v3108_v30  ;;  %v2031_v34 = vor.u32 %v2029_v55, %v2027_v21 }
 0x7db   :  { %v6829_v61 = vadd.f32 %v6493_v48, %v5163_v14  ;;  %9203 = vmatmul.msk.bf16.gmra.mxu0 %vm2098_vm1, %v13570_v36  ;;  %v7928_v36 = vsel %vm7380_vm15, %v7106_v24, %v7654_v20  ;;  %v5464_v48 = vsel %vm5207_vm2, %v5461_v31, %v5463_v33  ;;  %v13671_v30 = vsel %vm992_vm3, %v2031_v34, %v2035_v13  ;;  %v13681_v20 = vld [vmem:[%s13935_s0 + $0x418] sm:$0xff] }
 0x7dc   :  { %v6496_v35 = vpop.f32.mrf.mxu3  ;;  %v2041_v31 = vshll.u32 %v13681_v20, 16 }
 0x7dd   :  { %v4086_v40 = vpop.f32.mrf.mxu1  ;;  %v7107_v39 = vadd.f32 %v13601_v41, %v6829_v61  ;;  %9491 = vmatmul.msk.bf16.gmra.mxu2 %vm2098_vm1, %v13623_v23 }
 0x7df   :  { %vm7381_vm0 = vcmp.gt.f32.partialorder %v7107_v39, 0.0  ;;  %v7655_v42 = vmul.f32 0.2, %v7107_v39 }
 0x7e0   :  { %v4830_v50 = vpop.f32.mrf.mxu2  ;;  %v3110_v57 = vpop.f32.mrf.mxu0 }
 0x7e1   :  { %v7929_v53 = vsel %vm7381_vm0, %v7107_v39, %v7655_v42  ;;  %v5164_v47 = vadd.f32 %v4830_v50, %v4085_v46  ;;  %v4087_v2 = vadd.f32 %v4086_v40, %v3110_v57 }
 0x7e2   :  { %v10375_v49 = vpack.c.bf16 %v7929_v53, %v7928_v36  ;;  %v5465_v36 = vrot.slane %v13681_v20, 1 }
 0x7e3   :  { %v6830_v18 = vadd.f32 %v6496_v35, %v5164_v47  ;;  %v2037_v47 = vshrl.u32 %v13657_v8, 16 }
 0x7e4   :  { %v6498_v60 = vpop.f32.mrf.mxu3  ;;  %10593 = vst [vmem:[%s13937_s3 + $0x3a0] sm:$0xff] %v10375_v49  }
 0x7e5   :  { %v4089_v56 = vpop.f32.mrf.mxu1  ;;  %v7108_v4 = vadd.f32 %v13601_v41, %v6830_v18  ;;  %v2043_v18 = vrot.slane %v2041_v31, 1 }
 0x7e7   :  { %v7656_v5 = vmul.f32 0.2, %v7108_v4  ;;  %vm7382_vm4 = vcmp.gt.f32.partialorder %v7108_v4, 0.0 }
 0x7e8   :  { %9345 = vmatmul.msk.bf16.gmra.mxu1 %vm2098_vm1, %v13556_v12  ;;  %v4832_v62 = vpop.f32.mrf.mxu2  ;;  %v3113_v45 = vpop.f32.mrf.mxu0 }
 0x7e9   :  { %9635 = vmatmul.msk.bf16.gmra.mxu3 %vm2098_vm1, %v5462_v63  ;;  %v5165_v1 = vadd.f32 %v4832_v62, %v4087_v2  ;;  %v4090_v12 = vadd.f32 %v4089_v56, %v3113_v45  ;;  %v2039_v56 = vor.u32 %v2037_v47, %v2035_v13 }
 0x7eb   :  { %v6831_v7 = vadd.f32 %v6498_v60, %v5165_v1  ;;  %9204 = vmatmul.msk.bf16.gmra.mxu0 %vm2098_vm1, %v13594_v58  ;;  %v7930_v58 = vsel %vm7382_vm4, %v7108_v4, %v7656_v5  ;;  %v5466_v60 = vsel %vm5207_vm2, %v5463_v33, %v5465_v36  ;;  %v13695_v45 = vsel %vm992_vm3, %v2039_v56, %v2043_v18  ;;  %v13705_v5 = vld [vmem:[%s13935_s0 + $0x420] sm:$0xff] }
 0x7ec   :  { %v6501_v3 = vpop.f32.mrf.mxu3  ;;  %v2049_v33 = vshll.u32 %v13705_v5, 16 }
 0x7ed   :  { %v4091_v32 = vpop.f32.mrf.mxu1  ;;  %v7109_v6 = vadd.f32 %v13601_v41, %v6831_v7  ;;  %9492 = vmatmul.msk.bf16.gmra.mxu2 %vm2098_vm1, %v13647_v44 }
 0x7ef   :  { %vm7383_vm5 = vcmp.gt.f32.partialorder %v7109_v6, 0.0  ;;  %v7657_v0 = vmul.f32 0.2, %v7109_v6 }
 0x7f0   :  { %v4835_v9 = vpop.f32.mrf.mxu2  ;;  %v3115_v51 = vpop.f32.mrf.mxu0 }
 0x7f1   :  { %v7931_v29 = vsel %vm7383_vm5, %v7109_v6, %v7657_v0  ;;  %v5166_v22 = vadd.f32 %v4835_v9, %v4090_v12  ;;  %v4092_v25 = vadd.f32 %v4091_v32, %v3115_v51 }
 0x7f2   :  { %v10380_v17 = vpack.c.bf16 %v7931_v29, %v7930_v58  ;;  %v5467_v58 = vrot.slane %v13705_v5, 1 }
 0x7f3   :  { %v6832_v10 = vadd.f32 %v6501_v3, %v5166_v22  ;;  %v2045_v22 = vshrl.u32 %v13681_v20, 16 }
 0x7f4   :  { %v6503_v37 = vpop.f32.mrf.mxu3  ;;  %10594 = vst [vmem:[%s13937_s3 + $0x3a8] sm:$0xff] %v10380_v17  }
 0x7f5   :  { %v4094_v19 = vpop.f32.mrf.mxu1  ;;  %v7110_v54 = vadd.f32 %v13601_v41, %v6832_v10  ;;  %v2051_v10 = vrot.slane %v2049_v33, 1 }
 0x7f7   :  { %v7658_v35 = vmul.f32 0.2, %v7110_v54  ;;  %vm7384_vm6 = vcmp.gt.f32.partialorder %v7110_v54, 0.0 }
 0x7f8   :  { %9346 = vmatmul.msk.bf16.gmra.mxu1 %vm2098_vm1, %v13580_v27  ;;  %v4837_v28 = vpop.f32.mrf.mxu2  ;;  %v3118_v16 = vpop.f32.mrf.mxu0 }
 0x7f9   :  { %9636 = vmatmul.msk.bf16.gmra.mxu3 %vm2098_vm1, %v5464_v48  ;;  %v5167_v38 = vadd.f32 %v4837_v28, %v4092_v25  ;;  %v4095_v27 = vadd.f32 %v4094_v19, %v3118_v16  ;;  %v2047_v19 = vor.u32 %v2045_v22, %v2043_v18 }
 0x7fb   :  { %v6833_v24 = vadd.f32 %v6503_v37, %v5167_v38  ;;  %9205 = vmatmul.msk.bf16.gmra.mxu0 %vm2098_vm1, %v13623_v23  ;;  %v7932_v23 = vsel %vm7384_vm6, %v7110_v54, %v7658_v35  ;;  %v5468_v37 = vsel %vm5207_vm2, %v5465_v36, %v5467_v58  ;;  %v13719_v16 = vsel %vm992_vm3, %v2047_v19, %v2051_v10  ;;  %v13729_v35 = vld [vmem:[%s13935_s0 + $0x428] sm:$0xff] }
 0x7fc   :  { %v6506_v14 = vpop.f32.mrf.mxu3  ;;  %v2057_v36 = vshll.u32 %v13729_v35, 16 }
 0x7fd   :  { %v4096_v61 = vpop.f32.mrf.mxu1  ;;  %v7111_v40 = vadd.f32 %v13601_v41, %v6833_v24  ;;  %9493 = vmatmul.msk.bf16.gmra.mxu2 %vm2098_vm1, %v13671_v30 }
 0x7ff   :  { %vm7385_vm7 = vcmp.gt.f32.partialorder %v7111_v40, 0.0  ;;  %v7659_v39 = vmul.f32 0.2, %v7111_v40 }
 0x800   :  { %v4840_v46 = vpop.f32.mrf.mxu2  ;;  %v3120_v42 = vpop.f32.mrf.mxu0 }
 0x801   :  { %v7933_v50 = vsel %vm7385_vm7, %v7111_v40, %v7659_v39  ;;  %v5168_v57 = vadd.f32 %v4840_v46, %v4095_v27  ;;  %v4097_v63 = vadd.f32 %v4096_v61, %v3120_v42 }
 0x802   :  { %v10385_v53 = vpack.c.bf16 %v7933_v50, %v7932_v23  ;;  %v5469_v23 = vrot.slane %v13729_v35, 1 }
 0x803   :  { %v6834_v15 = vadd.f32 %v6506_v14, %v5168_v57  ;;  %v2053_v57 = vshrl.u32 %v13705_v5, 16 }
 0x804   :  { %v6508_v49 = vpop.f32.mrf.mxu3  ;;  %10595 = vst [vmem:[%s13937_s3 + $0x3b0] sm:$0xff] %v10385_v53  }
 0x805   :  { %v4099_v52 = vpop.f32.mrf.mxu1  ;;  %v7112_v2 = vadd.f32 %v13601_v41, %v6834_v15  ;;  %v2059_v15 = vrot.slane %v2057_v36, 1 }
 0x807   :  { %v7660_v3 = vmul.f32 0.2, %v7112_v2  ;;  %vm7386_vm8 = vcmp.gt.f32.partialorder %v7112_v2, 0.0 }
 0x808   :  { %9347 = vmatmul.msk.bf16.gmra.mxu1 %vm2098_vm1, %v13609_v11  ;;  %v4842_v59 = vpop.f32.mrf.mxu2  ;;  %v3123_v21 = vpop.f32.mrf.mxu0 }
 0x809   :  { %9637 = vmatmul.msk.bf16.gmra.mxu3 %vm2098_vm1, %v5466_v60  ;;  %v5169_v62 = vadd.f32 %v4842_v59, %v4097_v63  ;;  %v4100_v11 = vadd.f32 %v4099_v52, %v3123_v21  ;;  %v2055_v52 = vor.u32 %v2053_v57, %v2051_v10 }
 0x80b   :  { %v6835_v4 = vadd.f32 %v6508_v49, %v5169_v62  ;;  %9206 = vmatmul.msk.bf16.gmra.mxu0 %vm2098_vm1, %v13647_v44  ;;  %v7934_v44 = vsel %vm7386_vm8, %v7112_v2, %v7660_v3  ;;  %v5470_v49 = vsel %vm5207_vm2, %v5467_v58, %v5469_v23  ;;  %v13743_v21 = vsel %vm992_vm3, %v2055_v52, %v2059_v15  ;;  %v13753_v3 = vld [vmem:[%s13935_s0 + $0x430] sm:$0xff] }
 0x80c   :  { %v6511_v1 = vpop.f32.mrf.mxu3  ;;  %v2065_v58 = vshll.u32 %v13753_v3, 16 }
 0x80d   :  { %v4101_v7 = vpop.f32.mrf.mxu1  ;;  %v7113_v32 = vadd.f32 %v13601_v41, %v6835_v4  ;;  %9494 = vmatmul.msk.bf16.gmra.mxu2 %vm2098_vm1, %v13695_v45 }
 0x80f   :  { %vm7387_vm9 = vcmp.gt.f32.partialorder %v7113_v32, 0.0  ;;  %v7661_v6 = vmul.f32 0.2, %v7113_v32 }
 0x810   :  { %v4845_v12 = vpop.f32.mrf.mxu2  ;;  %v3125_v0 = vpop.f32.mrf.mxu0 }
 0x811   :  { %v7935_v9 = vsel %vm7387_vm9, %v7113_v32, %v7661_v6  ;;  %v5170_v51 = vadd.f32 %v4845_v12, %v4100_v11  ;;  %v4102_v48 = vadd.f32 %v4101_v7, %v3125_v0 }
 0x812   :  { %v10390_v29 = vpack.c.bf16 %v7935_v9, %v7934_v44  ;;  %v5471_v44 = vrot.slane %v13753_v3, 1 }
 0x813   :  { %v6836_v26 = vadd.f32 %v6511_v1, %v5170_v51  ;;  %v2061_v51 = vshrl.u32 %v13729_v35, 16 }
 0x814   :  { %v6513_v17 = vpop.f32.mrf.mxu3  ;;  %10596 = vst [vmem:[%s13937_s3 + $0x3b8] sm:$0xff] %v10390_v29  }
 0x815   :  { %v4104_v55 = vpop.f32.mrf.mxu1  ;;  %v7114_v25 = vadd.f32 %v13601_v41, %v6836_v26  ;;  %v2067_v26 = vrot.slane %v2065_v58, 1 }
 0x817   :  { %v7662_v14 = vmul.f32 0.2, %v7114_v25  ;;  %vm7388_vm10 = vcmp.gt.f32.partialorder %v7114_v25, 0.0 }
 0x818   :  { %9348 = vmatmul.msk.bf16.gmra.mxu1 %vm2098_vm1, %v13633_v43  ;;  %v4847_v34 = vpop.f32.mrf.mxu2  ;;  %v3128_v13 = vpop.f32.mrf.mxu0 }
 0x819   :  { %9638 = vmatmul.msk.bf16.gmra.mxu3 %vm2098_vm1, %v5468_v37  ;;  %v5171_v28 = vadd.f32 %v4847_v34, %v4102_v48  ;;  %v4105_v43 = vadd.f32 %v4104_v55, %v3128_v13  ;;  %v2063_v55 = vor.u32 %v2061_v51, %v2059_v15 }
 0x81b   :  { %v6837_v54 = vadd.f32 %v6513_v17, %v5171_v28  ;;  %9207 = vmatmul.msk.bf16.gmra.mxu0 %vm2098_vm1, %v13671_v30  ;;  %v7936_v30 = vsel %vm7388_vm10, %v7114_v25, %v7662_v14  ;;  %v5472_v17 = vsel %vm5207_vm2, %v5469_v23, %v5471_v44  ;;  %v13767_v13 = vsel %vm992_vm3, %v2063_v55, %v2067_v26  ;;  %v13777_v14 = vld [vmem:[%s13935_s0 + $0x438] sm:$0xff] }
 0x81c   :  { %v6516_v38 = vpop.f32.mrf.mxu3  ;;  %v2073_v23 = vshll.u32 %v13777_v14, 16 }
 0x81d   :  { %v4106_v24 = vpop.f32.mrf.mxu1  ;;  %v7115_v61 = vadd.f32 %v13601_v41, %v6837_v54  ;;  %9495 = vmatmul.msk.bf16.gmra.mxu2 %vm2098_vm1, %v13719_v16 }
 0x81f   :  { %vm7389_vm11 = vcmp.gt.f32.partialorder %v7115_v61, 0.0  ;;  %v7663_v40 = vmul.f32 0.2, %v7115_v61 }
 0x820   :  { %v4850_v27 = vpop.f32.mrf.mxu2  ;;  %v3130_v39 = vpop.f32.mrf.mxu0 }
 0x821   :  { %v7937_v46 = vsel %vm7389_vm11, %v7115_v61, %v7663_v40  ;;  %v5172_v42 = vadd.f32 %v4850_v27, %v4105_v43  ;;  %v4107_v60 = vadd.f32 %v4106_v24, %v3130_v39 }
 0x822   :  { %v10395_v50 = vpack.c.bf16 %v7937_v46, %v7936_v30  ;;  %v5473_v30 = vrot.slane %v13777_v14, 1 }
 0x823   :  { %v6838_v31 = vadd.f32 %v6516_v38, %v5172_v42  ;;  %v2069_v42 = vshrl.u32 %v13753_v3, 16 }
 0x824   :  { %v6518_v53 = vpop.f32.mrf.mxu3  ;;  %10597 = vst [vmem:[%s13937_s3 + $0x3c0] sm:$0xff] %v10395_v50  }
 0x825   :  { %v4109_v47 = vpop.f32.mrf.mxu1  ;;  %v7116_v63 = vadd.f32 %v13601_v41, %v6838_v31  ;;  %v2075_v31 = vrot.slane %v2073_v23, 1 }
 0x827   :  { %v7664_v1 = vmul.f32 0.2, %v7116_v63  ;;  %vm7390_vm12 = vcmp.gt.f32.partialorder %v7116_v63, 0.0 }
 0x828   :  { %9349 = vmatmul.msk.bf16.gmra.mxu1 %vm2098_vm1, %v13657_v8  ;;  %v4852_v56 = vpop.f32.mrf.mxu2  ;;  %v3133_v18 = vpop.f32.mrf.mxu0 }
 0x829   :  { %9639 = vmatmul.msk.bf16.gmra.mxu3 %vm2098_vm1, %v5470_v49  ;;  %v5173_v59 = vadd.f32 %v4852_v56, %v4107_v60  ;;  %v4110_v8 = vadd.f32 %v4109_v47, %v3133_v18  ;;  %v2071_v47 = vor.u32 %v2069_v42, %v2067_v26 }
 0x82b   :  { %v6839_v2 = vadd.f32 %v6518_v53, %v5173_v59  ;;  %9208 = vmatmul.msk.bf16.gmra.mxu0 %vm2098_vm1, %v13695_v45  ;;  %v7938_v45 = vsel %vm7390_vm12, %v7116_v63, %v7664_v1  ;;  %v5474_v53 = vsel %vm5207_vm2, %v5471_v44, %v5473_v30  ;;  %v13791_v18 = vsel %vm992_vm3, %v2071_v47, %v2075_v31  ;;  %v13801_v1 = vld [vmem:[%s13935_s0 + $0x440] sm:$0xff] }
 0x82c   :  { %v6521_v62 = vpop.f32.mrf.mxu3  ;;  %v2081_v44 = vshll.u32 %v13801_v1, 16 }
 0x82d   :  { %v4111_v4 = vpop.f32.mrf.mxu1  ;;  %v7117_v7 = vadd.f32 %v13601_v41, %v6839_v2  ;;  %9496 = vmatmul.msk.bf16.gmra.mxu2 %vm2098_vm1, %v13743_v21 }
 0x82f   :  { %vm7391_vm13 = vcmp.gt.f32.partialorder %v7117_v7, 0.0  ;;  %v7665_v32 = vmul.f32 0.2, %v7117_v7 }
 0x830   :  { %v4855_v11 = vpop.f32.mrf.mxu2  ;;  %v3135_v6 = vpop.f32.mrf.mxu0 }
 0x831   :  { %v7939_v12 = vsel %vm7391_vm13, %v7117_v7, %v7665_v32  ;;  %v5174_v0 = vadd.f32 %v4855_v11, %v4110_v8  ;;  %v4112_v37 = vadd.f32 %v4111_v4, %v3135_v6 }
 0x832   :  { %v10400_v9 = vpack.c.bf16 %v7939_v12, %v7938_v45  ;;  %v5475_v45 = vrot.slane %v13801_v1, 1 }
 0x833   :  { %v6840_v33 = vadd.f32 %v6521_v62, %v5174_v0  ;;  %v2077_v0 = vshrl.u32 %v13777_v14, 16 }
 0x834   :  { %v6523_v29 = vpop.f32.mrf.mxu3  ;;  %10598 = vst [vmem:[%s13937_s3 + $0x3c8] sm:$0xff] %v10400_v9  }
 0x835   :  { %v4114_v22 = vpop.f32.mrf.mxu1  ;;  %v7118_v48 = vadd.f32 %v13601_v41, %v6840_v33  ;;  %v2083_v33 = vrot.slane %v2081_v44, 1 }
 0x837   :  { %v7666_v38 = vmul.f32 0.2, %v7118_v48  ;;  %vm7392_vm14 = vcmp.gt.f32.partialorder %v7118_v48, 0.0 }
 0x838   :  { %9350 = vmatmul.msk.bf16.gmra.mxu1 %vm2098_vm1, %v13681_v20  ;;  %v4857_v19 = vpop.f32.mrf.mxu2  ;;  %v3138_v10 = vpop.f32.mrf.mxu0 }
 0x839   :  { %9640 = vmatmul.msk.bf16.gmra.mxu3 %vm2098_vm1, %v5472_v17  ;;  %v5175_v34 = vadd.f32 %v4857_v19, %v4112_v37  ;;  %v4115_v20 = vadd.f32 %v4114_v22, %v3138_v10  ;;  %v2079_v22 = vor.u32 %v2077_v0, %v2075_v31 }
 0x83b   :  { %v6841_v25 = vadd.f32 %v6523_v29, %v5175_v34  ;;  %9209 = vmatmul.msk.bf16.gmra.mxu0 %vm2098_vm1, %v13719_v16  ;;  %v7940_v16 = vsel %vm7392_vm14, %v7118_v48, %v7666_v38  ;;  %v5476_v29 = vsel %vm5207_vm2, %v5473_v30, %v5475_v45  ;;  %v13815_v10 = vsel %vm992_vm3, %v2079_v22, %v2083_v33  ;;  %v13825_v38 = vld [vmem:[%s13935_s0 + $0x448] sm:$0xff]  }
 0x83c   :  { %v6526_v28 = vpop.f32.mrf.mxu3  ;;  %v4199_v30 = vshll.u32 %v13825_v38, 16 }
 0x83d   :  { %v4116_v54 = vpop.f32.mrf.mxu1  ;;  %v7119_v24 = vadd.f32 %v13601_v41, %v6841_v25  ;;  %9497 = vmatmul.msk.bf16.gmra.mxu2 %vm2098_vm1, %v13767_v13 }
 0x83f   :  { %vm7393_vm15 = vcmp.gt.f32.partialorder %v7119_v24, 0.0  ;;  %v7667_v61 = vmul.f32 0.2, %v7119_v24 }
 0x840   :  { %v4860_v43 = vpop.f32.mrf.mxu2  ;;  %v3140_v40 = vpop.f32.mrf.mxu0 }
 0x841   :  { %v7941_v27 = vsel %vm7393_vm15, %v7119_v24, %v7667_v61  ;;  %v5176_v39 = vadd.f32 %v4860_v43, %v4115_v20  ;;  %v4117_v49 = vadd.f32 %v4116_v54, %v3140_v40 }
 0x842   :  { %v10405_v46 = vpack.c.bf16 %v7941_v27, %v7940_v16  ;;  %v5477_v16 = vrot.slane %v13825_v38, 1 }
 0x843   :  { %v6842_v36 = vadd.f32 %v6526_v28, %v5176_v39  ;;  %v2085_v39 = vshrl.u32 %v13801_v1, 16 }
 0x844   :  { %v6528_v50 = vpop.f32.mrf.mxu3  ;;  %10599 = vst [vmem:[%s13937_s3 + $0x3d0] sm:$0xff] %v10405_v46  }
 0x845   :  { %v4119_v57 = vpop.f32.mrf.mxu1  ;;  %v7120_v60 = vadd.f32 %v13601_v41, %v6842_v36  ;;  %v4201_v36 = vrot.slane %v4199_v30, 1 }
 0x847   :  { %v7668_v62 = vmul.f32 0.2, %v7120_v60  ;;  %vm7394_vm0 = vcmp.gt.f32.partialorder %v7120_v60, 0.0 }
 0x848   :  { %9351 = vmatmul.msk.bf16.gmra.mxu1 %vm2098_vm1, %v13705_v5  ;;  %v4862_v52 = vpop.f32.mrf.mxu2  ;;  %v3143_v15 = vpop.f32.mrf.mxu0 }
 0x849   :  { %9641 = vmatmul.msk.bf16.gmra.mxu3 %vm2098_vm1, %v5474_v53  ;;  %v5177_v56 = vadd.f32 %v4862_v52, %v4117_v49  ;;  %v4120_v5 = vadd.f32 %v4119_v57, %v3143_v15  ;;  %v13834_v57 = vor.u32 %v2085_v39, %v2083_v33 }
 0x84b   :  { %v6843_v63 = vadd.f32 %v6528_v50, %v5177_v56  ;;  %9210 = vmatmul.msk.bf16.gmra.mxu0 %vm2098_vm1, %v13743_v21  ;;  %v7942_v21 = vsel %vm7394_vm0, %v7120_v60, %v7668_v62  ;;  %v5478_v50 = vsel %vm5207_vm2, %v5475_v45, %v5477_v16  ;;  %v4202_v15 = vsel %vm992_vm3, %v13834_v57, %v4201_v36  ;;  %v9783_v62 = vld [vmem:[%s13935_s0 + $0x450] sm:$0xff] }
 0x84c   :  { %v6531_v59 = vpop.f32.mrf.mxu3  ;;  %v4207_v45 = vshll.u32 %v9783_v62, 16  ;;  %v4211_v30 = vshrl.u32 %v9783_v62, 16 }
 0x84d   :  { %v4121_v2 = vpop.f32.mrf.mxu1  ;;  %v7121_v4 = vadd.f32 %v13601_v41, %v6843_v63  ;;  %9498 = vmatmul.msk.bf16.gmra.mxu2 %vm2098_vm1, %v13791_v18 }
 0x84f   :  { %vm7395_vm4 = vcmp.gt.f32.partialorder %v7121_v4, 0.0  ;;  %v7669_v7 = vmul.f32 0.2, %v7121_v4 }
 0x850   :  { %v4865_v8 = vpop.f32.mrf.mxu2  ;;  %v3145_v32 = vpop.f32.mrf.mxu0 }
 0x851   :  { %v7943_v11 = vsel %vm7395_vm4, %v7121_v4, %v7669_v7  ;;  %v5178_v6 = vadd.f32 %v4865_v8, %v4120_v5  ;;  %v4122_v17 = vadd.f32 %v4121_v2, %v3145_v32 }
 0x852   :  { %v10410_v12 = vpack.c.bf16 %v7943_v11, %v7942_v21  ;;  %v5479_v21 = vrot.slane %v9783_v62, 1 }
 0x853   :  { %v6844_v58 = vadd.f32 %v6531_v59, %v5178_v6  ;;  %v4203_v6 = vshrl.u32 %v13825_v38, 16 }
 0x854   :  { %v6533_v9 = vpop.f32.mrf.mxu3  ;;  %10600 = vst [vmem:[%s13937_s3 + $0x3d8] sm:$0xff] %v10410_v12  }
 0x855   :  { %v4124_v51 = vpop.f32.mrf.mxu1  ;;  %v7122_v37 = vadd.f32 %v13601_v41, %v6844_v58  ;;  %v4209_v58 = vrot.slane %v4207_v45, 1 }
 0x857   :  { %v7670_v28 = vmul.f32 0.2, %v7122_v37  ;;  %vm7396_vm5 = vcmp.gt.f32.partialorder %v7122_v37, 0.0 }
 0x858   :  { %9352 = vmatmul.msk.bf16.gmra.mxu1 %vm2098_vm1, %v13729_v35  ;;  %v4867_v55 = vpop.f32.mrf.mxu2  ;;  %v3148_v26 = vpop.f32.mrf.mxu0 }
 0x859   :  { %9642 = vmatmul.msk.bf16.gmra.mxu3 %vm2098_vm1, %v5476_v29  ;;  %v5179_v19 = vadd.f32 %v4867_v55, %v4122_v17  ;;  %v4125_v35 = vadd.f32 %v4124_v51, %v3148_v26  ;;  %v4205_v51 = vor.u32 %v4203_v6, %v4201_v36  ;;  %v298_v29 = vld [vmem:[%s13935_s0 + $0x458] sm:$0xf]  ;;  %v9790_v55 = vunpack.c.l.b16 %v13825_v38 }
 0x85b   :  { %v6845_v48 = vadd.f32 %v6533_v9, %v5179_v19  ;;  %9211 = vmatmul.msk.bf16.gmra.mxu0 %vm2098_vm1, %v13767_v13  ;;  %v7944_v13 = vsel %vm7396_vm5, %v7122_v37, %v7670_v28  ;;  %v5480_v9 = vsel %vm5207_vm2, %v5477_v16, %v5479_v21  ;;  %v4194_v19 = vunpack.c.l.b16 %v298_v29 }
 0x85c   :  { %v6536_v34 = vpop.f32.mrf.mxu3 }
 0x85d   :  { %v4126_v25 = vpop.f32.mrf.mxu1  ;;  %v7123_v54 = vadd.f32 %v13601_v41, %v6845_v48  ;;  %9499 = vmatmul.msk.bf16.gmra.mxu2 %vm2098_vm1, %v13815_v10  ;;  %v4210_v48 = vsel %vm992_vm3, %v4205_v51, %v4209_v58  ;;  %v4197_v38 = vpack.c.b16 %v4194_v19, %v4194_v19 }
 0x85f   :  { %vm7397_vm6 = vcmp.gt.f32.partialorder %v7123_v54, 0.0  ;;  %v7671_v24 = vmul.f32 0.2, %v7123_v54 }
 0x860   :  { %v4870_v20 = vpop.f32.mrf.mxu2  ;;  %v3150_v61 = vpop.f32.mrf.mxu0 }
 0x861   :  { %v7945_v43 = vsel %vm7397_vm6, %v7123_v54, %v7671_v24  ;;  %v5180_v40 = vadd.f32 %v4870_v20, %v4125_v35  ;;  %v4127_v53 = vadd.f32 %v4126_v25, %v3150_v61  ;;  %v991_v54 = vpack.c.b16 %v9790_v55, %v9790_v55 }
 0x862   :  { %v10415_v27 = vpack.c.bf16 %v7945_v43, %v7944_v13 }
 0x863   :  { %v6846_v23 = vadd.f32 %v6536_v34, %v5180_v40  ;;  %v2089_v43 = vshll.u32 %v991_v54, 16 }
 0x864   :  { %v6538_v46 = vpop.f32.mrf.mxu3  ;;  %10601 = vst [vmem:[%s13937_s3 + $0x3e0] sm:$0xff] %v10415_v27  }
 0x865   :  { %v4129_v42 = vpop.f32.mrf.mxu1  ;;  %v7124_v49 = vadd.f32 %v13601_v41, %v6846_v23 }
 0x867   :  { %v7672_v59 = vmul.f32 0.2, %v7124_v49  ;;  %vm7398_vm7 = vcmp.gt.f32.partialorder %v7124_v49, 0.0 }
 0x868   :  { %9353 = vmatmul.msk.bf16.gmra.mxu1 %vm2098_vm1, %v13753_v3  ;;  %v4872_v47 = vpop.f32.mrf.mxu2  ;;  %v3153_v31 = vpop.f32.mrf.mxu0 }
 0x869   :  { %9643 = vmatmul.msk.bf16.gmra.mxu3 %vm2098_vm1, %v5478_v50  ;;  %v5181_v52 = vadd.f32 %v4872_v47, %v4127_v53  ;;  %v4130_v3 = vadd.f32 %v4129_v42, %v3153_v31  ;;  %v7946_v8 = vsel %vm7398_vm7, %v7124_v49, %v7672_v59  ;;  %v2091_v50 = vrot.slane %v2089_v43, 1 }
 0x86a   :  { %v4213_v47 = vor.u32 %v4211_v30, %v4209_v58 }
 0x86b   :  { %v6847_v60 = vadd.f32 %v6538_v46, %v5181_v52  ;;  %9212 = vmatmul.msk.bf16.gmra.mxu0 %vm2098_vm1, %v13791_v18  ;;  %v4215_v46 = vshll.u32 %v4197_v38, 16 }
 0x86c   :  { %v6541_v56 = vpop.f32.mrf.mxu3 }
 0x86d   :  { %v4131_v63 = vpop.f32.mrf.mxu1  ;;  %v7125_v2 = vadd.f32 %v13601_v41, %v6847_v60  ;;  %9500 = vmatmul.msk.bf16.gmra.mxu2 %vm2098_vm1, %v4202_v15  ;;  %v4217_v31 = vrot.slane %v4215_v46, 1  ;;  %v2092_v60 = vsel %vm992_vm3, %v13834_v57, %v2091_v50 }
 0x86f   :  { %vm7399_vm8 = vcmp.gt.f32.partialorder %v7125_v2, 0.0  ;;  %v7673_v4 = vmul.f32 0.2, %v7125_v2  ;;  %v4218_v59 = vsel %vm992_vm3, %v4213_v47, %v4217_v31 }
 0x870   :  { %v4875_v5 = vpop.f32.mrf.mxu2  ;;  %v3155_v7 = vpop.f32.mrf.mxu0 }
 0x871   :  { %v7947_v32 = vsel %vm7399_vm8, %v7125_v2, %v7673_v4  ;;  %v5182_v18 = vadd.f32 %v4875_v5, %v4130_v3  ;;  %v4132_v22 = vadd.f32 %v4131_v63, %v3155_v7 }
 0x872   :  { %v10420_v11 = vpack.c.bf16 %v7947_v32, %v7946_v8 }
 0x873   :  { %v6848_v44 = vadd.f32 %v6541_v56, %v5182_v18 }
 0x874   :  { %v6543_v12 = vpop.f32.mrf.mxu3  ;;  %10602 = vst [vmem:[%s13937_s3 + $0x3e8] sm:$0xff] %v10420_v11  }
 0x875   :  { %v4134_v0 = vpop.f32.mrf.mxu1  ;;  %v7126_v26 = vadd.f32 %v13601_v41, %v6848_v44 }
 0x877   :  { %vm7400_vm9 = vcmp.gt.f32.partialorder %v7126_v26, 0.0 }
 0x878   :  { %9354 = vmatmul.msk.bf16.gmra.mxu1 %vm2098_vm1, %v13777_v14  ;;  %v4877_v33 = vpop.f32.mrf.mxu2  ;;  %v3158_v17 = vpop.f32.mrf.mxu0  ;;  %v7674_v14 = vmul.f32 0.2, %v7126_v26 }
 0x879   :  { %9644 = vmatmul.msk.bf16.gmra.mxu3 %vm2098_vm1, %v5480_v9  ;;  %v5183_v37 = vadd.f32 %v4877_v33, %v4132_v22  ;;  %v4135_v24 = vadd.f32 %v4134_v0, %v3158_v17 }
 0x87a   :  { %v7948_v40 = vsel %vm7400_vm9, %v7126_v26, %v7674_v14 }
 0x87b   :  { %v6849_v34 = vadd.f32 %v6543_v12, %v5183_v37  ;;  %9213 = vmatmul.msk.bf16.gmra.mxu0 %vm2098_vm1, %v13815_v10  ;;  %v5481_v10 = vrot.slane %v4197_v38, 1 }
 0x87c   :  { %v6546_v25 = vpop.f32.mrf.mxu3 }
 0x87d   :  { %v4136_v28 = vpop.f32.mrf.mxu1  ;;  %v7127_v35 = vadd.f32 %v13601_v41, %v6849_v34  ;;  %9501 = vmatmul.msk.bf16.gmra.mxu2 %vm2098_vm1, %v4210_v48  ;;  %v5482_v53 = vsel %vm5207_vm2, %v5479_v21, %v5481_v10 }
 0x87f   :  { %vm7401_vm10 = vcmp.gt.f32.partialorder %v7127_v35, 0.0  ;;  %v7675_v20 = vmul.f32 0.2, %v7127_v35 }
 0x880   :  { %v4880_v61 = vpop.f32.mrf.mxu2  ;;  %v3160_v13 = vpop.f32.mrf.mxu0 }
 0x881   :  { %v7949_v16 = vsel %vm7401_vm10, %v7127_v35, %v7675_v20  ;;  %v5184_v27 = vadd.f32 %v4880_v61, %v4135_v24  ;;  %v4137_v49 = vadd.f32 %v4136_v28, %v3160_v13 }
 0x882   :  { %v10425_v39 = vpack.c.bf16 %v7949_v16, %v7948_v40 }
 0x883   :  { %v6850_v36 = vadd.f32 %v6546_v25, %v5184_v27 }
 0x884   :  { %v6548_v42 = vpop.f32.mrf.mxu3  ;;  %10603 = vst [vmem:[%s13937_s3 + $0x3f0] sm:$0xff] %v10425_v39  }
 0x885   :  { %v4139_v23 = vpop.f32.mrf.mxu1  ;;  %v7128_v56 = vadd.f32 %v13601_v41, %v6850_v36 }
 0x887   :  { %v7676_v4 = vmul.f32 0.2, %v7128_v56  ;;  %vm7402_vm2 = vcmp.gt.f32.partialorder %v7128_v56, 0.0 }
 0x888   :  { %9355 = vmatmul.msk.bf16.gmra.mxu1 %vm2098_vm1, %v13801_v1  ;;  %v4882_v52 = vpop.f32.mrf.mxu2  ;;  %v3163_v15 = vpop.f32.mrf.mxu0 }
 0x889   :  { %9645 = vmatmul.msk.bf16.gmra.mxu3 %vm2098_vm1, %v5482_v53  ;;  %v5185_v63 = vadd.f32 %v4882_v52, %v4137_v49  ;;  %v4140_v5 = vadd.f32 %v4139_v23, %v3163_v15  ;;  %v7950_v32 = vsel %vm7402_vm2, %v7128_v56, %v7676_v4 }
 0x88b   :  { %v6851_v2 = vadd.f32 %v6548_v42, %v5185_v63  ;;  %9214 = vmatmul.msk.bf16.gmra.mxu0 %vm2098_vm1, %v2092_v60 }
 0x88c   :  { %v6551_v3 = vpop.f32.mrf.mxu3 }
 0x88d   :  { %v4141_v62 = vpop.f32.mrf.mxu1  ;;  %v7129_v1 = vadd.f32 %v13601_v41, %v6851_v2  ;;  %9502 = vmatmul.msk.bf16.gmra.mxu2 %vm2098_vm1, %v4218_v59 }
 0x88f   :  { %vm7403_vm11 = vcmp.gt.f32.partialorder %v7129_v1, 0.0  ;;  %v7677_v7 = vmul.f32 0.2, %v7129_v1 }
 0x890   :  { %v4885_v57 = vpop.f32.mrf.mxu2  ;;  %v3165_v8 = vpop.f32.mrf.mxu0 }
 0x891   :  { %v7951_v18 = vsel %vm7403_vm11, %v7129_v1, %v7677_v7  ;;  %v5186_v21 = vadd.f32 %v4885_v57, %v4140_v5  ;;  %v4142_v0 = vadd.f32 %v4141_v62, %v3165_v8  ;;  %v13898_v1 = vld [vmem:[%s13936_s2] ss:$0 sm:$0xff] }
 0x892   :  { %v10430_v11 = vpack.c.bf16 %v7951_v18, %v7950_v32 }
 0x893   :  { %v6852_v12 = vadd.f32 %v6551_v3, %v5186_v21 }
 0x894   :  { %v6553_v6 = vpop.f32.mrf.mxu3  ;;  %10604 = vst [vmem:[%s13937_s3 + $0x3f8] sm:$0xff] %v10430_v11  }
 0x895   :  { %v4144_v45 = vpop.f32.mrf.mxu1  ;;  %v7130_v51 = vadd.f32 %v13601_v41, %v6852_v12 }
 0x897   :  { %v7678_v17 = vmul.f32 0.2, %v7130_v51  ;;  %vm7404_vm1 = vcmp.gt.f32.partialorder %v7130_v51, 0.0 }
 0x898   :  { %v4887_v44 = vpop.f32.mrf.mxu2  ;;  %v3168_v9 = vpop.f32.mrf.mxu0 }
 0x899   :  { %v5187_v58 = vadd.f32 %v4887_v44, %v4142_v0  ;;  %v4145_v26 = vadd.f32 %v4144_v45, %v3168_v9  ;;  %v7952_v34 = vsel %vm7404_vm1, %v7130_v51, %v7678_v17 }
 0x89b   :  { %v6853_v29 = vadd.f32 %v6553_v6, %v5187_v58 }
 0x89c   :  { %v6556_v22 = vpop.f32.mrf.mxu3 }
 0x89d   :  { %v4146_v33 = vpop.f32.mrf.mxu1  ;;  %v7131_v55 = vadd.f32 %v13601_v41, %v6853_v29 }
 0x89f   :  { %vm7405_vm3 = vcmp.gt.f32.partialorder %v7131_v55, 0.0  ;;  %v7679_v37 = vmul.f32 0.2, %v7131_v55 }
 0x8a0   :  { %v4890_v19 = vpop.f32.mrf.mxu2  ;;  %v3170_v48 = vpop.f32.mrf.mxu0 }
 0x8a1   :  { %v7953_v25 = vsel %vm7405_vm3, %v7131_v55, %v7679_v37  ;;  %v5188_v28 = vadd.f32 %v4890_v19, %v4145_v26  ;;  %v4147_v38 = vadd.f32 %v4146_v33, %v3170_v48 }
 0x8a2   :  { %v10435_v54 = vpack.c.bf16 %v7953_v25, %v7952_v34 }
 0x8a3   :  { %v6854_v24 = vadd.f32 %v6556_v22, %v5188_v28 }
 0x8a4   :  { %v6558_v14 = vpop.f32.mrf.mxu3  ;;  %10605 = vst [vmem:[%s13937_s3 + $0x400] sm:$0xff] %v10435_v54  }
 0x8a5   :  { %v4149_v35 = vpop.f32.mrf.mxu1  ;;  %v7132_v13 = vadd.f32 %v13601_v41, %v6854_v24 }
 0x8a7   :  { %v7680_v10 = vmul.f32 0.2, %v7132_v13  ;;  %vm7406_vm12 = vcmp.gt.f32.partialorder %v7132_v13, 0.0 }
 0x8a8   :  { %v4892_v20 = vpop.f32.mrf.mxu2  ;;  %v3173_v61 = vpop.f32.mrf.mxu0 }
 0x8a9   :  { %v5189_v43 = vadd.f32 %v4892_v20, %v4147_v38  ;;  %v4150_v30 = vadd.f32 %v4149_v35, %v3173_v61  ;;  %v7954_v50 = vsel %vm7406_vm12, %v7132_v13, %v7680_v10 }
 0x8ab   :  { %v6855_v40 = vadd.f32 %v6558_v14, %v5189_v43 }
 0x8ac   :  { %v6561_v16 = vpop.f32.mrf.mxu3 }
 0x8ad   :  { %v4151_v27 = vpop.f32.mrf.mxu1  ;;  %v7133_v39 = vadd.f32 %v13601_v41, %v6855_v40 }
 0x8af   :  { %vm7407_vm13 = vcmp.gt.f32.partialorder %v7133_v39, 0.0  ;;  %v7681_v46 = vmul.f32 0.2, %v7133_v39 }
 0x8b0   :  { %v4895_v42 = vpop.f32.mrf.mxu2  ;;  %v3175_v23 = vpop.f32.mrf.mxu0 }
 0x8b1   :  { %v7955_v36 = vsel %vm7407_vm13, %v7133_v39, %v7681_v46  ;;  %v5190_v53 = vadd.f32 %v4895_v42, %v4150_v30  ;;  %v4152_v15 = vadd.f32 %v4151_v27, %v3175_v23 }
 0x8b2   :  { %v10440_v47 = vpack.c.bf16 %v7955_v36, %v7954_v50 }
 0x8b3   :  { %v6856_v52 = vadd.f32 %v6561_v16, %v5190_v53 }
 0x8b4   :  { %v6563_v31 = vpop.f32.mrf.mxu3  ;;  %10606 = vst [vmem:[%s13937_s3 + $0x408] sm:$0xff] %v10440_v47  }
 0x8b5   :  { %v4154_v49 = vpop.f32.mrf.mxu1  ;;  %v7134_v63 = vadd.f32 %v13601_v41, %v6856_v52 }
 0x8b7   :  { %v7682_v4 = vmul.f32 0.2, %v7134_v63  ;;  %vm7408_vm14 = vcmp.gt.f32.partialorder %v7134_v63, 0.0 }
 0x8b8   :  { %v4897_v60 = vpop.f32.mrf.mxu2  ;;  %v3178_v56 = vpop.f32.mrf.mxu0 }
 0x8b9   :  { %v5191_v59 = vadd.f32 %v4897_v60, %v4152_v15  ;;  %v4155_v7 = vadd.f32 %v4154_v49, %v3178_v56  ;;  %v7956_v18 = vsel %vm7408_vm14, %v7134_v63, %v7682_v4 }
 0x8bb   :  { %v6857_v2 = vadd.f32 %v6563_v31, %v5191_v59 }
 0x8bc   :  { %v6566_v3 = vpop.f32.mrf.mxu3 }
 0x8bd   :  { %v4156_v62 = vpop.f32.mrf.mxu1  ;;  %v7135_v5 = vadd.f32 %v13898_v1, %v6857_v2 }
 0x8bf   :  { %vm7409_vm15 = vcmp.gt.f32.partialorder %v7135_v5, 0.0  ;;  %v7683_v57 = vmul.f32 0.2, %v7135_v5 }
 0x8c0   :  { %v4900_v8 = vpop.f32.mrf.mxu2  ;;  %v3180_v32 = vpop.f32.mrf.mxu0 }
 0x8c1   :  { %v7957_v41 = vsel %vm7409_vm15, %v7135_v5, %v7683_v57  ;;  %v5192_v21 = vadd.f32 %v4900_v8, %v4155_v7  ;;  %v4157_v0 = vadd.f32 %v4156_v62, %v3180_v32 }
 0x8c2   :  { %v10445_v11 = vpack.c.bf16 %v7957_v41, %v7956_v18 }
 0x8c3   :  { %v6858_v12 = vadd.f32 %v6566_v3, %v5192_v21 }
 0x8c4   :  { %v6568_v6 = vpop.f32.mrf.mxu3  ;;  %10607 = vst [vmem:[%s13937_s3 + $0x410] sm:$0xff] %v10445_v11  }
 0x8c5   :  { %v4159_v45 = vpop.f32.mrf.mxu1  ;;  %v7136_v51 = vadd.f32 %v13898_v1, %v6858_v12 }
 0x8c7   :  { %v7684_v17 = vmul.f32 0.2, %v7136_v51  ;;  %vm7410_vm0 = vcmp.gt.f32.partialorder %v7136_v51, 0.0 }
 0x8c8   :  { %v4902_v44 = vpop.f32.mrf.mxu2  ;;  %v3183_v9 = vpop.f32.mrf.mxu0 }
 0x8c9   :  { %v5193_v58 = vadd.f32 %v4902_v44, %v4157_v0  ;;  %v4160_v26 = vadd.f32 %v4159_v45, %v3183_v9  ;;  %v7958_v34 = vsel %vm7410_vm0, %v7136_v51, %v7684_v17 }
 0x8cb   :  { %v6859_v29 = vadd.f32 %v6568_v6, %v5193_v58 }
 0x8cc   :  { %v6571_v22 = vpop.f32.mrf.mxu3 }
 0x8cd   :  { %v4161_v33 = vpop.f32.mrf.mxu1  ;;  %v7137_v55 = vadd.f32 %v13898_v1, %v6859_v29 }
 0x8cf   :  { %vm7411_vm4 = vcmp.gt.f32.partialorder %v7137_v55, 0.0  ;;  %v7685_v37 = vmul.f32 0.2, %v7137_v55 }
 0x8d0   :  { %v4905_v19 = vpop.f32.mrf.mxu2  ;;  %v3185_v48 = vpop.f32.mrf.mxu0 }
 0x8d1   :  { %v7959_v25 = vsel %vm7411_vm4, %v7137_v55, %v7685_v37  ;;  %v5194_v28 = vadd.f32 %v4905_v19, %v4160_v26  ;;  %v4162_v38 = vadd.f32 %v4161_v33, %v3185_v48 }
 0x8d2   :  { %v10450_v54 = vpack.c.bf16 %v7959_v25, %v7958_v34 }
 0x8d3   :  { %v6860_v24 = vadd.f32 %v6571_v22, %v5194_v28 }
 0x8d4   :  { %v6573_v14 = vpop.f32.mrf.mxu3  ;;  %10608 = vst [vmem:[%s13937_s3 + $0x418] sm:$0xff] %v10450_v54  }
 0x8d5   :  { %v4164_v35 = vpop.f32.mrf.mxu1  ;;  %v7138_v13 = vadd.f32 %v13898_v1, %v6860_v24 }
 0x8d7   :  { %v7686_v10 = vmul.f32 0.2, %v7138_v13  ;;  %vm7412_vm5 = vcmp.gt.f32.partialorder %v7138_v13, 0.0 }
 0x8d8   :  { %v4907_v20 = vpop.f32.mrf.mxu2  ;;  %v3188_v61 = vpop.f32.mrf.mxu0 }
 0x8d9   :  { %v5195_v43 = vadd.f32 %v4907_v20, %v4162_v38  ;;  %v4165_v30 = vadd.f32 %v4164_v35, %v3188_v61  ;;  %v7960_v50 = vsel %vm7412_vm5, %v7138_v13, %v7686_v10 }
 0x8db   :  { %v6861_v40 = vadd.f32 %v6573_v14, %v5195_v43 }
 0x8dc   :  { %v6576_v16 = vpop.f32.mrf.mxu3 }
 0x8dd   :  { %v4166_v27 = vpop.f32.mrf.mxu1  ;;  %v7139_v39 = vadd.f32 %v13898_v1, %v6861_v40 }
 0x8df   :  { %vm7413_vm6 = vcmp.gt.f32.partialorder %v7139_v39, 0.0  ;;  %v7687_v46 = vmul.f32 0.2, %v7139_v39 }
 0x8e0   :  { %v4910_v42 = vpop.f32.mrf.mxu2  ;;  %v3190_v23 = vpop.f32.mrf.mxu0 }
 0x8e1   :  { %v7961_v36 = vsel %vm7413_vm6, %v7139_v39, %v7687_v46  ;;  %v5196_v53 = vadd.f32 %v4910_v42, %v4165_v30  ;;  %v4167_v15 = vadd.f32 %v4166_v27, %v3190_v23 }
 0x8e2   :  { %v10455_v47 = vpack.c.bf16 %v7961_v36, %v7960_v50 }
 0x8e3   :  { %v6862_v52 = vadd.f32 %v6576_v16, %v5196_v53 }
 0x8e4   :  { %v6578_v31 = vpop.f32.mrf.mxu3  ;;  %10609 = vst [vmem:[%s13937_s3 + $0x420] sm:$0xff] %v10455_v47  }
 0x8e5   :  { %v4169_v49 = vpop.f32.mrf.mxu1  ;;  %v7140_v63 = vadd.f32 %v13898_v1, %v6862_v52 }
 0x8e7   :  { %v7688_v62 = vmul.f32 0.2, %v7140_v63  ;;  %vm7414_vm7 = vcmp.gt.f32.partialorder %v7140_v63, 0.0 }
 0x8e8   :  { %v4912_v60 = vpop.f32.mrf.mxu2  ;;  %v3193_v56 = vpop.f32.mrf.mxu0 }
 0x8e9   :  { %v5197_v59 = vadd.f32 %v4912_v60, %v4167_v15  ;;  %v4170_v5 = vadd.f32 %v4169_v49, %v3193_v56  ;;  %v7962_v18 = vsel %vm7414_vm7, %v7140_v63, %v7688_v62 }
 0x8eb   :  { %v6863_v2 = vadd.f32 %v6578_v31, %v5197_v59 }
 0x8ec   :  { %v6581_v3 = vpop.f32.mrf.mxu3 }
 0x8ed   :  { %v7141_v4 = vadd.f32 %v13898_v1, %v6863_v2  ;;  %v4171_v7 = vpop.f32.mrf.mxu1 }
 0x8ef   :  { %vm7415_vm8 = vcmp.gt.f32.partialorder %v7141_v4, 0.0  ;;  %v7689_v57 = vmul.f32 0.2, %v7141_v4 }
 0x8f0   :  { %v4915_v8 = vpop.f32.mrf.mxu2  ;;  %v3195_v32 = vpop.f32.mrf.mxu0 }
 0x8f1   :  { %v7963_v41 = vsel %vm7415_vm8, %v7141_v4, %v7689_v57  ;;  %v5198_v21 = vadd.f32 %v4915_v8, %v4170_v5  ;;  %v4172_v12 = vadd.f32 %v4171_v7, %v3195_v32 }
 0x8f2   :  { %v10460_v11 = vpack.c.bf16 %v7963_v41, %v7962_v18 }
 0x8f3   :  { %v6864_v45 = vadd.f32 %v6581_v3, %v5198_v21 }
 0x8f4   :  { %v6583_v6 = vpop.f32.mrf.mxu3  ;;  %10610 = vst [vmem:[%s13937_s3 + $0x428] sm:$0xff] %v10460_v11  }
 0x8f5   :  { %v4174_v0 = vpop.f32.mrf.mxu1  ;;  %v7142_v51 = vadd.f32 %v13898_v1, %v6864_v45 }
 0x8f7   :  { %v7690_v33 = vmul.f32 0.2, %v7142_v51  ;;  %vm7416_vm9 = vcmp.gt.f32.partialorder %v7142_v51, 0.0 }
 0x8f8   :  { %v4917_v44 = vpop.f32.mrf.mxu2  ;;  %v3198_v9 = vpop.f32.mrf.mxu0 }
 0x8f9   :  { %v5199_v58 = vadd.f32 %v4917_v44, %v4172_v12  ;;  %v4175_v55 = vadd.f32 %v4174_v0, %v3198_v9  ;;  %v7964_v48 = vsel %vm7416_vm9, %v7142_v51, %v7690_v33 }
 0x8fb   :  { %v6865_v29 = vadd.f32 %v6583_v6, %v5199_v58 }
 0x8fc   :  { %v6586_v22 = vpop.f32.mrf.mxu3 }
 0x8fd   :  { %v7143_v17 = vadd.f32 %v13898_v1, %v6865_v29  ;;  %v4176_v54 = vpop.f32.mrf.mxu1 }
 0x8ff   :  { %vm7417_vm10 = vcmp.gt.f32.partialorder %v7143_v17, 0.0  ;;  %v7691_v26 = vmul.f32 0.2, %v7143_v17 }
 0x900   :  { %v4920_v37 = vpop.f32.mrf.mxu2  ;;  %v3200_v19 = vpop.f32.mrf.mxu0 }
 0x901   :  { %v7965_v34 = vsel %vm7417_vm10, %v7143_v17, %v7691_v26  ;;  %v5200_v25 = vadd.f32 %v4920_v37, %v4175_v55  ;;  %v4177_v24 = vadd.f32 %v4176_v54, %v3200_v19 }
 0x902   :  { %v10465_v28 = vpack.c.bf16 %v7965_v34, %v7964_v48 }
 0x903   :  { %v6866_v14 = vadd.f32 %v6586_v22, %v5200_v25 }
 0x904   :  { %10611 = vst [vmem:[%s13937_s3 + $0x430] sm:$0xff] %v10465_v28   ;;  %v6588_v35 = vpop.f32.mrf.mxu3 }
 0x905   :  { %v7144_v20 = vadd.f32 %v13898_v1, %v6866_v14  ;;  %v4179_v40 = vpop.f32.mrf.mxu1 }
 0x907   :  { %v7692_v16 = vmul.f32 0.2, %v7144_v20  ;;  %vm7418_vm2 = vcmp.gt.f32.partialorder %v7144_v20, 0.0 }
 0x908   :  { %v4922_v38 = vpop.f32.mrf.mxu2  ;;  %v3203_v13 = vpop.f32.mrf.mxu0 }
 0x909   :  { %v5201_v61 = vadd.f32 %v4922_v38, %v4177_v24  ;;  %v4180_v10 = vadd.f32 %v4179_v40, %v3203_v13  ;;  %v7966_v42 = vsel %vm7418_vm2, %v7144_v20, %v7692_v16 }
 0x90b   :  { %v6867_v43 = vadd.f32 %v6588_v35, %v5201_v61 }
 0x90c   :  { %v6591_v30 = vpop.f32.mrf.mxu3 }
 0x90d   :  { %v7145_v27 = vadd.f32 %v13898_v1, %v6867_v43  ;;  %v4181_v31 = vpop.f32.mrf.mxu1 }
 0x90f   :  { %vm7419_vm11 = vcmp.gt.f32.partialorder %v7145_v27, 0.0  ;;  %v7693_v39 = vmul.f32 0.2, %v7145_v27 }
 0x910   :  { %v4925_v46 = vpop.f32.mrf.mxu2  ;;  %v3205_v53 = vpop.f32.mrf.mxu0 }
 0x911   :  { %v7967_v23 = vsel %vm7419_vm11, %v7145_v27, %v7693_v39  ;;  %v5202_v50 = vadd.f32 %v4925_v46, %v4180_v10  ;;  %v4182_v49 = vadd.f32 %v4181_v31, %v3205_v53 }
 0x912   :  { %v10470_v36 = vpack.c.bf16 %v7967_v23, %v7966_v42 }
 0x913   :  { %v6868_v47 = vadd.f32 %v6591_v30, %v5202_v50 }
 0x914   :  { %10612 = vst [vmem:[%s13937_s3 + $0x438] sm:$0xff] %v10470_v36   ;;  %v6593_v56 = vpop.f32.mrf.mxu3 }
 0x915   :  { %v7146_v15 = vadd.f32 %v13898_v1, %v6868_v47 }
 0x917   :  { %v7694_v59 = vmul.f32 0.2, %v7146_v15  ;;  %vm7420_vm1 = vcmp.gt.f32.partialorder %v7146_v15, 0.0 }
 0x918   :  { %v4927_v52 = vpop.f32.mrf.mxu2 }
 0x919   :  { %v5203_v60 = vadd.f32 %v4927_v52, %v4182_v49  ;;  %v7968_v62 = vsel %vm7420_vm1, %v7146_v15, %v7694_v59 }
 0x91b   :  { %v6869_v63 = vadd.f32 %v6593_v56, %v5203_v60 }
 0x91d   :  { %v7147_v2 = vadd.f32 %v13898_v1, %v6869_v63 }
 0x91f   :  { %vm7421_vm3 = vcmp.gt.f32.partialorder %v7147_v2, 0.0  ;;  %v7695_v3 = vmul.f32 0.2, %v7147_v2 }
 0x921   :  { %v7969_v4 = vsel %vm7421_vm3, %v7147_v2, %v7695_v3 }
 0x922   :  { %v10475_v5 = vpack.c.bf16 %v7969_v4, %v7968_v62 }
 0x924   :  { %10613 = vst [vmem:[%s13937_s3 + $0x440] sm:$0xff] %v10475_v5  }

// kernel: discriminator_forward.5
= control target key start
LH: loop header
LB: loop body
LE: loop exit
PB: predicated region body
PF: predicated region fallthrough
CT: control target
= control target key end

     0   :  { %vm1508_vm0 = vcmask 1046528   ;;  %vm607_vm1 = vcmask 261120   ;;  %vm294_vm2 = vsmask.f32 7424  ;;  %s3790_s1 = inlined_call_operand.vmem [shape: bf16[4,32,128], index: 1, kind: input, shape index: {}]   ;;  %s3791_s0 = inlined_call_operand.vmem [shape: bf16[616,32], index: 0, kind: input, shape index: {}]   ;;  %s3792_s2 = inlined_call_operand.vmem [shape: f32[1,128], index: 2, kind: input, shape index: {}]   ;;  %s3793_s3 = inlined_call_operand.vmem [shape: bf16[592,128], index: 3, kind: output, shape index: {}]  }
   0x1   :  { %v2809_v0 = vld [vmem:[%s3790_s1 + $0x18] sm:$0xff]  ;;  %v2807_v1 = vld [vmem:[%s3790_s1 + $0x8] sm:$0xff]  ;;  %v2808_v4 = vld [vmem:[%s3790_s1 + $0x10] sm:$0xff] }
   0x2   :  { %v2811_v2 = vld [vmem:[%s3790_s1 + $0x28] sm:$0xff]  ;;  %v2813_v3 = vld [vmem:[%s3790_s1 + $0x38] sm:$0xff]  ;;  %725 = vmatpush.bf16.msra.mxu0 %v2809_v0  ;;  %1005 = vmatpush.bf16.msra.mxu1 %v2807_v1  ;;  %v2806_v5 = vld [vmem:[%s3790_s1] sm:$0xff] }
   0x3   :  { %v2810_v6 = vld [vmem:[%s3790_s1 + $0x20] sm:$0xff]  ;;  %1241 = vmatpush.bf16.msra.mxu2 %v2811_v2  ;;  %1713 = vmatpush.bf16.msra.mxu3 %v2813_v3  ;;  %v2812_v8 = vld [vmem:[%s3790_s1 + $0x30] sm:$0xff]  ;;  %v2770_v9 = vld [vmem:[%s3791_s0 + $0x8] sm:$0xff] }
   0x4   :  { %v2769_v7 = vld [vmem:[%s3791_s0] sm:$0xff]  ;;  %v2771_v10 = vld [vmem:[%s3791_s0 + $0x10] sm:$0xff]  ;;  %v303_v13 = vshll.u32 %v2770_v9, 16  ;;  %v307_v14 = vshrl.u32 %v2770_v9, 16  ;;  %v1509_v16 = vrot.slane %v2770_v9, 1  ;;  %v2772_v26 = vld [vmem:[%s3791_s0 + $0x18] sm:$0xff] }
   0x5   :  { %v296_v11 = vshrl.u32 %v2769_v7, 16  ;;  %v298_v12 = vshll.u32 %v2769_v7, 16  ;;  %v311_v15 = vshll.u32 %v2771_v10, 16  ;;  %v1510_v18 = vrot.slane %v2771_v10, 1  ;;  %v2773_v34 = vld [vmem:[%s3791_s0 + $0x20] sm:$0xff]  ;;  %v2774_v42 = vld [vmem:[%s3791_s0 + $0x28] sm:$0xff] }
   0x6   :  { %726 = vmatpush.bf16.msra.mxu0 %v2808_v4  ;;  %1006 = vmatpush.bf16.msra.mxu1 %v2806_v5  ;;  %v305_v19 = vrot.slane %v303_v13, 1  ;;  %v315_v27 = vshrl.u32 %v2771_v10, 16  ;;  %v319_v28 = vshll.u32 %v2772_v26, 16  ;;  %v1512_v29 = vrot.slane %v2772_v26, 1  ;;  %v2775_v50 = vld [vmem:[%s3791_s0 + $0x30] sm:$0xff]  ;;  %v2776_v58 = vld [vmem:[%s3791_s0 + $0x38] sm:$0xff] }
   0x7   :  { %v300_v17 = vrot.slane %v298_v12, 1  ;;  %1242 = vmatpush.bf16.msra.mxu2 %v2810_v6  ;;  %1714 = vmatpush.bf16.msra.mxu3 %v2812_v8  ;;  %v313_v20 = vrot.slane %v311_v15, 1  ;;  %v1511_v22 = vsel %vm1508_vm0, %v1509_v16, %v1510_v18  ;;  %v323_v35 = vshrl.u32 %v2772_v26, 16  ;;  %v2777_v2 = vld [vmem:[%s3791_s0 + $0x40] sm:$0xff] }
   0x8   :  { %v309_v23 = vor.u32 %v307_v14, %v305_v19  ;;  %v321_v31 = vrot.slane %v319_v28, 1  ;;  %v1513_v32 = vsel %vm1508_vm0, %v1510_v18, %v1512_v29  ;;  %v327_v36 = vshll.u32 %v2773_v34, 16  ;;  %v3169_v18 = vld [vmem:[%s3791_s0 + $0x50] sm:$0xff] }
   0x9   :  { %v301_v21 = vor.u32 %v300_v17, %v296_v11  ;;  %2634 = vmatmul.msk.bf16.vlgmr.msra.gmra.mxu1 %vm607_vm1, %v2769_v7  ;;  %v317_v30 = vor.u32 %v315_v27, %v313_v20  ;;  %v1514_v37 = vrot.slane %v2773_v34, 1  ;;  %v331_v43 = vshrl.u32 %v2773_v34, 16 }
   0xa   :  { %2732 = vmatmul.msk.bf16.vlgmr.msra.gmra.mxu3 %vm607_vm1, %v1511_v22  ;;  %v314_v25 = vsel %vm294_vm2, %v309_v23, %v313_v20  ;;  %v325_v38 = vor.u32 %v323_v35, %v321_v31  ;;  %v329_v39 = vrot.slane %v327_v36, 1  ;;  %v335_v44 = vshll.u32 %v2774_v42, 16 }
   0xb   :  { %v306_v24 = vsel %vm294_vm2, %v301_v21, %v305_v19  ;;  %2683 = vmatmul.msk.bf16.vlgmr.msra.gmra.mxu2 %vm607_vm1, %v314_v25  ;;  %v322_v33 = vsel %vm294_vm2, %v317_v30, %v321_v31  ;;  %v1515_v40 = vsel %vm1508_vm0, %v1512_v29, %v1514_v37  ;;  %v1516_v45 = vrot.slane %v2774_v42, 1  ;;  %v3182_v30 = vld [vmem:[%s3791_s0 + $0x58] sm:$0xff] }
   0xc   :  { %2589 = vmatmul.msk.bf16.vlgmr.msra.gmra.mxu0 %vm607_vm1, %v306_v24  ;;  %v330_v41 = vsel %vm294_vm2, %v325_v38, %v329_v39  ;;  %v333_v46 = vor.u32 %v331_v43, %v329_v39  ;;  %v337_v47 = vrot.slane %v335_v44, 1  ;;  %v339_v51 = vshrl.u32 %v2774_v42, 16  ;;  %v3190_v39 = vld [vmem:[%s3792_s2] ss:$0 sm:$0xff] }
   0xd   :  { %v1517_v48 = vsel %vm1508_vm0, %v1514_v37, %v1516_v45  ;;  %v343_v52 = vshll.u32 %v2775_v50, 16  ;;  %v1518_v53 = vrot.slane %v2775_v50, 1  ;;  %v347_v59 = vshrl.u32 %v2775_v50, 16 }
   0xe   :  { %v338_v49 = vsel %vm294_vm2, %v333_v46, %v337_v47  ;;  %v341_v54 = vor.u32 %v339_v51, %v337_v47  ;;  %v351_v60 = vshll.u32 %v2776_v58, 16  ;;  %v1520_v61 = vrot.slane %v2776_v58, 1 }
   0xf   :  { %v345_v55 = vrot.slane %v343_v52, 1  ;;  %v1519_v56 = vsel %vm1508_vm0, %v1516_v45, %v1518_v53  ;;  %v355_v3 = vshrl.u32 %v2776_v58, 16  ;;  %v359_v4 = vshll.u32 %v2777_v2, 16 }
  0x10   :  { %v353_v63 = vrot.slane %v351_v60, 1  ;;  %v1521_v0 = vsel %vm1508_vm0, %v1518_v53, %v1520_v61  ;;  %v1522_v5 = vrot.slane %v2777_v2, 1  ;;  %v363_v11 = vshrl.u32 %v2777_v2, 16 }
  0x11   :  { %v346_v57 = vsel %vm294_vm2, %v341_v54, %v345_v55  ;;  %v349_v62 = vor.u32 %v347_v59, %v345_v55  ;;  %v361_v7 = vrot.slane %v359_v4, 1  ;;  %v375_v20 = vshll.u32 %v3169_v18, 16 }
  0x12   :  { %v357_v6 = vor.u32 %v355_v3, %v353_v63  ;;  %v1523_v8 = vsel %vm1508_vm0, %v1520_v61, %v1522_v5  ;;  %v1526_v21 = vrot.slane %v3169_v18, 1  ;;  %v379_v35 = vshrl.u32 %v3169_v18, 16 }
  0x13   :  { %v354_v1 = vsel %vm294_vm2, %v349_v62, %v353_v63  ;;  %v365_v14 = vor.u32 %v363_v11, %v361_v7  ;;  %v377_v23 = vrot.slane %v375_v20, 1  ;;  %v383_v36 = vshll.u32 %v3182_v30, 16 }
  0x14   :  { %v1528_v37 = vrot.slane %v3182_v30, 1 }
  0x16   :  { %v1529_v46 = vsel %vm1508_vm0, %v1526_v21, %v1528_v37 }
  0x19   :  { %2635 = vmatmul.msk.bf16.gmra.mxu1 %vm607_vm1, %v2770_v9  ;;  %v362_v9 = vsel %vm294_vm2, %v357_v6, %v361_v7 }
  0x1a   :  { %2733 = vmatmul.msk.bf16.gmra.mxu3 %vm607_vm1, %v1513_v32 }
  0x1b   :  { %2684 = vmatmul.msk.bf16.gmra.mxu2 %vm607_vm1, %v322_v33 }
  0x1c   :  { %2590 = vmatmul.msk.bf16.gmra.mxu0 %vm607_vm1, %v314_v25 }
  0x29   :  { %2636 = vmatmul.msk.bf16.gmra.mxu1 %vm607_vm1, %v2771_v10  ;;  %v2778_v10 = vld [vmem:[%s3791_s0 + $0x48] sm:$0xff] }
  0x2a   :  { %2734 = vmatmul.msk.bf16.gmra.mxu3 %vm607_vm1, %v1515_v40  ;;  %v367_v12 = vshll.u32 %v2778_v10, 16  ;;  %v1524_v13 = vrot.slane %v2778_v10, 1  ;;  %v371_v19 = vshrl.u32 %v2778_v10, 16 }
  0x2b   :  { %2685 = vmatmul.msk.bf16.gmra.mxu2 %vm607_vm1, %v330_v41 }
  0x2c   :  { %2591 = vmatmul.msk.bf16.gmra.mxu0 %vm607_vm1, %v322_v33  ;;  %v369_v15 = vrot.slane %v367_v12, 1  ;;  %v1525_v16 = vsel %vm1508_vm0, %v1522_v5, %v1524_v13  ;;  %v1527_v25 = vsel %vm1508_vm0, %v1524_v13, %v1526_v21 }
  0x2e   :  { %v370_v17 = vsel %vm294_vm2, %v365_v14, %v369_v15  ;;  %v373_v22 = vor.u32 %v371_v19, %v369_v15 }
  0x30   :  { %v378_v27 = vsel %vm294_vm2, %v373_v22, %v377_v23  ;;  %v3223_v22 = vld [vmem:[%s3791_s0 + $0x68] sm:$0xff] }
  0x39   :  { %2637 = vmatmul.msk.bf16.gmra.mxu1 %vm607_vm1, %v2772_v26 }
  0x3a   :  { %2735 = vmatmul.msk.bf16.gmra.mxu3 %vm607_vm1, %v1517_v48 }
  0x3b   :  { %2686 = vmatmul.msk.bf16.gmra.mxu2 %vm607_vm1, %v338_v49 }
  0x3c   :  { %2592 = vmatmul.msk.bf16.gmra.mxu0 %vm607_vm1, %v330_v41  ;;  %v381_v41 = vor.u32 %v379_v35, %v377_v23 }
  0x49   :  { %2638 = vmatmul.msk.bf16.gmra.mxu1 %vm607_vm1, %v2773_v34 }
  0x4a   :  { %2736 = vmatmul.msk.bf16.gmra.mxu3 %vm607_vm1, %v1519_v56  ;;  %v3203_v56 = vld [vmem:[%s3791_s0 + $0x60] sm:$0xff] }
  0x4b   :  { %2687 = vmatmul.msk.bf16.gmra.mxu2 %vm607_vm1, %v346_v57  ;;  %v1530_v3 = vrot.slane %v3203_v56, 1 }
  0x4c   :  { %2593 = vmatmul.msk.bf16.gmra.mxu0 %vm607_vm1, %v338_v49 }
  0x4d   :  { %v1531_v11 = vsel %vm1508_vm0, %v1528_v37, %v1530_v3 }
  0x59   :  { %2639 = vmatmul.msk.bf16.gmra.mxu1 %vm607_vm1, %v2774_v42  ;;  %v385_v42 = vrot.slane %v383_v36, 1 }
  0x5a   :  { %2737 = vmatmul.msk.bf16.gmra.mxu3 %vm607_vm1, %v1521_v0 }
  0x5b   :  { %2688 = vmatmul.msk.bf16.gmra.mxu2 %vm607_vm1, %v354_v1 }
  0x5c   :  { %2594 = vmatmul.msk.bf16.gmra.mxu0 %vm607_vm1, %v346_v57 }
  0x69   :  { %2640 = vmatmul.msk.bf16.gmra.mxu1 %vm607_vm1, %v2775_v50  ;;  %v386_v50 = vsel %vm294_vm2, %v381_v41, %v385_v42 }
  0x6a   :  { %2738 = vmatmul.msk.bf16.gmra.mxu3 %vm607_vm1, %v1523_v8 }
  0x6b   :  { %2689 = vmatmul.msk.bf16.gmra.mxu2 %vm607_vm1, %v362_v9 }
  0x6c   :  { %2595 = vmatmul.msk.bf16.gmra.mxu0 %vm607_vm1, %v354_v1  ;;  %v387_v1 = vshrl.u32 %v3182_v30, 16 }
  0x6e   :  { %v389_v6 = vor.u32 %v387_v1, %v385_v42 }
  0x79   :  { %2641 = vmatmul.msk.bf16.gmra.mxu1 %vm607_vm1, %v2776_v58 }
  0x7a   :  { %2739 = vmatmul.msk.bf16.gmra.mxu3 %vm607_vm1, %v1525_v16 }
  0x7b   :  { %2690 = vmatmul.msk.bf16.gmra.mxu2 %vm607_vm1, %v370_v17 }
  0x7c   :  { %2596 = vmatmul.msk.bf16.gmra.mxu0 %vm607_vm1, %v362_v9 }
  0x86   :  { %v1008_v24 = vpop.f32.mrf.mxu1 }
  0x89   :  { %v728_v26 = vpop.f32.mrf.mxu0  ;;  %2642 = vmatmul.msk.bf16.gmra.mxu1 %vm607_vm1, %v2777_v2  ;;  %v391_v2 = vshll.u32 %v3203_v56, 16 }
  0x8a   :  { %2740 = vmatmul.msk.bf16.gmra.mxu3 %vm607_vm1, %v1527_v25  ;;  %v1009_v28 = vadd.f32 %v1008_v24, %v728_v26 }
  0x8b   :  { %2691 = vmatmul.msk.bf16.gmra.mxu2 %vm607_vm1, %v378_v27  ;;  %v393_v7 = vrot.slane %v391_v2, 1 }
  0x8c   :  { %2597 = vmatmul.msk.bf16.gmra.mxu0 %vm607_vm1, %v370_v17 }
  0x8d   :  { %v1716_v29 = vpop.f32.mrf.mxu3  ;;  %v394_v15 = vsel %vm294_vm2, %v389_v6, %v393_v7 }
  0x8e   :  { %v1010_v31 = vpop.f32.mrf.mxu1  ;;  %v1244_v32 = vpop.f32.mrf.mxu2 }
  0x8f   :  { %v1429_v33 = vadd.f32 %v1244_v32, %v1009_v28  ;;  %v399_v32 = vshll.u32 %v3223_v22, 16 }
  0x91   :  { %v730_v34 = vpop.f32.mrf.mxu0  ;;  %v1901_v38 = vadd.f32 %v1716_v29, %v1429_v33  ;;  %v1532_v33 = vrot.slane %v3223_v22, 1  ;;  %v401_v37 = vrot.slane %v399_v32, 1 }
  0x92   :  { %v1011_v43 = vadd.f32 %v1010_v31, %v730_v34  ;;  %v395_v31 = vshrl.u32 %v3203_v56, 16 }
  0x93   :  { %v1979_v47 = vadd.f32 %v3190_v39, %v1901_v38  ;;  %v1533_v42 = vsel %vm1508_vm0, %v1530_v3, %v1532_v33 }
  0x94   :  { %v397_v36 = vor.u32 %v395_v31, %v393_v7 }
  0x95   :  { %v1718_v40 = vpop.f32.mrf.mxu3  ;;  %v2127_v52 = vmul.f32 0.2, %v1979_v47  ;;  %vm2053_vm3 = vcmp.gt.f32.partialorder %v1979_v47, 0.0 }
  0x96   :  { %v1013_v44 = vpop.f32.mrf.mxu1  ;;  %v1246_v45 = vpop.f32.mrf.mxu2 }
  0x97   :  { %v1430_v48 = vadd.f32 %v1246_v45, %v1011_v43  ;;  %v2201_v60 = vsel %vm2053_vm3, %v1979_v47, %v2127_v52  ;;  %v3243_v52 = vld [vmem:[%s3791_s0 + $0x70] sm:$0xff] }
  0x99   :  { %v733_v49 = vpop.f32.mrf.mxu0  ;;  %2643 = vmatmul.msk.bf16.gmra.mxu1 %vm607_vm1, %v2778_v10  ;;  %v1902_v51 = vadd.f32 %v1718_v40, %v1430_v48 }
  0x9a   :  { %2741 = vmatmul.msk.bf16.gmra.mxu3 %vm607_vm1, %v1529_v46  ;;  %v1014_v54 = vadd.f32 %v1013_v44, %v733_v49  ;;  %v402_v46 = vsel %vm294_vm2, %v397_v36, %v401_v37 }
  0x9b   :  { %v1980_v53 = vadd.f32 %v3190_v39, %v1902_v51  ;;  %2692 = vmatmul.msk.bf16.gmra.mxu2 %vm607_vm1, %v386_v50 }
  0x9c   :  { %2598 = vmatmul.msk.bf16.gmra.mxu0 %vm607_vm1, %v378_v27 }
  0x9d   :  { %v1721_v55 = vpop.f32.mrf.mxu3  ;;  %vm2054_vm4 = vcmp.gt.f32.partialorder %v1980_v53, 0.0  ;;  %v2128_v57 = vmul.f32 0.2, %v1980_v53 }
  0x9e   :  { %v1015_v58 = vpop.f32.mrf.mxu1  ;;  %v1249_v59 = vpop.f32.mrf.mxu2 }
  0x9f   :  { %v2202_v61 = vsel %vm2054_vm4, %v1980_v53, %v2128_v57  ;;  %v1431_v62 = vadd.f32 %v1249_v59, %v1014_v54 }
  0xa0   :  { %v2821_v0 = vpack.c.bf16 %v2202_v61, %v2201_v60  ;;  %v403_v61 = vshrl.u32 %v3223_v22, 16 }
  0xa1   :  { %v735_v63 = vpop.f32.mrf.mxu0  ;;  %v1903_v4 = vadd.f32 %v1721_v55, %v1431_v62  ;;  %v407_v62 = vshll.u32 %v3243_v52, 16 }
  0xa2   :  { %2822 = vst [vmem:[%s3793_s3] sm:$0xff] %v2821_v0   ;;  %v1016_v8 = vadd.f32 %v1015_v58, %v735_v63  ;;  %v1534_v63 = vrot.slane %v3243_v52, 1  ;;  %v405_v2 = vor.u32 %v403_v61, %v401_v37 }
  0xa3   :  { %v1981_v12 = vadd.f32 %v3190_v39, %v1903_v4  ;;  %v409_v3 = vrot.slane %v407_v62, 1 }
  0xa4   :  { %v1535_v7 = vsel %vm1508_vm0, %v1532_v33, %v1534_v63 }
  0xa5   :  { %v1723_v5 = vpop.f32.mrf.mxu3  ;;  %v2129_v17 = vmul.f32 0.2, %v1981_v12  ;;  %vm2055_vm5 = vcmp.gt.f32.partialorder %v1981_v12, 0.0 }
  0xa6   :  { %v1018_v9 = vpop.f32.mrf.mxu1  ;;  %v1251_v10 = vpop.f32.mrf.mxu2 }
  0xa7   :  { %v1432_v13 = vadd.f32 %v1251_v10, %v1016_v8  ;;  %v2203_v25 = vsel %vm2055_vm5, %v1981_v12, %v2129_v17  ;;  %v3263_v17 = vld [vmem:[%s3791_s0 + $0x78] sm:$0xff] }
  0xa9   :  { %v738_v14 = vpop.f32.mrf.mxu0  ;;  %2644 = vmatmul.msk.bf16.gmra.mxu1 %vm607_vm1, %v3169_v18  ;;  %v1904_v16 = vadd.f32 %v1723_v5, %v1432_v13 }
  0xaa   :  { %2742 = vmatmul.msk.bf16.gmra.mxu3 %vm607_vm1, %v1531_v11  ;;  %v1019_v20 = vadd.f32 %v1018_v9, %v738_v14  ;;  %v410_v11 = vsel %vm294_vm2, %v405_v2, %v409_v3 }
  0xab   :  { %v1982_v19 = vadd.f32 %v3190_v39, %v1904_v16  ;;  %2693 = vmatmul.msk.bf16.gmra.mxu2 %vm607_vm1, %v394_v15 }
  0xac   :  { %2599 = vmatmul.msk.bf16.gmra.mxu0 %vm607_vm1, %v386_v50 }
  0xad   :  { %v1726_v21 = vpop.f32.mrf.mxu3  ;;  %vm2056_vm6 = vcmp.gt.f32.partialorder %v1982_v19, 0.0  ;;  %v2130_v18 = vmul.f32 0.2, %v1982_v19 }
  0xae   :  { %v1020_v23 = vpop.f32.mrf.mxu1  ;;  %v1254_v24 = vpop.f32.mrf.mxu2 }
  0xaf   :  { %v2204_v26 = vsel %vm2056_vm6, %v1982_v19, %v2130_v18  ;;  %v1433_v27 = vadd.f32 %v1254_v24, %v1019_v20 }
  0xb0   :  { %v2826_v29 = vpack.c.bf16 %v2204_v26, %v2203_v25  ;;  %v411_v26 = vshrl.u32 %v3243_v52, 16 }
  0xb1   :  { %v740_v28 = vpop.f32.mrf.mxu0  ;;  %v1905_v34 = vadd.f32 %v1726_v21, %v1433_v27  ;;  %v415_v27 = vshll.u32 %v3263_v17, 16 }
  0xb2   :  { %3004 = vst [vmem:[%s3793_s3 + $0x8] sm:$0xff] %v2826_v29   ;;  %v1021_v38 = vadd.f32 %v1020_v23, %v740_v28  ;;  %v1536_v28 = vrot.slane %v3263_v17, 1  ;;  %v413_v32 = vor.u32 %v411_v26, %v409_v3 }
  0xb3   :  { %v1983_v43 = vadd.f32 %v3190_v39, %v1905_v34  ;;  %v417_v33 = vrot.slane %v415_v27, 1 }
  0xb4   :  { %v1537_v37 = vsel %vm1508_vm0, %v1534_v63, %v1536_v28 }
  0xb5   :  { %v1728_v35 = vpop.f32.mrf.mxu3  ;;  %v2131_v48 = vmul.f32 0.2, %v1983_v43  ;;  %vm2057_vm7 = vcmp.gt.f32.partialorder %v1983_v43, 0.0 }
  0xb6   :  { %v1023_v40 = vpop.f32.mrf.mxu1  ;;  %v1256_v41 = vpop.f32.mrf.mxu2 }
  0xb7   :  { %v1434_v44 = vadd.f32 %v1256_v41, %v1021_v38  ;;  %v2205_v55 = vsel %vm2057_vm7, %v1983_v43, %v2131_v48  ;;  %v3283_v48 = vld [vmem:[%s3791_s0 + $0x80] sm:$0xff] }
  0xb9   :  { %v743_v45 = vpop.f32.mrf.mxu0  ;;  %2645 = vmatmul.msk.bf16.gmra.mxu1 %vm607_vm1, %v3182_v30  ;;  %v1906_v47 = vadd.f32 %v1728_v35, %v1434_v44 }
  0xba   :  { %2743 = vmatmul.msk.bf16.gmra.mxu3 %vm607_vm1, %v1533_v42  ;;  %v1024_v50 = vadd.f32 %v1023_v40, %v743_v45  ;;  %v418_v42 = vsel %vm294_vm2, %v413_v32, %v417_v33 }
  0xbb   :  { %v1984_v49 = vadd.f32 %v3190_v39, %v1906_v47  ;;  %2694 = vmatmul.msk.bf16.gmra.mxu2 %vm607_vm1, %v402_v46 }
  0xbc   :  { %2600 = vmatmul.msk.bf16.gmra.mxu0 %vm607_vm1, %v394_v15 }
  0xbd   :  { %v1731_v51 = vpop.f32.mrf.mxu3  ;;  %vm2058_vm8 = vcmp.gt.f32.partialorder %v1984_v49, 0.0  ;;  %v2132_v30 = vmul.f32 0.2, %v1984_v49 }
  0xbe   :  { %v1025_v53 = vpop.f32.mrf.mxu1  ;;  %v1259_v54 = vpop.f32.mrf.mxu2 }
  0xbf   :  { %v2206_v57 = vsel %vm2058_vm8, %v1984_v49, %v2132_v30  ;;  %v1435_v58 = vadd.f32 %v1259_v54, %v1024_v50 }
  0xc0   :  { %v2831_v60 = vpack.c.bf16 %v2206_v57, %v2205_v55  ;;  %v419_v57 = vshrl.u32 %v3263_v17, 16 }
  0xc1   :  { %v745_v59 = vpop.f32.mrf.mxu0  ;;  %v1907_v0 = vadd.f32 %v1731_v51, %v1435_v58  ;;  %v423_v58 = vshll.u32 %v3283_v48, 16 }
  0xc2   :  { %3005 = vst [vmem:[%s3793_s3 + $0x10] sm:$0xff] %v2831_v60   ;;  %v1026_v4 = vadd.f32 %v1025_v53, %v745_v59  ;;  %v1538_v59 = vrot.slane %v3283_v48, 1  ;;  %v421_v62 = vor.u32 %v419_v57, %v417_v33 }
  0xc3   :  { %v1985_v8 = vadd.f32 %v3190_v39, %v1907_v0  ;;  %v425_v63 = vrot.slane %v423_v58, 1 }
  0xc4   :  { %v1539_v3 = vsel %vm1508_vm0, %v1536_v28, %v1538_v59 }
  0xc5   :  { %v1733_v1 = vpop.f32.mrf.mxu3  ;;  %v2133_v13 = vmul.f32 0.2, %v1985_v8  ;;  %vm2059_vm9 = vcmp.gt.f32.partialorder %v1985_v8, 0.0 }
  0xc6   :  { %v1028_v5 = vpop.f32.mrf.mxu1  ;;  %v1261_v6 = vpop.f32.mrf.mxu2 }
  0xc7   :  { %v1436_v9 = vadd.f32 %v1261_v6, %v1026_v4  ;;  %v2207_v21 = vsel %vm2059_vm9, %v1985_v8, %v2133_v13  ;;  %v3303_v13 = vld [vmem:[%s3791_s0 + $0x88] sm:$0xff] }
  0xc9   :  { %v748_v10 = vpop.f32.mrf.mxu0  ;;  %2646 = vmatmul.msk.bf16.gmra.mxu1 %vm607_vm1, %v3203_v56  ;;  %v1908_v12 = vadd.f32 %v1733_v1, %v1436_v9 }
  0xca   :  { %2744 = vmatmul.msk.bf16.gmra.mxu3 %vm607_vm1, %v1535_v7  ;;  %v1029_v15 = vadd.f32 %v1028_v5, %v748_v10  ;;  %v426_v7 = vsel %vm294_vm2, %v421_v62, %v425_v63 }
  0xcb   :  { %v1986_v14 = vadd.f32 %v3190_v39, %v1908_v12  ;;  %2695 = vmatmul.msk.bf16.gmra.mxu2 %vm607_vm1, %v410_v11 }
  0xcc   :  { %2601 = vmatmul.msk.bf16.gmra.mxu0 %vm607_vm1, %v402_v46 }
  0xcd   :  { %v1736_v16 = vpop.f32.mrf.mxu3  ;;  %vm2060_vm10 = vcmp.gt.f32.partialorder %v1986_v14, 0.0  ;;  %v2134_v56 = vmul.f32 0.2, %v1986_v14 }
  0xce   :  { %v1030_v19 = vpop.f32.mrf.mxu1  ;;  %v1264_v20 = vpop.f32.mrf.mxu2 }
  0xcf   :  { %v2208_v18 = vsel %vm2060_vm10, %v1986_v14, %v2134_v56  ;;  %v1437_v23 = vadd.f32 %v1264_v20, %v1029_v15 }
  0xd0   :  { %v2836_v25 = vpack.c.bf16 %v2208_v18, %v2207_v21  ;;  %v427_v18 = vshrl.u32 %v3283_v48, 16 }
  0xd1   :  { %v750_v24 = vpop.f32.mrf.mxu0  ;;  %v1909_v29 = vadd.f32 %v1736_v16, %v1437_v23  ;;  %v431_v23 = vshll.u32 %v3303_v13, 16 }
  0xd2   :  { %3006 = vst [vmem:[%s3793_s3 + $0x18] sm:$0xff] %v2836_v25   ;;  %v1031_v34 = vadd.f32 %v1030_v19, %v750_v24  ;;  %v1540_v24 = vrot.slane %v3303_v13, 1  ;;  %v429_v27 = vor.u32 %v427_v18, %v425_v63 }
  0xd3   :  { %v1987_v38 = vadd.f32 %v3190_v39, %v1909_v29  ;;  %v433_v28 = vrot.slane %v431_v23, 1 }
  0xd4   :  { %v1541_v33 = vsel %vm1508_vm0, %v1538_v59, %v1540_v24 }
  0xd5   :  { %v1738_v31 = vpop.f32.mrf.mxu3  ;;  %v2135_v44 = vmul.f32 0.2, %v1987_v38  ;;  %vm2061_vm11 = vcmp.gt.f32.partialorder %v1987_v38, 0.0 }
  0xd6   :  { %v1033_v35 = vpop.f32.mrf.mxu1  ;;  %v1266_v36 = vpop.f32.mrf.mxu2 }
  0xd7   :  { %v1438_v40 = vadd.f32 %v1266_v36, %v1031_v34  ;;  %v2209_v51 = vsel %vm2061_vm11, %v1987_v38, %v2135_v44  ;;  %v3323_v44 = vld [vmem:[%s3791_s0 + $0x90] sm:$0xff] }
  0xd9   :  { %v753_v41 = vpop.f32.mrf.mxu0  ;;  %2647 = vmatmul.msk.bf16.gmra.mxu1 %vm607_vm1, %v3223_v22  ;;  %v1910_v43 = vadd.f32 %v1738_v31, %v1438_v40 }
  0xda   :  { %2745 = vmatmul.msk.bf16.gmra.mxu3 %vm607_vm1, %v1537_v37  ;;  %v1034_v46 = vadd.f32 %v1033_v35, %v753_v41  ;;  %v434_v37 = vsel %vm294_vm2, %v429_v27, %v433_v28 }
  0xdb   :  { %v1988_v45 = vadd.f32 %v3190_v39, %v1910_v43  ;;  %2696 = vmatmul.msk.bf16.gmra.mxu2 %vm607_vm1, %v418_v42 }
  0xdc   :  { %2602 = vmatmul.msk.bf16.gmra.mxu0 %vm607_vm1, %v410_v11 }
  0xdd   :  { %v1741_v47 = vpop.f32.mrf.mxu3  ;;  %vm2062_vm12 = vcmp.gt.f32.partialorder %v1988_v45, 0.0  ;;  %v2136_v22 = vmul.f32 0.2, %v1988_v45 }
  0xde   :  { %v1035_v49 = vpop.f32.mrf.mxu1  ;;  %v1269_v50 = vpop.f32.mrf.mxu2 }
  0xdf   :  { %v2210_v30 = vsel %vm2062_vm12, %v1988_v45, %v2136_v22  ;;  %v1439_v53 = vadd.f32 %v1269_v50, %v1034_v46 }
  0xe0   :  { %v2841_v55 = vpack.c.bf16 %v2210_v30, %v2209_v51  ;;  %v435_v30 = vshrl.u32 %v3303_v13, 16 }
  0xe1   :  { %v755_v54 = vpop.f32.mrf.mxu0  ;;  %v1911_v60 = vadd.f32 %v1741_v47, %v1439_v53  ;;  %v439_v53 = vshll.u32 %v3323_v44, 16 }
  0xe2   :  { %3007 = vst [vmem:[%s3793_s3 + $0x20] sm:$0xff] %v2841_v55   ;;  %v1036_v0 = vadd.f32 %v1035_v49, %v755_v54  ;;  %v1542_v54 = vrot.slane %v3323_v44, 1  ;;  %v437_v58 = vor.u32 %v435_v30, %v433_v28 }
  0xe3   :  { %v1989_v4 = vadd.f32 %v3190_v39, %v1911_v60  ;;  %v441_v59 = vrot.slane %v439_v53, 1 }
  0xe4   :  { %v1543_v63 = vsel %vm1508_vm0, %v1540_v24, %v1542_v54 }
  0xe5   :  { %v1743_v61 = vpop.f32.mrf.mxu3  ;;  %v2137_v9 = vmul.f32 0.2, %v1989_v4  ;;  %vm2063_vm13 = vcmp.gt.f32.partialorder %v1989_v4, 0.0 }
  0xe6   :  { %v1038_v1 = vpop.f32.mrf.mxu1  ;;  %v1271_v2 = vpop.f32.mrf.mxu2 }
  0xe7   :  { %v1440_v5 = vadd.f32 %v1271_v2, %v1036_v0  ;;  %v2211_v16 = vsel %vm2063_vm13, %v1989_v4, %v2137_v9  ;;  %v3343_v9 = vld [vmem:[%s3791_s0 + $0x98] sm:$0xff] }
  0xe9   :  { %v758_v6 = vpop.f32.mrf.mxu0  ;;  %2648 = vmatmul.msk.bf16.gmra.mxu1 %vm607_vm1, %v3243_v52  ;;  %v1912_v8 = vadd.f32 %v1743_v61, %v1440_v5 }
  0xea   :  { %2746 = vmatmul.msk.bf16.gmra.mxu3 %vm607_vm1, %v1539_v3  ;;  %v1039_v11 = vadd.f32 %v1038_v1, %v758_v6  ;;  %v442_v3 = vsel %vm294_vm2, %v437_v58, %v441_v59 }
  0xeb   :  { %v1990_v10 = vadd.f32 %v3190_v39, %v1912_v8  ;;  %2697 = vmatmul.msk.bf16.gmra.mxu2 %vm607_vm1, %v426_v7 }
  0xec   :  { %2603 = vmatmul.msk.bf16.gmra.mxu0 %vm607_vm1, %v418_v42 }
  0xed   :  { %v1746_v12 = vpop.f32.mrf.mxu3  ;;  %vm2064_vm14 = vcmp.gt.f32.partialorder %v1990_v10, 0.0  ;;  %v2138_v52 = vmul.f32 0.2, %v1990_v10 }
  0xee   :  { %v1040_v14 = vpop.f32.mrf.mxu1  ;;  %v1274_v15 = vpop.f32.mrf.mxu2 }
  0xef   :  { %v2212_v56 = vsel %vm2064_vm14, %v1990_v10, %v2138_v52  ;;  %v1441_v19 = vadd.f32 %v1274_v15, %v1039_v11 }
  0xf0   :  { %v2846_v21 = vpack.c.bf16 %v2212_v56, %v2211_v16  ;;  %v443_v56 = vshrl.u32 %v3323_v44, 16 }
  0xf1   :  { %v760_v20 = vpop.f32.mrf.mxu0  ;;  %v1913_v25 = vadd.f32 %v1746_v12, %v1441_v19  ;;  %v447_v19 = vshll.u32 %v3343_v9, 16 }
  0xf2   :  { %3008 = vst [vmem:[%s3793_s3 + $0x28] sm:$0xff] %v2846_v21   ;;  %v1041_v29 = vadd.f32 %v1040_v14, %v760_v20  ;;  %v1544_v20 = vrot.slane %v3343_v9, 1  ;;  %v445_v23 = vor.u32 %v443_v56, %v441_v59 }
  0xf3   :  { %v1991_v34 = vadd.f32 %v3190_v39, %v1913_v25  ;;  %v449_v24 = vrot.slane %v447_v19, 1 }
  0xf4   :  { %v1545_v28 = vsel %vm1508_vm0, %v1542_v54, %v1544_v20 }
  0xf5   :  { %v1748_v26 = vpop.f32.mrf.mxu3  ;;  %v2139_v40 = vmul.f32 0.2, %v1991_v34  ;;  %vm2065_vm15 = vcmp.gt.f32.partialorder %v1991_v34, 0.0 }
  0xf6   :  { %v1043_v31 = vpop.f32.mrf.mxu1  ;;  %v1276_v32 = vpop.f32.mrf.mxu2 }
  0xf7   :  { %v1442_v35 = vadd.f32 %v1276_v32, %v1041_v29  ;;  %v2213_v47 = vsel %vm2065_vm15, %v1991_v34, %v2139_v40  ;;  %v3363_v40 = vld [vmem:[%s3791_s0 + $0xa0] sm:$0xff] }
  0xf9   :  { %v763_v36 = vpop.f32.mrf.mxu0  ;;  %2649 = vmatmul.msk.bf16.gmra.mxu1 %vm607_vm1, %v3263_v17  ;;  %v1914_v38 = vadd.f32 %v1748_v26, %v1442_v35 }
  0xfa   :  { %2747 = vmatmul.msk.bf16.gmra.mxu3 %vm607_vm1, %v1541_v33  ;;  %v1044_v42 = vadd.f32 %v1043_v31, %v763_v36  ;;  %v450_v33 = vsel %vm294_vm2, %v445_v23, %v449_v24 }
  0xfb   :  { %v1992_v41 = vadd.f32 %v3190_v39, %v1914_v38  ;;  %2698 = vmatmul.msk.bf16.gmra.mxu2 %vm607_vm1, %v434_v37 }
  0xfc   :  { %2604 = vmatmul.msk.bf16.gmra.mxu0 %vm607_vm1, %v426_v7 }
  0xfd   :  { %v1751_v43 = vpop.f32.mrf.mxu3  ;;  %vm2066_vm3 = vcmp.gt.f32.partialorder %v1992_v41, 0.0  ;;  %v2140_v17 = vmul.f32 0.2, %v1992_v41 }
  0xfe   :  { %v1045_v45 = vpop.f32.mrf.mxu1  ;;  %v1279_v46 = vpop.f32.mrf.mxu2 }
  0xff   :  { %v2214_v22 = vsel %vm2066_vm3, %v1992_v41, %v2140_v17  ;;  %v1443_v49 = vadd.f32 %v1279_v46, %v1044_v42 }
 0x100   :  { %v2851_v51 = vpack.c.bf16 %v2214_v22, %v2213_v47  ;;  %v451_v22 = vshrl.u32 %v3343_v9, 16 }
 0x101   :  { %v765_v50 = vpop.f32.mrf.mxu0  ;;  %v1915_v55 = vadd.f32 %v1751_v43, %v1443_v49  ;;  %v455_v49 = vshll.u32 %v3363_v40, 16 }
 0x102   :  { %3009 = vst [vmem:[%s3793_s3 + $0x30] sm:$0xff] %v2851_v51   ;;  %v1046_v60 = vadd.f32 %v1045_v45, %v765_v50  ;;  %v1546_v50 = vrot.slane %v3363_v40, 1  ;;  %v453_v53 = vor.u32 %v451_v22, %v449_v24 }
 0x103   :  { %v1993_v0 = vadd.f32 %v3190_v39, %v1915_v55  ;;  %v457_v54 = vrot.slane %v455_v49, 1 }
 0x104   :  { %v1547_v59 = vsel %vm1508_vm0, %v1544_v20, %v1546_v50 }
 0x105   :  { %v1753_v57 = vpop.f32.mrf.mxu3  ;;  %v2141_v5 = vmul.f32 0.2, %v1993_v0  ;;  %vm2067_vm4 = vcmp.gt.f32.partialorder %v1993_v0, 0.0 }
 0x106   :  { %v1048_v61 = vpop.f32.mrf.mxu1  ;;  %v1281_v62 = vpop.f32.mrf.mxu2 }
 0x107   :  { %v1444_v1 = vadd.f32 %v1281_v62, %v1046_v60  ;;  %v2215_v12 = vsel %vm2067_vm4, %v1993_v0, %v2141_v5  ;;  %v3383_v5 = vld [vmem:[%s3791_s0 + $0xa8] sm:$0xff] }
 0x109   :  { %v768_v2 = vpop.f32.mrf.mxu0  ;;  %2650 = vmatmul.msk.bf16.gmra.mxu1 %vm607_vm1, %v3283_v48  ;;  %v1916_v4 = vadd.f32 %v1753_v57, %v1444_v1 }
 0x10a   :  { %2748 = vmatmul.msk.bf16.gmra.mxu3 %vm607_vm1, %v1543_v63  ;;  %v1049_v7 = vadd.f32 %v1048_v61, %v768_v2  ;;  %v458_v63 = vsel %vm294_vm2, %v453_v53, %v457_v54 }
 0x10b   :  { %v1994_v6 = vadd.f32 %v3190_v39, %v1916_v4  ;;  %2699 = vmatmul.msk.bf16.gmra.mxu2 %vm607_vm1, %v442_v3 }
 0x10c   :  { %2605 = vmatmul.msk.bf16.gmra.mxu0 %vm607_vm1, %v434_v37 }
 0x10d   :  { %v1756_v8 = vpop.f32.mrf.mxu3  ;;  %vm2068_vm5 = vcmp.gt.f32.partialorder %v1994_v6, 0.0  ;;  %v2142_v48 = vmul.f32 0.2, %v1994_v6 }
 0x10e   :  { %v1050_v10 = vpop.f32.mrf.mxu1  ;;  %v1284_v11 = vpop.f32.mrf.mxu2 }
 0x10f   :  { %v2216_v52 = vsel %vm2068_vm5, %v1994_v6, %v2142_v48  ;;  %v1445_v14 = vadd.f32 %v1284_v11, %v1049_v7 }
 0x110   :  { %v2856_v16 = vpack.c.bf16 %v2216_v52, %v2215_v12  ;;  %v459_v52 = vshrl.u32 %v3363_v40, 16 }
 0x111   :  { %v770_v15 = vpop.f32.mrf.mxu0  ;;  %v1917_v21 = vadd.f32 %v1756_v8, %v1445_v14  ;;  %v463_v14 = vshll.u32 %v3383_v5, 16 }
 0x112   :  { %3010 = vst [vmem:[%s3793_s3 + $0x38] sm:$0xff] %v2856_v16   ;;  %v1051_v25 = vadd.f32 %v1050_v10, %v770_v15  ;;  %v1548_v15 = vrot.slane %v3383_v5, 1  ;;  %v461_v19 = vor.u32 %v459_v52, %v457_v54 }
 0x113   :  { %v1995_v29 = vadd.f32 %v3190_v39, %v1917_v21  ;;  %v465_v20 = vrot.slane %v463_v14, 1 }
 0x114   :  { %v1549_v24 = vsel %vm1508_vm0, %v1546_v50, %v1548_v15 }
 0x115   :  { %v1758_v18 = vpop.f32.mrf.mxu3  ;;  %v2143_v35 = vmul.f32 0.2, %v1995_v29  ;;  %vm2069_vm6 = vcmp.gt.f32.partialorder %v1995_v29, 0.0 }
 0x116   :  { %v1053_v26 = vpop.f32.mrf.mxu1  ;;  %v1286_v27 = vpop.f32.mrf.mxu2 }
 0x117   :  { %v1446_v31 = vadd.f32 %v1286_v27, %v1051_v25  ;;  %v2217_v43 = vsel %vm2069_vm6, %v1995_v29, %v2143_v35  ;;  %v3403_v35 = vld [vmem:[%s3791_s0 + $0xb0] sm:$0xff] }
 0x119   :  { %v773_v32 = vpop.f32.mrf.mxu0  ;;  %2651 = vmatmul.msk.bf16.gmra.mxu1 %vm607_vm1, %v3303_v13  ;;  %v1918_v34 = vadd.f32 %v1758_v18, %v1446_v31 }
 0x11a   :  { %2749 = vmatmul.msk.bf16.gmra.mxu3 %vm607_vm1, %v1545_v28  ;;  %v1054_v37 = vadd.f32 %v1053_v26, %v773_v32  ;;  %v466_v28 = vsel %vm294_vm2, %v461_v19, %v465_v20 }
 0x11b   :  { %v1996_v36 = vadd.f32 %v3190_v39, %v1918_v34  ;;  %2700 = vmatmul.msk.bf16.gmra.mxu2 %vm607_vm1, %v450_v33 }
 0x11c   :  { %2606 = vmatmul.msk.bf16.gmra.mxu0 %vm607_vm1, %v442_v3 }
 0x11d   :  { %v1761_v38 = vpop.f32.mrf.mxu3  ;;  %vm2070_vm7 = vcmp.gt.f32.partialorder %v1996_v36, 0.0  ;;  %v2144_v13 = vmul.f32 0.2, %v1996_v36 }
 0x11e   :  { %v1055_v41 = vpop.f32.mrf.mxu1  ;;  %v1289_v42 = vpop.f32.mrf.mxu2 }
 0x11f   :  { %v2218_v17 = vsel %vm2070_vm7, %v1996_v36, %v2144_v13  ;;  %v1447_v45 = vadd.f32 %v1289_v42, %v1054_v37 }
 0x120   :  { %v2861_v47 = vpack.c.bf16 %v2218_v17, %v2217_v43  ;;  %v467_v17 = vshrl.u32 %v3383_v5, 16 }
 0x121   :  { %v775_v46 = vpop.f32.mrf.mxu0  ;;  %v1919_v51 = vadd.f32 %v1761_v38, %v1447_v45  ;;  %v471_v45 = vshll.u32 %v3403_v35, 16 }
 0x122   :  { %3011 = vst [vmem:[%s3793_s3 + $0x40] sm:$0xff] %v2861_v47   ;;  %v1056_v55 = vadd.f32 %v1055_v41, %v775_v46  ;;  %v1550_v46 = vrot.slane %v3403_v35, 1  ;;  %v469_v49 = vor.u32 %v467_v17, %v465_v20 }
 0x123   :  { %v1997_v60 = vadd.f32 %v3190_v39, %v1919_v51  ;;  %v473_v50 = vrot.slane %v471_v45, 1 }
 0x124   :  { %v1551_v54 = vsel %vm1508_vm0, %v1548_v15, %v1550_v46 }
 0x125   :  { %v1763_v30 = vpop.f32.mrf.mxu3  ;;  %v2145_v1 = vmul.f32 0.2, %v1997_v60  ;;  %vm2071_vm8 = vcmp.gt.f32.partialorder %v1997_v60, 0.0 }
 0x126   :  { %v1058_v57 = vpop.f32.mrf.mxu1  ;;  %v1291_v58 = vpop.f32.mrf.mxu2 }
 0x127   :  { %v1448_v61 = vadd.f32 %v1291_v58, %v1056_v55  ;;  %v2219_v8 = vsel %vm2071_vm8, %v1997_v60, %v2145_v1  ;;  %v3423_v1 = vld [vmem:[%s3791_s0 + $0xb8] sm:$0xff] }
 0x129   :  { %v778_v62 = vpop.f32.mrf.mxu0  ;;  %2652 = vmatmul.msk.bf16.gmra.mxu1 %vm607_vm1, %v3323_v44  ;;  %v1920_v0 = vadd.f32 %v1763_v30, %v1448_v61 }
 0x12a   :  { %2750 = vmatmul.msk.bf16.gmra.mxu3 %vm607_vm1, %v1547_v59  ;;  %v1059_v3 = vadd.f32 %v1058_v57, %v778_v62  ;;  %v474_v59 = vsel %vm294_vm2, %v469_v49, %v473_v50 }
 0x12b   :  { %v1998_v2 = vadd.f32 %v3190_v39, %v1920_v0  ;;  %2701 = vmatmul.msk.bf16.gmra.mxu2 %vm607_vm1, %v458_v63 }
 0x12c   :  { %2607 = vmatmul.msk.bf16.gmra.mxu0 %vm607_vm1, %v450_v33 }
 0x12d   :  { %v1766_v4 = vpop.f32.mrf.mxu3  ;;  %vm2072_vm9 = vcmp.gt.f32.partialorder %v1998_v2, 0.0  ;;  %v2146_v44 = vmul.f32 0.2, %v1998_v2 }
 0x12e   :  { %v1060_v6 = vpop.f32.mrf.mxu1  ;;  %v1294_v7 = vpop.f32.mrf.mxu2 }
 0x12f   :  { %v2220_v48 = vsel %vm2072_vm9, %v1998_v2, %v2146_v44  ;;  %v1449_v10 = vadd.f32 %v1294_v7, %v1059_v3 }
 0x130   :  { %v2866_v12 = vpack.c.bf16 %v2220_v48, %v2219_v8  ;;  %v475_v48 = vshrl.u32 %v3403_v35, 16 }
 0x131   :  { %v780_v11 = vpop.f32.mrf.mxu0  ;;  %v1921_v16 = vadd.f32 %v1766_v4, %v1449_v10  ;;  %v479_v10 = vshll.u32 %v3423_v1, 16 }
 0x132   :  { %3012 = vst [vmem:[%s3793_s3 + $0x48] sm:$0xff] %v2866_v12   ;;  %v1061_v21 = vadd.f32 %v1060_v6, %v780_v11  ;;  %v1552_v11 = vrot.slane %v3423_v1, 1  ;;  %v477_v14 = vor.u32 %v475_v48, %v473_v50 }
 0x133   :  { %v1999_v25 = vadd.f32 %v3190_v39, %v1921_v16  ;;  %v481_v15 = vrot.slane %v479_v10, 1 }
 0x134   :  { %v1553_v20 = vsel %vm1508_vm0, %v1550_v46, %v1552_v11 }
 0x135   :  { %v1768_v56 = vpop.f32.mrf.mxu3  ;;  %v2147_v31 = vmul.f32 0.2, %v1999_v25  ;;  %vm2073_vm10 = vcmp.gt.f32.partialorder %v1999_v25, 0.0 }
 0x136   :  { %v1063_v18 = vpop.f32.mrf.mxu1  ;;  %v1296_v23 = vpop.f32.mrf.mxu2 }
 0x137   :  { %v1450_v26 = vadd.f32 %v1296_v23, %v1061_v21  ;;  %v2221_v38 = vsel %vm2073_vm10, %v1999_v25, %v2147_v31  ;;  %v3443_v31 = vld [vmem:[%s3791_s0 + $0xc0] sm:$0xff] }
 0x139   :  { %v783_v27 = vpop.f32.mrf.mxu0  ;;  %2653 = vmatmul.msk.bf16.gmra.mxu1 %vm607_vm1, %v3343_v9  ;;  %v1922_v29 = vadd.f32 %v1768_v56, %v1450_v26 }
 0x13a   :  { %2751 = vmatmul.msk.bf16.gmra.mxu3 %vm607_vm1, %v1549_v24  ;;  %v1064_v33 = vadd.f32 %v1063_v18, %v783_v27  ;;  %v482_v24 = vsel %vm294_vm2, %v477_v14, %v481_v15 }
 0x13b   :  { %v2000_v32 = vadd.f32 %v3190_v39, %v1922_v29  ;;  %2702 = vmatmul.msk.bf16.gmra.mxu2 %vm607_vm1, %v466_v28 }
 0x13c   :  { %2608 = vmatmul.msk.bf16.gmra.mxu0 %vm607_vm1, %v458_v63 }
 0x13d   :  { %v1771_v34 = vpop.f32.mrf.mxu3  ;;  %vm2074_vm11 = vcmp.gt.f32.partialorder %v2000_v32, 0.0  ;;  %v2148_v9 = vmul.f32 0.2, %v2000_v32 }
 0x13e   :  { %v1065_v36 = vpop.f32.mrf.mxu1  ;;  %v1299_v37 = vpop.f32.mrf.mxu2 }
 0x13f   :  { %v2222_v13 = vsel %vm2074_vm11, %v2000_v32, %v2148_v9  ;;  %v1451_v41 = vadd.f32 %v1299_v37, %v1064_v33 }
 0x140   :  { %v2871_v43 = vpack.c.bf16 %v2222_v13, %v2221_v38  ;;  %v483_v13 = vshrl.u32 %v3423_v1, 16 }
 0x141   :  { %v785_v42 = vpop.f32.mrf.mxu0  ;;  %v1923_v47 = vadd.f32 %v1771_v34, %v1451_v41  ;;  %v487_v41 = vshll.u32 %v3443_v31, 16 }
 0x142   :  { %3013 = vst [vmem:[%s3793_s3 + $0x50] sm:$0xff] %v2871_v43   ;;  %v1066_v51 = vadd.f32 %v1065_v36, %v785_v42  ;;  %v1554_v42 = vrot.slane %v3443_v31, 1  ;;  %v485_v45 = vor.u32 %v483_v13, %v481_v15  ;;  %v3475_v15 = vld [vmem:[%s3792_s2] ss:$0 sm:$0xff] }
 0x143   :  { %v2001_v55 = vadd.f32 %v3190_v39, %v1923_v47  ;;  %v489_v46 = vrot.slane %v487_v41, 1 }
 0x144   :  { %v1555_v50 = vsel %vm1508_vm0, %v1552_v11, %v1554_v42 }
 0x145   :  { %v1773_v22 = vpop.f32.mrf.mxu3  ;;  %v2149_v61 = vmul.f32 0.2, %v2001_v55  ;;  %vm2075_vm12 = vcmp.gt.f32.partialorder %v2001_v55, 0.0 }
 0x146   :  { %v1068_v30 = vpop.f32.mrf.mxu1  ;;  %v1301_v53 = vpop.f32.mrf.mxu2 }
 0x147   :  { %v1452_v57 = vadd.f32 %v1301_v53, %v1066_v51  ;;  %v2223_v4 = vsel %vm2075_vm12, %v2001_v55, %v2149_v61  ;;  %v3463_v61 = vld [vmem:[%s3791_s0 + $0xc8] sm:$0xff] }
 0x149   :  { %v788_v58 = vpop.f32.mrf.mxu0  ;;  %2654 = vmatmul.msk.bf16.gmra.mxu1 %vm607_vm1, %v3363_v40  ;;  %v1924_v60 = vadd.f32 %v1773_v22, %v1452_v57 }
 0x14a   :  { %2752 = vmatmul.msk.bf16.gmra.mxu3 %vm607_vm1, %v1551_v54  ;;  %v1069_v63 = vadd.f32 %v1068_v30, %v788_v58  ;;  %v490_v54 = vsel %vm294_vm2, %v485_v45, %v489_v46 }
 0x14b   :  { %v2002_v62 = vadd.f32 %v3190_v39, %v1924_v60  ;;  %2703 = vmatmul.msk.bf16.gmra.mxu2 %vm607_vm1, %v474_v59 }
 0x14c   :  { %2609 = vmatmul.msk.bf16.gmra.mxu0 %vm607_vm1, %v466_v28 }
 0x14d   :  { %v1776_v0 = vpop.f32.mrf.mxu3  ;;  %vm2076_vm13 = vcmp.gt.f32.partialorder %v2002_v62, 0.0  ;;  %v2150_v40 = vmul.f32 0.2, %v2002_v62 }
 0x14e   :  { %v1070_v2 = vpop.f32.mrf.mxu1  ;;  %v1304_v3 = vpop.f32.mrf.mxu2 }
 0x14f   :  { %v2224_v44 = vsel %vm2076_vm13, %v2002_v62, %v2150_v40  ;;  %v1453_v6 = vadd.f32 %v1304_v3, %v1069_v63 }
 0x150   :  { %v2876_v8 = vpack.c.bf16 %v2224_v44, %v2223_v4  ;;  %v495_v44 = vshll.u32 %v3463_v61, 16 }
 0x151   :  { %v790_v7 = vpop.f32.mrf.mxu0  ;;  %v1925_v12 = vadd.f32 %v1776_v0, %v1453_v6  ;;  %v1556_v6 = vrot.slane %v3463_v61, 1 }
 0x152   :  { %3014 = vst [vmem:[%s3793_s3 + $0x58] sm:$0xff] %v2876_v8   ;;  %v1071_v16 = vadd.f32 %v1070_v2, %v790_v7  ;;  %v497_v10 = vrot.slane %v495_v44, 1 }
 0x153   :  { %v2003_v21 = vadd.f32 %v3190_v39, %v1925_v12  ;;  %v1557_v14 = vsel %vm1508_vm0, %v1554_v42, %v1556_v6 }
 0x155   :  { %v1778_v52 = vpop.f32.mrf.mxu3  ;;  %v2151_v26 = vmul.f32 0.2, %v2003_v21  ;;  %vm2077_vm14 = vcmp.gt.f32.partialorder %v2003_v21, 0.0 }
 0x156   :  { %v1073_v56 = vpop.f32.mrf.mxu1  ;;  %v1306_v19 = vpop.f32.mrf.mxu2 }
 0x157   :  { %v1454_v18 = vadd.f32 %v1306_v19, %v1071_v16  ;;  %v2225_v34 = vsel %vm2077_vm14, %v2003_v21, %v2151_v26  ;;  %v3488_v26 = vld [vmem:[%s3791_s0 + $0xd0] sm:$0xff] }
 0x159   :  { %v793_v23 = vpop.f32.mrf.mxu0  ;;  %2655 = vmatmul.msk.bf16.gmra.mxu1 %vm607_vm1, %v3383_v5  ;;  %v1926_v25 = vadd.f32 %v1778_v52, %v1454_v18 }
 0x15a   :  { %2753 = vmatmul.msk.bf16.gmra.mxu3 %vm607_vm1, %v1553_v20  ;;  %v1074_v28 = vadd.f32 %v1073_v56, %v793_v23 }
 0x15b   :  { %v2004_v27 = vadd.f32 %v3190_v39, %v1926_v25  ;;  %2704 = vmatmul.msk.bf16.gmra.mxu2 %vm607_vm1, %v482_v24 }
 0x15c   :  { %2610 = vmatmul.msk.bf16.gmra.mxu0 %vm607_vm1, %v474_v59 }
 0x15d   :  { %v1781_v29 = vpop.f32.mrf.mxu3  ;;  %vm2078_vm15 = vcmp.gt.f32.partialorder %v2004_v27, 0.0  ;;  %v2152_v5 = vmul.f32 0.2, %v2004_v27 }
 0x15e   :  { %v1075_v32 = vpop.f32.mrf.mxu1  ;;  %v1309_v33 = vpop.f32.mrf.mxu2 }
 0x15f   :  { %v2226_v9 = vsel %vm2078_vm15, %v2004_v27, %v2152_v5  ;;  %v1455_v36 = vadd.f32 %v1309_v33, %v1074_v28 }
 0x160   :  { %v2881_v38 = vpack.c.bf16 %v2226_v9, %v2225_v34  ;;  %v499_v9 = vshrl.u32 %v3463_v61, 16 }
 0x161   :  { %v795_v37 = vpop.f32.mrf.mxu0  ;;  %v1927_v43 = vadd.f32 %v1781_v29, %v1455_v36  ;;  %v503_v36 = vshll.u32 %v3488_v26, 16 }
 0x162   :  { %3015 = vst [vmem:[%s3793_s3 + $0x60] sm:$0xff] %v2881_v38   ;;  %v1076_v47 = vadd.f32 %v1075_v32, %v795_v37  ;;  %v1558_v37 = vrot.slane %v3488_v26, 1  ;;  %v501_v41 = vor.u32 %v499_v9, %v497_v10 }
 0x163   :  { %v2005_v51 = vadd.f32 %v3190_v39, %v1927_v43  ;;  %v505_v42 = vrot.slane %v503_v36, 1 }
 0x165   :  { %v1783_v17 = vpop.f32.mrf.mxu3  ;;  %v2153_v57 = vmul.f32 0.2, %v2005_v51  ;;  %vm2079_vm3 = vcmp.gt.f32.partialorder %v2005_v51, 0.0 }
 0x166   :  { %v1078_v22 = vpop.f32.mrf.mxu1  ;;  %v1311_v49 = vpop.f32.mrf.mxu2 }
 0x167   :  { %v1456_v30 = vadd.f32 %v1311_v49, %v1076_v47  ;;  %v2227_v0 = vsel %vm2079_vm3, %v2005_v51, %v2153_v57  ;;  %v3508_v57 = vld [vmem:[%s3791_s0 + $0xd8] sm:$0xff] }
 0x169   :  { %v798_v53 = vpop.f32.mrf.mxu0  ;;  %2656 = vmatmul.msk.bf16.gmra.mxu1 %vm607_vm1, %v3403_v35  ;;  %v1928_v55 = vadd.f32 %v1783_v17, %v1456_v30 }
 0x16a   :  { %2754 = vmatmul.msk.bf16.gmra.mxu3 %vm607_vm1, %v1555_v50  ;;  %v1079_v59 = vadd.f32 %v1078_v22, %v798_v53  ;;  %v506_v50 = vsel %vm294_vm2, %v501_v41, %v505_v42 }
 0x16b   :  { %v2006_v58 = vadd.f32 %v3190_v39, %v1928_v55  ;;  %2705 = vmatmul.msk.bf16.gmra.mxu2 %vm607_vm1, %v490_v54  ;;  %v491_v39 = vshrl.u32 %v3443_v31, 16 }
 0x16c   :  { %2611 = vmatmul.msk.bf16.gmra.mxu0 %vm607_vm1, %v482_v24 }
 0x16d   :  { %v1786_v60 = vpop.f32.mrf.mxu3  ;;  %vm2080_vm4 = vcmp.gt.f32.partialorder %v2006_v58, 0.0  ;;  %v2154_v35 = vmul.f32 0.2, %v2006_v58  ;;  %v493_v48 = vor.u32 %v491_v39, %v489_v46  ;;  %v1559_v46 = vsel %vm1508_vm0, %v1556_v6, %v1558_v37 }
 0x16e   :  { %v1080_v62 = vpop.f32.mrf.mxu1  ;;  %v1314_v63 = vpop.f32.mrf.mxu2 }
 0x16f   :  { %v2228_v40 = vsel %vm2080_vm4, %v2006_v58, %v2154_v35  ;;  %v1457_v2 = vadd.f32 %v1314_v63, %v1079_v59  ;;  %v498_v20 = vsel %vm294_vm2, %v493_v48, %v497_v10 }
 0x170   :  { %v2886_v4 = vpack.c.bf16 %v2228_v40, %v2227_v0  ;;  %v507_v40 = vshrl.u32 %v3488_v26, 16 }
 0x171   :  { %v800_v3 = vpop.f32.mrf.mxu0  ;;  %v1929_v7 = vadd.f32 %v1786_v60, %v1457_v2  ;;  %v511_v2 = vshll.u32 %v3508_v57, 16 }
 0x172   :  { %3016 = vst [vmem:[%s3793_s3 + $0x68] sm:$0xff] %v2886_v4   ;;  %v1081_v11 = vadd.f32 %v1080_v62, %v800_v3  ;;  %v1560_v3 = vrot.slane %v3508_v57, 1  ;;  %v509_v44 = vor.u32 %v507_v40, %v505_v42 }
 0x173   :  { %v2007_v16 = vadd.f32 %v3475_v15, %v1929_v7  ;;  %v513_v6 = vrot.slane %v511_v2, 1 }
 0x174   :  { %v1561_v10 = vsel %vm1508_vm0, %v1558_v37, %v1560_v3 }
 0x175   :  { %v1788_v8 = vpop.f32.mrf.mxu3  ;;  %v2155_v18 = vmul.f32 0.2, %v2007_v16  ;;  %vm2081_vm5 = vcmp.gt.f32.partialorder %v2007_v16, 0.0 }
 0x176   :  { %v1083_v12 = vpop.f32.mrf.mxu1  ;;  %v1316_v52 = vpop.f32.mrf.mxu2 }
 0x177   :  { %v1458_v56 = vadd.f32 %v1316_v52, %v1081_v11  ;;  %v2229_v29 = vsel %vm2081_vm5, %v2007_v16, %v2155_v18  ;;  %v3528_v18 = vld [vmem:[%s3791_s0 + $0xe0] sm:$0xff] }
 0x179   :  { %v803_v19 = vpop.f32.mrf.mxu0  ;;  %2657 = vmatmul.msk.bf16.gmra.mxu1 %vm607_vm1, %v3423_v1  ;;  %v1930_v21 = vadd.f32 %v1788_v8, %v1458_v56 }
 0x17a   :  { %2755 = vmatmul.msk.bf16.gmra.mxu3 %vm607_vm1, %v1557_v14  ;;  %v1084_v24 = vadd.f32 %v1083_v12, %v803_v19  ;;  %v514_v14 = vsel %vm294_vm2, %v509_v44, %v513_v6 }
 0x17b   :  { %v2008_v23 = vadd.f32 %v3475_v15, %v1930_v21  ;;  %2706 = vmatmul.msk.bf16.gmra.mxu2 %vm607_vm1, %v498_v20 }
 0x17c   :  { %2612 = vmatmul.msk.bf16.gmra.mxu0 %vm607_vm1, %v490_v54 }
 0x17d   :  { %v1791_v25 = vpop.f32.mrf.mxu3  ;;  %vm2082_vm6 = vcmp.gt.f32.partialorder %v2008_v23, 0.0  ;;  %v2156_v1 = vmul.f32 0.2, %v2008_v23 }
 0x17e   :  { %v1085_v27 = vpop.f32.mrf.mxu1  ;;  %v1319_v28 = vpop.f32.mrf.mxu2 }
 0x17f   :  { %v2230_v5 = vsel %vm2082_vm6, %v2008_v23, %v2156_v1  ;;  %v1459_v32 = vadd.f32 %v1319_v28, %v1084_v24 }
 0x180   :  { %v2891_v34 = vpack.c.bf16 %v2230_v5, %v2229_v29  ;;  %v515_v5 = vshrl.u32 %v3508_v57, 16 }
 0x181   :  { %v805_v33 = vpop.f32.mrf.mxu0  ;;  %v1931_v38 = vadd.f32 %v1791_v25, %v1459_v32  ;;  %v519_v32 = vshll.u32 %v3528_v18, 16 }
 0x182   :  { %3017 = vst [vmem:[%s3793_s3 + $0x70] sm:$0xff] %v2891_v34   ;;  %v1086_v43 = vadd.f32 %v1085_v27, %v805_v33  ;;  %v1562_v33 = vrot.slane %v3528_v18, 1  ;;  %v517_v36 = vor.u32 %v515_v5, %v513_v6 }
 0x183   :  { %v2009_v47 = vadd.f32 %v3475_v15, %v1931_v38  ;;  %v521_v37 = vrot.slane %v519_v32, 1 }
 0x184   :  { %v1563_v42 = vsel %vm1508_vm0, %v1560_v3, %v1562_v33 }
 0x185   :  { %v1793_v13 = vpop.f32.mrf.mxu3  ;;  %v2157_v30 = vmul.f32 0.2, %v2009_v47  ;;  %vm2083_vm7 = vcmp.gt.f32.partialorder %v2009_v47, 0.0 }
 0x186   :  { %v1088_v17 = vpop.f32.mrf.mxu1  ;;  %v1321_v45 = vpop.f32.mrf.mxu2 }
 0x187   :  { %v1460_v22 = vadd.f32 %v1321_v45, %v1086_v43  ;;  %v2231_v60 = vsel %vm2083_vm7, %v2009_v47, %v2157_v30  ;;  %v3548_v30 = vld [vmem:[%s3791_s0 + $0xe8] sm:$0xff] }
 0x189   :  { %v808_v49 = vpop.f32.mrf.mxu0  ;;  %2658 = vmatmul.msk.bf16.gmra.mxu1 %vm607_vm1, %v3443_v31  ;;  %v1932_v51 = vadd.f32 %v1793_v13, %v1460_v22 }
 0x18a   :  { %2756 = vmatmul.msk.bf16.gmra.mxu3 %vm607_vm1, %v1559_v46  ;;  %v1089_v54 = vadd.f32 %v1088_v17, %v808_v49  ;;  %v522_v46 = vsel %vm294_vm2, %v517_v36, %v521_v37 }
 0x18b   :  { %v2010_v53 = vadd.f32 %v3475_v15, %v1932_v51  ;;  %2707 = vmatmul.msk.bf16.gmra.mxu2 %vm607_vm1, %v506_v50 }
 0x18c   :  { %2613 = vmatmul.msk.bf16.gmra.mxu0 %vm607_vm1, %v498_v20 }
 0x18d   :  { %v1796_v55 = vpop.f32.mrf.mxu3  ;;  %vm2084_vm8 = vcmp.gt.f32.partialorder %v2010_v53, 0.0  ;;  %v2158_v31 = vmul.f32 0.2, %v2010_v53 }
 0x18e   :  { %v1090_v58 = vpop.f32.mrf.mxu1  ;;  %v1324_v59 = vpop.f32.mrf.mxu2 }
 0x18f   :  { %v2232_v35 = vsel %vm2084_vm8, %v2010_v53, %v2158_v31  ;;  %v1461_v62 = vadd.f32 %v1324_v59, %v1089_v54 }
 0x190   :  { %v2896_v0 = vpack.c.bf16 %v2232_v35, %v2231_v60  ;;  %v523_v35 = vshrl.u32 %v3528_v18, 16 }
 0x191   :  { %v810_v63 = vpop.f32.mrf.mxu0  ;;  %v1933_v4 = vadd.f32 %v1796_v55, %v1461_v62  ;;  %v527_v62 = vshll.u32 %v3548_v30, 16 }
 0x192   :  { %3018 = vst [vmem:[%s3793_s3 + $0x78] sm:$0xff] %v2896_v0   ;;  %v1091_v7 = vadd.f32 %v1090_v58, %v810_v63  ;;  %v1564_v63 = vrot.slane %v3548_v30, 1  ;;  %v525_v2 = vor.u32 %v523_v35, %v521_v37 }
 0x193   :  { %v2011_v11 = vadd.f32 %v3475_v15, %v1933_v4  ;;  %v529_v3 = vrot.slane %v527_v62, 1 }
 0x194   :  { %v1565_v6 = vsel %vm1508_vm0, %v1562_v33, %v1564_v63 }
 0x195   :  { %v1798_v39 = vpop.f32.mrf.mxu3  ;;  %v2159_v56 = vmul.f32 0.2, %v2011_v11  ;;  %vm2085_vm9 = vcmp.gt.f32.partialorder %v2011_v11, 0.0 }
 0x196   :  { %v1093_v8 = vpop.f32.mrf.mxu1  ;;  %v1326_v48 = vpop.f32.mrf.mxu2 }
 0x197   :  { %v1462_v12 = vadd.f32 %v1326_v48, %v1091_v7  ;;  %v2233_v25 = vsel %vm2085_vm9, %v2011_v11, %v2159_v56  ;;  %v3568_v56 = vld [vmem:[%s3791_s0 + $0xf0] sm:$0xff] }
 0x199   :  { %v813_v52 = vpop.f32.mrf.mxu0  ;;  %2659 = vmatmul.msk.bf16.gmra.mxu1 %vm607_vm1, %v3463_v61  ;;  %v1934_v16 = vadd.f32 %v1798_v39, %v1462_v12 }
 0x19a   :  { %2757 = vmatmul.msk.bf16.gmra.mxu3 %vm607_vm1, %v1561_v10  ;;  %v1094_v20 = vadd.f32 %v1093_v8, %v813_v52  ;;  %v530_v10 = vsel %vm294_vm2, %v525_v2, %v529_v3 }
 0x19b   :  { %v2012_v19 = vadd.f32 %v3475_v15, %v1934_v16  ;;  %2708 = vmatmul.msk.bf16.gmra.mxu2 %vm607_vm1, %v514_v14 }
 0x19c   :  { %2614 = vmatmul.msk.bf16.gmra.mxu0 %vm607_vm1, %v506_v50 }
 0x19d   :  { %v1801_v21 = vpop.f32.mrf.mxu3  ;;  %vm2086_vm10 = vcmp.gt.f32.partialorder %v2012_v19, 0.0  ;;  %v2160_v61 = vmul.f32 0.2, %v2012_v19 }
 0x19e   :  { %v1095_v23 = vpop.f32.mrf.mxu1  ;;  %v1329_v24 = vpop.f32.mrf.mxu2 }
 0x19f   :  { %v2234_v1 = vsel %vm2086_vm10, %v2012_v19, %v2160_v61  ;;  %v1463_v27 = vadd.f32 %v1329_v24, %v1094_v20 }
 0x1a0   :  { %v2901_v29 = vpack.c.bf16 %v2234_v1, %v2233_v25  ;;  %v531_v1 = vshrl.u32 %v3548_v30, 16 }
 0x1a1   :  { %v815_v28 = vpop.f32.mrf.mxu0  ;;  %v1935_v34 = vadd.f32 %v1801_v21, %v1463_v27  ;;  %v535_v27 = vshll.u32 %v3568_v56, 16 }
 0x1a2   :  { %3019 = vst [vmem:[%s3793_s3 + $0x80] sm:$0xff] %v2901_v29   ;;  %v1096_v38 = vadd.f32 %v1095_v23, %v815_v28  ;;  %v1566_v28 = vrot.slane %v3568_v56, 1  ;;  %v533_v32 = vor.u32 %v531_v1, %v529_v3 }
 0x1a3   :  { %v2013_v43 = vadd.f32 %v3475_v15, %v1935_v34  ;;  %v537_v33 = vrot.slane %v535_v27, 1 }
 0x1a4   :  { %v1567_v37 = vsel %vm1508_vm0, %v1564_v63, %v1566_v28 }
 0x1a5   :  { %v1803_v9 = vpop.f32.mrf.mxu3  ;;  %v2161_v22 = vmul.f32 0.2, %v2013_v43  ;;  %vm2087_vm11 = vcmp.gt.f32.partialorder %v2013_v43, 0.0 }
 0x1a6   :  { %v1098_v13 = vpop.f32.mrf.mxu1  ;;  %v1331_v41 = vpop.f32.mrf.mxu2 }
 0x1a7   :  { %v1464_v17 = vadd.f32 %v1331_v41, %v1096_v38  ;;  %v2235_v55 = vsel %vm2087_vm11, %v2013_v43, %v2161_v22  ;;  %v3588_v22 = vld [vmem:[%s3791_s0 + $0xf8] sm:$0xff] }
 0x1a9   :  { %v818_v45 = vpop.f32.mrf.mxu0  ;;  %2660 = vmatmul.msk.bf16.gmra.mxu1 %vm607_vm1, %v3488_v26  ;;  %v1936_v47 = vadd.f32 %v1803_v9, %v1464_v17 }
 0x1aa   :  { %2758 = vmatmul.msk.bf16.gmra.mxu3 %vm607_vm1, %v1563_v42  ;;  %v1099_v50 = vadd.f32 %v1098_v13, %v818_v45  ;;  %v538_v42 = vsel %vm294_vm2, %v533_v32, %v537_v33 }
 0x1ab   :  { %v2014_v49 = vadd.f32 %v3475_v15, %v1936_v47  ;;  %2709 = vmatmul.msk.bf16.gmra.mxu2 %vm607_vm1, %v522_v46 }
 0x1ac   :  { %2615 = vmatmul.msk.bf16.gmra.mxu0 %vm607_vm1, %v514_v14 }
 0x1ad   :  { %v1806_v51 = vpop.f32.mrf.mxu3  ;;  %vm2088_vm12 = vcmp.gt.f32.partialorder %v2014_v49, 0.0  ;;  %v2162_v26 = vmul.f32 0.2, %v2014_v49 }
 0x1ae   :  { %v1100_v53 = vpop.f32.mrf.mxu1  ;;  %v1334_v54 = vpop.f32.mrf.mxu2 }
 0x1af   :  { %v2236_v31 = vsel %vm2088_vm12, %v2014_v49, %v2162_v26  ;;  %v1465_v58 = vadd.f32 %v1334_v54, %v1099_v50 }
 0x1b0   :  { %v2906_v60 = vpack.c.bf16 %v2236_v31, %v2235_v55  ;;  %v539_v31 = vshrl.u32 %v3568_v56, 16 }
 0x1b1   :  { %v820_v59 = vpop.f32.mrf.mxu0  ;;  %v1937_v0 = vadd.f32 %v1806_v51, %v1465_v58  ;;  %v543_v58 = vshll.u32 %v3588_v22, 16 }
 0x1b2   :  { %3020 = vst [vmem:[%s3793_s3 + $0x88] sm:$0xff] %v2906_v60   ;;  %v1101_v4 = vadd.f32 %v1100_v53, %v820_v59  ;;  %v1568_v59 = vrot.slane %v3588_v22, 1  ;;  %v541_v62 = vor.u32 %v539_v31, %v537_v33 }
 0x1b3   :  { %v2015_v7 = vadd.f32 %v3475_v15, %v1937_v0  ;;  %v545_v63 = vrot.slane %v543_v58, 1 }
 0x1b4   :  { %v1569_v3 = vsel %vm1508_vm0, %v1566_v28, %v1568_v59 }
 0x1b5   :  { %v1808_v40 = vpop.f32.mrf.mxu3  ;;  %v2163_v12 = vmul.f32 0.2, %v2015_v7  ;;  %vm2089_vm13 = vcmp.gt.f32.partialorder %v2015_v7, 0.0 }
 0x1b6   :  { %v1103_v39 = vpop.f32.mrf.mxu1  ;;  %v1336_v44 = vpop.f32.mrf.mxu2 }
 0x1b7   :  { %v1466_v8 = vadd.f32 %v1336_v44, %v1101_v4  ;;  %v2237_v21 = vsel %vm2089_vm13, %v2015_v7, %v2163_v12  ;;  %v3608_v12 = vld [vmem:[%s3791_s0 + $0x100] sm:$0xff] }
 0x1b9   :  { %v823_v48 = vpop.f32.mrf.mxu0  ;;  %2661 = vmatmul.msk.bf16.gmra.mxu1 %vm607_vm1, %v3508_v57  ;;  %v1938_v11 = vadd.f32 %v1808_v40, %v1466_v8 }
 0x1ba   :  { %2759 = vmatmul.msk.bf16.gmra.mxu3 %vm607_vm1, %v1565_v6  ;;  %v1104_v14 = vadd.f32 %v1103_v39, %v823_v48  ;;  %v546_v6 = vsel %vm294_vm2, %v541_v62, %v545_v63 }
 0x1bb   :  { %v2016_v52 = vadd.f32 %v3475_v15, %v1938_v11  ;;  %2710 = vmatmul.msk.bf16.gmra.mxu2 %vm607_vm1, %v530_v10 }
 0x1bc   :  { %2616 = vmatmul.msk.bf16.gmra.mxu0 %vm607_vm1, %v522_v46 }
 0x1bd   :  { %v1811_v16 = vpop.f32.mrf.mxu3  ;;  %vm2090_vm14 = vcmp.gt.f32.partialorder %v2016_v52, 0.0  ;;  %v2164_v57 = vmul.f32 0.2, %v2016_v52 }
 0x1be   :  { %v1105_v19 = vpop.f32.mrf.mxu1  ;;  %v1339_v20 = vpop.f32.mrf.mxu2 }
 0x1bf   :  { %v2238_v61 = vsel %vm2090_vm14, %v2016_v52, %v2164_v57  ;;  %v1467_v23 = vadd.f32 %v1339_v20, %v1104_v14 }
 0x1c0   :  { %v2911_v25 = vpack.c.bf16 %v2238_v61, %v2237_v21  ;;  %v547_v61 = vshrl.u32 %v3588_v22, 16 }
 0x1c1   :  { %v825_v24 = vpop.f32.mrf.mxu0  ;;  %v1939_v29 = vadd.f32 %v1811_v16, %v1467_v23  ;;  %v551_v23 = vshll.u32 %v3608_v12, 16 }
 0x1c2   :  { %3021 = vst [vmem:[%s3793_s3 + $0x90] sm:$0xff] %v2911_v25   ;;  %v1106_v34 = vadd.f32 %v1105_v19, %v825_v24  ;;  %v1570_v24 = vrot.slane %v3608_v12, 1  ;;  %v549_v27 = vor.u32 %v547_v61, %v545_v63 }
 0x1c3   :  { %v2017_v38 = vadd.f32 %v3475_v15, %v1939_v29  ;;  %v553_v28 = vrot.slane %v551_v23, 1 }
 0x1c4   :  { %v1571_v33 = vsel %vm1508_vm0, %v1568_v59, %v1570_v24 }
 0x1c5   :  { %v1813_v5 = vpop.f32.mrf.mxu3  ;;  %v2165_v17 = vmul.f32 0.2, %v2017_v38  ;;  %vm2091_vm15 = vcmp.gt.f32.partialorder %v2017_v38, 0.0 }
 0x1c6   :  { %v1108_v9 = vpop.f32.mrf.mxu1  ;;  %v1341_v36 = vpop.f32.mrf.mxu2 }
 0x1c7   :  { %v1468_v13 = vadd.f32 %v1341_v36, %v1106_v34  ;;  %v2239_v51 = vsel %vm2091_vm15, %v2017_v38, %v2165_v17  ;;  %v3628_v17 = vld [vmem:[%s3791_s0 + $0x108] sm:$0xff] }
 0x1c9   :  { %v828_v41 = vpop.f32.mrf.mxu0  ;;  %2662 = vmatmul.msk.bf16.gmra.mxu1 %vm607_vm1, %v3528_v18  ;;  %v1940_v43 = vadd.f32 %v1813_v5, %v1468_v13 }
 0x1ca   :  { %2760 = vmatmul.msk.bf16.gmra.mxu3 %vm607_vm1, %v1567_v37  ;;  %v1109_v46 = vadd.f32 %v1108_v9, %v828_v41  ;;  %v554_v37 = vsel %vm294_vm2, %v549_v27, %v553_v28 }
 0x1cb   :  { %v2018_v45 = vadd.f32 %v3475_v15, %v1940_v43  ;;  %2711 = vmatmul.msk.bf16.gmra.mxu2 %vm607_vm1, %v538_v42 }
 0x1cc   :  { %2617 = vmatmul.msk.bf16.gmra.mxu0 %vm607_vm1, %v530_v10 }
 0x1cd   :  { %v1816_v47 = vpop.f32.mrf.mxu3  ;;  %vm2092_vm3 = vcmp.gt.f32.partialorder %v2018_v45, 0.0  ;;  %v2166_v18 = vmul.f32 0.2, %v2018_v45 }
 0x1ce   :  { %v1110_v49 = vpop.f32.mrf.mxu1  ;;  %v1344_v50 = vpop.f32.mrf.mxu2 }
 0x1cf   :  { %v2240_v26 = vsel %vm2092_vm3, %v2018_v45, %v2166_v18  ;;  %v1469_v53 = vadd.f32 %v1344_v50, %v1109_v46 }
 0x1d0   :  { %v2916_v55 = vpack.c.bf16 %v2240_v26, %v2239_v51  ;;  %v555_v26 = vshrl.u32 %v3608_v12, 16 }
 0x1d1   :  { %v830_v54 = vpop.f32.mrf.mxu0  ;;  %v1941_v60 = vadd.f32 %v1816_v47, %v1469_v53  ;;  %v559_v53 = vshll.u32 %v3628_v17, 16 }
 0x1d2   :  { %3022 = vst [vmem:[%s3793_s3 + $0x98] sm:$0xff] %v2916_v55   ;;  %v1111_v0 = vadd.f32 %v1110_v49, %v830_v54  ;;  %v1572_v54 = vrot.slane %v3628_v17, 1  ;;  %v557_v58 = vor.u32 %v555_v26, %v553_v28 }
 0x1d3   :  { %v2019_v4 = vadd.f32 %v3475_v15, %v1941_v60  ;;  %v561_v59 = vrot.slane %v559_v53, 1 }
 0x1d4   :  { %v1573_v63 = vsel %vm1508_vm0, %v1570_v24, %v1572_v54 }
 0x1d5   :  { %v1818_v35 = vpop.f32.mrf.mxu3  ;;  %v2167_v8 = vmul.f32 0.2, %v2019_v4  ;;  %vm2093_vm4 = vcmp.gt.f32.partialorder %v2019_v4, 0.0 }
 0x1d6   :  { %v1113_v40 = vpop.f32.mrf.mxu1  ;;  %v1346_v2 = vpop.f32.mrf.mxu2 }
 0x1d7   :  { %v1470_v39 = vadd.f32 %v1346_v2, %v1111_v0  ;;  %v2241_v16 = vsel %vm2093_vm4, %v2019_v4, %v2167_v8  ;;  %v3648_v8 = vld [vmem:[%s3791_s0 + $0x110] sm:$0xff] }
 0x1d9   :  { %v833_v44 = vpop.f32.mrf.mxu0  ;;  %2663 = vmatmul.msk.bf16.gmra.mxu1 %vm607_vm1, %v3548_v30  ;;  %v1942_v7 = vadd.f32 %v1818_v35, %v1470_v39 }
 0x1da   :  { %2761 = vmatmul.msk.bf16.gmra.mxu3 %vm607_vm1, %v1569_v3  ;;  %v1114_v10 = vadd.f32 %v1113_v40, %v833_v44  ;;  %v562_v3 = vsel %vm294_vm2, %v557_v58, %v561_v59 }
 0x1db   :  { %v2020_v48 = vadd.f32 %v3475_v15, %v1942_v7  ;;  %2712 = vmatmul.msk.bf16.gmra.mxu2 %vm607_vm1, %v546_v6 }
 0x1dc   :  { %2618 = vmatmul.msk.bf16.gmra.mxu0 %vm607_vm1, %v538_v42 }
 0x1dd   :  { %v1821_v11 = vpop.f32.mrf.mxu3  ;;  %vm2094_vm5 = vcmp.gt.f32.partialorder %v2020_v48, 0.0  ;;  %v2168_v30 = vmul.f32 0.2, %v2020_v48 }
 0x1de   :  { %v1115_v52 = vpop.f32.mrf.mxu1  ;;  %v1349_v14 = vpop.f32.mrf.mxu2 }
 0x1df   :  { %v2242_v57 = vsel %vm2094_vm5, %v2020_v48, %v2168_v30  ;;  %v1471_v19 = vadd.f32 %v1349_v14, %v1114_v10 }
 0x1e0   :  { %v2921_v21 = vpack.c.bf16 %v2242_v57, %v2241_v16  ;;  %v563_v57 = vshrl.u32 %v3628_v17, 16 }
 0x1e1   :  { %v835_v20 = vpop.f32.mrf.mxu0  ;;  %v1943_v25 = vadd.f32 %v1821_v11, %v1471_v19  ;;  %v567_v19 = vshll.u32 %v3648_v8, 16 }
 0x1e2   :  { %3023 = vst [vmem:[%s3793_s3 + $0xa0] sm:$0xff] %v2921_v21   ;;  %v1116_v29 = vadd.f32 %v1115_v52, %v835_v20  ;;  %v1574_v20 = vrot.slane %v3648_v8, 1  ;;  %v565_v23 = vor.u32 %v563_v57, %v561_v59 }
 0x1e3   :  { %v2021_v34 = vadd.f32 %v3475_v15, %v1943_v25  ;;  %v569_v24 = vrot.slane %v567_v19, 1 }
 0x1e4   :  { %v1575_v28 = vsel %vm1508_vm0, %v1572_v54, %v1574_v20 }
 0x1e5   :  { %v1823_v1 = vpop.f32.mrf.mxu3  ;;  %v2169_v13 = vmul.f32 0.2, %v2021_v34  ;;  %vm2095_vm6 = vcmp.gt.f32.partialorder %v2021_v34, 0.0 }
 0x1e6   :  { %v1118_v5 = vpop.f32.mrf.mxu1  ;;  %v1351_v32 = vpop.f32.mrf.mxu2 }
 0x1e7   :  { %v1472_v9 = vadd.f32 %v1351_v32, %v1116_v29  ;;  %v2243_v47 = vsel %vm2095_vm6, %v2021_v34, %v2169_v13  ;;  %v3668_v13 = vld [vmem:[%s3791_s0 + $0x118] sm:$0xff] }
 0x1e9   :  { %v838_v36 = vpop.f32.mrf.mxu0  ;;  %2664 = vmatmul.msk.bf16.gmra.mxu1 %vm607_vm1, %v3568_v56  ;;  %v1944_v38 = vadd.f32 %v1823_v1, %v1472_v9 }
 0x1ea   :  { %2762 = vmatmul.msk.bf16.gmra.mxu3 %vm607_vm1, %v1571_v33  ;;  %v1119_v42 = vadd.f32 %v1118_v5, %v838_v36  ;;  %v570_v33 = vsel %vm294_vm2, %v565_v23, %v569_v24 }
 0x1eb   :  { %v2022_v41 = vadd.f32 %v3475_v15, %v1944_v38  ;;  %2713 = vmatmul.msk.bf16.gmra.mxu2 %vm607_vm1, %v554_v37 }
 0x1ec   :  { %2619 = vmatmul.msk.bf16.gmra.mxu0 %vm607_vm1, %v546_v6 }
 0x1ed   :  { %v1826_v43 = vpop.f32.mrf.mxu3  ;;  %vm2096_vm7 = vcmp.gt.f32.partialorder %v2022_v41, 0.0  ;;  %v2170_v56 = vmul.f32 0.2, %v2022_v41 }
 0x1ee   :  { %v1120_v45 = vpop.f32.mrf.mxu1  ;;  %v1354_v46 = vpop.f32.mrf.mxu2 }
 0x1ef   :  { %v2244_v18 = vsel %vm2096_vm7, %v2022_v41, %v2170_v56  ;;  %v1473_v49 = vadd.f32 %v1354_v46, %v1119_v42 }
 0x1f0   :  { %v2926_v51 = vpack.c.bf16 %v2244_v18, %v2243_v47  ;;  %v571_v18 = vshrl.u32 %v3648_v8, 16 }
 0x1f1   :  { %v840_v50 = vpop.f32.mrf.mxu0  ;;  %v1945_v55 = vadd.f32 %v1826_v43, %v1473_v49  ;;  %v575_v49 = vshll.u32 %v3668_v13, 16 }
 0x1f2   :  { %3024 = vst [vmem:[%s3793_s3 + $0xa8] sm:$0xff] %v2926_v51   ;;  %v1121_v60 = vadd.f32 %v1120_v45, %v840_v50  ;;  %v1576_v50 = vrot.slane %v3668_v13, 1  ;;  %v573_v53 = vor.u32 %v571_v18, %v569_v24 }
 0x1f3   :  { %v2023_v0 = vadd.f32 %v3475_v15, %v1945_v55  ;;  %v577_v54 = vrot.slane %v575_v49, 1 }
 0x1f4   :  { %v1577_v59 = vsel %vm1508_vm0, %v1574_v20, %v1576_v50 }
 0x1f5   :  { %v1828_v31 = vpop.f32.mrf.mxu3  ;;  %v2171_v39 = vmul.f32 0.2, %v2023_v0  ;;  %vm2097_vm8 = vcmp.gt.f32.partialorder %v2023_v0, 0.0 }
 0x1f6   :  { %v1123_v35 = vpop.f32.mrf.mxu1  ;;  %v1356_v62 = vpop.f32.mrf.mxu2 }
 0x1f7   :  { %v1474_v40 = vadd.f32 %v1356_v62, %v1121_v60  ;;  %v2245_v11 = vsel %vm2097_vm8, %v2023_v0, %v2171_v39  ;;  %v3688_v39 = vld [vmem:[%s3791_s0 + $0x120] sm:$0xff] }
 0x1f9   :  { %v843_v2 = vpop.f32.mrf.mxu0  ;;  %2665 = vmatmul.msk.bf16.gmra.mxu1 %vm607_vm1, %v3588_v22  ;;  %v1946_v4 = vadd.f32 %v1828_v31, %v1474_v40 }
 0x1fa   :  { %2763 = vmatmul.msk.bf16.gmra.mxu3 %vm607_vm1, %v1573_v63  ;;  %v1124_v6 = vadd.f32 %v1123_v35, %v843_v2  ;;  %v578_v63 = vsel %vm294_vm2, %v573_v53, %v577_v54  ;;  %v96_v53 = vld [vmem:[%s3791_s0 + $0x130] sm:$0xf] }
 0x1fb   :  { %v2024_v44 = vadd.f32 %v3475_v15, %v1946_v4  ;;  %2714 = vmatmul.msk.bf16.gmra.mxu2 %vm607_vm1, %v562_v3 }
 0x1fc   :  { %2620 = vmatmul.msk.bf16.gmra.mxu0 %vm607_vm1, %v554_v37 }
 0x1fd   :  { %v1831_v7 = vpop.f32.mrf.mxu3  ;;  %vm2098_vm9 = vcmp.gt.f32.partialorder %v2024_v44, 0.0  ;;  %v2172_v22 = vmul.f32 0.2, %v2024_v44 }
 0x1fe   :  { %v1125_v48 = vpop.f32.mrf.mxu1  ;;  %v1359_v10 = vpop.f32.mrf.mxu2 }
 0x1ff   :  { %v2246_v30 = vsel %vm2098_vm9, %v2024_v44, %v2172_v22  ;;  %v1475_v52 = vadd.f32 %v1359_v10, %v1124_v6 }
 0x200   :  { %v2931_v16 = vpack.c.bf16 %v2246_v30, %v2245_v11  ;;  %v579_v30 = vshrl.u32 %v3668_v13, 16 }
 0x201   :  { %v845_v14 = vpop.f32.mrf.mxu0  ;;  %v1947_v21 = vadd.f32 %v1831_v7, %v1475_v52  ;;  %v583_v52 = vshll.u32 %v3688_v39, 16 }
 0x202   :  { %3025 = vst [vmem:[%s3793_s3 + $0xb0] sm:$0xff] %v2931_v16   ;;  %v1126_v25 = vadd.f32 %v1125_v48, %v845_v14  ;;  %v1578_v14 = vrot.slane %v3688_v39, 1  ;;  %v581_v19 = vor.u32 %v579_v30, %v577_v54 }
 0x203   :  { %v2025_v29 = vadd.f32 %v3475_v15, %v1947_v21  ;;  %v585_v20 = vrot.slane %v583_v52, 1 }
 0x204   :  { %v1579_v24 = vsel %vm1508_vm0, %v1576_v50, %v1578_v14 }
 0x205   :  { %v1833_v61 = vpop.f32.mrf.mxu3  ;;  %v2173_v9 = vmul.f32 0.2, %v2025_v29  ;;  %vm2099_vm10 = vcmp.gt.f32.partialorder %v2025_v29, 0.0 }
 0x206   :  { %v1128_v1 = vpop.f32.mrf.mxu1  ;;  %v1361_v27 = vpop.f32.mrf.mxu2 }
 0x207   :  { %v1476_v5 = vadd.f32 %v1361_v27, %v1126_v25  ;;  %v2247_v43 = vsel %vm2099_vm10, %v2025_v29, %v2173_v9 }
 0x209   :  { %v848_v32 = vpop.f32.mrf.mxu0  ;;  %2666 = vmatmul.msk.bf16.gmra.mxu1 %vm607_vm1, %v3608_v12  ;;  %v1948_v34 = vadd.f32 %v1833_v61, %v1476_v5 }
 0x20a   :  { %2764 = vmatmul.msk.bf16.gmra.mxu3 %vm607_vm1, %v1575_v28  ;;  %v1129_v37 = vadd.f32 %v1128_v1, %v848_v32  ;;  %v586_v28 = vsel %vm294_vm2, %v581_v19, %v585_v20 }
 0x20b   :  { %v2026_v36 = vadd.f32 %v3475_v15, %v1948_v34  ;;  %2715 = vmatmul.msk.bf16.gmra.mxu2 %vm607_vm1, %v570_v33 }
 0x20c   :  { %2621 = vmatmul.msk.bf16.gmra.mxu0 %vm607_vm1, %v562_v3 }
 0x20d   :  { %v1836_v38 = vpop.f32.mrf.mxu3  ;;  %vm2100_vm11 = vcmp.gt.f32.partialorder %v2026_v36, 0.0  ;;  %v2174_v12 = vmul.f32 0.2, %v2026_v36 }
 0x20e   :  { %v1130_v41 = vpop.f32.mrf.mxu1  ;;  %v1364_v42 = vpop.f32.mrf.mxu2 }
 0x20f   :  { %v2248_v56 = vsel %vm2100_vm11, %v2026_v36, %v2174_v12  ;;  %v1477_v45 = vadd.f32 %v1364_v42, %v1129_v37 }
 0x210   :  { %v2936_v47 = vpack.c.bf16 %v2248_v56, %v2247_v43  ;;  %v587_v56 = vshrl.u32 %v3688_v39, 16 }
 0x211   :  { %v850_v46 = vpop.f32.mrf.mxu0  ;;  %v1949_v51 = vadd.f32 %v1836_v38, %v1477_v45 }
 0x212   :  { %3026 = vst [vmem:[%s3793_s3 + $0xb8] sm:$0xff] %v2936_v47   ;;  %v1131_v55 = vadd.f32 %v1130_v41, %v850_v46  ;;  %v589_v49 = vor.u32 %v587_v56, %v585_v20 }
 0x213   :  { %v2027_v60 = vadd.f32 %v3475_v15, %v1949_v51 }
 0x215   :  { %v1838_v26 = vpop.f32.mrf.mxu3  ;;  %v2175_v40 = vmul.f32 0.2, %v2027_v60  ;;  %vm2101_vm12 = vcmp.gt.f32.partialorder %v2027_v60, 0.0 }
 0x216   :  { %v1133_v31 = vpop.f32.mrf.mxu1  ;;  %v1366_v58 = vpop.f32.mrf.mxu2 }
 0x217   :  { %v1478_v35 = vadd.f32 %v1366_v58, %v1131_v55  ;;  %v2249_v7 = vsel %vm2101_vm12, %v2027_v60, %v2175_v40 }
 0x219   :  { %v853_v62 = vpop.f32.mrf.mxu0  ;;  %2667 = vmatmul.msk.bf16.gmra.mxu1 %vm607_vm1, %v3628_v17  ;;  %v1950_v0 = vadd.f32 %v1838_v26, %v1478_v35 }
 0x21a   :  { %2765 = vmatmul.msk.bf16.gmra.mxu3 %vm607_vm1, %v1577_v59  ;;  %v1134_v3 = vadd.f32 %v1133_v31, %v853_v62  ;;  %v1201_v62 = vunpack.c.l.b16 %v96_v53 }
 0x21b   :  { %v2028_v2 = vadd.f32 %v3475_v15, %v1950_v0  ;;  %2716 = vmatmul.msk.bf16.gmra.mxu2 %vm607_vm1, %v578_v63 }
 0x21c   :  { %2622 = vmatmul.msk.bf16.gmra.mxu0 %vm607_vm1, %v570_v33 }
 0x21d   :  { %v1841_v4 = vpop.f32.mrf.mxu3  ;;  %vm2102_vm13 = vcmp.gt.f32.partialorder %v2028_v2, 0.0  ;;  %v2176_v17 = vmul.f32 0.2, %v2028_v2 }
 0x21e   :  { %v1135_v44 = vpop.f32.mrf.mxu1  ;;  %v1369_v6 = vpop.f32.mrf.mxu2 }
 0x21f   :  { %v2250_v22 = vsel %vm2102_vm13, %v2028_v2, %v2176_v17  ;;  %v1479_v48 = vadd.f32 %v1369_v6, %v1134_v3  ;;  %v1203_v17 = vpack.c.b16 %v1201_v62, %v1201_v62 }
 0x220   :  { %v2941_v11 = vpack.c.bf16 %v2250_v22, %v2249_v7 }
 0x221   :  { %v855_v10 = vpop.f32.mrf.mxu0  ;;  %v1951_v16 = vadd.f32 %v1841_v4, %v1479_v48 }
 0x222   :  { %3027 = vst [vmem:[%s3793_s3 + $0xc0] sm:$0xff] %v2941_v11   ;;  %v1136_v21 = vadd.f32 %v1135_v44, %v855_v10 }
 0x223   :  { %v2029_v25 = vadd.f32 %v3475_v15, %v1951_v16  ;;  %v1582_v16 = vrot.slane %v1203_v17, 1 }
 0x225   :  { %v1843_v57 = vpop.f32.mrf.mxu3  ;;  %v2177_v5 = vmul.f32 0.2, %v2029_v25  ;;  %vm2103_vm14 = vcmp.gt.f32.partialorder %v2029_v25, 0.0 }
 0x226   :  { %v1138_v61 = vpop.f32.mrf.mxu1  ;;  %v1371_v23 = vpop.f32.mrf.mxu2 }
 0x227   :  { %v1480_v1 = vadd.f32 %v1371_v23, %v1136_v21  ;;  %v2251_v38 = vsel %vm2103_vm14, %v2029_v25, %v2177_v5 }
 0x229   :  { %v858_v27 = vpop.f32.mrf.mxu0  ;;  %2668 = vmatmul.msk.bf16.gmra.mxu1 %vm607_vm1, %v3648_v8  ;;  %v1952_v29 = vadd.f32 %v1843_v57, %v1480_v1  ;;  %v3003_v8 = vld [vmem:[%s3791_s0 + $0x128] sm:$0xff]  }
 0x22a   :  { %2766 = vmatmul.msk.bf16.gmra.mxu3 %vm607_vm1, %v1579_v24  ;;  %v1139_v33 = vadd.f32 %v1138_v61, %v858_v27  ;;  %v1205_v45 = vshll.u32 %v3003_v8, 16  ;;  %v1580_v46 = vrot.slane %v3003_v8, 1  ;;  %v2816_v60 = vunpack.c.l.b16 %v3003_v8 }
 0x22b   :  { %v2030_v32 = vadd.f32 %v3475_v15, %v1952_v29  ;;  %2717 = vmatmul.msk.bf16.gmra.mxu2 %vm607_vm1, %v586_v28  ;;  %v1209_v52 = vshrl.u32 %v3003_v8, 16 }
 0x22c   :  { %2623 = vmatmul.msk.bf16.gmra.mxu0 %vm607_vm1, %v578_v63  ;;  %v1207_v50 = vrot.slane %v1205_v45, 1  ;;  %v1581_v55 = vsel %vm1508_vm0, %v1578_v14, %v1580_v46  ;;  %v293_v3 = vpack.c.b16 %v2816_v60, %v2816_v60  ;;  %v1213_v14 = vshll.u32 %v1203_v17, 16 }
 0x22d   :  { %v1846_v34 = vpop.f32.mrf.mxu3  ;;  %vm2104_vm15 = vcmp.gt.f32.partialorder %v2030_v32, 0.0  ;;  %v2178_v9 = vmul.f32 0.2, %v2030_v32  ;;  %v1583_v1 = vsel %vm1508_vm0, %v1580_v46, %v1582_v16 }
 0x22e   :  { %v1140_v36 = vpop.f32.mrf.mxu1  ;;  %v1374_v37 = vpop.f32.mrf.mxu2  ;;  %v1208_v35 = vsel %vm294_vm2, %v589_v49, %v1207_v50  ;;  %v591_v11 = vshll.u32 %v293_v3, 16  ;;  %v1211_v21 = vor.u32 %v1209_v52, %v1207_v50  ;;  %v1215_v61 = vrot.slane %v1213_v14, 1 }
 0x22f   :  { %v2252_v12 = vsel %vm2104_vm15, %v2030_v32, %v2178_v9  ;;  %v1481_v41 = vadd.f32 %v1374_v37, %v1139_v33 }
 0x230   :  { %v2946_v43 = vpack.c.bf16 %v2252_v12, %v2251_v38  ;;  %v593_v19 = vrot.slane %v591_v11, 1  ;;  %v1216_v32 = vsel %vm294_vm2, %v1211_v21, %v1215_v61 }
 0x231   :  { %v860_v42 = vpop.f32.mrf.mxu0  ;;  %v1953_v47 = vadd.f32 %v1846_v34, %v1481_v41 }
 0x232   :  { %3028 = vst [vmem:[%s3793_s3 + $0xc8] sm:$0xff] %v2946_v43   ;;  %v1141_v51 = vadd.f32 %v1140_v36, %v860_v42  ;;  %v594_v5 = vsel %vm294_vm2, %v589_v49, %v593_v19 }
 0x233   :  { %v2031_v31 = vadd.f32 %v3475_v15, %v1953_v47 }
 0x235   :  { %v1848_v18 = vpop.f32.mrf.mxu3  ;;  %v2179_v0 = vmul.f32 0.2, %v2031_v31  ;;  %vm2105_vm3 = vcmp.gt.f32.partialorder %v2031_v31, 0.0 }
 0x236   :  { %v1143_v26 = vpop.f32.mrf.mxu1  ;;  %v1376_v54 = vpop.f32.mrf.mxu2 }
 0x237   :  { %v1482_v58 = vadd.f32 %v1376_v54, %v1141_v51  ;;  %v2253_v7 = vsel %vm2105_vm3, %v2031_v31, %v2179_v0 }
 0x239   :  { %v863_v59 = vpop.f32.mrf.mxu0  ;;  %2669 = vmatmul.msk.bf16.gmra.mxu1 %vm607_vm1, %v3668_v13  ;;  %v1954_v63 = vadd.f32 %v1848_v18, %v1482_v58 }
 0x23a   :  { %2767 = vmatmul.msk.bf16.gmra.mxu3 %vm607_vm1, %v1581_v55  ;;  %v1144_v2 = vadd.f32 %v1143_v26, %v863_v59 }
 0x23b   :  { %v2032_v40 = vadd.f32 %v3475_v15, %v1954_v63  ;;  %2718 = vmatmul.msk.bf16.gmra.mxu2 %vm607_vm1, %v1208_v35 }
 0x23c   :  { %2624 = vmatmul.msk.bf16.gmra.mxu0 %vm607_vm1, %v586_v28 }
 0x23d   :  { %v1851_v4 = vpop.f32.mrf.mxu3  ;;  %vm2106_vm4 = vcmp.gt.f32.partialorder %v2032_v40, 0.0  ;;  %v2180_v13 = vmul.f32 0.2, %v2032_v40 }
 0x23e   :  { %v1145_v44 = vpop.f32.mrf.mxu1  ;;  %v1379_v6 = vpop.f32.mrf.mxu2 }
 0x23f   :  { %v2254_v22 = vsel %vm2106_vm4, %v2032_v40, %v2180_v13  ;;  %v1483_v48 = vadd.f32 %v1379_v6, %v1144_v2 }
 0x240   :  { %v2951_v30 = vpack.c.bf16 %v2254_v22, %v2253_v7 }
 0x241   :  { %v865_v10 = vpop.f32.mrf.mxu0  ;;  %v1955_v57 = vadd.f32 %v1851_v4, %v1483_v48 }
 0x242   :  { %3029 = vst [vmem:[%s3793_s3 + $0xd0] sm:$0xff] %v2951_v30   ;;  %v1146_v23 = vadd.f32 %v1145_v44, %v865_v10  ;;  %v3748_v44 = vld [vmem:[%s3792_s2] ss:$0 sm:$0xff] }
 0x243   :  { %v2033_v27 = vadd.f32 %v3475_v15, %v1955_v57 }
 0x245   :  { %v1853_v20 = vpop.f32.mrf.mxu3  ;;  %v2181_v34 = vmul.f32 0.2, %v2033_v27  ;;  %vm2107_vm0 = vcmp.gt.f32.partialorder %v2033_v27, 0.0 }
 0x246   :  { %v1148_v24 = vpop.f32.mrf.mxu1  ;;  %v1381_v25 = vpop.f32.mrf.mxu2 }
 0x247   :  { %v1484_v28 = vadd.f32 %v1381_v25, %v1146_v23 }
 0x249   :  { %v868_v29 = vpop.f32.mrf.mxu0  ;;  %2670 = vmatmul.msk.bf16.gmra.mxu1 %vm607_vm1, %v3688_v39  ;;  %v1956_v33 = vadd.f32 %v1853_v20, %v1484_v28  ;;  %v2255_v39 = vsel %vm2107_vm0, %v2033_v27, %v2181_v34 }
 0x24a   :  { %2768 = vmatmul.msk.bf16.gmra.mxu3 %vm607_vm1, %v1583_v1  ;;  %v1149_v36 = vadd.f32 %v1148_v24, %v868_v29 }
 0x24b   :  { %v2034_v9 = vadd.f32 %v3475_v15, %v1956_v33  ;;  %2719 = vmatmul.msk.bf16.gmra.mxu2 %vm607_vm1, %v1216_v32 }
 0x24c   :  { %2625 = vmatmul.msk.bf16.gmra.mxu0 %vm607_vm1, %v594_v5 }
 0x24d   :  { %v1856_v8 = vpop.f32.mrf.mxu3  ;;  %vm2108_vm5 = vcmp.gt.f32.partialorder %v2034_v9, 0.0  ;;  %v2182_v37 = vmul.f32 0.2, %v2034_v9 }
 0x24e   :  { %v1150_v38 = vpop.f32.mrf.mxu1  ;;  %v1384_v12 = vpop.f32.mrf.mxu2 }
 0x24f   :  { %v2256_v41 = vsel %vm2108_vm5, %v2034_v9, %v2182_v37  ;;  %v1485_v42 = vadd.f32 %v1384_v12, %v1149_v36 }
 0x250   :  { %v2956_v56 = vpack.c.bf16 %v2256_v41, %v2255_v39 }
 0x251   :  { %v870_v43 = vpop.f32.mrf.mxu0  ;;  %v1957_v45 = vadd.f32 %v1856_v8, %v1485_v42 }
 0x252   :  { %3030 = vst [vmem:[%s3793_s3 + $0xd8] sm:$0xff] %v2956_v56   ;;  %v1151_v47 = vadd.f32 %v1150_v38, %v870_v43 }
 0x253   :  { %v2035_v50 = vadd.f32 %v3475_v15, %v1957_v45 }
 0x255   :  { %v1858_v46 = vpop.f32.mrf.mxu3  ;;  %v2183_v54 = vmul.f32 0.2, %v2035_v50  ;;  %vm2109_vm1 = vcmp.gt.f32.partialorder %v2035_v50, 0.0 }
 0x256   :  { %v1153_v18 = vpop.f32.mrf.mxu1  ;;  %v1386_v49 = vpop.f32.mrf.mxu2 }
 0x257   :  { %v1486_v51 = vadd.f32 %v1386_v49, %v1151_v47  ;;  %v2257_v62 = vsel %vm2109_vm1, %v2035_v50, %v2183_v54 }
 0x259   :  { %v873_v26 = vpop.f32.mrf.mxu0  ;;  %v1958_v53 = vadd.f32 %v1858_v46, %v1486_v51 }
 0x25a   :  { %v1154_v31 = vadd.f32 %v1153_v18, %v873_v26 }
 0x25b   :  { %v2036_v55 = vadd.f32 %v3475_v15, %v1958_v53 }
 0x25d   :  { %v1861_v58 = vpop.f32.mrf.mxu3  ;;  %vm2110_vm2 = vcmp.gt.f32.partialorder %v2036_v55, 0.0  ;;  %v2184_v59 = vmul.f32 0.2, %v2036_v55 }
 0x25e   :  { %v1155_v60 = vpop.f32.mrf.mxu1  ;;  %v1389_v35 = vpop.f32.mrf.mxu2 }
 0x25f   :  { %v2258_v63 = vsel %vm2110_vm2, %v2036_v55, %v2184_v59  ;;  %v1487_v0 = vadd.f32 %v1389_v35, %v1154_v31 }
 0x260   :  { %v2961_v2 = vpack.c.bf16 %v2258_v63, %v2257_v62 }
 0x261   :  { %v875_v40 = vpop.f32.mrf.mxu0  ;;  %v1959_v3 = vadd.f32 %v1861_v58, %v1487_v0 }
 0x262   :  { %3031 = vst [vmem:[%s3793_s3 + $0xe0] sm:$0xff] %v2961_v2   ;;  %v1156_v17 = vadd.f32 %v1155_v60, %v875_v40 }
 0x263   :  { %v2037_v6 = vadd.f32 %v3748_v44, %v1959_v3 }
 0x265   :  { %v1863_v4 = vpop.f32.mrf.mxu3  ;;  %v2185_v10 = vmul.f32 0.2, %v2037_v6  ;;  %vm2111_vm6 = vcmp.gt.f32.partialorder %v2037_v6, 0.0 }
 0x266   :  { %v1158_v15 = vpop.f32.mrf.mxu1  ;;  %v1391_v13 = vpop.f32.mrf.mxu2 }
 0x267   :  { %v1488_v7 = vadd.f32 %v1391_v13, %v1156_v17  ;;  %v2259_v19 = vsel %vm2111_vm6, %v2037_v6, %v2185_v10 }
 0x269   :  { %v878_v22 = vpop.f32.mrf.mxu0  ;;  %v1960_v48 = vadd.f32 %v1863_v4, %v1488_v7 }
 0x26a   :  { %v1159_v30 = vadd.f32 %v1158_v15, %v878_v22 }
 0x26b   :  { %v2038_v11 = vadd.f32 %v3748_v44, %v1960_v48 }
 0x26d   :  { %v1866_v52 = vpop.f32.mrf.mxu3  ;;  %vm2112_vm7 = vcmp.gt.f32.partialorder %v2038_v11, 0.0  ;;  %v2186_v14 = vmul.f32 0.2, %v2038_v11 }
 0x26e   :  { %v1160_v16 = vpop.f32.mrf.mxu1  ;;  %v1394_v57 = vpop.f32.mrf.mxu2 }
 0x26f   :  { %v2260_v20 = vsel %vm2112_vm7, %v2038_v11, %v2186_v14  ;;  %v1489_v21 = vadd.f32 %v1394_v57, %v1159_v30 }
 0x270   :  { %v2966_v23 = vpack.c.bf16 %v2260_v20, %v2259_v19 }
 0x271   :  { %v880_v61 = vpop.f32.mrf.mxu0  ;;  %v1961_v24 = vadd.f32 %v1866_v52, %v1489_v21 }
 0x272   :  { %3032 = vst [vmem:[%s3793_s3 + $0xe8] sm:$0xff] %v2966_v23   ;;  %v1161_v1 = vadd.f32 %v1160_v16, %v880_v61 }
 0x273   :  { %v2039_v29 = vadd.f32 %v3748_v44, %v1961_v24 }
 0x275   :  { %v1868_v25 = vpop.f32.mrf.mxu3  ;;  %v2187_v34 = vmul.f32 0.2, %v2039_v29  ;;  %vm2113_vm8 = vcmp.gt.f32.partialorder %v2039_v29, 0.0 }
 0x276   :  { %v1163_v27 = vpop.f32.mrf.mxu1  ;;  %v1396_v28 = vpop.f32.mrf.mxu2 }
 0x277   :  { %v1490_v5 = vadd.f32 %v1396_v28, %v1161_v1  ;;  %v2261_v39 = vsel %vm2113_vm8, %v2039_v29, %v2187_v34 }
 0x279   :  { %v883_v32 = vpop.f32.mrf.mxu0  ;;  %v1962_v33 = vadd.f32 %v1868_v25, %v1490_v5 }
 0x27a   :  { %v1164_v36 = vadd.f32 %v1163_v27, %v883_v32 }
 0x27b   :  { %v2040_v9 = vadd.f32 %v3748_v44, %v1962_v33 }
 0x27d   :  { %v1871_v8 = vpop.f32.mrf.mxu3  ;;  %vm2114_vm9 = vcmp.gt.f32.partialorder %v2040_v9, 0.0  ;;  %v2188_v37 = vmul.f32 0.2, %v2040_v9 }
 0x27e   :  { %v1165_v38 = vpop.f32.mrf.mxu1  ;;  %v1399_v12 = vpop.f32.mrf.mxu2 }
 0x27f   :  { %v2262_v41 = vsel %vm2114_vm9, %v2040_v9, %v2188_v37  ;;  %v1491_v42 = vadd.f32 %v1399_v12, %v1164_v36 }
 0x280   :  { %v2971_v56 = vpack.c.bf16 %v2262_v41, %v2261_v39 }
 0x281   :  { %v885_v43 = vpop.f32.mrf.mxu0  ;;  %v1963_v45 = vadd.f32 %v1871_v8, %v1491_v42 }
 0x282   :  { %3033 = vst [vmem:[%s3793_s3 + $0xf0] sm:$0xff] %v2971_v56   ;;  %v1166_v47 = vadd.f32 %v1165_v38, %v885_v43 }
 0x283   :  { %v2041_v50 = vadd.f32 %v3748_v44, %v1963_v45 }
 0x285   :  { %v1873_v46 = vpop.f32.mrf.mxu3  ;;  %v2189_v54 = vmul.f32 0.2, %v2041_v50  ;;  %vm2115_vm10 = vcmp.gt.f32.partialorder %v2041_v50, 0.0 }
 0x286   :  { %v1168_v18 = vpop.f32.mrf.mxu1  ;;  %v1401_v49 = vpop.f32.mrf.mxu2 }
 0x287   :  { %v1492_v51 = vadd.f32 %v1401_v49, %v1166_v47  ;;  %v2263_v62 = vsel %vm2115_vm10, %v2041_v50, %v2189_v54 }
 0x289   :  { %v888_v26 = vpop.f32.mrf.mxu0  ;;  %v1964_v53 = vadd.f32 %v1873_v46, %v1492_v51 }
 0x28a   :  { %v1169_v31 = vadd.f32 %v1168_v18, %v888_v26 }
 0x28b   :  { %v2042_v55 = vadd.f32 %v3748_v44, %v1964_v53 }
 0x28d   :  { %v1876_v58 = vpop.f32.mrf.mxu3  ;;  %vm2116_vm11 = vcmp.gt.f32.partialorder %v2042_v55, 0.0  ;;  %v2190_v59 = vmul.f32 0.2, %v2042_v55 }
 0x28e   :  { %v1170_v60 = vpop.f32.mrf.mxu1  ;;  %v1404_v35 = vpop.f32.mrf.mxu2 }
 0x28f   :  { %v2264_v63 = vsel %vm2116_vm11, %v2042_v55, %v2190_v59  ;;  %v1493_v0 = vadd.f32 %v1404_v35, %v1169_v31 }
 0x290   :  { %v2976_v2 = vpack.c.bf16 %v2264_v63, %v2263_v62 }
 0x291   :  { %v890_v40 = vpop.f32.mrf.mxu0  ;;  %v1965_v3 = vadd.f32 %v1876_v58, %v1493_v0 }
 0x292   :  { %3034 = vst [vmem:[%s3793_s3 + $0xf8] sm:$0xff] %v2976_v2   ;;  %v1171_v17 = vadd.f32 %v1170_v60, %v890_v40 }
 0x293   :  { %v2043_v6 = vadd.f32 %v3748_v44, %v1965_v3 }
 0x295   :  { %v1878_v4 = vpop.f32.mrf.mxu3  ;;  %v2191_v10 = vmul.f32 0.2, %v2043_v6  ;;  %vm2117_vm12 = vcmp.gt.f32.partialorder %v2043_v6, 0.0 }
 0x296   :  { %v1173_v15 = vpop.f32.mrf.mxu1  ;;  %v1406_v13 = vpop.f32.mrf.mxu2 }
 0x297   :  { %v1494_v7 = vadd.f32 %v1406_v13, %v1171_v17  ;;  %v2265_v19 = vsel %vm2117_vm12, %v2043_v6, %v2191_v10 }
 0x299   :  { %v893_v22 = vpop.f32.mrf.mxu0  ;;  %v1966_v48 = vadd.f32 %v1878_v4, %v1494_v7 }
 0x29a   :  { %v1174_v30 = vadd.f32 %v1173_v15, %v893_v22 }
 0x29b   :  { %v2044_v11 = vadd.f32 %v3748_v44, %v1966_v48 }
 0x29d   :  { %v1881_v52 = vpop.f32.mrf.mxu3  ;;  %vm2118_vm13 = vcmp.gt.f32.partialorder %v2044_v11, 0.0  ;;  %v2192_v14 = vmul.f32 0.2, %v2044_v11 }
 0x29e   :  { %v1175_v16 = vpop.f32.mrf.mxu1  ;;  %v1409_v57 = vpop.f32.mrf.mxu2 }
 0x29f   :  { %v2266_v20 = vsel %vm2118_vm13, %v2044_v11, %v2192_v14  ;;  %v1495_v21 = vadd.f32 %v1409_v57, %v1174_v30 }
 0x2a0   :  { %v2981_v23 = vpack.c.bf16 %v2266_v20, %v2265_v19 }
 0x2a1   :  { %v895_v61 = vpop.f32.mrf.mxu0  ;;  %v1967_v24 = vadd.f32 %v1881_v52, %v1495_v21 }
 0x2a2   :  { %3035 = vst [vmem:[%s3793_s3 + $0x100] sm:$0xff] %v2981_v23   ;;  %v1176_v1 = vadd.f32 %v1175_v16, %v895_v61 }
 0x2a3   :  { %v2045_v29 = vadd.f32 %v3748_v44, %v1967_v24 }
 0x2a5   :  { %v1883_v25 = vpop.f32.mrf.mxu3  ;;  %v2193_v34 = vmul.f32 0.2, %v2045_v29  ;;  %vm2119_vm14 = vcmp.gt.f32.partialorder %v2045_v29, 0.0 }
 0x2a6   :  { %v1178_v27 = vpop.f32.mrf.mxu1  ;;  %v1411_v28 = vpop.f32.mrf.mxu2 }
 0x2a7   :  { %v1496_v5 = vadd.f32 %v1411_v28, %v1176_v1  ;;  %v2267_v39 = vsel %vm2119_vm14, %v2045_v29, %v2193_v34 }
 0x2a9   :  { %v898_v32 = vpop.f32.mrf.mxu0  ;;  %v1968_v33 = vadd.f32 %v1883_v25, %v1496_v5 }
 0x2aa   :  { %v1179_v36 = vadd.f32 %v1178_v27, %v898_v32 }
 0x2ab   :  { %v2046_v9 = vadd.f32 %v3748_v44, %v1968_v33 }
 0x2ad   :  { %v1886_v8 = vpop.f32.mrf.mxu3  ;;  %vm2120_vm15 = vcmp.gt.f32.partialorder %v2046_v9, 0.0  ;;  %v2194_v37 = vmul.f32 0.2, %v2046_v9 }
 0x2ae   :  { %v1180_v38 = vpop.f32.mrf.mxu1  ;;  %v1414_v12 = vpop.f32.mrf.mxu2 }
 0x2af   :  { %v2268_v41 = vsel %vm2120_vm15, %v2046_v9, %v2194_v37  ;;  %v1497_v42 = vadd.f32 %v1414_v12, %v1179_v36 }
 0x2b0   :  { %v2986_v56 = vpack.c.bf16 %v2268_v41, %v2267_v39 }
 0x2b1   :  { %v900_v43 = vpop.f32.mrf.mxu0  ;;  %v1969_v45 = vadd.f32 %v1886_v8, %v1497_v42 }
 0x2b2   :  { %3036 = vst [vmem:[%s3793_s3 + $0x108] sm:$0xff] %v2986_v56   ;;  %v1181_v47 = vadd.f32 %v1180_v38, %v900_v43 }
 0x2b3   :  { %v2047_v50 = vadd.f32 %v3748_v44, %v1969_v45 }
 0x2b5   :  { %v1888_v46 = vpop.f32.mrf.mxu3  ;;  %v2195_v54 = vmul.f32 0.2, %v2047_v50  ;;  %vm2121_vm3 = vcmp.gt.f32.partialorder %v2047_v50, 0.0 }
 0x2b6   :  { %v1183_v18 = vpop.f32.mrf.mxu1  ;;  %v1416_v49 = vpop.f32.mrf.mxu2 }
 0x2b7   :  { %v1498_v51 = vadd.f32 %v1416_v49, %v1181_v47  ;;  %v2269_v62 = vsel %vm2121_vm3, %v2047_v50, %v2195_v54 }
 0x2b9   :  { %v903_v26 = vpop.f32.mrf.mxu0  ;;  %v1970_v53 = vadd.f32 %v1888_v46, %v1498_v51 }
 0x2ba   :  { %v1184_v31 = vadd.f32 %v1183_v18, %v903_v26 }
 0x2bb   :  { %v2048_v55 = vadd.f32 %v3748_v44, %v1970_v53 }
 0x2bd   :  { %v1891_v58 = vpop.f32.mrf.mxu3  ;;  %vm2122_vm4 = vcmp.gt.f32.partialorder %v2048_v55, 0.0  ;;  %v2196_v59 = vmul.f32 0.2, %v2048_v55 }
 0x2be   :  { %v1419_v60 = vpop.f32.mrf.mxu2  ;;  %v1185_v35 = vpop.f32.mrf.mxu1 }
 0x2bf   :  { %v2270_v63 = vsel %vm2122_vm4, %v2048_v55, %v2196_v59  ;;  %v1499_v0 = vadd.f32 %v1419_v60, %v1184_v31 }
 0x2c0   :  { %v2991_v2 = vpack.c.bf16 %v2270_v63, %v2269_v62 }
 0x2c1   :  { %v905_v40 = vpop.f32.mrf.mxu0  ;;  %v1971_v3 = vadd.f32 %v1891_v58, %v1499_v0 }
 0x2c2   :  { %3037 = vst [vmem:[%s3793_s3 + $0x110] sm:$0xff] %v2991_v2   ;;  %v1186_v17 = vadd.f32 %v1185_v35, %v905_v40 }
 0x2c3   :  { %v2049_v13 = vadd.f32 %v3748_v44, %v1971_v3 }
 0x2c5   :  { %v1893_v4 = vpop.f32.mrf.mxu3  ;;  %v2197_v10 = vmul.f32 0.2, %v2049_v13  ;;  %vm2123_vm0 = vcmp.gt.f32.partialorder %v2049_v13, 0.0 }
 0x2c6   :  { %v1421_v15 = vpop.f32.mrf.mxu2  ;;  %v1188_v22 = vpop.f32.mrf.mxu1 }
 0x2c7   :  { %v1500_v6 = vadd.f32 %v1421_v15, %v1186_v17  ;;  %v2271_v57 = vsel %vm2123_vm0, %v2049_v13, %v2197_v10 }
 0x2c9   :  { %v908_v7 = vpop.f32.mrf.mxu0  ;;  %v1972_v48 = vadd.f32 %v1893_v4, %v1500_v6 }
 0x2ca   :  { %v1189_v30 = vadd.f32 %v1188_v22, %v908_v7 }
 0x2cb   :  { %v2050_v11 = vadd.f32 %v3748_v44, %v1972_v48 }
 0x2cd   :  { %vm2124_vm5 = vcmp.gt.f32.partialorder %v2050_v11, 0.0  ;;  %v2198_v52 = vmul.f32 0.2, %v2050_v11  ;;  %v1896_v16 = vpop.f32.mrf.mxu3 }
 0x2ce   :  { %v1424_v14 = vpop.f32.mrf.mxu2  ;;  %v1190_v23 = vpop.f32.mrf.mxu1 }
 0x2cf   :  { %v2272_v19 = vsel %vm2124_vm5, %v2050_v11, %v2198_v52  ;;  %v1501_v20 = vadd.f32 %v1424_v14, %v1189_v30 }
 0x2d0   :  { %v2996_v21 = vpack.c.bf16 %v2272_v19, %v2271_v57 }
 0x2d1   :  { %v910_v61 = vpop.f32.mrf.mxu0  ;;  %v1973_v24 = vadd.f32 %v1896_v16, %v1501_v20 }
 0x2d2   :  { %3038 = vst [vmem:[%s3793_s3 + $0x118] sm:$0xff] %v2996_v21   ;;  %v1191_v25 = vadd.f32 %v1190_v23, %v910_v61 }
 0x2d3   :  { %v2051_v27 = vadd.f32 %v3748_v44, %v1973_v24 }
 0x2d5   :  { %v1898_v29 = vpop.f32.mrf.mxu3  ;;  %v2199_v32 = vmul.f32 0.2, %v2051_v27  ;;  %vm2125_vm1 = vcmp.gt.f32.partialorder %v2051_v27, 0.0 }
 0x2d6   :  { %v1426_v1 = vpop.f32.mrf.mxu2 }
 0x2d7   :  { %v1502_v28 = vadd.f32 %v1426_v1, %v1191_v25  ;;  %v2273_v9 = vsel %vm2125_vm1, %v2051_v27, %v2199_v32 }
 0x2d9   :  { %v1974_v5 = vadd.f32 %v1898_v29, %v1502_v28 }
 0x2db   :  { %v2052_v33 = vadd.f32 %v3748_v44, %v1974_v5 }
 0x2dd   :  { %vm2126_vm2 = vcmp.gt.f32.partialorder %v2052_v33, 0.0  ;;  %v2200_v34 = vmul.f32 0.2, %v2052_v33 }
 0x2df   :  { %v2274_v36 = vsel %vm2126_vm2, %v2052_v33, %v2200_v34 }
 0x2e0   :  { %v3001_v8 = vpack.c.bf16 %v2274_v36, %v2273_v9 }
 0x2e2   :  { %3039 = vst [vmem:[%s3793_s3 + $0x120] sm:$0xff] %v3001_v8  }

// kernel: discriminator_forward.6
= control target key start
LH: loop header
LB: loop body
LE: loop exit
PB: predicated region body
PF: predicated region fallthrough
CT: control target
= control target key end

     0   :  { %vm119_vm0 = vsmask.f32 7424  ;;  %vm711_vm1 = vcmask 1046528   ;;  %vm236_vm2 = vcmask 523264   ;;  %s1645_s1 = inlined_call_operand.vmem [shape: bf16[4,64,128], index: 1, kind: input, shape index: {}]   ;;  %s1646_s0 = inlined_call_operand.vmem [shape: bf16[192,64], index: 0, kind: input, shape index: {}]   ;;  %s1647_s2 = inlined_call_operand.vmem [shape: f32[1,128], index: 2, kind: input, shape index: {}]   ;;  %s1648_s3 = inlined_call_operand.vmem [shape: bf16[176,128], index: 3, kind: output, shape index: {}]  }
   0x1   :  { %v1159_v0 = vld [vmem:[%s1645_s1 + $0x38] sm:$0xff]  ;;  %v1158_v4 = vld [vmem:[%s1645_s1 + $0x30] sm:$0xff]  ;;  %v1157_v8 = vld [vmem:[%s1645_s1 + $0x28] sm:$0xff] }
   0x2   :  { %v1155_v1 = vld [vmem:[%s1645_s1 + $0x18] sm:$0xff]  ;;  %274 = vmatpush.bf16.msra.mxu0 %v1159_v0  ;;  %v1154_v5 = vld [vmem:[%s1645_s1 + $0x10] sm:$0xff]  ;;  %v1169_v9 = vld [vmem:[%s1646_s0] sm:$0xff]  }
   0x3   :  { %v1163_v2 = vld [vmem:[%s1645_s1 + $0x58] sm:$0xff]  ;;  %384 = vmatpush.bf16.msra.mxu1 %v1155_v1  ;;  %v1162_v6 = vld [vmem:[%s1645_s1 + $0x50] sm:$0xff]  ;;  %v1271_v10 = vld [vmem:[%s1646_s0 + $0x8] sm:$0xff]   ;;  %v121_v12 = vshrl.u32 %v1169_v9, 16  ;;  %v123_v13 = vshll.u32 %v1169_v9, 16 }
   0x4   :  { %v1167_v3 = vld [vmem:[%s1645_s1 + $0x78] sm:$0xff]  ;;  %620 = vmatpush.bf16.msra.mxu2 %v1163_v2  ;;  %v1166_v7 = vld [vmem:[%s1645_s1 + $0x70] sm:$0xff]  ;;  %v1153_v11 = vld [vmem:[%s1645_s1 + $0x8] sm:$0xff]  ;;  %v128_v14 = vshll.u32 %v1271_v10, 16  ;;  %v132_v39 = vshrl.u32 %v1271_v10, 16 }
   0x5   :  { %796 = vmatpush.bf16.msra.mxu3 %v1167_v3  ;;  %v1344_v15 = vld [vmem:[%s1646_s0 + $0x4] sm:$0xff]   ;;  %v1346_v16 = vld [vmem:[%s1646_s0 + $0xc] sm:$0xff]   ;;  %v125_v19 = vrot.slane %v123_v13, 1  ;;  %v1348_v38 = vld [vmem:[%s1646_s0 + $0x14] sm:$0xff]  }
   0x6   :  { %275 = vmatpush.bf16.msra.mxu0 %v1158_v4  ;;  %v1161_v17 = vld [vmem:[%s1645_s1 + $0x48] sm:$0xff]  ;;  %v468_v20 = vshrl.u32 %v1344_v15, 16  ;;  %v470_v21 = vshll.u32 %v1344_v15, 16  ;;  %v475_v22 = vshll.u32 %v1346_v16, 16  ;;  %v1156_v23 = vld [vmem:[%s1645_s1 + $0x20] sm:$0xff]  ;;  %v130_v26 = vrot.slane %v128_v14, 1 }
   0x7   :  { %385 = vmatpush.bf16.msra.mxu1 %v1154_v5  ;;  %v1165_v18 = vld [vmem:[%s1645_s1 + $0x68] sm:$0xff]  ;;  %v1152_v24 = vld [vmem:[%s1645_s1] sm:$0xff]  ;;  %v126_v25 = vor.u32 %v125_v19, %v121_v12  ;;  %v712_v31 = vrot.slane %v1344_v15, 1  ;;  %v713_v32 = vrot.slane %v1346_v16, 1  ;;  %v1272_v37 = vld [vmem:[%s1646_s0 + $0x10] sm:$0xff]   ;;  %v479_v41 = vshrl.u32 %v1346_v16, 16 }
   0x8   :  { %621 = vmatpush.bf16.msra.mxu2 %v1162_v6  ;;  %v472_v27 = vrot.slane %v470_v21, 1  ;;  %v1160_v28 = vld [vmem:[%s1645_s1 + $0x40] sm:$0xff]  ;;  %v477_v30 = vrot.slane %v475_v22, 1  ;;  %v136_v40 = vshll.u32 %v1272_v37, 16  ;;  %v483_v42 = vshll.u32 %v1348_v38, 16  ;;  %v1273_v51 = vld [vmem:[%s1646_s0 + $0x18] sm:$0xff]  }
   0x9   :  { %797 = vmatpush.bf16.msra.mxu3 %v1166_v7  ;;  %v1164_v29 = vld [vmem:[%s1645_s1 + $0x60] sm:$0xff]  ;;  %v131_v34 = vsel %vm119_vm0, %v126_v25, %v130_v26  ;;  %v714_v36 = vsel %vm711_vm1, %v712_v31, %v713_v32  ;;  %v134_v43 = vor.u32 %v132_v39, %v130_v26  ;;  %v715_v47 = vrot.slane %v1348_v38, 1  ;;  %v1275_v15 = vld [vmem:[%s1646_s0 + $0x28] sm:$0xff]  }
   0xa   :  { %276 = vmatpush.bf16.msra.mxu0 %v1157_v8  ;;  %v473_v33 = vor.u32 %v472_v27, %v468_v20  ;;  %v138_v44 = vrot.slane %v136_v40, 1  ;;  %v481_v45 = vor.u32 %v479_v41, %v477_v30  ;;  %v485_v46 = vrot.slane %v483_v42, 1  ;;  %v1350_v52 = vld [vmem:[%s1646_s0 + $0x1c] sm:$0xff]   ;;  %v1352_v2 = vld [vmem:[%s1646_s0 + $0x24] sm:$0xff]   ;;  %v1354_v16 = vld [vmem:[%s1646_s0 + $0x2c] sm:$0xff]  }
   0xb   :  { %386 = vmatpush.bf16.msra.mxu1 %v1153_v11  ;;  %v716_v50 = vsel %vm711_vm1, %v713_v32, %v715_v47  ;;  %v140_v53 = vshrl.u32 %v1272_v37, 16  ;;  %v144_v54 = vshll.u32 %v1273_v51, 16  ;;  %v487_v55 = vshrl.u32 %v1348_v38, 16  ;;  %v1274_v1 = vld [vmem:[%s1646_s0 + $0x20] sm:$0xff]  }
   0xc   :  { %622 = vmatpush.bf16.msra.mxu2 %v1161_v17  ;;  %v478_v35 = vsel %vm119_vm0, %v473_v33, %v477_v30  ;;  %v139_v48 = vsel %vm119_vm0, %v134_v43, %v138_v44  ;;  %v486_v49 = vsel %vm119_vm0, %v481_v45, %v485_v46  ;;  %v491_v56 = vshll.u32 %v1350_v52, 16  ;;  %v1356_v30 = vld [vmem:[%s1646_s0 + $0x34] sm:$0xff]  }
   0xd   :  { %798 = vmatpush.bf16.msra.mxu3 %v1165_v18  ;;  %v142_v57 = vor.u32 %v140_v53, %v138_v44  ;;  %v146_v58 = vrot.slane %v144_v54, 1  ;;  %v489_v59 = vor.u32 %v487_v55, %v485_v46  ;;  %v717_v61 = vrot.slane %v1350_v52, 1  ;;  %v1277_v43 = vld [vmem:[%s1646_s0 + $0x38] sm:$0xff]  }
   0xe   :  { %277 = vmatpush.bf16.msra.mxu0 %v1156_v23  ;;  %v493_v60 = vrot.slane %v491_v56, 1  ;;  %v148_v3 = vshrl.u32 %v1273_v51, 16  ;;  %v152_v4 = vshll.u32 %v1274_v1, 16  ;;  %v495_v5 = vshrl.u32 %v1350_v52, 16  ;;  %v1358_v44 = vld [vmem:[%s1646_s0 + $0x3c] sm:$0xff]  }
   0xf   :  { %387 = vmatpush.bf16.msra.mxu1 %v1152_v24  ;;  %v147_v62 = vsel %vm119_vm0, %v142_v57, %v146_v58  ;;  %v718_v0 = vsel %vm711_vm1, %v715_v47, %v717_v61  ;;  %v499_v6 = vshll.u32 %v1352_v2, 16  ;;  %v719_v11 = vrot.slane %v1352_v2, 1  ;;  %v1278_v57 = vld [vmem:[%s1646_s0 + $0x40] sm:$0xff]  }
  0x10   :  { %623 = vmatpush.bf16.msra.mxu2 %v1160_v28  ;;  %v494_v63 = vsel %vm119_vm0, %v489_v59, %v493_v60  ;;  %v150_v7 = vor.u32 %v148_v3, %v146_v58  ;;  %v154_v8 = vrot.slane %v152_v4, 1  ;;  %v156_v17 = vshrl.u32 %v1274_v1, 16  ;;  %v1360_v58 = vld [vmem:[%s1646_s0 + $0x44] sm:$0xff]  }
  0x11   :  { %799 = vmatpush.bf16.msra.mxu3 %v1164_v29  ;;  %1044 = vmatmul.msk.bf16.vlgmr.msra.gmra.mxu0 %vm236_vm2, %v131_v34  ;;  %v720_v14 = vsel %vm711_vm1, %v717_v61, %v719_v11  ;;  %v160_v18 = vshll.u32 %v1275_v15, 16  ;;  %v503_v19 = vshrl.u32 %v1352_v2, 16  ;;  %v507_v20 = vshll.u32 %v1354_v16, 16  ;;  %v1276_v29 = vld [vmem:[%s1646_s0 + $0x30] sm:$0xff]  }
  0x12   :  { %1071 = vmatmul.msk.bf16.vlgmr.msra.gmra.mxu1 %vm236_vm2, %v1169_v9  ;;  %v497_v9 = vor.u32 %v495_v5, %v493_v60  ;;  %v155_v12 = vsel %vm119_vm0, %v150_v7, %v154_v8  ;;  %v158_v21 = vor.u32 %v156_v17, %v154_v8  ;;  %v721_v25 = vrot.slane %v1354_v16, 1  ;;  %v1279_v7 = vld [vmem:[%s1646_s0 + $0x48] sm:$0xff]  }
  0x13   :  { %1106 = vmatmul.msk.bf16.vlgmr.msra.gmra.mxu2 %vm236_vm2, %v478_v35  ;;  %v162_v22 = vrot.slane %v160_v18, 1  ;;  %v509_v24 = vrot.slane %v507_v20, 1  ;;  %v164_v31 = vshrl.u32 %v1275_v15, 16  ;;  %v168_v32 = vshll.u32 %v1276_v29, 16  ;;  %v1361_v8 = vld [vmem:[%s1646_s0 + $0x4c] sm:$0xff]  }
  0x14   :  { %1141 = vmatmul.msk.bf16.vlgmr.msra.gmra.mxu3 %vm236_vm2, %v714_v36  ;;  %v722_v28 = vsel %vm711_vm1, %v719_v11, %v721_v25  ;;  %v511_v33 = vshrl.u32 %v1354_v16, 16  ;;  %v515_v34 = vshll.u32 %v1356_v30, 16  ;;  %v723_v39 = vrot.slane %v1356_v30, 1  ;;  %v1550_v18 = vld [vmem:[%s1646_s0 + $0x50] sm:$0xff]  }
  0x15   :  { %v163_v26 = vsel %vm119_vm0, %v158_v21, %v162_v22  ;;  %v166_v35 = vor.u32 %v164_v31, %v162_v22  ;;  %v170_v36 = vrot.slane %v168_v32, 1  ;;  %v172_v45 = vshrl.u32 %v1276_v29, 16 }
  0x16   :  { %v517_v38 = vrot.slane %v515_v34, 1  ;;  %v724_v42 = vsel %vm711_vm1, %v721_v25, %v723_v39  ;;  %v176_v46 = vshll.u32 %v1277_v43, 16  ;;  %v519_v47 = vshrl.u32 %v1356_v30, 16 }
  0x17   :  { %v171_v40 = vsel %vm119_vm0, %v166_v35, %v170_v36  ;;  %v725_v53 = vrot.slane %v1358_v44, 1  ;;  %v180_v59 = vshrl.u32 %v1277_v43, 16  ;;  %v184_v60 = vshll.u32 %v1278_v57, 16 }
  0x18   :  { %v527_v61 = vshrl.u32 %v1358_v44, 16  ;;  %v727_v3 = vrot.slane %v1360_v58, 1  ;;  %v535_v11 = vshrl.u32 %v1360_v58, 16  ;;  %v729_v17 = vrot.slane %v1361_v8, 1 }
  0x19   :  { %v726_v56 = vsel %vm711_vm1, %v723_v39, %v725_v53  ;;  %v1211_v25 = vunpack.c.h.b16 %v1550_v18  ;;  %v196_v34 = vshrl.u32 %v1279_v7, 16  ;;  %v200_v35 = vshll.u32 %v1550_v18, 16  ;;  %v1570_v39 = vld [vmem:[%s1647_s2] ss:$0 sm:$0xff] }
  0x21   :  { %1045 = vmatmul.msk.bf16.gmra.mxu0 %vm236_vm2, %v139_v48  ;;  %v523_v48 = vshll.u32 %v1358_v44, 16 }
  0x22   :  { %1072 = vmatmul.msk.bf16.gmra.mxu1 %vm236_vm2, %v1271_v10  ;;  %v501_v10 = vrot.slane %v499_v6, 1  ;;  %v728_v6 = vsel %vm711_vm1, %v725_v53, %v727_v3 }
  0x23   :  { %1107 = vmatmul.msk.bf16.gmra.mxu2 %vm236_vm2, %v486_v49  ;;  %v174_v49 = vor.u32 %v172_v45, %v170_v36  ;;  %v525_v52 = vrot.slane %v523_v48, 1  ;;  %v543_v36 = vshrl.u32 %v1361_v8, 16 }
  0x24   :  { %1142 = vmatmul.msk.bf16.gmra.mxu3 %vm236_vm2, %v716_v50  ;;  %v502_v13 = vsel %vm119_vm0, %v497_v9, %v501_v10  ;;  %v505_v23 = vor.u32 %v503_v19, %v501_v10  ;;  %v178_v50 = vrot.slane %v176_v46, 1  ;;  %v188_v9 = vshrl.u32 %v1278_v57, 16  ;;  %v1281_v19 = vld [vmem:[%s1646_s0 + $0x58] sm:$0xff]  }
  0x25   :  { %v192_v10 = vshll.u32 %v1279_v7, 16 }
  0x26   :  { %v510_v27 = vsel %vm119_vm0, %v505_v23, %v509_v24  ;;  %v179_v54 = vsel %vm119_vm0, %v174_v49, %v178_v50 }
  0x31   :  { %1046 = vmatmul.msk.bf16.gmra.mxu0 %vm236_vm2, %v147_v62  ;;  %v531_v62 = vshll.u32 %v1360_v58, 16 }
  0x32   :  { %1073 = vmatmul.msk.bf16.gmra.mxu1 %vm236_vm2, %v1272_v37  ;;  %v513_v37 = vor.u32 %v511_v33, %v509_v24  ;;  %v730_v24 = vsel %vm711_vm1, %v727_v3, %v729_v17 }
  0x33   :  { %1108 = vmatmul.msk.bf16.gmra.mxu2 %vm236_vm2, %v494_v63  ;;  %v182_v63 = vor.u32 %v180_v59, %v178_v50  ;;  %v533_v2 = vrot.slane %v531_v62, 1 }
  0x34   :  { %1143 = vmatmul.msk.bf16.gmra.mxu3 %vm236_vm2, %v718_v0  ;;  %v518_v41 = vsel %vm119_vm0, %v513_v37, %v517_v38  ;;  %v186_v0 = vrot.slane %v184_v60, 1 }
  0x36   :  { %v187_v4 = vsel %vm119_vm0, %v182_v63, %v186_v0 }
  0x41   :  { %1047 = vmatmul.msk.bf16.gmra.mxu0 %vm236_vm2, %v155_v12  ;;  %v539_v12 = vshll.u32 %v1361_v8, 16 }
  0x42   :  { %1074 = vmatmul.msk.bf16.gmra.mxu1 %vm236_vm2, %v1273_v51  ;;  %v521_v51 = vor.u32 %v519_v47, %v517_v38 }
  0x43   :  { %1109 = vmatmul.msk.bf16.gmra.mxu2 %vm236_vm2, %v502_v13  ;;  %v190_v13 = vor.u32 %v188_v9, %v186_v0  ;;  %v541_v16 = vrot.slane %v539_v12, 1 }
  0x44   :  { %1144 = vmatmul.msk.bf16.gmra.mxu3 %vm236_vm2, %v720_v14  ;;  %v526_v55 = vsel %vm119_vm0, %v521_v51, %v525_v52  ;;  %v194_v14 = vrot.slane %v192_v10, 1 }
  0x46   :  { %v195_v22 = vsel %vm119_vm0, %v190_v13, %v194_v14 }
  0x51   :  { %1048 = vmatmul.msk.bf16.gmra.mxu0 %vm236_vm2, %v163_v26  ;;  %v1214_v26 = vunpack.c.l.b16 %v1281_v19 }
  0x52   :  { %1075 = vmatmul.msk.bf16.gmra.mxu1 %vm236_vm2, %v1274_v1  ;;  %v529_v1 = vor.u32 %v527_v61, %v525_v52 }
  0x53   :  { %1110 = vmatmul.msk.bf16.gmra.mxu2 %vm236_vm2, %v510_v27  ;;  %v118_v60 = vpack.c.b16 %v1214_v26, %v1214_v26 }
  0x54   :  { %1145 = vmatmul.msk.bf16.gmra.mxu3 %vm236_vm2, %v722_v28  ;;  %v534_v5 = vsel %vm119_vm0, %v529_v1, %v533_v2  ;;  %v1563_v28 = vpack.c.b16 %v1214_v26, %v1211_v25  ;;  %v204_v1 = vshrl.u32 %v1550_v18, 16 }
  0x56   :  { %v547_v37 = vshll.u32 %v1563_v28, 16  ;;  %v731_v44 = vrot.slane %v1563_v28, 1  ;;  %v551_v9 = vshrl.u32 %v1563_v28, 16 }
  0x61   :  { %1049 = vmatmul.msk.bf16.gmra.mxu0 %vm236_vm2, %v171_v40  ;;  %v198_v40 = vor.u32 %v196_v34, %v194_v14 }
  0x62   :  { %1076 = vmatmul.msk.bf16.gmra.mxu1 %vm236_vm2, %v1275_v15  ;;  %v537_v15 = vor.u32 %v535_v11, %v533_v2 }
  0x63   :  { %1111 = vmatmul.msk.bf16.gmra.mxu2 %vm236_vm2, %v518_v41  ;;  %v202_v41 = vrot.slane %v200_v35, 1 }
  0x64   :  { %1146 = vmatmul.msk.bf16.gmra.mxu3 %vm236_vm2, %v724_v42  ;;  %v542_v23 = vsel %vm119_vm0, %v537_v15, %v541_v16  ;;  %v545_v42 = vor.u32 %v543_v36, %v541_v16 }
  0x65   :  { %v203_v52 = vsel %vm119_vm0, %v198_v40, %v202_v41  ;;  %v206_v12 = vor.u32 %v204_v1, %v202_v41 }
  0x71   :  { %1050 = vmatmul.msk.bf16.gmra.mxu0 %vm236_vm2, %v179_v54  ;;  %v732_v54 = vsel %vm711_vm1, %v729_v17, %v731_v44 }
  0x72   :  { %1077 = vmatmul.msk.bf16.gmra.mxu1 %vm236_vm2, %v1276_v29 }
  0x73   :  { %1112 = vmatmul.msk.bf16.gmra.mxu2 %vm236_vm2, %v526_v55  ;;  %v1215_v55 = vunpack.c.h.b16 %v1281_v19 }
  0x74   :  { %1147 = vmatmul.msk.bf16.gmra.mxu3 %vm236_vm2, %v726_v56 }
  0x75   :  { %v466_v61 = vpack.c.b16 %v1215_v55, %v1215_v55 }
  0x77   :  { %v555_v10 = vshll.u32 %v466_v61, 16  ;;  %v733_v16 = vrot.slane %v466_v61, 1 }
  0x79   :  { %v557_v15 = vrot.slane %v555_v10, 1 }
  0x81   :  { %1051 = vmatmul.msk.bf16.gmra.mxu0 %vm236_vm2, %v187_v4 }
  0x82   :  { %1078 = vmatmul.msk.bf16.gmra.mxu1 %vm236_vm2, %v1277_v43  ;;  %v549_v43 = vrot.slane %v547_v37, 1 }
  0x83   :  { %1113 = vmatmul.msk.bf16.gmra.mxu2 %vm236_vm2, %v534_v5 }
  0x84   :  { %1148 = vmatmul.msk.bf16.gmra.mxu3 %vm236_vm2, %v728_v6  ;;  %v550_v53 = vsel %vm119_vm0, %v545_v42, %v549_v43  ;;  %v553_v14 = vor.u32 %v551_v9, %v549_v43 }
  0x86   :  { %v558_v26 = vsel %vm119_vm0, %v553_v14, %v557_v15 }
  0x8e   :  { %v279_v20 = vpop.f32.mrf.mxu0 }
  0x8f   :  { %v389_v21 = vpop.f32.mrf.mxu1 }
  0x90   :  { %v390_v27 = vadd.f32 %v389_v21, %v279_v20 }
  0x91   :  { %1052 = vmatmul.msk.bf16.gmra.mxu0 %vm236_vm2, %v195_v22 }
  0x92   :  { %1079 = vmatmul.msk.bf16.gmra.mxu1 %vm236_vm2, %v1278_v57 }
  0x93   :  { %1114 = vmatmul.msk.bf16.gmra.mxu2 %vm236_vm2, %v542_v23 }
  0x94   :  { %1149 = vmatmul.msk.bf16.gmra.mxu3 %vm236_vm2, %v730_v24 }
  0x96   :  { %v625_v29 = vpop.f32.mrf.mxu2  ;;  %v281_v32 = vpop.f32.mrf.mxu0 }
  0x97   :  { %v801_v30 = vpop.f32.mrf.mxu3  ;;  %v680_v31 = vadd.f32 %v625_v29, %v390_v27  ;;  %v391_v33 = vpop.f32.mrf.mxu1  ;;  %v734_v27 = vsel %vm711_vm1, %v731_v44, %v733_v16 }
  0x98   :  { %v392_v45 = vadd.f32 %v391_v33, %v281_v32 }
  0x99   :  { %v856_v38 = vadd.f32 %v801_v30, %v680_v31 }
  0x9b   :  { %v882_v48 = vadd.f32 %v1570_v39, %v856_v38 }
  0x9d   :  { %v926_v57 = vmul.f32 0.2, %v882_v48  ;;  %vm904_vm3 = vcmp.gt.f32.partialorder %v882_v48, 0.0 }
  0x9e   :  { %v627_v46 = vpop.f32.mrf.mxu2  ;;  %v284_v50 = vpop.f32.mrf.mxu0 }
  0x9f   :  { %v803_v47 = vpop.f32.mrf.mxu3  ;;  %v681_v49 = vadd.f32 %v627_v46, %v392_v45  ;;  %v394_v51 = vpop.f32.mrf.mxu1  ;;  %v948_v2 = vsel %vm904_vm3, %v882_v48, %v926_v57 }
  0xa0   :  { %v395_v59 = vadd.f32 %v394_v51, %v284_v50 }
  0xa1   :  { %v857_v56 = vadd.f32 %v803_v47, %v681_v49  ;;  %1053 = vmatmul.msk.bf16.gmra.mxu0 %vm236_vm2, %v203_v52 }
  0xa2   :  { %1080 = vmatmul.msk.bf16.gmra.mxu1 %vm236_vm2, %v1279_v7  ;;  %v208_v7 = vshll.u32 %v118_v60, 16 }
  0xa3   :  { %v883_v58 = vadd.f32 %v1570_v39, %v857_v56  ;;  %1115 = vmatmul.msk.bf16.gmra.mxu2 %vm236_vm2, %v550_v53 }
  0xa4   :  { %1150 = vmatmul.msk.bf16.gmra.mxu3 %vm236_vm2, %v732_v54  ;;  %v210_v13 = vrot.slane %v208_v7, 1 }
  0xa5   :  { %vm905_vm4 = vcmp.gt.f32.partialorder %v883_v58, 0.0  ;;  %v927_v62 = vmul.f32 0.2, %v883_v58 }
  0xa6   :  { %v630_v63 = vpop.f32.mrf.mxu2  ;;  %v286_v5 = vpop.f32.mrf.mxu0  ;;  %v211_v25 = vsel %vm119_vm0, %v206_v12, %v210_v13 }
  0xa7   :  { %v806_v0 = vpop.f32.mrf.mxu3  ;;  %v949_v3 = vsel %vm905_vm4, %v883_v58, %v927_v62  ;;  %v682_v4 = vadd.f32 %v630_v63, %v395_v59  ;;  %v396_v6 = vpop.f32.mrf.mxu1 }
  0xa8   :  { %v1219_v8 = vpack.c.bf16 %v949_v3, %v948_v2  ;;  %v397_v17 = vadd.f32 %v396_v6, %v286_v5 }
  0xa9   :  { %v858_v11 = vadd.f32 %v806_v0, %v682_v4 }
  0xaa   :  { %1220 = vst [vmem:[%s1648_s3] sm:$0xff] %v1219_v8  }
  0xab   :  { %v884_v21 = vadd.f32 %v1570_v39, %v858_v11 }
  0xad   :  { %v928_v29 = vmul.f32 0.2, %v884_v21  ;;  %vm906_vm5 = vcmp.gt.f32.partialorder %v884_v21, 0.0 }
  0xae   :  { %v632_v19 = vpop.f32.mrf.mxu2  ;;  %v289_v23 = vpop.f32.mrf.mxu0 }
  0xaf   :  { %v808_v20 = vpop.f32.mrf.mxu3  ;;  %v683_v22 = vadd.f32 %v632_v19, %v397_v17  ;;  %v399_v24 = vpop.f32.mrf.mxu1  ;;  %v950_v35 = vsel %vm906_vm5, %v884_v21, %v928_v29 }
  0xb0   :  { %v400_v31 = vadd.f32 %v399_v24, %v289_v23 }
  0xb1   :  { %v859_v28 = vadd.f32 %v808_v20, %v683_v22  ;;  %1054 = vmatmul.msk.bf16.gmra.mxu0 %vm236_vm2, %v211_v25 }
  0xb2   :  { %1081 = vmatmul.msk.bf16.gmra.mxu1 %vm236_vm2, %v1550_v18 }
  0xb3   :  { %v885_v30 = vadd.f32 %v1570_v39, %v859_v28  ;;  %1116 = vmatmul.msk.bf16.gmra.mxu2 %vm236_vm2, %v558_v26 }
  0xb4   :  { %1151 = vmatmul.msk.bf16.gmra.mxu3 %vm236_vm2, %v734_v27 }
  0xb5   :  { %vm907_vm6 = vcmp.gt.f32.partialorder %v885_v30, 0.0  ;;  %v929_v32 = vmul.f32 0.2, %v885_v30 }
  0xb6   :  { %v635_v33 = vpop.f32.mrf.mxu2  ;;  %v291_v38 = vpop.f32.mrf.mxu0 }
  0xb7   :  { %v811_v34 = vpop.f32.mrf.mxu3  ;;  %v951_v36 = vsel %vm907_vm6, %v885_v30, %v929_v32  ;;  %v684_v37 = vadd.f32 %v635_v33, %v400_v31  ;;  %v401_v40 = vpop.f32.mrf.mxu1 }
  0xb8   :  { %v1224_v41 = vpack.c.bf16 %v951_v36, %v950_v35  ;;  %v402_v42 = vadd.f32 %v401_v40, %v291_v38 }
  0xb9   :  { %v860_v18 = vadd.f32 %v811_v34, %v684_v37 }
  0xba   :  { %1332 = vst [vmem:[%s1648_s3 + $0x8] sm:$0xff] %v1224_v41  }
  0xbb   :  { %v886_v45 = vadd.f32 %v1570_v39, %v860_v18 }
  0xbd   :  { %v930_v50 = vmul.f32 0.2, %v886_v45  ;;  %vm908_vm7 = vcmp.gt.f32.partialorder %v886_v45, 0.0 }
  0xbe   :  { %v637_v43 = vpop.f32.mrf.mxu2  ;;  %v294_v47 = vpop.f32.mrf.mxu0 }
  0xbf   :  { %v813_v44 = vpop.f32.mrf.mxu3  ;;  %v685_v46 = vadd.f32 %v637_v43, %v402_v42  ;;  %v404_v48 = vpop.f32.mrf.mxu1  ;;  %v952_v56 = vsel %vm908_vm7, %v886_v45, %v930_v50 }
  0xc0   :  { %v405_v52 = vadd.f32 %v404_v48, %v294_v47 }
  0xc1   :  { %v861_v49 = vadd.f32 %v813_v44, %v685_v46 }
  0xc3   :  { %v887_v51 = vadd.f32 %v1570_v39, %v861_v49 }
  0xc5   :  { %vm909_vm8 = vcmp.gt.f32.partialorder %v887_v51, 0.0  ;;  %v931_v53 = vmul.f32 0.2, %v887_v51 }
  0xc6   :  { %v640_v54 = vpop.f32.mrf.mxu2  ;;  %v296_v59 = vpop.f32.mrf.mxu0 }
  0xc7   :  { %v816_v55 = vpop.f32.mrf.mxu3  ;;  %v953_v57 = vsel %vm909_vm8, %v887_v51, %v931_v53  ;;  %v686_v58 = vadd.f32 %v640_v54, %v405_v52  ;;  %v406_v60 = vpop.f32.mrf.mxu1 }
  0xc8   :  { %v1229_v61 = vpack.c.bf16 %v953_v57, %v952_v56  ;;  %v407_v63 = vadd.f32 %v406_v60, %v296_v59 }
  0xc9   :  { %v862_v62 = vadd.f32 %v816_v55, %v686_v58 }
  0xca   :  { %1333 = vst [vmem:[%s1648_s3 + $0x10] sm:$0xff] %v1229_v61  }
  0xcb   :  { %v888_v2 = vadd.f32 %v1570_v39, %v862_v62 }
  0xcd   :  { %v932_v7 = vmul.f32 0.2, %v888_v2  ;;  %vm910_vm9 = vcmp.gt.f32.partialorder %v888_v2, 0.0 }
  0xce   :  { %v642_v0 = vpop.f32.mrf.mxu2  ;;  %v299_v4 = vpop.f32.mrf.mxu0 }
  0xcf   :  { %v818_v1 = vpop.f32.mrf.mxu3  ;;  %v687_v3 = vadd.f32 %v642_v0, %v407_v63  ;;  %v409_v5 = vpop.f32.mrf.mxu1  ;;  %v954_v13 = vsel %vm910_vm9, %v888_v2, %v932_v7 }
  0xd0   :  { %v410_v9 = vadd.f32 %v409_v5, %v299_v4 }
  0xd1   :  { %v863_v6 = vadd.f32 %v818_v1, %v687_v3 }
  0xd3   :  { %v889_v8 = vadd.f32 %v1570_v39, %v863_v6 }
  0xd5   :  { %vm911_vm10 = vcmp.gt.f32.partialorder %v889_v8, 0.0  ;;  %v933_v10 = vmul.f32 0.2, %v889_v8 }
  0xd6   :  { %v645_v11 = vpop.f32.mrf.mxu2  ;;  %v301_v16 = vpop.f32.mrf.mxu0 }
  0xd7   :  { %v821_v12 = vpop.f32.mrf.mxu3  ;;  %v955_v14 = vsel %vm911_vm10, %v889_v8, %v933_v10  ;;  %v688_v15 = vadd.f32 %v645_v11, %v410_v9  ;;  %v411_v17 = vpop.f32.mrf.mxu1 }
  0xd8   :  { %v1234_v19 = vpack.c.bf16 %v955_v14, %v954_v13  ;;  %v412_v21 = vadd.f32 %v411_v17, %v301_v16 }
  0xd9   :  { %v864_v20 = vadd.f32 %v821_v12, %v688_v15 }
  0xda   :  { %1334 = vst [vmem:[%s1648_s3 + $0x18] sm:$0xff] %v1234_v19  }
  0xdb   :  { %v890_v24 = vadd.f32 %v1570_v39, %v864_v20 }
  0xdd   :  { %v934_v29 = vmul.f32 0.2, %v890_v24  ;;  %vm912_vm11 = vcmp.gt.f32.partialorder %v890_v24, 0.0 }
  0xde   :  { %v647_v22 = vpop.f32.mrf.mxu2  ;;  %v304_v26 = vpop.f32.mrf.mxu0 }
  0xdf   :  { %v823_v23 = vpop.f32.mrf.mxu3  ;;  %v689_v25 = vadd.f32 %v647_v22, %v412_v21  ;;  %v414_v27 = vpop.f32.mrf.mxu1  ;;  %v956_v35 = vsel %vm912_vm11, %v890_v24, %v934_v29 }
  0xe0   :  { %v415_v31 = vadd.f32 %v414_v27, %v304_v26 }
  0xe1   :  { %v865_v28 = vadd.f32 %v823_v23, %v689_v25 }
  0xe3   :  { %v891_v30 = vadd.f32 %v1570_v39, %v865_v28 }
  0xe5   :  { %vm913_vm12 = vcmp.gt.f32.partialorder %v891_v30, 0.0  ;;  %v935_v32 = vmul.f32 0.2, %v891_v30 }
  0xe6   :  { %v650_v33 = vpop.f32.mrf.mxu2  ;;  %v306_v38 = vpop.f32.mrf.mxu0 }
  0xe7   :  { %v826_v34 = vpop.f32.mrf.mxu3  ;;  %v957_v36 = vsel %vm913_vm12, %v891_v30, %v935_v32  ;;  %v690_v37 = vadd.f32 %v650_v33, %v415_v31  ;;  %v416_v40 = vpop.f32.mrf.mxu1 }
  0xe8   :  { %v1239_v41 = vpack.c.bf16 %v957_v36, %v956_v35  ;;  %v417_v42 = vadd.f32 %v416_v40, %v306_v38 }
  0xe9   :  { %v866_v18 = vadd.f32 %v826_v34, %v690_v37 }
  0xea   :  { %1335 = vst [vmem:[%s1648_s3 + $0x20] sm:$0xff] %v1239_v41  }
  0xeb   :  { %v892_v45 = vadd.f32 %v1570_v39, %v866_v18 }
  0xed   :  { %v936_v50 = vmul.f32 0.2, %v892_v45  ;;  %vm914_vm13 = vcmp.gt.f32.partialorder %v892_v45, 0.0 }
  0xee   :  { %v652_v43 = vpop.f32.mrf.mxu2  ;;  %v309_v47 = vpop.f32.mrf.mxu0 }
  0xef   :  { %v828_v44 = vpop.f32.mrf.mxu3  ;;  %v691_v46 = vadd.f32 %v652_v43, %v417_v42  ;;  %v419_v48 = vpop.f32.mrf.mxu1  ;;  %v958_v56 = vsel %vm914_vm13, %v892_v45, %v936_v50 }
  0xf0   :  { %v420_v52 = vadd.f32 %v419_v48, %v309_v47 }
  0xf1   :  { %v867_v49 = vadd.f32 %v828_v44, %v691_v46 }
  0xf3   :  { %v893_v51 = vadd.f32 %v1570_v39, %v867_v49 }
  0xf5   :  { %vm915_vm14 = vcmp.gt.f32.partialorder %v893_v51, 0.0  ;;  %v937_v53 = vmul.f32 0.2, %v893_v51 }
  0xf6   :  { %v655_v54 = vpop.f32.mrf.mxu2  ;;  %v311_v59 = vpop.f32.mrf.mxu0 }
  0xf7   :  { %v831_v55 = vpop.f32.mrf.mxu3  ;;  %v959_v57 = vsel %vm915_vm14, %v893_v51, %v937_v53  ;;  %v692_v58 = vadd.f32 %v655_v54, %v420_v52  ;;  %v421_v60 = vpop.f32.mrf.mxu1 }
  0xf8   :  { %v1244_v61 = vpack.c.bf16 %v959_v57, %v958_v56  ;;  %v422_v63 = vadd.f32 %v421_v60, %v311_v59 }
  0xf9   :  { %v868_v62 = vadd.f32 %v831_v55, %v692_v58 }
  0xfa   :  { %1336 = vst [vmem:[%s1648_s3 + $0x28] sm:$0xff] %v1244_v61  }
  0xfb   :  { %v894_v2 = vadd.f32 %v1570_v39, %v868_v62 }
  0xfd   :  { %v938_v7 = vmul.f32 0.2, %v894_v2  ;;  %vm916_vm15 = vcmp.gt.f32.partialorder %v894_v2, 0.0 }
  0xfe   :  { %v657_v0 = vpop.f32.mrf.mxu2  ;;  %v314_v4 = vpop.f32.mrf.mxu0 }
  0xff   :  { %v833_v1 = vpop.f32.mrf.mxu3  ;;  %v693_v3 = vadd.f32 %v657_v0, %v422_v63  ;;  %v424_v5 = vpop.f32.mrf.mxu1  ;;  %v960_v13 = vsel %vm916_vm15, %v894_v2, %v938_v7 }
 0x100   :  { %v425_v9 = vadd.f32 %v424_v5, %v314_v4 }
 0x101   :  { %v869_v6 = vadd.f32 %v833_v1, %v693_v3 }
 0x103   :  { %v895_v8 = vadd.f32 %v1570_v39, %v869_v6 }
 0x105   :  { %vm917_vm0 = vcmp.gt.f32.partialorder %v895_v8, 0.0  ;;  %v939_v10 = vmul.f32 0.2, %v895_v8 }
 0x106   :  { %v660_v11 = vpop.f32.mrf.mxu2  ;;  %v316_v16 = vpop.f32.mrf.mxu0 }
 0x107   :  { %v836_v12 = vpop.f32.mrf.mxu3  ;;  %v961_v14 = vsel %vm917_vm0, %v895_v8, %v939_v10  ;;  %v694_v15 = vadd.f32 %v660_v11, %v425_v9  ;;  %v426_v17 = vpop.f32.mrf.mxu1 }
 0x108   :  { %v1249_v19 = vpack.c.bf16 %v961_v14, %v960_v13  ;;  %v427_v21 = vadd.f32 %v426_v17, %v316_v16 }
 0x109   :  { %v870_v20 = vadd.f32 %v836_v12, %v694_v15 }
 0x10a   :  { %1337 = vst [vmem:[%s1648_s3 + $0x30] sm:$0xff] %v1249_v19  }
 0x10b   :  { %v896_v24 = vadd.f32 %v1570_v39, %v870_v20 }
 0x10d   :  { %v940_v29 = vmul.f32 0.2, %v896_v24  ;;  %vm918_vm1 = vcmp.gt.f32.partialorder %v896_v24, 0.0 }
 0x10e   :  { %v662_v22 = vpop.f32.mrf.mxu2  ;;  %v319_v26 = vpop.f32.mrf.mxu0 }
 0x10f   :  { %v838_v23 = vpop.f32.mrf.mxu3  ;;  %v695_v25 = vadd.f32 %v662_v22, %v427_v21  ;;  %v429_v27 = vpop.f32.mrf.mxu1  ;;  %v962_v35 = vsel %vm918_vm1, %v896_v24, %v940_v29 }
 0x110   :  { %v430_v31 = vadd.f32 %v429_v27, %v319_v26 }
 0x111   :  { %v871_v28 = vadd.f32 %v838_v23, %v695_v25 }
 0x113   :  { %v897_v30 = vadd.f32 %v1570_v39, %v871_v28 }
 0x115   :  { %vm919_vm2 = vcmp.gt.f32.partialorder %v897_v30, 0.0  ;;  %v941_v32 = vmul.f32 0.2, %v897_v30 }
 0x116   :  { %v665_v33 = vpop.f32.mrf.mxu2  ;;  %v321_v38 = vpop.f32.mrf.mxu0 }
 0x117   :  { %v841_v34 = vpop.f32.mrf.mxu3  ;;  %v963_v36 = vsel %vm919_vm2, %v897_v30, %v941_v32  ;;  %v696_v37 = vadd.f32 %v665_v33, %v430_v31  ;;  %v431_v40 = vpop.f32.mrf.mxu1 }
 0x118   :  { %v1254_v41 = vpack.c.bf16 %v963_v36, %v962_v35  ;;  %v432_v42 = vadd.f32 %v431_v40, %v321_v38 }
 0x119   :  { %v872_v18 = vadd.f32 %v841_v34, %v696_v37 }
 0x11a   :  { %1338 = vst [vmem:[%s1648_s3 + $0x38] sm:$0xff] %v1254_v41  }
 0x11b   :  { %v898_v45 = vadd.f32 %v1570_v39, %v872_v18 }
 0x11d   :  { %v942_v50 = vmul.f32 0.2, %v898_v45  ;;  %vm920_vm3 = vcmp.gt.f32.partialorder %v898_v45, 0.0 }
 0x11e   :  { %v667_v43 = vpop.f32.mrf.mxu2  ;;  %v324_v47 = vpop.f32.mrf.mxu0 }
 0x11f   :  { %v843_v44 = vpop.f32.mrf.mxu3  ;;  %v697_v46 = vadd.f32 %v667_v43, %v432_v42  ;;  %v434_v48 = vpop.f32.mrf.mxu1  ;;  %v964_v56 = vsel %vm920_vm3, %v898_v45, %v942_v50 }
 0x120   :  { %v435_v52 = vadd.f32 %v434_v48, %v324_v47 }
 0x121   :  { %v873_v49 = vadd.f32 %v843_v44, %v697_v46 }
 0x123   :  { %v899_v51 = vadd.f32 %v1570_v39, %v873_v49 }
 0x125   :  { %vm921_vm4 = vcmp.gt.f32.partialorder %v899_v51, 0.0  ;;  %v943_v53 = vmul.f32 0.2, %v899_v51 }
 0x126   :  { %v670_v54 = vpop.f32.mrf.mxu2  ;;  %v326_v59 = vpop.f32.mrf.mxu0 }
 0x127   :  { %v846_v55 = vpop.f32.mrf.mxu3  ;;  %v965_v57 = vsel %vm921_vm4, %v899_v51, %v943_v53  ;;  %v698_v58 = vadd.f32 %v670_v54, %v435_v52  ;;  %v436_v60 = vpop.f32.mrf.mxu1 }
 0x128   :  { %v1259_v61 = vpack.c.bf16 %v965_v57, %v964_v56  ;;  %v437_v63 = vadd.f32 %v436_v60, %v326_v59 }
 0x129   :  { %v874_v62 = vadd.f32 %v846_v55, %v698_v58 }
 0x12a   :  { %1339 = vst [vmem:[%s1648_s3 + $0x40] sm:$0xff] %v1259_v61  }
 0x12b   :  { %v900_v2 = vadd.f32 %v1570_v39, %v874_v62 }
 0x12d   :  { %v944_v7 = vmul.f32 0.2, %v900_v2  ;;  %vm922_vm5 = vcmp.gt.f32.partialorder %v900_v2, 0.0 }
 0x12e   :  { %v672_v0 = vpop.f32.mrf.mxu2  ;;  %v329_v4 = vpop.f32.mrf.mxu0 }
 0x12f   :  { %v848_v1 = vpop.f32.mrf.mxu3  ;;  %v699_v3 = vadd.f32 %v672_v0, %v437_v63  ;;  %v439_v5 = vpop.f32.mrf.mxu1  ;;  %v966_v13 = vsel %vm922_vm5, %v900_v2, %v944_v7 }
 0x130   :  { %v440_v9 = vadd.f32 %v439_v5, %v329_v4 }
 0x131   :  { %v875_v6 = vadd.f32 %v848_v1, %v699_v3 }
 0x133   :  { %v901_v8 = vadd.f32 %v1570_v39, %v875_v6 }
 0x135   :  { %vm923_vm6 = vcmp.gt.f32.partialorder %v901_v8, 0.0  ;;  %v945_v10 = vmul.f32 0.2, %v901_v8 }
 0x136   :  { %v675_v11 = vpop.f32.mrf.mxu2  ;;  %v331_v17 = vpop.f32.mrf.mxu0 }
 0x137   :  { %v851_v12 = vpop.f32.mrf.mxu3  ;;  %v967_v14 = vsel %vm923_vm6, %v901_v8, %v945_v10  ;;  %v700_v15 = vadd.f32 %v675_v11, %v440_v9  ;;  %v441_v19 = vpop.f32.mrf.mxu1 }
 0x138   :  { %v1264_v16 = vpack.c.bf16 %v967_v14, %v966_v13  ;;  %v442_v21 = vadd.f32 %v441_v19, %v331_v17 }
 0x139   :  { %v876_v20 = vadd.f32 %v851_v12, %v700_v15 }
 0x13a   :  { %1340 = vst [vmem:[%s1648_s3 + $0x48] sm:$0xff] %v1264_v16  }
 0x13b   :  { %v902_v23 = vadd.f32 %v1570_v39, %v876_v20 }
 0x13d   :  { %v946_v27 = vmul.f32 0.2, %v902_v23  ;;  %vm924_vm7 = vcmp.gt.f32.partialorder %v902_v23, 0.0 }
 0x13e   :  { %v677_v22 = vpop.f32.mrf.mxu2 }
 0x13f   :  { %v701_v24 = vadd.f32 %v677_v22, %v442_v21  ;;  %v853_v25 = vpop.f32.mrf.mxu3  ;;  %v968_v30 = vsel %vm924_vm7, %v902_v23, %v946_v27 }
 0x141   :  { %v877_v26 = vadd.f32 %v853_v25, %v701_v24 }
 0x143   :  { %v903_v28 = vadd.f32 %v1570_v39, %v877_v26 }
 0x145   :  { %vm925_vm8 = vcmp.gt.f32.partialorder %v903_v28, 0.0  ;;  %v947_v29 = vmul.f32 0.2, %v903_v28 }
 0x147   :  { %v969_v31 = vsel %vm925_vm8, %v903_v28, %v947_v29 }
 0x148   :  { %v1269_v32 = vpack.c.bf16 %v969_v31, %v968_v30 }
 0x14a   :  { %1341 = vst [vmem:[%s1648_s3 + $0x50] sm:$0xff] %v1269_v32  }

// kernel: discriminator_forward.7
= control target key start
LH: loop header
LB: loop body
LE: loop exit
PB: predicated region body
PF: predicated region fallthrough
CT: control target
= control target key end

     0   :  { %vm84_vm0 = vsmask.f32 7424  ;;  %vm300_vm1 = vsmask.f32 5376  ;;  %vm428_vm2 = vcmask 1044480   ;;  %s1011_s1 = inlined_call_operand.vmem [shape: bf16[4,128,128], index: 1, kind: input, shape index: {}]   ;;  %s1012_s0 = inlined_call_operand.vmem [shape: bf16[72,128], index: 0, kind: input, shape index: {}]   ;;  %s1013_s2 = inlined_call_operand.vmem [shape: f32[1,128], index: 2, kind: input, shape index: {}]   ;;  %s1014_s3 = inlined_call_operand.vmem [shape: bf16[64,128], index: 3, kind: output, shape index: {}]  }
   0x1   :  { %v796_v0 = vld [vmem:[%s1011_s1 + $0x78] sm:$0xff]  ;;  %v795_v4 = vld [vmem:[%s1011_s1 + $0x70] sm:$0xff]  ;;  %v794_v8 = vld [vmem:[%s1011_s1 + $0x68] sm:$0xff] }
   0x2   :  { %v788_v1 = vld [vmem:[%s1011_s1 + $0x38] sm:$0xff]  ;;  %173 = vmatpush.bf16.msra.mxu0 %v796_v0  ;;  %v787_v5 = vld [vmem:[%s1011_s1 + $0x30] sm:$0xff]  ;;  %v786_v9 = vld [vmem:[%s1011_s1 + $0x28] sm:$0xff] }
   0x3   :  { %v804_v2 = vld [vmem:[%s1011_s1 + $0xb8] sm:$0xff]  ;;  %254 = vmatpush.bf16.msra.mxu1 %v788_v1  ;;  %v803_v6 = vld [vmem:[%s1011_s1 + $0xb0] sm:$0xff]  ;;  %v802_v10 = vld [vmem:[%s1011_s1 + $0xa8] sm:$0xff] }
   0x4   :  { %v812_v3 = vld [vmem:[%s1011_s1 + $0xf8] sm:$0xff]  ;;  %374 = vmatpush.bf16.msra.mxu2 %v804_v2  ;;  %v811_v7 = vld [vmem:[%s1011_s1 + $0xf0] sm:$0xff]  ;;  %v810_v11 = vld [vmem:[%s1011_s1 + $0xe8] sm:$0xff] }
   0x5   :  { %490 = vmatpush.bf16.msra.mxu3 %v812_v3  ;;  %v793_v12 = vld [vmem:[%s1011_s1 + $0x60] sm:$0xff]  ;;  %v792_v16 = vld [vmem:[%s1011_s1 + $0x58] sm:$0xff]  ;;  %v923_v21 = vld [vmem:[%s1012_s0 + $0x8] sm:$0xff] }
   0x6   :  { %174 = vmatpush.bf16.msra.mxu0 %v795_v4  ;;  %v785_v13 = vld [vmem:[%s1011_s1 + $0x20] sm:$0xff]  ;;  %v784_v17 = vld [vmem:[%s1011_s1 + $0x18] sm:$0xff]  ;;  %v791_v22 = vld [vmem:[%s1011_s1 + $0x50] sm:$0xff]  ;;  %v93_v28 = vshll.u32 %v923_v21, 16  ;;  %v97_v29 = vshrl.u32 %v923_v21, 16  ;;  %v430_v48 = vrot.slane %v923_v21, 3 }
   0x7   :  { %255 = vmatpush.bf16.msra.mxu1 %v787_v5  ;;  %v801_v14 = vld [vmem:[%s1011_s1 + $0xa0] sm:$0xff]  ;;  %v800_v19 = vld [vmem:[%s1011_s1 + $0x98] sm:$0xff]  ;;  %v783_v23 = vld [vmem:[%s1011_s1 + $0x10] sm:$0xff] }
   0x8   :  { %375 = vmatpush.bf16.msra.mxu2 %v803_v6  ;;  %v809_v15 = vld [vmem:[%s1011_s1 + $0xe0] sm:$0xff]  ;;  %v808_v20 = vld [vmem:[%s1011_s1 + $0xd8] sm:$0xff]  ;;  %v799_v25 = vld [vmem:[%s1011_s1 + $0x90] sm:$0xff]  ;;  %v304_v37 = vrot.slane %v97_v29, 2  ;;  %v305_v38 = vrot.slane %v93_v28, 3  ;;  %v95_v42 = vrot.slane %v93_v28, 1 }
   0x9   :  { %491 = vmatpush.bf16.msra.mxu3 %v811_v7  ;;  %v777_v18 = vld [vmem:[%s1012_s0] sm:$0xff]  ;;  %v807_v26 = vld [vmem:[%s1011_s1 + $0xd0] sm:$0xff]  ;;  %v790_v30 = vld [vmem:[%s1011_s1 + $0x48] sm:$0xff] }
   0xa   :  { %175 = vmatpush.bf16.msra.mxu0 %v794_v8  ;;  %v88_v24 = vshll.u32 %v777_v18, 16  ;;  %v86_v27 = vshrl.u32 %v777_v18, 16  ;;  %v782_v31 = vld [vmem:[%s1011_s1 + $0x8] sm:$0xff]  ;;  %v789_v39 = vld [vmem:[%s1011_s1 + $0x40] sm:$0xff]  ;;  %v306_v46 = vor.u32 %v305_v38, %v304_v37  ;;  %v429_v47 = vrot.slane %v777_v18, 3  ;;  %v779_v52 = vld [vmem:[%s1012_s0 + $0x10] sm:$0xff] }
   0xb   :  { %256 = vmatpush.bf16.msra.mxu1 %v786_v9  ;;  %v798_v33 = vld [vmem:[%s1011_s1 + $0x88] sm:$0xff]  ;;  %v781_v40 = vld [vmem:[%s1011_s1] sm:$0xff]  ;;  %v101_v53 = vshll.u32 %v779_v52, 16  ;;  %v105_v54 = vshrl.u32 %v779_v52, 16  ;;  %v99_v57 = vor.u32 %v97_v29, %v95_v42  ;;  %v432_v60 = vrot.slane %v779_v52, 3  ;;  %v780_v0 = vld [vmem:[%s1012_s0 + $0x18] sm:$0xff] }
   0xc   :  { %376 = vmatpush.bf16.msra.mxu2 %v802_v10  ;;  %v90_v32 = vrot.slane %v88_v24, 1  ;;  %v806_v34 = vld [vmem:[%s1011_s1 + $0xc8] sm:$0xff]  ;;  %v301_v35 = vrot.slane %v86_v27, 2  ;;  %v302_v36 = vrot.slane %v88_v24, 3  ;;  %v797_v43 = vld [vmem:[%s1011_s1 + $0x80] sm:$0xff]  ;;  %v431_v51 = vsel %vm428_vm2, %v429_v47, %v430_v48 }
   0xd   :  { %492 = vmatpush.bf16.msra.mxu3 %v810_v11  ;;  %v805_v44 = vld [vmem:[%s1011_s1 + $0xc0] sm:$0xff]  ;;  %v308_v55 = vrot.slane %v105_v54, 2  ;;  %v309_v56 = vrot.slane %v101_v53, 3  ;;  %v103_v58 = vrot.slane %v101_v53, 1  ;;  %v433_v63 = vsel %vm428_vm2, %v430_v48, %v432_v60 }
   0xe   :  { %176 = vmatpush.bf16.msra.mxu0 %v793_v12  ;;  %v91_v41 = vor.u32 %v90_v32, %v86_v27  ;;  %v303_v45 = vor.u32 %v302_v36, %v301_v35  ;;  %v109_v1 = vshll.u32 %v780_v0, 16  ;;  %v113_v2 = vshrl.u32 %v780_v0, 16  ;;  %v27_v5 = vld [vmem:[%s1012_s0 + $0x20] sm:$0xf] }
   0xf   :  { %257 = vmatpush.bf16.msra.mxu1 %v785_v13  ;;  %v310_v59 = vor.u32 %v309_v56, %v308_v55  ;;  %v104_v61 = vsel %vm84_vm0, %v99_v57, %v103_v58  ;;  %v107_v6 = vor.u32 %v105_v54, %v103_v58  ;;  %v434_v9 = vrot.slane %v780_v0, 3  ;;  %v989_v35 = vld [vmem:[%s1013_s2] ss:$0 sm:$0xff] }
  0x10   :  { %377 = vmatpush.bf16.msra.mxu2 %v801_v14  ;;  %v96_v49 = vsel %vm84_vm0, %v91_v41, %v95_v42  ;;  %v307_v50 = vsel %vm300_vm1, %v303_v45, %v306_v46  ;;  %v312_v3 = vrot.slane %v113_v2, 2  ;;  %v313_v4 = vrot.slane %v109_v1, 3 }
  0x11   :  { %493 = vmatpush.bf16.msra.mxu3 %v809_v15  ;;  %v311_v62 = vsel %vm300_vm1, %v306_v46, %v310_v59  ;;  %v111_v7 = vrot.slane %v109_v1, 1  ;;  %v78_v10 = vunpack.c.l.b16 %v27_v5  ;;  %v435_v13 = vsel %vm428_vm2, %v432_v60, %v434_v9 }
  0x12   :  { %177 = vmatpush.bf16.msra.mxu0 %v792_v16  ;;  %v314_v8 = vor.u32 %v313_v4, %v312_v3 }
  0x13   :  { %258 = vmatpush.bf16.msra.mxu1 %v784_v17  ;;  %v112_v11 = vsel %vm84_vm0, %v107_v6, %v111_v7  ;;  %v83_v14 = vpack.c.b16 %v78_v10, %v78_v10 }
  0x14   :  { %378 = vmatpush.bf16.msra.mxu2 %v800_v19  ;;  %v315_v12 = vsel %vm300_vm1, %v310_v59, %v314_v8  ;;  %v115_v19 = vor.u32 %v113_v2, %v111_v7 }
  0x15   :  { %494 = vmatpush.bf16.msra.mxu3 %v808_v20  ;;  %v117_v15 = vshll.u32 %v83_v14, 16  ;;  %v316_v16 = vshrl.u32 %v83_v14, 16 }
  0x16   :  { %178 = vmatpush.bf16.msra.mxu0 %v791_v22  ;;  %v436_v22 = vrot.slane %v83_v14, 3 }
  0x17   :  { %259 = vmatpush.bf16.msra.mxu1 %v783_v23  ;;  %v318_v17 = vrot.slane %v316_v16, 2  ;;  %v119_v20 = vrot.slane %v117_v15, 1 }
  0x18   :  { %379 = vmatpush.bf16.msra.mxu2 %v799_v25  ;;  %v437_v25 = vsel %vm428_vm2, %v434_v9, %v436_v22 }
  0x19   :  { %495 = vmatpush.bf16.msra.mxu3 %v807_v26  ;;  %v120_v23 = vsel %vm84_vm0, %v115_v19, %v119_v20 }
  0x1a   :  { %179 = vmatpush.bf16.msra.mxu0 %v790_v30 }
  0x1b   :  { %260 = vmatpush.bf16.msra.mxu1 %v782_v31 }
  0x1c   :  { %380 = vmatpush.bf16.msra.mxu2 %v798_v33 }
  0x1d   :  { %496 = vmatpush.bf16.msra.mxu3 %v806_v34 }
  0x1e   :  { %180 = vmatpush.bf16.msra.mxu0 %v789_v39 }
  0x1f   :  { %261 = vmatpush.bf16.msra.mxu1 %v781_v40 }
  0x20   :  { %381 = vmatpush.bf16.msra.mxu2 %v797_v43 }
  0x21   :  { %497 = vmatpush.bf16.msra.mxu3 %v805_v44  ;;  %181 = vmatmul.bf16.vlgmr.msra.gmra.mxu0 %v96_v49 }
  0x22   :  { %262 = vmatmul.bf16.vlgmr.msra.gmra.mxu1 %v777_v18  ;;  %v319_v18 = vrot.slane %v117_v15, 3 }
  0x23   :  { %382 = vmatmul.bf16.vlgmr.msra.gmra.mxu2 %v307_v50 }
  0x24   :  { %498 = vmatmul.bf16.vlgmr.msra.gmra.mxu3 %v431_v51 }
  0x31   :  { %186 = vmatmul.bf16.gmra.mxu0 %v104_v61 }
  0x32   :  { %267 = vmatmul.bf16.gmra.mxu1 %v923_v21  ;;  %v320_v21 = vor.u32 %v319_v18, %v318_v17 }
  0x33   :  { %387 = vmatmul.bf16.gmra.mxu2 %v311_v62 }
  0x34   :  { %503 = vmatmul.bf16.gmra.mxu3 %v433_v63  ;;  %v321_v24 = vsel %vm300_vm1, %v314_v8, %v320_v21 }
  0x41   :  { %191 = vmatmul.bf16.gmra.mxu0 %v112_v11 }
  0x42   :  { %272 = vmatmul.bf16.gmra.mxu1 %v779_v52 }
  0x43   :  { %392 = vmatmul.bf16.gmra.mxu2 %v315_v12 }
  0x44   :  { %508 = vmatmul.bf16.gmra.mxu3 %v435_v13 }
  0x51   :  { %196 = vmatmul.bf16.gmra.mxu0 %v120_v23 }
  0x52   :  { %277 = vmatmul.bf16.gmra.mxu1 %v780_v0 }
  0x53   :  { %397 = vmatmul.bf16.gmra.mxu2 %v321_v24 }
  0x54   :  { %513 = vmatmul.bf16.gmra.mxu3 %v437_v25 }
  0x9e   :  { %v182_v26 = vpop.f32.mrf.mxu0 }
  0x9f   :  { %v263_v27 = vpop.f32.mrf.mxu1 }
  0xa0   :  { %v264_v28 = vadd.f32 %v263_v27, %v182_v26 }
  0xa6   :  { %v383_v29 = vpop.f32.mrf.mxu2  ;;  %v184_v32 = vpop.f32.mrf.mxu0 }
  0xa7   :  { %v499_v30 = vpop.f32.mrf.mxu3  ;;  %v403_v31 = vadd.f32 %v383_v29, %v264_v28  ;;  %v265_v33 = vpop.f32.mrf.mxu1 }
  0xa8   :  { %v266_v36 = vadd.f32 %v265_v33, %v184_v32 }
  0xa9   :  { %v519_v34 = vadd.f32 %v499_v30, %v403_v31 }
  0xab   :  { %v531_v39 = vadd.f32 %v989_v35, %v519_v34 }
  0xad   :  { %v547_v44 = vmul.f32 0.2, %v531_v39  ;;  %vm539_vm3 = vcmp.gt.f32.partialorder %v531_v39, 0.0 }
  0xae   :  { %v385_v37 = vpop.f32.mrf.mxu2  ;;  %v187_v41 = vpop.f32.mrf.mxu0 }
  0xaf   :  { %v501_v38 = vpop.f32.mrf.mxu3  ;;  %v404_v40 = vadd.f32 %v385_v37, %v266_v36  ;;  %v268_v42 = vpop.f32.mrf.mxu1  ;;  %v555_v50 = vsel %vm539_vm3, %v531_v39, %v547_v44 }
  0xb0   :  { %v269_v46 = vadd.f32 %v268_v42, %v187_v41 }
  0xb1   :  { %v520_v43 = vadd.f32 %v501_v38, %v404_v40 }
  0xb3   :  { %v532_v45 = vadd.f32 %v989_v35, %v520_v43 }
  0xb5   :  { %vm540_vm4 = vcmp.gt.f32.partialorder %v532_v45, 0.0  ;;  %v548_v47 = vmul.f32 0.2, %v532_v45 }
  0xb6   :  { %v388_v48 = vpop.f32.mrf.mxu2  ;;  %v189_v53 = vpop.f32.mrf.mxu0 }
  0xb7   :  { %v504_v49 = vpop.f32.mrf.mxu3  ;;  %v556_v51 = vsel %vm540_vm4, %v532_v45, %v548_v47  ;;  %v405_v52 = vadd.f32 %v388_v48, %v269_v46  ;;  %v270_v54 = vpop.f32.mrf.mxu1 }
  0xb8   :  { %v816_v55 = vpack.c.bf16 %v556_v51, %v555_v50  ;;  %v271_v57 = vadd.f32 %v270_v54, %v189_v53 }
  0xb9   :  { %v521_v56 = vadd.f32 %v504_v49, %v405_v52 }
  0xba   :  { %817 = vst [vmem:[%s1014_s3] sm:$0xff] %v816_v55  }
  0xbb   :  { %v533_v60 = vadd.f32 %v989_v35, %v521_v56 }
  0xbd   :  { %v549_v1 = vmul.f32 0.2, %v533_v60  ;;  %vm541_vm5 = vcmp.gt.f32.partialorder %v533_v60, 0.0 }
  0xbe   :  { %v390_v58 = vpop.f32.mrf.mxu2  ;;  %v192_v62 = vpop.f32.mrf.mxu0 }
  0xbf   :  { %v506_v59 = vpop.f32.mrf.mxu3  ;;  %v406_v61 = vadd.f32 %v390_v58, %v271_v57  ;;  %v273_v63 = vpop.f32.mrf.mxu1  ;;  %v557_v7 = vsel %vm541_vm5, %v533_v60, %v549_v1 }
  0xc0   :  { %v274_v3 = vadd.f32 %v273_v63, %v192_v62 }
  0xc1   :  { %v522_v0 = vadd.f32 %v506_v59, %v406_v61 }
  0xc3   :  { %v534_v2 = vadd.f32 %v989_v35, %v522_v0 }
  0xc5   :  { %vm542_vm6 = vcmp.gt.f32.partialorder %v534_v2, 0.0  ;;  %v550_v4 = vmul.f32 0.2, %v534_v2 }
  0xc6   :  { %v393_v5 = vpop.f32.mrf.mxu2  ;;  %v194_v10 = vpop.f32.mrf.mxu0 }
  0xc7   :  { %v509_v6 = vpop.f32.mrf.mxu3  ;;  %v558_v8 = vsel %vm542_vm6, %v534_v2, %v550_v4  ;;  %v407_v9 = vadd.f32 %v393_v5, %v274_v3  ;;  %v275_v11 = vpop.f32.mrf.mxu1 }
  0xc8   :  { %v821_v12 = vpack.c.bf16 %v558_v8, %v557_v7  ;;  %v276_v14 = vadd.f32 %v275_v11, %v194_v10 }
  0xc9   :  { %v523_v13 = vadd.f32 %v509_v6, %v407_v9 }
  0xca   :  { %833 = vst [vmem:[%s1014_s3 + $0x8] sm:$0xff] %v821_v12  }
  0xcb   :  { %v535_v17 = vadd.f32 %v989_v35, %v523_v13 }
  0xcd   :  { %v551_v22 = vmul.f32 0.2, %v535_v17  ;;  %vm543_vm7 = vcmp.gt.f32.partialorder %v535_v17, 0.0 }
  0xce   :  { %v395_v15 = vpop.f32.mrf.mxu2  ;;  %v197_v19 = vpop.f32.mrf.mxu0 }
  0xcf   :  { %v511_v16 = vpop.f32.mrf.mxu3  ;;  %v408_v18 = vadd.f32 %v395_v15, %v276_v14  ;;  %v278_v20 = vpop.f32.mrf.mxu1  ;;  %v559_v28 = vsel %vm543_vm7, %v535_v17, %v551_v22 }
  0xd0   :  { %v279_v24 = vadd.f32 %v278_v20, %v197_v19 }
  0xd1   :  { %v524_v21 = vadd.f32 %v511_v16, %v408_v18 }
  0xd3   :  { %v536_v23 = vadd.f32 %v989_v35, %v524_v21 }
  0xd5   :  { %vm544_vm8 = vcmp.gt.f32.partialorder %v536_v23, 0.0  ;;  %v552_v25 = vmul.f32 0.2, %v536_v23 }
  0xd6   :  { %v398_v26 = vpop.f32.mrf.mxu2  ;;  %v199_v32 = vpop.f32.mrf.mxu0 }
  0xd7   :  { %v514_v27 = vpop.f32.mrf.mxu3  ;;  %v560_v29 = vsel %vm544_vm8, %v536_v23, %v552_v25  ;;  %v409_v30 = vadd.f32 %v398_v26, %v279_v24  ;;  %v280_v33 = vpop.f32.mrf.mxu1 }
  0xd8   :  { %v826_v31 = vpack.c.bf16 %v560_v29, %v559_v28  ;;  %v281_v36 = vadd.f32 %v280_v33, %v199_v32 }
  0xd9   :  { %v525_v34 = vadd.f32 %v514_v27, %v409_v30 }
  0xda   :  { %834 = vst [vmem:[%s1014_s3 + $0x10] sm:$0xff] %v826_v31  }
  0xdb   :  { %v537_v38 = vadd.f32 %v989_v35, %v525_v34 }
  0xdd   :  { %v553_v42 = vmul.f32 0.2, %v537_v38  ;;  %vm545_vm9 = vcmp.gt.f32.partialorder %v537_v38, 0.0 }
  0xde   :  { %v400_v37 = vpop.f32.mrf.mxu2 }
  0xdf   :  { %v410_v39 = vadd.f32 %v400_v37, %v281_v36  ;;  %v516_v40 = vpop.f32.mrf.mxu3  ;;  %v561_v45 = vsel %vm545_vm9, %v537_v38, %v553_v42 }
  0xe1   :  { %v526_v41 = vadd.f32 %v516_v40, %v410_v39 }
  0xe3   :  { %v538_v43 = vadd.f32 %v989_v35, %v526_v41 }
  0xe5   :  { %vm546_vm10 = vcmp.gt.f32.partialorder %v538_v43, 0.0  ;;  %v554_v44 = vmul.f32 0.2, %v538_v43 }
  0xe7   :  { %v562_v46 = vsel %vm546_vm10, %v538_v43, %v554_v44 }
  0xe8   :  { %v831_v47 = vpack.c.bf16 %v562_v46, %v561_v45 }
  0xea   :  { %835 = vst [vmem:[%s1014_s3 + $0x18] sm:$0xff] %v831_v47  }

</bundles_post_ra>
